<compile_context>
chip_gen: v5e
topology: v5e:2x2
jax: 0.10.0
libtpu: 0.0.40
codegen_flags: <defaults>
</compile_context>

<pallas_src>
import jax
import jax.numpy as jnp
from jax import lax
from jax.experimental import pallas as pl
from jax.experimental.pallas import tpu as pltpu

OUT_SCALE = 0.001  # SiamFC head out_scale


def _round_up(n, m):
    return ((n + m - 1) // m) * m


# ----------------------- backbone: conv3x3 + ReLU (implicit GEMM) -----------

def backbone_conv_relu(x_nchw, weight, bias):
    """Conv2d(Cin->Cout, kh x kw, stride 1, valid) + ReLU.
    x_nchw: (N, Cin, H, W) -> channels-last bf16 features (N, Ho, Wo, Cout)."""
    N, Cin, H, W = x_nchw.shape
    Cout, _, kh, kw = weight.shape
    Ho, Wo = H - kh + 1, W - kw + 1

    M = Ho * W                                  # full-width output rows
    Mp = _round_up(M, 8)
    Min = _round_up((kh - 1) * W + (kw - 1) + Mp, 8)

    # cast to bf16 BEFORE any materialization / padding
    x = jnp.transpose(x_nchw, (0, 2, 3, 1)).astype(jnp.bfloat16)     # NHWC
    x_flat = x.reshape(N, H * W, Cin)
    x_flat = jnp.pad(x_flat, ((0, 0), (0, Min - H * W), (0, 0)))     # (N, Min, Cin)

    # W[i*kw+j][c, co] = weight[co, c, i, j]
    w = weight.transpose(2, 3, 1, 0).reshape(kh * kw, Cin, Cout).astype(jnp.bfloat16)
    b = bias.reshape(1, Cout).astype(jnp.float32)

    def kernel(x_ref, w_ref, b_ref, o_ref):
        # x_ref: (1, Min, Cin) bf16, w_ref: (kh*kw, Cin, Cout) bf16,
        # b_ref: (1, Cout) f32, o_ref: (1, Mp, Cout) bf16
        acc = jnp.zeros((Mp, Cout), jnp.float32)
        for idx in range(kh * kw):              # static, unrolled
            off = (idx // kw) * W + (idx % kw)
            a = x_ref[0, off:off + Mp, :]       # (Mp, Cin) shifted row slab
            acc = acc + jnp.dot(a, w_ref[idx],
                                preferred_element_type=jnp.float32)
        y = jnp.maximum(acc + b_ref[...], 0.0)
        o_ref[0] = y.astype(o_ref.dtype)

    out = pl.pallas_call(
        kernel,
        out_shape=jax.ShapeDtypeStruct((N, Mp, Cout), jnp.bfloat16),
        grid=(N,),
        in_specs=[
            pl.BlockSpec((1, Min, Cin), lambda n: (n, 0, 0)),
            pl.BlockSpec((kh * kw, Cin, Cout), lambda n: (0, 0, 0)),  # resident
            pl.BlockSpec((1, Cout), lambda n: (0, 0)),                # resident
        ],
        out_specs=pl.BlockSpec((1, Mp, Cout), lambda n: (n, 0, 0)),
        compiler_params=pltpu.CompilerParams(
            dimension_semantics=("parallel",),
            vmem_limit_bytes=32 * 1024 * 1024,
        ),
        cost_estimate=pl.CostEstimate(
            flops=2 * N * Mp * Cin * Cout * kh * kw,
            transcendentals=0,
            bytes_accessed=(N * Min * Cin * 2 + kh * kw * Cin * Cout * 2
                            + Cout * 4 + N * Mp * Cout * 2),
        ),
    )(x_flat, w, b)

    # strip padded rows and the full-width garbage columns (ow >= Wo)
    return out[:, :M].reshape(N, Ho, W, Cout)[:, :, :Wo, :]


# ----------------------- head: SiamFC cross-correlation ---------------------

def siamfc_head(z_feat, x_feat):
    """SiamFC._fast_xcorr(z, x) * out_scale on channels-last bf16 features.
    z_feat: (N, Hz, Wz, C), x_feat: (N, Hx, Wx, C) -> (N, 1, Ho, Wo) f32."""
    N, Hz, Wz, C = z_feat.shape
    _, Hx, Wx, _ = x_feat.shape
    Ho, Wo = Hx - Hz + 1, Wx - Wz + 1

    P = Ho * Wx                                 # full-width score rows
    Pp = _round_up(P, 128)                      # lane-dense output row
    Pz = Hz * Wz
    max_off = (Hz - 1) * Wx + (Wz - 1)
    Mx = _round_up(max_off + Pp, 8)

    zf = z_feat.reshape(N, Pz, C).astype(jnp.bfloat16)
    xf = x_feat.reshape(N, Hx * Wx, C).astype(jnp.bfloat16)
    xf = jnp.pad(xf, ((0, 0), (0, Mx - Hx * Wx), (0, 0)))     # (N, Mx, C)

    def kernel(z_ref, x_ref, o_ref):
        # z_ref: (1, Pz, C) bf16, x_ref: (1, Mx, C) bf16, o_ref: (1, 1, Pp) f32
        acc = jnp.zeros((1, Pp), jnp.float32)
        for p in range(Pz):                     # static, unrolled
            off = (p // Wz) * Wx + (p % Wz)
            zv = z_ref[0, p:p + 1, :]           # (1, C) template tap
            xs = x_ref[0, off:off + Pp, :]      # (Pp, C) shifted search slab
            acc = acc + lax.dot_general(
                zv, xs,
                dimension_numbers=(((1,), (1,)), ((), ())),   # contract on C
                preferred_element_type=jnp.float32)
        o_ref[0] = (acc * OUT_SCALE).astype(o_ref.dtype)

    out = pl.pallas_call(
        kernel,
        out_shape=jax.ShapeDtypeStruct((N, 1, Pp), jnp.float32),
        grid=(N,),
        in_specs=[
            pl.BlockSpec((1, Pz, C), lambda n: (n, 0, 0)),
            pl.BlockSpec((1, Mx, C), lambda n: (n, 0, 0)),
        ],
        out_specs=pl.BlockSpec((1, 1, Pp), lambda n: (n, 0, 0)),
        compiler_params=pltpu.CompilerParams(
            dimension_semantics=("parallel",),
            vmem_limit_bytes=32 * 1024 * 1024,
        ),
        cost_estimate=pl.CostEstimate(
            flops=2 * N * Pp * Pz * C,
            transcendentals=0,
            bytes_accessed=N * (Pz * C * 2 + Mx * C * 2 + Pp * 4),
        ),
    )(zf, xf)

    return out[:, :, :P].reshape(N, 1, Ho, Wx)[:, :, :, :Wo]


# ----------------------- Net.forward ----------------------------------------

def net_forward(z, x, params):
    """Net.forward: return head(backbone(z), backbone(x))."""
    zf = backbone_conv_relu(z, params["w"], params["b"])   # (N, Hz, Wz, C) bf16
    xf = backbone_conv_relu(x, params["w"], params["b"])   # (N, Hx, Wx, C) bf16
    return siamfc_head(zf, xf)                              # (N, 1, Ho, Wo) f32


# ----------------------- pure-JAX reference for validation ------------------

def net_reference(z, x, params):
    dn = ("NCHW", "OIHW", "NCHW")

    def conv_relu(inp):
        y = lax.conv_general_dilated(inp, params["w"], (1, 1), "VALID",
                                     dimension_numbers=dn)
        y = y + params["b"].reshape(1, -1, 1, 1)
        return jnp.maximum(y, 0.0)

    zf = conv_relu(z)
    xf = conv_relu(x)
    N, C, Hx, Wx = xf.shape
    # exact replica of SiamFC._fast_xcorr: grouped conv with z as weights
    xr = xf.reshape(1, N * C, Hx, Wx)
    out = lax.conv_general_dilated(xr, zf, (1, 1), "VALID",
                                   dimension_numbers=dn,
                                   feature_group_count=N)
    return out.reshape(N, 1, out.shape[2], out.shape[3]) * OUT_SCALE


if __name__ == "__main__":
    key = jax.random.PRNGKey(0)
    k1, k2, k3, k4 = jax.random.split(key, 4)
    N, Cin, Cout = 2, 3, 8
    # z: exemplar (template) image, x: search image — as in SiamFC
    z = jax.random.normal(k1, (N, Cin, 10, 10), dtype=jnp.float32)
    x = jax.random.normal(k2, (N, Cin, 16, 16), dtype=jnp.float32)
    params = {
        "w": jax.random.normal(k3, (Cout, Cin, 3, 3), dtype=jnp.float32) * 0.1,
        "b": jax.random.normal(k4, (Cout,), dtype=jnp.float32) * 0.1,
    }

    out = jax.jit(net_forward)(z, x, params)
    out = jax.block_until_ready(out)

    ref = net_reference(z, x, params)
    assert out.shape == (N, 1, 7, 7), out.shape
    # bf16 MXU operands + bf16 feature writeback with f32 accumulation:
    # errors stay ~<1%, budget is relaxed vs a pure-f32 pipeline.
    assert jnp.allclose(out, ref, rtol=5e-2, atol=2e-3), "mismatch vs reference"
    print("KERNEL_OK")
</pallas_src>

<mosaic_0001>
module attributes {stable_mosaic.version = 11 : i64} {
  func.func @kernel(%arg0: i32, %arg1: memref<1x264x3xbf16, #tpu.memory_space<vmem>>, %arg2: memref<9x3x8xbf16, #tpu.memory_space<vmem>>, %arg3: memref<1x8xf32, #tpu.memory_space<vmem>>, %arg4: memref<1x224x8xbf16, #tpu.memory_space<vmem>>) attributes {dimension_semantics = [#tpu.dimension_semantics<parallel>], iteration_bounds = array<i64: 2>, scalar_prefetch = 0 : i64, scratch_operands = 0 : i64, tpu.core_type = #tpu.core_type<tc>, window_params = [{transform_indices = @transform_0, window_bounds = array<i64: 1, 264, 3>}, {pipeline_mode = #tpu.pipeline_mode<synchronous>, transform_indices = @transform_1, window_bounds = array<i64: 9, 3, 8>}, {pipeline_mode = #tpu.pipeline_mode<synchronous>, transform_indices = @transform_2, window_bounds = array<i64: 1, 8>}, {transform_indices = @transform_3, window_bounds = array<i64: 1, 224, 8>}]} {
    %cst = arith.constant 0.000000e+00 : f32
    %0 = vector.broadcast %cst : f32 to vector<224x8xf32>
    %c0 = arith.constant 0 : index
    %c0_0 = arith.constant 0 : index
    %c0_1 = arith.constant 0 : index
    %1 = vector.load %arg1[%c0, %c0_0, %c0_1] : memref<1x264x3xbf16, #tpu.memory_space<vmem>>, vector<1x224x3xbf16>
    %2 = vector.shape_cast %1 : vector<1x224x3xbf16> to vector<224x3xbf16>
    %c0_2 = arith.constant 0 : index
    %c0_3 = arith.constant 0 : index
    %c0_4 = arith.constant 0 : index
    %3 = vector.load %arg2[%c0_2, %c0_3, %c0_4] : memref<9x3x8xbf16, #tpu.memory_space<vmem>>, vector<1x3x8xbf16>
    %4 = vector.shape_cast %3 : vector<1x3x8xbf16> to vector<3x8xbf16>
    %cst_5 = arith.constant dense<0.000000e+00> : vector<224x8xf32>
    %5 = tpu.matmul %2, %4, %cst_5 {dimension_numbers = #tpu.dot_dimension_numbers<[1], [0], [0], [1], [0, 0, 1, 1], [], []>} : vector<224x3xbf16>, vector<3x8xbf16>, vector<224x8xf32> -> vector<224x8xf32>
    %6 = arith.addf %0, %5 : vector<224x8xf32>
    %c0_6 = arith.constant 0 : index
    %c1 = arith.constant 1 : index
    %c0_7 = arith.constant 0 : index
    %7 = vector.load %arg1[%c0_6, %c1, %c0_7] : memref<1x264x3xbf16, #tpu.memory_space<vmem>>, vector<1x224x3xbf16>
    %8 = vector.shape_cast %7 : vector<1x224x3xbf16> to vector<224x3xbf16>
    %c1_8 = arith.constant 1 : index
    %c0_9 = arith.constant 0 : index
    %c0_10 = arith.constant 0 : index
    %9 = vector.load %arg2[%c1_8, %c0_9, %c0_10] : memref<9x3x8xbf16, #tpu.memory_space<vmem>>, vector<1x3x8xbf16>
    %10 = vector.shape_cast %9 : vector<1x3x8xbf16> to vector<3x8xbf16>
    %cst_11 = arith.constant dense<0.000000e+00> : vector<224x8xf32>
    %11 = tpu.matmul %8, %10, %cst_11 {dimension_numbers = #tpu.dot_dimension_numbers<[1], [0], [0], [1], [0, 0, 1, 1], [], []>} : vector<224x3xbf16>, vector<3x8xbf16>, vector<224x8xf32> -> vector<224x8xf32>
    %12 = arith.addf %6, %11 : vector<224x8xf32>
    %c0_12 = arith.constant 0 : index
    %c2 = arith.constant 2 : index
    %c0_13 = arith.constant 0 : index
    %13 = vector.load %arg1[%c0_12, %c2, %c0_13] : memref<1x264x3xbf16, #tpu.memory_space<vmem>>, vector<1x224x3xbf16>
    %14 = vector.shape_cast %13 : vector<1x224x3xbf16> to vector<224x3xbf16>
    %c2_14 = arith.constant 2 : index
    %c0_15 = arith.constant 0 : index
    %c0_16 = arith.constant 0 : index
    %15 = vector.load %arg2[%c2_14, %c0_15, %c0_16] : memref<9x3x8xbf16, #tpu.memory_space<vmem>>, vector<1x3x8xbf16>
    %16 = vector.shape_cast %15 : vector<1x3x8xbf16> to vector<3x8xbf16>
    %cst_17 = arith.constant dense<0.000000e+00> : vector<224x8xf32>
    %17 = tpu.matmul %14, %16, %cst_17 {dimension_numbers = #tpu.dot_dimension_numbers<[1], [0], [0], [1], [0, 0, 1, 1], [], []>} : vector<224x3xbf16>, vector<3x8xbf16>, vector<224x8xf32> -> vector<224x8xf32>
    %18 = arith.addf %12, %17 : vector<224x8xf32>
    %c0_18 = arith.constant 0 : index
    %c16 = arith.constant 16 : index
    %c0_19 = arith.constant 0 : index
    %19 = vector.load %arg1[%c0_18, %c16, %c0_19] : memref<1x264x3xbf16, #tpu.memory_space<vmem>>, vector<1x224x3xbf16>
    %20 = vector.shape_cast %19 : vector<1x224x3xbf16> to vector<224x3xbf16>
    %c3 = arith.constant 3 : index
    %c0_20 = arith.constant 0 : index
    %c0_21 = arith.constant 0 : index
    %21 = vector.load %arg2[%c3, %c0_20, %c0_21] : memref<9x3x8xbf16, #tpu.memory_space<vmem>>, vector<1x3x8xbf16>
    %22 = vector.shape_cast %21 : vector<1x3x8xbf16> to vector<3x8xbf16>
    %cst_22 = arith.constant dense<0.000000e+00> : vector<224x8xf32>
    %23 = tpu.matmul %20, %22, %cst_22 {dimension_numbers = #tpu.dot_dimension_numbers<[1], [0], [0], [1], [0, 0, 1, 1], [], []>} : vector<224x3xbf16>, vector<3x8xbf16>, vector<224x8xf32> -> vector<224x8xf32>
    %24 = arith.addf %18, %23 : vector<224x8xf32>
    %c0_23 = arith.constant 0 : index
    %c17 = arith.constant 17 : index
    %c0_24 = arith.constant 0 : index
    %25 = vector.load %arg1[%c0_23, %c17, %c0_24] : memref<1x264x3xbf16, #tpu.memory_space<vmem>>, vector<1x224x3xbf16>
    %26 = vector.shape_cast %25 : vector<1x224x3xbf16> to vector<224x3xbf16>
    %c4 = arith.constant 4 : index
    %c0_25 = arith.constant 0 : index
    %c0_26 = arith.constant 0 : index
    %27 = vector.load %arg2[%c4, %c0_25, %c0_26] : memref<9x3x8xbf16, #tpu.memory_space<vmem>>, vector<1x3x8xbf16>
    %28 = vector.shape_cast %27 : vector<1x3x8xbf16> to vector<3x8xbf16>
    %cst_27 = arith.constant dense<0.000000e+00> : vector<224x8xf32>
    %29 = tpu.matmul %26, %28, %cst_27 {dimension_numbers = #tpu.dot_dimension_numbers<[1], [0], [0], [1], [0, 0, 1, 1], [], []>} : vector<224x3xbf16>, vector<3x8xbf16>, vector<224x8xf32> -> vector<224x8xf32>
    %30 = arith.addf %24, %29 : vector<224x8xf32>
    %c0_28 = arith.constant 0 : index
    %c18 = arith.constant 18 : index
    %c0_29 = arith.constant 0 : index
    %31 = vector.load %arg1[%c0_28, %c18, %c0_29] : memref<1x264x3xbf16, #tpu.memory_space<vmem>>, vector<1x224x3xbf16>
    %32 = vector.shape_cast %31 : vector<1x224x3xbf16> to vector<224x3xbf16>
    %c5 = arith.constant 5 : index
    %c0_30 = arith.constant 0 : index
    %c0_31 = arith.constant 0 : index
    %33 = vector.load %arg2[%c5, %c0_30, %c0_31] : memref<9x3x8xbf16, #tpu.memory_space<vmem>>, vector<1x3x8xbf16>
    %34 = vector.shape_cast %33 : vector<1x3x8xbf16> to vector<3x8xbf16>
    %cst_32 = arith.constant dense<0.000000e+00> : vector<224x8xf32>
    %35 = tpu.matmul %32, %34, %cst_32 {dimension_numbers = #tpu.dot_dimension_numbers<[1], [0], [0], [1], [0, 0, 1, 1], [], []>} : vector<224x3xbf16>, vector<3x8xbf16>, vector<224x8xf32> -> vector<224x8xf32>
    %36 = arith.addf %30, %35 : vector<224x8xf32>
    %c0_33 = arith.constant 0 : index
    %c32 = arith.constant 32 : index
    %c0_34 = arith.constant 0 : index
    %37 = vector.load %arg1[%c0_33, %c32, %c0_34] : memref<1x264x3xbf16, #tpu.memory_space<vmem>>, vector<1x224x3xbf16>
    %38 = vector.shape_cast %37 : vector<1x224x3xbf16> to vector<224x3xbf16>
    %c6 = arith.constant 6 : index
    %c0_35 = arith.constant 0 : index
    %c0_36 = arith.constant 0 : index
    %39 = vector.load %arg2[%c6, %c0_35, %c0_36] : memref<9x3x8xbf16, #tpu.memory_space<vmem>>, vector<1x3x8xbf16>
    %40 = vector.shape_cast %39 : vector<1x3x8xbf16> to vector<3x8xbf16>
    %cst_37 = arith.constant dense<0.000000e+00> : vector<224x8xf32>
    %41 = tpu.matmul %38, %40, %cst_37 {dimension_numbers = #tpu.dot_dimension_numbers<[1], [0], [0], [1], [0, 0, 1, 1], [], []>} : vector<224x3xbf16>, vector<3x8xbf16>, vector<224x8xf32> -> vector<224x8xf32>
    %42 = arith.addf %36, %41 : vector<224x8xf32>
    %c0_38 = arith.constant 0 : index
    %c33 = arith.constant 33 : index
    %c0_39 = arith.constant 0 : index
    %43 = vector.load %arg1[%c0_38, %c33, %c0_39] : memref<1x264x3xbf16, #tpu.memory_space<vmem>>, vector<1x224x3xbf16>
    %44 = vector.shape_cast %43 : vector<1x224x3xbf16> to vector<224x3xbf16>
    %c7 = arith.constant 7 : index
    %c0_40 = arith.constant 0 : index
    %c0_41 = arith.constant 0 : index
    %45 = vector.load %arg2[%c7, %c0_40, %c0_41] : memref<9x3x8xbf16, #tpu.memory_space<vmem>>, vector<1x3x8xbf16>
    %46 = vector.shape_cast %45 : vector<1x3x8xbf16> to vector<3x8xbf16>
    %cst_42 = arith.constant dense<0.000000e+00> : vector<224x8xf32>
    %47 = tpu.matmul %44, %46, %cst_42 {dimension_numbers = #tpu.dot_dimension_numbers<[1], [0], [0], [1], [0, 0, 1, 1], [], []>} : vector<224x3xbf16>, vector<3x8xbf16>, vector<224x8xf32> -> vector<224x8xf32>
    %48 = arith.addf %42, %47 : vector<224x8xf32>
    %c0_43 = arith.constant 0 : index
    %c34 = arith.constant 34 : index
    %c0_44 = arith.constant 0 : index
    %49 = vector.load %arg1[%c0_43, %c34, %c0_44] : memref<1x264x3xbf16, #tpu.memory_space<vmem>>, vector<1x224x3xbf16>
    %50 = vector.shape_cast %49 : vector<1x224x3xbf16> to vector<224x3xbf16>
    %c8 = arith.constant 8 : index
    %c0_45 = arith.constant 0 : index
    %c0_46 = arith.constant 0 : index
    %51 = vector.load %arg2[%c8, %c0_45, %c0_46] : memref<9x3x8xbf16, #tpu.memory_space<vmem>>, vector<1x3x8xbf16>
    %52 = vector.shape_cast %51 : vector<1x3x8xbf16> to vector<3x8xbf16>
    %cst_47 = arith.constant dense<0.000000e+00> : vector<224x8xf32>
    %53 = tpu.matmul %50, %52, %cst_47 {dimension_numbers = #tpu.dot_dimension_numbers<[1], [0], [0], [1], [0, 0, 1, 1], [], []>} : vector<224x3xbf16>, vector<3x8xbf16>, vector<224x8xf32> -> vector<224x8xf32>
    %54 = arith.addf %48, %53 : vector<224x8xf32>
    %c0_48 = arith.constant 0 : index
    %c0_49 = arith.constant 0 : index
    %55 = vector.load %arg3[%c0_48, %c0_49] : memref<1x8xf32, #tpu.memory_space<vmem>>, vector<1x8xf32>
    %56 = vector.broadcast %55 : vector<1x8xf32> to vector<224x8xf32>
    %57 = arith.addf %54, %56 : vector<224x8xf32>
    %cst_50 = arith.constant 0.000000e+00 : f32
    %58 = vector.broadcast %cst_50 : f32 to vector<224x8xf32>
    %59 = arith.maximumf %57, %58 : vector<224x8xf32>
    %60 = arith.truncf %59 : vector<224x8xf32> to vector<224x8xbf16>
    %c0_51 = arith.constant 0 : index
    %c0_52 = arith.constant 0 : index
    %c0_53 = arith.constant 0 : index
    %61 = vector.load %arg4[%c0_51, %c0_52, %c0_53] : memref<1x224x8xbf16, #tpu.memory_space<vmem>>, vector<1x224x8xbf16>
    %62 = vector.shape_cast %61 : vector<1x224x8xbf16> to vector<224x8xbf16>
    %63 = vector.shape_cast %60 : vector<224x8xbf16> to vector<1x224x8xbf16>
    tpu.vector_store %arg4[%c0_51, %c0_52, %c0_53], %63 {strides = array<i32>} : memref<1x224x8xbf16, #tpu.memory_space<vmem>>, vector<1x224x8xbf16>,
    return
  }
  func.func @transform_0(%arg0: i32) -> (i32, i32, i32) {
    %c0_i32 = arith.constant 0 : i32
    %c0_i32_0 = arith.constant 0 : i32
    %c0_i32_1 = arith.constant 0 : i32
    return %arg0, %c0_i32, %c0_i32_0 : i32, i32, i32
  }
  func.func @transform_1(%arg0: i32) -> (i32, i32, i32) {
    %c0_i32 = arith.constant 0 : i32
    %c0_i32_0 = arith.constant 0 : i32
    %c0_i32_1 = arith.constant 0 : i32
    %c0_i32_2 = arith.constant 0 : i32
    return %c0_i32, %c0_i32_0, %c0_i32_1 : i32, i32, i32
  }
  func.func @transform_2(%arg0: i32) -> (i32, i32) {
    %c0_i32 = arith.constant 0 : i32
    %c0_i32_0 = arith.constant 0 : i32
    %c0_i32_1 = arith.constant 0 : i32
    return %c0_i32, %c0_i32_0 : i32, i32
  }
  func.func @transform_3(%arg0: i32) -> (i32, i32, i32) {
    %c0_i32 = arith.constant 0 : i32
    %c0_i32_0 = arith.constant 0 : i32
    %c0_i32_1 = arith.constant 0 : i32
    return %arg0, %c0_i32, %c0_i32_0 : i32, i32, i32
  }
}

module attributes {stable_mosaic.version = 11 : i64} {
  func.func @kernel(%arg0: i32, %arg1: memref<1x104x3xbf16, #tpu.memory_space<vmem>>, %arg2: memref<9x3x8xbf16, #tpu.memory_space<vmem>>, %arg3: memref<1x8xf32, #tpu.memory_space<vmem>>, %arg4: memref<1x80x8xbf16, #tpu.memory_space<vmem>>) attributes {dimension_semantics = [#tpu.dimension_semantics<parallel>], iteration_bounds = array<i64: 2>, scalar_prefetch = 0 : i64, scratch_operands = 0 : i64, tpu.core_type = #tpu.core_type<tc>, window_params = [{transform_indices = @transform_0, window_bounds = array<i64: 1, 104, 3>}, {pipeline_mode = #tpu.pipeline_mode<synchronous>, transform_indices = @transform_1, window_bounds = array<i64: 9, 3, 8>}, {pipeline_mode = #tpu.pipeline_mode<synchronous>, transform_indices = @transform_2, window_bounds = array<i64: 1, 8>}, {transform_indices = @transform_3, window_bounds = array<i64: 1, 80, 8>}]} {
    %cst = arith.constant 0.000000e+00 : f32
    %0 = vector.broadcast %cst : f32 to vector<80x8xf32>
    %c0 = arith.constant 0 : index
    %c0_0 = arith.constant 0 : index
    %c0_1 = arith.constant 0 : index
    %1 = vector.load %arg1[%c0, %c0_0, %c0_1] : memref<1x104x3xbf16, #tpu.memory_space<vmem>>, vector<1x80x3xbf16>
    %2 = vector.shape_cast %1 : vector<1x80x3xbf16> to vector<80x3xbf16>
    %c0_2 = arith.constant 0 : index
    %c0_3 = arith.constant 0 : index
    %c0_4 = arith.constant 0 : index
    %3 = vector.load %arg2[%c0_2, %c0_3, %c0_4] : memref<9x3x8xbf16, #tpu.memory_space<vmem>>, vector<1x3x8xbf16>
    %4 = vector.shape_cast %3 : vector<1x3x8xbf16> to vector<3x8xbf16>
    %cst_5 = arith.constant dense<0.000000e+00> : vector<80x8xf32>
    %5 = tpu.matmul %2, %4, %cst_5 {dimension_numbers = #tpu.dot_dimension_numbers<[1], [0], [0], [1], [0, 0, 1, 1], [], []>} : vector<80x3xbf16>, vector<3x8xbf16>, vector<80x8xf32> -> vector<80x8xf32>
    %6 = arith.addf %0, %5 : vector<80x8xf32>
    %c0_6 = arith.constant 0 : index
    %c1 = arith.constant 1 : index
    %c0_7 = arith.constant 0 : index
    %7 = vector.load %arg1[%c0_6, %c1, %c0_7] : memref<1x104x3xbf16, #tpu.memory_space<vmem>>, vector<1x80x3xbf16>
    %8 = vector.shape_cast %7 : vector<1x80x3xbf16> to vector<80x3xbf16>
    %c1_8 = arith.constant 1 : index
    %c0_9 = arith.constant 0 : index
    %c0_10 = arith.constant 0 : index
    %9 = vector.load %arg2[%c1_8, %c0_9, %c0_10] : memref<9x3x8xbf16, #tpu.memory_space<vmem>>, vector<1x3x8xbf16>
    %10 = vector.shape_cast %9 : vector<1x3x8xbf16> to vector<3x8xbf16>
    %cst_11 = arith.constant dense<0.000000e+00> : vector<80x8xf32>
    %11 = tpu.matmul %8, %10, %cst_11 {dimension_numbers = #tpu.dot_dimension_numbers<[1], [0], [0], [1], [0, 0, 1, 1], [], []>} : vector<80x3xbf16>, vector<3x8xbf16>, vector<80x8xf32> -> vector<80x8xf32>
    %12 = arith.addf %6, %11 : vector<80x8xf32>
    %c0_12 = arith.constant 0 : index
    %c2 = arith.constant 2 : index
    %c0_13 = arith.constant 0 : index
    %13 = vector.load %arg1[%c0_12, %c2, %c0_13] : memref<1x104x3xbf16, #tpu.memory_space<vmem>>, vector<1x80x3xbf16>
    %14 = vector.shape_cast %13 : vector<1x80x3xbf16> to vector<80x3xbf16>
    %c2_14 = arith.constant 2 : index
    %c0_15 = arith.constant 0 : index
    %c0_16 = arith.constant 0 : index
    %15 = vector.load %arg2[%c2_14, %c0_15, %c0_16] : memref<9x3x8xbf16, #tpu.memory_space<vmem>>, vector<1x3x8xbf16>
    %16 = vector.shape_cast %15 : vector<1x3x8xbf16> to vector<3x8xbf16>
    %cst_17 = arith.constant dense<0.000000e+00> : vector<80x8xf32>
    %17 = tpu.matmul %14, %16, %cst_17 {dimension_numbers = #tpu.dot_dimension_numbers<[1], [0], [0], [1], [0, 0, 1, 1], [], []>} : vector<80x3xbf16>, vector<3x8xbf16>, vector<80x8xf32> -> vector<80x8xf32>
    %18 = arith.addf %12, %17 : vector<80x8xf32>
    %c0_18 = arith.constant 0 : index
    %c10 = arith.constant 10 : index
    %c0_19 = arith.constant 0 : index
    %19 = vector.load %arg1[%c0_18, %c10, %c0_19] : memref<1x104x3xbf16, #tpu.memory_space<vmem>>, vector<1x80x3xbf16>
    %20 = vector.shape_cast %19 : vector<1x80x3xbf16> to vector<80x3xbf16>
    %c3 = arith.constant 3 : index
    %c0_20 = arith.constant 0 : index
    %c0_21 = arith.constant 0 : index
    %21 = vector.load %arg2[%c3, %c0_20, %c0_21] : memref<9x3x8xbf16, #tpu.memory_space<vmem>>, vector<1x3x8xbf16>
    %22 = vector.shape_cast %21 : vector<1x3x8xbf16> to vector<3x8xbf16>
    %cst_22 = arith.constant dense<0.000000e+00> : vector<80x8xf32>
    %23 = tpu.matmul %20, %22, %cst_22 {dimension_numbers = #tpu.dot_dimension_numbers<[1], [0], [0], [1], [0, 0, 1, 1], [], []>} : vector<80x3xbf16>, vector<3x8xbf16>, vector<80x8xf32> -> vector<80x8xf32>
    %24 = arith.addf %18, %23 : vector<80x8xf32>
    %c0_23 = arith.constant 0 : index
    %c11 = arith.constant 11 : index
    %c0_24 = arith.constant 0 : index
    %25 = vector.load %arg1[%c0_23, %c11, %c0_24] : memref<1x104x3xbf16, #tpu.memory_space<vmem>>, vector<1x80x3xbf16>
    %26 = vector.shape_cast %25 : vector<1x80x3xbf16> to vector<80x3xbf16>
    %c4 = arith.constant 4 : index
    %c0_25 = arith.constant 0 : index
    %c0_26 = arith.constant 0 : index
    %27 = vector.load %arg2[%c4, %c0_25, %c0_26] : memref<9x3x8xbf16, #tpu.memory_space<vmem>>, vector<1x3x8xbf16>
    %28 = vector.shape_cast %27 : vector<1x3x8xbf16> to vector<3x8xbf16>
    %cst_27 = arith.constant dense<0.000000e+00> : vector<80x8xf32>
    %29 = tpu.matmul %26, %28, %cst_27 {dimension_numbers = #tpu.dot_dimension_numbers<[1], [0], [0], [1], [0, 0, 1, 1], [], []>} : vector<80x3xbf16>, vector<3x8xbf16>, vector<80x8xf32> -> vector<80x8xf32>
    %30 = arith.addf %24, %29 : vector<80x8xf32>
    %c0_28 = arith.constant 0 : index
    %c12 = arith.constant 12 : index
    %c0_29 = arith.constant 0 : index
    %31 = vector.load %arg1[%c0_28, %c12, %c0_29] : memref<1x104x3xbf16, #tpu.memory_space<vmem>>, vector<1x80x3xbf16>
    %32 = vector.shape_cast %31 : vector<1x80x3xbf16> to vector<80x3xbf16>
    %c5 = arith.constant 5 : index
    %c0_30 = arith.constant 0 : index
    %c0_31 = arith.constant 0 : index
    %33 = vector.load %arg2[%c5, %c0_30, %c0_31] : memref<9x3x8xbf16, #tpu.memory_space<vmem>>, vector<1x3x8xbf16>
    %34 = vector.shape_cast %33 : vector<1x3x8xbf16> to vector<3x8xbf16>
    %cst_32 = arith.constant dense<0.000000e+00> : vector<80x8xf32>
    %35 = tpu.matmul %32, %34, %cst_32 {dimension_numbers = #tpu.dot_dimension_numbers<[1], [0], [0], [1], [0, 0, 1, 1], [], []>} : vector<80x3xbf16>, vector<3x8xbf16>, vector<80x8xf32> -> vector<80x8xf32>
    %36 = arith.addf %30, %35 : vector<80x8xf32>
    %c0_33 = arith.constant 0 : index
    %c20 = arith.constant 20 : index
    %c0_34 = arith.constant 0 : index
    %37 = vector.load %arg1[%c0_33, %c20, %c0_34] : memref<1x104x3xbf16, #tpu.memory_space<vmem>>, vector<1x80x3xbf16>
    %38 = vector.shape_cast %37 : vector<1x80x3xbf16> to vector<80x3xbf16>
    %c6 = arith.constant 6 : index
    %c0_35 = arith.constant 0 : index
    %c0_36 = arith.constant 0 : index
    %39 = vector.load %arg2[%c6, %c0_35, %c0_36] : memref<9x3x8xbf16, #tpu.memory_space<vmem>>, vector<1x3x8xbf16>
    %40 = vector.shape_cast %39 : vector<1x3x8xbf16> to vector<3x8xbf16>
    %cst_37 = arith.constant dense<0.000000e+00> : vector<80x8xf32>
    %41 = tpu.matmul %38, %40, %cst_37 {dimension_numbers = #tpu.dot_dimension_numbers<[1], [0], [0], [1], [0, 0, 1, 1], [], []>} : vector<80x3xbf16>, vector<3x8xbf16>, vector<80x8xf32> -> vector<80x8xf32>
    %42 = arith.addf %36, %41 : vector<80x8xf32>
    %c0_38 = arith.constant 0 : index
    %c21 = arith.constant 21 : index
    %c0_39 = arith.constant 0 : index
    %43 = vector.load %arg1[%c0_38, %c21, %c0_39] : memref<1x104x3xbf16, #tpu.memory_space<vmem>>, vector<1x80x3xbf16>
    %44 = vector.shape_cast %43 : vector<1x80x3xbf16> to vector<80x3xbf16>
    %c7 = arith.constant 7 : index
    %c0_40 = arith.constant 0 : index
    %c0_41 = arith.constant 0 : index
    %45 = vector.load %arg2[%c7, %c0_40, %c0_41] : memref<9x3x8xbf16, #tpu.memory_space<vmem>>, vector<1x3x8xbf16>
    %46 = vector.shape_cast %45 : vector<1x3x8xbf16> to vector<3x8xbf16>
    %cst_42 = arith.constant dense<0.000000e+00> : vector<80x8xf32>
    %47 = tpu.matmul %44, %46, %cst_42 {dimension_numbers = #tpu.dot_dimension_numbers<[1], [0], [0], [1], [0, 0, 1, 1], [], []>} : vector<80x3xbf16>, vector<3x8xbf16>, vector<80x8xf32> -> vector<80x8xf32>
    %48 = arith.addf %42, %47 : vector<80x8xf32>
    %c0_43 = arith.constant 0 : index
    %c22 = arith.constant 22 : index
    %c0_44 = arith.constant 0 : index
    %49 = vector.load %arg1[%c0_43, %c22, %c0_44] : memref<1x104x3xbf16, #tpu.memory_space<vmem>>, vector<1x80x3xbf16>
    %50 = vector.shape_cast %49 : vector<1x80x3xbf16> to vector<80x3xbf16>
    %c8 = arith.constant 8 : index
    %c0_45 = arith.constant 0 : index
    %c0_46 = arith.constant 0 : index
    %51 = vector.load %arg2[%c8, %c0_45, %c0_46] : memref<9x3x8xbf16, #tpu.memory_space<vmem>>, vector<1x3x8xbf16>
    %52 = vector.shape_cast %51 : vector<1x3x8xbf16> to vector<3x8xbf16>
    %cst_47 = arith.constant dense<0.000000e+00> : vector<80x8xf32>
    %53 = tpu.matmul %50, %52, %cst_47 {dimension_numbers = #tpu.dot_dimension_numbers<[1], [0], [0], [1], [0, 0, 1, 1], [], []>} : vector<80x3xbf16>, vector<3x8xbf16>, vector<80x8xf32> -> vector<80x8xf32>
    %54 = arith.addf %48, %53 : vector<80x8xf32>
    %c0_48 = arith.constant 0 : index
    %c0_49 = arith.constant 0 : index
    %55 = vector.load %arg3[%c0_48, %c0_49] : memref<1x8xf32, #tpu.memory_space<vmem>>, vector<1x8xf32>
    %56 = vector.broadcast %55 : vector<1x8xf32> to vector<80x8xf32>
    %57 = arith.addf %54, %56 : vector<80x8xf32>
    %cst_50 = arith.constant 0.000000e+00 : f32
    %58 = vector.broadcast %cst_50 : f32 to vector<80x8xf32>
    %59 = arith.maximumf %57, %58 : vector<80x8xf32>
    %60 = arith.truncf %59 : vector<80x8xf32> to vector<80x8xbf16>
    %c0_51 = arith.constant 0 : index
    %c0_52 = arith.constant 0 : index
    %c0_53 = arith.constant 0 : index
    %61 = vector.load %arg4[%c0_51, %c0_52, %c0_53] : memref<1x80x8xbf16, #tpu.memory_space<vmem>>, vector<1x80x8xbf16>
    %62 = vector.shape_cast %61 : vector<1x80x8xbf16> to vector<80x8xbf16>
    %63 = vector.shape_cast %60 : vector<80x8xbf16> to vector<1x80x8xbf16>
    tpu.vector_store %arg4[%c0_51, %c0_52, %c0_53], %63 {strides = array<i32>} : memref<1x80x8xbf16, #tpu.memory_space<vmem>>, vector<1x80x8xbf16>,
    return
  }
  func.func @transform_0(%arg0: i32) -> (i32, i32, i32) {
    %c0_i32 = arith.constant 0 : i32
    %c0_i32_0 = arith.constant 0 : i32
    %c0_i32_1 = arith.constant 0 : i32
    return %arg0, %c0_i32, %c0_i32_0 : i32, i32, i32
  }
  func.func @transform_1(%arg0: i32) -> (i32, i32, i32) {
    %c0_i32 = arith.constant 0 : i32
    %c0_i32_0 = arith.constant 0 : i32
    %c0_i32_1 = arith.constant 0 : i32
    %c0_i32_2 = arith.constant 0 : i32
    return %c0_i32, %c0_i32_0, %c0_i32_1 : i32, i32, i32
  }
  func.func @transform_2(%arg0: i32) -> (i32, i32) {
    %c0_i32 = arith.constant 0 : i32
    %c0_i32_0 = arith.constant 0 : i32
    %c0_i32_1 = arith.constant 0 : i32
    return %c0_i32, %c0_i32_0 : i32, i32
  }
  func.func @transform_3(%arg0: i32) -> (i32, i32, i32) {
    %c0_i32 = arith.constant 0 : i32
    %c0_i32_0 = arith.constant 0 : i32
    %c0_i32_1 = arith.constant 0 : i32
    return %arg0, %c0_i32, %c0_i32_0 : i32, i32, i32
  }
}

module attributes {stable_mosaic.version = 11 : i64} {
  func.func @kernel(%arg0: i32, %arg1: memref<1x64x8xbf16, #tpu.memory_space<vmem>>, %arg2: memref<1x240x8xbf16, #tpu.memory_space<vmem>>, %arg3: memref<1x1x128xf32, #tpu.memory_space<vmem>>) attributes {dimension_semantics = [#tpu.dimension_semantics<parallel>], iteration_bounds = array<i64: 2>, scalar_prefetch = 0 : i64, scratch_operands = 0 : i64, tpu.core_type = #tpu.core_type<tc>, window_params = [{transform_indices = @transform_0, window_bounds = array<i64: 1, 64, 8>}, {transform_indices = @transform_1, window_bounds = array<i64: 1, 240, 8>}, {transform_indices = @transform_2, window_bounds = array<i64: 1, 1, 128>}]} {
    %cst = arith.constant 0.000000e+00 : f32
    %0 = vector.broadcast %cst : f32 to vector<1x128xf32>
    %c0 = arith.constant 0 : index
    %c0_0 = arith.constant 0 : index
    %c0_1 = arith.constant 0 : index
    %1 = vector.load %arg1[%c0, %c0_0, %c0_1] : memref<1x64x8xbf16, #tpu.memory_space<vmem>>, vector<1x1x8xbf16>
    %2 = vector.shape_cast %1 : vector<1x1x8xbf16> to vector<1x8xbf16>
    %c0_2 = arith.constant 0 : index
    %c0_3 = arith.constant 0 : index
    %c0_4 = arith.constant 0 : index
    %3 = vector.load %arg2[%c0_2, %c0_3, %c0_4] : memref<1x240x8xbf16, #tpu.memory_space<vmem>>, vector<1x128x8xbf16>
    %4 = vector.shape_cast %3 : vector<1x128x8xbf16> to vector<128x8xbf16>
    %cst_5 = arith.constant dense<0.000000e+00> : vector<1x128xf32>
    %5 = tpu.matmul %2, %4, %cst_5 {dimension_numbers = #tpu.dot_dimension_numbers<[1], [1], [0], [0], [0, 0, 1, 0], [], []>} : vector<1x8xbf16>, vector<128x8xbf16>, vector<1x128xf32> -> vector<1x128xf32>
    %6 = arith.addf %0, %5 : vector<1x128xf32>
    %c0_6 = arith.constant 0 : index
    %c1 = arith.constant 1 : index
    %c0_7 = arith.constant 0 : index
    %7 = vector.load %arg1[%c0_6, %c1, %c0_7] : memref<1x64x8xbf16, #tpu.memory_space<vmem>>, vector<1x1x8xbf16>
    %8 = vector.shape_cast %7 : vector<1x1x8xbf16> to vector<1x8xbf16>
    %c0_8 = arith.constant 0 : index
    %c1_9 = arith.constant 1 : index
    %c0_10 = arith.constant 0 : index
    %9 = vector.load %arg2[%c0_8, %c1_9, %c0_10] : memref<1x240x8xbf16, #tpu.memory_space<vmem>>, vector<1x128x8xbf16>
    %10 = vector.shape_cast %9 : vector<1x128x8xbf16> to vector<128x8xbf16>
    %cst_11 = arith.constant dense<0.000000e+00> : vector<1x128xf32>
    %11 = tpu.matmul %8, %10, %cst_11 {dimension_numbers = #tpu.dot_dimension_numbers<[1], [1], [0], [0], [0, 0, 1, 0], [], []>} : vector<1x8xbf16>, vector<128x8xbf16>, vector<1x128xf32> -> vector<1x128xf32>
    %12 = arith.addf %6, %11 : vector<1x128xf32>
    %c0_12 = arith.constant 0 : index
    %c2 = arith.constant 2 : index
    %c0_13 = arith.constant 0 : index
    %13 = vector.load %arg1[%c0_12, %c2, %c0_13] : memref<1x64x8xbf16, #tpu.memory_space<vmem>>, vector<1x1x8xbf16>
    %14 = vector.shape_cast %13 : vector<1x1x8xbf16> to vector<1x8xbf16>
    %c0_14 = arith.constant 0 : index
    %c2_15 = arith.constant 2 : index
    %c0_16 = arith.constant 0 : index
    %15 = vector.load %arg2[%c0_14, %c2_15, %c0_16] : memref<1x240x8xbf16, #tpu.memory_space<vmem>>, vector<1x128x8xbf16>
    %16 = vector.shape_cast %15 : vector<1x128x8xbf16> to vector<128x8xbf16>
    %cst_17 = arith.constant dense<0.000000e+00> : vector<1x128xf32>
    %17 = tpu.matmul %14, %16, %cst_17 {dimension_numbers = #tpu.dot_dimension_numbers<[1], [1], [0], [0], [0, 0, 1, 0], [], []>} : vector<1x8xbf16>, vector<128x8xbf16>, vector<1x128xf32> -> vector<1x128xf32>
    %18 = arith.addf %12, %17 : vector<1x128xf32>
    %c0_18 = arith.constant 0 : index
    %c3 = arith.constant 3 : index
    %c0_19 = arith.constant 0 : index
    %19 = vector.load %arg1[%c0_18, %c3, %c0_19] : memref<1x64x8xbf16, #tpu.memory_space<vmem>>, vector<1x1x8xbf16>
    %20 = vector.shape_cast %19 : vector<1x1x8xbf16> to vector<1x8xbf16>
    %c0_20 = arith.constant 0 : index
    %c3_21 = arith.constant 3 : index
    %c0_22 = arith.constant 0 : index
    %21 = vector.load %arg2[%c0_20, %c3_21, %c0_22] : memref<1x240x8xbf16, #tpu.memory_space<vmem>>, vector<1x128x8xbf16>
    %22 = vector.shape_cast %21 : vector<1x128x8xbf16> to vector<128x8xbf16>
    %cst_23 = arith.constant dense<0.000000e+00> : vector<1x128xf32>
    %23 = tpu.matmul %20, %22, %cst_23 {dimension_numbers = #tpu.dot_dimension_numbers<[1], [1], [0], [0], [0, 0, 1, 0], [], []>} : vector<1x8xbf16>, vector<128x8xbf16>, vector<1x128xf32> -> vector<1x128xf32>
    %24 = arith.addf %18, %23 : vector<1x128xf32>
    %c0_24 = arith.constant 0 : index
    %c4 = arith.constant 4 : index
    %c0_25 = arith.constant 0 : index
    %25 = vector.load %arg1[%c0_24, %c4, %c0_25] : memref<1x64x8xbf16, #tpu.memory_space<vmem>>, vector<1x1x8xbf16>
    %26 = vector.shape_cast %25 : vector<1x1x8xbf16> to vector<1x8xbf16>
    %c0_26 = arith.constant 0 : index
    %c4_27 = arith.constant 4 : index
    %c0_28 = arith.constant 0 : index
    %27 = vector.load %arg2[%c0_26, %c4_27, %c0_28] : memref<1x240x8xbf16, #tpu.memory_space<vmem>>, vector<1x128x8xbf16>
    %28 = vector.shape_cast %27 : vector<1x128x8xbf16> to vector<128x8xbf16>
    %cst_29 = arith.constant dense<0.000000e+00> : vector<1x128xf32>
    %29 = tpu.matmul %26, %28, %cst_29 {dimension_numbers = #tpu.dot_dimension_numbers<[1], [1], [0], [0], [0, 0, 1, 0], [], []>} : vector<1x8xbf16>, vector<128x8xbf16>, vector<1x128xf32> -> vector<1x128xf32>
    %30 = arith.addf %24, %29 : vector<1x128xf32>
    %c0_30 = arith.constant 0 : index
    %c5 = arith.constant 5 : index
    %c0_31 = arith.constant 0 : index
    %31 = vector.load %arg1[%c0_30, %c5, %c0_31] : memref<1x64x8xbf16, #tpu.memory_space<vmem>>, vector<1x1x8xbf16>
    %32 = vector.shape_cast %31 : vector<1x1x8xbf16> to vector<1x8xbf16>
    %c0_32 = arith.constant 0 : index
    %c5_33 = arith.constant 5 : index
    %c0_34 = arith.constant 0 : index
    %33 = vector.load %arg2[%c0_32, %c5_33, %c0_34] : memref<1x240x8xbf16, #tpu.memory_space<vmem>>, vector<1x128x8xbf16>
    %34 = vector.shape_cast %33 : vector<1x128x8xbf16> to vector<128x8xbf16>
    %cst_35 = arith.constant dense<0.000000e+00> : vector<1x128xf32>
    %35 = tpu.matmul %32, %34, %cst_35 {dimension_numbers = #tpu.dot_dimension_numbers<[1], [1], [0], [0], [0, 0, 1, 0], [], []>} : vector<1x8xbf16>, vector<128x8xbf16>, vector<1x128xf32> -> vector<1x128xf32>
    %36 = arith.addf %30, %35 : vector<1x128xf32>
    %c0_36 = arith.constant 0 : index
    %c6 = arith.constant 6 : index
    %c0_37 = arith.constant 0 : index
    %37 = vector.load %arg1[%c0_36, %c6, %c0_37] : memref<1x64x8xbf16, #tpu.memory_space<vmem>>, vector<1x1x8xbf16>
    %38 = vector.shape_cast %37 : vector<1x1x8xbf16> to vector<1x8xbf16>
    %c0_38 = arith.constant 0 : index
    %c6_39 = arith.constant 6 : index
    %c0_40 = arith.constant 0 : index
    %39 = vector.load %arg2[%c0_38, %c6_39, %c0_40] : memref<1x240x8xbf16, #tpu.memory_space<vmem>>, vector<1x128x8xbf16>
    %40 = vector.shape_cast %39 : vector<1x128x8xbf16> to vector<128x8xbf16>
    %cst_41 = arith.constant dense<0.000000e+00> : vector<1x128xf32>
    %41 = tpu.matmul %38, %40, %cst_41 {dimension_numbers = #tpu.dot_dimension_numbers<[1], [1], [0], [0], [0, 0, 1, 0], [], []>} : vector<1x8xbf16>, vector<128x8xbf16>, vector<1x128xf32> -> vector<1x128xf32>
    %42 = arith.addf %36, %41 : vector<1x128xf32>
    %c0_42 = arith.constant 0 : index
    %c7 = arith.constant 7 : index
    %c0_43 = arith.constant 0 : index
    %43 = vector.load %arg1[%c0_42, %c7, %c0_43] : memref<1x64x8xbf16, #tpu.memory_space<vmem>>, vector<1x1x8xbf16>
    %44 = vector.shape_cast %43 : vector<1x1x8xbf16> to vector<1x8xbf16>
    %c0_44 = arith.constant 0 : index
    %c7_45 = arith.constant 7 : index
    %c0_46 = arith.constant 0 : index
    %45 = vector.load %arg2[%c0_44, %c7_45, %c0_46] : memref<1x240x8xbf16, #tpu.memory_space<vmem>>, vector<1x128x8xbf16>
    %46 = vector.shape_cast %45 : vector<1x128x8xbf16> to vector<128x8xbf16>
    %cst_47 = arith.constant dense<0.000000e+00> : vector<1x128xf32>
    %47 = tpu.matmul %44, %46, %cst_47 {dimension_numbers = #tpu.dot_dimension_numbers<[1], [1], [0], [0], [0, 0, 1, 0], [], []>} : vector<1x8xbf16>, vector<128x8xbf16>, vector<1x128xf32> -> vector<1x128xf32>
    %48 = arith.addf %42, %47 : vector<1x128xf32>
    %c0_48 = arith.constant 0 : index
    %c8 = arith.constant 8 : index
    %c0_49 = arith.constant 0 : index
    %49 = vector.load %arg1[%c0_48, %c8, %c0_49] : memref<1x64x8xbf16, #tpu.memory_space<vmem>>, vector<1x1x8xbf16>
    %50 = vector.shape_cast %49 : vector<1x1x8xbf16> to vector<1x8xbf16>
    %c0_50 = arith.constant 0 : index
    %c14 = arith.constant 14 : index
    %c0_51 = arith.constant 0 : index
    %51 = vector.load %arg2[%c0_50, %c14, %c0_51] : memref<1x240x8xbf16, #tpu.memory_space<vmem>>, vector<1x128x8xbf16>
    %52 = vector.shape_cast %51 : vector<1x128x8xbf16> to vector<128x8xbf16>
    %cst_52 = arith.constant dense<0.000000e+00> : vector<1x128xf32>
    %53 = tpu.matmul %50, %52, %cst_52 {dimension_numbers = #tpu.dot_dimension_numbers<[1], [1], [0], [0], [0, 0, 1, 0], [], []>} : vector<1x8xbf16>, vector<128x8xbf16>, vector<1x128xf32> -> vector<1x128xf32>
    %54 = arith.addf %48, %53 : vector<1x128xf32>
    %c0_53 = arith.constant 0 : index
    %c9 = arith.constant 9 : index
    %c0_54 = arith.constant 0 : index
    %55 = vector.load %arg1[%c0_53, %c9, %c0_54] : memref<1x64x8xbf16, #tpu.memory_space<vmem>>, vector<1x1x8xbf16>
    %56 = vector.shape_cast %55 : vector<1x1x8xbf16> to vector<1x8xbf16>
    %c0_55 = arith.constant 0 : index
    %c15 = arith.constant 15 : index
    %c0_56 = arith.constant 0 : index
    %57 = vector.load %arg2[%c0_55, %c15, %c0_56] : memref<1x240x8xbf16, #tpu.memory_space<vmem>>, vector<1x128x8xbf16>
    %58 = vector.shape_cast %57 : vector<1x128x8xbf16> to vector<128x8xbf16>
    %cst_57 = arith.constant dense<0.000000e+00> : vector<1x128xf32>
    %59 = tpu.matmul %56, %58, %cst_57 {dimension_numbers = #tpu.dot_dimension_numbers<[1], [1], [0], [0], [0, 0, 1, 0], [], []>} : vector<1x8xbf16>, vector<128x8xbf16>, vector<1x128xf32> -> vector<1x128xf32>
    %60 = arith.addf %54, %59 : vector<1x128xf32>
    %c0_58 = arith.constant 0 : index
    %c10 = arith.constant 10 : index
    %c0_59 = arith.constant 0 : index
    %61 = vector.load %arg1[%c0_58, %c10, %c0_59] : memref<1x64x8xbf16, #tpu.memory_space<vmem>>, vector<1x1x8xbf16>
    %62 = vector.shape_cast %61 : vector<1x1x8xbf16> to vector<1x8xbf16>
    %c0_60 = arith.constant 0 : index
    %c16 = arith.constant 16 : index
    %c0_61 = arith.constant 0 : index
    %63 = vector.load %arg2[%c0_60, %c16, %c0_61] : memref<1x240x8xbf16, #tpu.memory_space<vmem>>, vector<1x128x8xbf16>
    %64 = vector.shape_cast %63 : vector<1x128x8xbf16> to vector<128x8xbf16>
    %cst_62 = arith.constant dense<0.000000e+00> : vector<1x128xf32>
    %65 = tpu.matmul %62, %64, %cst_62 {dimension_numbers = #tpu.dot_dimension_numbers<[1], [1], [0], [0], [0, 0, 1, 0], [], []>} : vector<1x8xbf16>, vector<128x8xbf16>, vector<1x128xf32> -> vector<1x128xf32>
    %66 = arith.addf %60, %65 : vector<1x128xf32>
    %c0_63 = arith.constant 0 : index
    %c11 = arith.constant 11 : index
    %c0_64 = arith.constant 0 : index
    %67 = vector.load %arg1[%c0_63, %c11, %c0_64] : memref<1x64x8xbf16, #tpu.memory_space<vmem>>, vector<1x1x8xbf16>
    %68 = vector.shape_cast %67 : vector<1x1x8xbf16> to vector<1x8xbf16>
    %c0_65 = arith.constant 0 : index
    %c17 = arith.constant 17 : index
    %c0_66 = arith.constant 0 : index
    %69 = vector.load %arg2[%c0_65, %c17, %c0_66] : memref<1x240x8xbf16, #tpu.memory_space<vmem>>, vector<1x128x8xbf16>
    %70 = vector.shape_cast %69 : vector<1x128x8xbf16> to vector<128x8xbf16>
    %cst_67 = arith.constant dense<0.000000e+00> : vector<1x128xf32>
    %71 = tpu.matmul %68, %70, %cst_67 {dimension_numbers = #tpu.dot_dimension_numbers<[1], [1], [0], [0], [0, 0, 1, 0], [], []>} : vector<1x8xbf16>, vector<128x8xbf16>, vector<1x128xf32> -> vector<1x128xf32>
    %72 = arith.addf %66, %71 : vector<1x128xf32>
    %c0_68 = arith.constant 0 : index
    %c12 = arith.constant 12 : index
    %c0_69 = arith.constant 0 : index
    %73 = vector.load %arg1[%c0_68, %c12, %c0_69] : memref<1x64x8xbf16, #tpu.memory_space<vmem>>, vector<1x1x8xbf16>
    %74 = vector.shape_cast %73 : vector<1x1x8xbf16> to vector<1x8xbf16>
    %c0_70 = arith.constant 0 : index
    %c18 = arith.constant 18 : index
    %c0_71 = arith.constant 0 : index
    %75 = vector.load %arg2[%c0_70, %c18, %c0_71] : memref<1x240x8xbf16, #tpu.memory_space<vmem>>, vector<1x128x8xbf16>
    %76 = vector.shape_cast %75 : vector<1x128x8xbf16> to vector<128x8xbf16>
    %cst_72 = arith.constant dense<0.000000e+00> : vector<1x128xf32>
    %77 = tpu.matmul %74, %76, %cst_72 {dimension_numbers = #tpu.dot_dimension_numbers<[1], [1], [0], [0], [0, 0, 1, 0], [], []>} : vector<1x8xbf16>, vector<128x8xbf16>, vector<1x128xf32> -> vector<1x128xf32>
    %78 = arith.addf %72, %77 : vector<1x128xf32>
    %c0_73 = arith.constant 0 : index
    %c13 = arith.constant 13 : index
    %c0_74 = arith.constant 0 : index
    %79 = vector.load %arg1[%c0_73, %c13, %c0_74] : memref<1x64x8xbf16, #tpu.memory_space<vmem>>, vector<1x1x8xbf16>
    %80 = vector.shape_cast %79 : vector<1x1x8xbf16> to vector<1x8xbf16>
    %c0_75 = arith.constant 0 : index
    %c19 = arith.constant 19 : index
    %c0_76 = arith.constant 0 : index
    %81 = vector.load %arg2[%c0_75, %c19, %c0_76] : memref<1x240x8xbf16, #tpu.memory_space<vmem>>, vector<1x128x8xbf16>
    %82 = vector.shape_cast %81 : vector<1x128x8xbf16> to vector<128x8xbf16>
    %cst_77 = arith.constant dense<0.000000e+00> : vector<1x128xf32>
    %83 = tpu.matmul %80, %82, %cst_77 {dimension_numbers = #tpu.dot_dimension_numbers<[1], [1], [0], [0], [0, 0, 1, 0], [], []>} : vector<1x8xbf16>, vector<128x8xbf16>, vector<1x128xf32> -> vector<1x128xf32>
    %84 = arith.addf %78, %83 : vector<1x128xf32>
    %c0_78 = arith.constant 0 : index
    %c14_79 = arith.constant 14 : index
    %c0_80 = arith.constant 0 : index
    %85 = vector.load %arg1[%c0_78, %c14_79, %c0_80] : memref<1x64x8xbf16, #tpu.memory_space<vmem>>, vector<1x1x8xbf16>
    %86 = vector.shape_cast %85 : vector<1x1x8xbf16> to vector<1x8xbf16>
    %c0_81 = arith.constant 0 : index
    %c20 = arith.constant 20 : index
    %c0_82 = arith.constant 0 : index
    %87 = vector.load %arg2[%c0_81, %c20, %c0_82] : memref<1x240x8xbf16, #tpu.memory_space<vmem>>, vector<1x128x8xbf16>
    %88 = vector.shape_cast %87 : vector<1x128x8xbf16> to vector<128x8xbf16>
    %cst_83 = arith.constant dense<0.000000e+00> : vector<1x128xf32>
    %89 = tpu.matmul %86, %88, %cst_83 {dimension_numbers = #tpu.dot_dimension_numbers<[1], [1], [0], [0], [0, 0, 1, 0], [], []>} : vector<1x8xbf16>, vector<128x8xbf16>, vector<1x128xf32> -> vector<1x128xf32>
    %90 = arith.addf %84, %89 : vector<1x128xf32>
    %c0_84 = arith.constant 0 : index
    %c15_85 = arith.constant 15 : index
    %c0_86 = arith.constant 0 : index
    %91 = vector.load %arg1[%c0_84, %c15_85, %c0_86] : memref<1x64x8xbf16, #tpu.memory_space<vmem>>, vector<1x1x8xbf16>
    %92 = vector.shape_cast %91 : vector<1x1x8xbf16> to vector<1x8xbf16>
    %c0_87 = arith.constant 0 : index
    %c21 = arith.constant 21 : index
    %c0_88 = arith.constant 0 : index
    %93 = vector.load %arg2[%c0_87, %c21, %c0_88] : memref<1x240x8xbf16, #tpu.memory_space<vmem>>, vector<1x128x8xbf16>
    %94 = vector.shape_cast %93 : vector<1x128x8xbf16> to vector<128x8xbf16>
    %cst_89 = arith.constant dense<0.000000e+00> : vector<1x128xf32>
    %95 = tpu.matmul %92, %94, %cst_89 {dimension_numbers = #tpu.dot_dimension_numbers<[1], [1], [0], [0], [0, 0, 1, 0], [], []>} : vector<1x8xbf16>, vector<128x8xbf16>, vector<1x128xf32> -> vector<1x128xf32>
    %96 = arith.addf %90, %95 : vector<1x128xf32>
    %c0_90 = arith.constant 0 : index
    %c16_91 = arith.constant 16 : index
    %c0_92 = arith.constant 0 : index
    %97 = vector.load %arg1[%c0_90, %c16_91, %c0_92] : memref<1x64x8xbf16, #tpu.memory_space<vmem>>, vector<1x1x8xbf16>
    %98 = vector.shape_cast %97 : vector<1x1x8xbf16> to vector<1x8xbf16>
    %c0_93 = arith.constant 0 : index
    %c28 = arith.constant 28 : index
    %c0_94 = arith.constant 0 : index
    %99 = vector.load %arg2[%c0_93, %c28, %c0_94] : memref<1x240x8xbf16, #tpu.memory_space<vmem>>, vector<1x128x8xbf16>
    %100 = vector.shape_cast %99 : vector<1x128x8xbf16> to vector<128x8xbf16>
    %cst_95 = arith.constant dense<0.000000e+00> : vector<1x128xf32>
    %101 = tpu.matmul %98, %100, %cst_95 {dimension_numbers = #tpu.dot_dimension_numbers<[1], [1], [0], [0], [0, 0, 1, 0], [], []>} : vector<1x8xbf16>, vector<128x8xbf16>, vector<1x128xf32> -> vector<1x128xf32>
    %102 = arith.addf %96, %101 : vector<1x128xf32>
    %c0_96 = arith.constant 0 : index
    %c17_97 = arith.constant 17 : index
    %c0_98 = arith.constant 0 : index
    %103 = vector.load %arg1[%c0_96, %c17_97, %c0_98] : memref<1x64x8xbf16, #tpu.memory_space<vmem>>, vector<1x1x8xbf16>
    %104 = vector.shape_cast %103 : vector<1x1x8xbf16> to vector<1x8xbf16>
    %c0_99 = arith.constant 0 : index
    %c29 = arith.constant 29 : index
    %c0_100 = arith.constant 0 : index
    %105 = vector.load %arg2[%c0_99, %c29, %c0_100] : memref<1x240x8xbf16, #tpu.memory_space<vmem>>, vector<1x128x8xbf16>
    %106 = vector.shape_cast %105 : vector<1x128x8xbf16> to vector<128x8xbf16>
    %cst_101 = arith.constant dense<0.000000e+00> : vector<1x128xf32>
    %107 = tpu.matmul %104, %106, %cst_101 {dimension_numbers = #tpu.dot_dimension_numbers<[1], [1], [0], [0], [0, 0, 1, 0], [], []>} : vector<1x8xbf16>, vector<128x8xbf16>, vector<1x128xf32> -> vector<1x128xf32>
    %108 = arith.addf %102, %107 : vector<1x128xf32>
    %c0_102 = arith.constant 0 : index
    %c18_103 = arith.constant 18 : index
    %c0_104 = arith.constant 0 : index
    %109 = vector.load %arg1[%c0_102, %c18_103, %c0_104] : memref<1x64x8xbf16, #tpu.memory_space<vmem>>, vector<1x1x8xbf16>
    %110 = vector.shape_cast %109 : vector<1x1x8xbf16> to vector<1x8xbf16>
    %c0_105 = arith.constant 0 : index
    %c30 = arith.constant 30 : index
    %c0_106 = arith.constant 0 : index
    %111 = vector.load %arg2[%c0_105, %c30, %c0_106] : memref<1x240x8xbf16, #tpu.memory_space<vmem>>, vector<1x128x8xbf16>
    %112 = vector.shape_cast %111 : vector<1x128x8xbf16> to vector<128x8xbf16>
    %cst_107 = arith.constant dense<0.000000e+00> : vector<1x128xf32>
    %113 = tpu.matmul %110, %112, %cst_107 {dimension_numbers = #tpu.dot_dimension_numbers<[1], [1], [0], [0], [0, 0, 1, 0], [], []>} : vector<1x8xbf16>, vector<128x8xbf16>, vector<1x128xf32> -> vector<1x128xf32>
    %114 = arith.addf %108, %113 : vector<1x128xf32>
    %c0_108 = arith.constant 0 : index
    %c19_109 = arith.constant 19 : index
    %c0_110 = arith.constant 0 : index
    %115 = vector.load %arg1[%c0_108, %c19_109, %c0_110] : memref<1x64x8xbf16, #tpu.memory_space<vmem>>, vector<1x1x8xbf16>
    %116 = vector.shape_cast %115 : vector<1x1x8xbf16> to vector<1x8xbf16>
    %c0_111 = arith.constant 0 : index
    %c31 = arith.constant 31 : index
    %c0_112 = arith.constant 0 : index
    %117 = vector.load %arg2[%c0_111, %c31, %c0_112] : memref<1x240x8xbf16, #tpu.memory_space<vmem>>, vector<1x128x8xbf16>
    %118 = vector.shape_cast %117 : vector<1x128x8xbf16> to vector<128x8xbf16>
    %cst_113 = arith.constant dense<0.000000e+00> : vector<1x128xf32>
    %119 = tpu.matmul %116, %118, %cst_113 {dimension_numbers = #tpu.dot_dimension_numbers<[1], [1], [0], [0], [0, 0, 1, 0], [], []>} : vector<1x8xbf16>, vector<128x8xbf16>, vector<1x128xf32> -> vector<1x128xf32>
    %120 = arith.addf %114, %119 : vector<1x128xf32>
    %c0_114 = arith.constant 0 : index
    %c20_115 = arith.constant 20 : index
    %c0_116 = arith.constant 0 : index
    %121 = vector.load %arg1[%c0_114, %c20_115, %c0_116] : memref<1x64x8xbf16, #tpu.memory_space<vmem>>, vector<1x1x8xbf16>
    %122 = vector.shape_cast %121 : vector<1x1x8xbf16> to vector<1x8xbf16>
    %c0_117 = arith.constant 0 : index
    %c32 = arith.constant 32 : index
    %c0_118 = arith.constant 0 : index
    %123 = vector.load %arg2[%c0_117, %c32, %c0_118] : memref<1x240x8xbf16, #tpu.memory_space<vmem>>, vector<1x128x8xbf16>
    %124 = vector.shape_cast %123 : vector<1x128x8xbf16> to vector<128x8xbf16>
    %cst_119 = arith.constant dense<0.000000e+00> : vector<1x128xf32>
    %125 = tpu.matmul %122, %124, %cst_119 {dimension_numbers = #tpu.dot_dimension_numbers<[1], [1], [0], [0], [0, 0, 1, 0], [], []>} : vector<1x8xbf16>, vector<128x8xbf16>, vector<1x128xf32> -> vector<1x128xf32>
    %126 = arith.addf %120, %125 : vector<1x128xf32>
    %c0_120 = arith.constant 0 : index
    %c21_121 = arith.constant 21 : index
    %c0_122 = arith.constant 0 : index
    %127 = vector.load %arg1[%c0_120, %c21_121, %c0_122] : memref<1x64x8xbf16, #tpu.memory_space<vmem>>, vector<1x1x8xbf16>
    %128 = vector.shape_cast %127 : vector<1x1x8xbf16> to vector<1x8xbf16>
    %c0_123 = arith.constant 0 : index
    %c33 = arith.constant 33 : index
    %c0_124 = arith.constant 0 : index
    %129 = vector.load %arg2[%c0_123, %c33, %c0_124] : memref<1x240x8xbf16, #tpu.memory_space<vmem>>, vector<1x128x8xbf16>
    %130 = vector.shape_cast %129 : vector<1x128x8xbf16> to vector<128x8xbf16>
    %cst_125 = arith.constant dense<0.000000e+00> : vector<1x128xf32>
    %131 = tpu.matmul %128, %130, %cst_125 {dimension_numbers = #tpu.dot_dimension_numbers<[1], [1], [0], [0], [0, 0, 1, 0], [], []>} : vector<1x8xbf16>, vector<128x8xbf16>, vector<1x128xf32> -> vector<1x128xf32>
    %132 = arith.addf %126, %131 : vector<1x128xf32>
    %c0_126 = arith.constant 0 : index
    %c22 = arith.constant 22 : index
    %c0_127 = arith.constant 0 : index
    %133 = vector.load %arg1[%c0_126, %c22, %c0_127] : memref<1x64x8xbf16, #tpu.memory_space<vmem>>, vector<1x1x8xbf16>
    %134 = vector.shape_cast %133 : vector<1x1x8xbf16> to vector<1x8xbf16>
    %c0_128 = arith.constant 0 : index
    %c34 = arith.constant 34 : index
    %c0_129 = arith.constant 0 : index
    %135 = vector.load %arg2[%c0_128, %c34, %c0_129] : memref<1x240x8xbf16, #tpu.memory_space<vmem>>, vector<1x128x8xbf16>
    %136 = vector.shape_cast %135 : vector<1x128x8xbf16> to vector<128x8xbf16>
    %cst_130 = arith.constant dense<0.000000e+00> : vector<1x128xf32>
    %137 = tpu.matmul %134, %136, %cst_130 {dimension_numbers = #tpu.dot_dimension_numbers<[1], [1], [0], [0], [0, 0, 1, 0], [], []>} : vector<1x8xbf16>, vector<128x8xbf16>, vector<1x128xf32> -> vector<1x128xf32>
    %138 = arith.addf %132, %137 : vector<1x128xf32>
    %c0_131 = arith.constant 0 : index
    %c23 = arith.constant 23 : index
    %c0_132 = arith.constant 0 : index
    %139 = vector.load %arg1[%c0_131, %c23, %c0_132] : memref<1x64x8xbf16, #tpu.memory_space<vmem>>, vector<1x1x8xbf16>
    %140 = vector.shape_cast %139 : vector<1x1x8xbf16> to vector<1x8xbf16>
    %c0_133 = arith.constant 0 : index
    %c35 = arith.constant 35 : index
    %c0_134 = arith.constant 0 : index
    %141 = vector.load %arg2[%c0_133, %c35, %c0_134] : memref<1x240x8xbf16, #tpu.memory_space<vmem>>, vector<1x128x8xbf16>
    %142 = vector.shape_cast %141 : vector<1x128x8xbf16> to vector<128x8xbf16>
    %cst_135 = arith.constant dense<0.000000e+00> : vector<1x128xf32>
    %143 = tpu.matmul %140, %142, %cst_135 {dimension_numbers = #tpu.dot_dimension_numbers<[1], [1], [0], [0], [0, 0, 1, 0], [], []>} : vector<1x8xbf16>, vector<128x8xbf16>, vector<1x128xf32> -> vector<1x128xf32>
    %144 = arith.addf %138, %143 : vector<1x128xf32>
    %c0_136 = arith.constant 0 : index
    %c24 = arith.constant 24 : index
    %c0_137 = arith.constant 0 : index
    %145 = vector.load %arg1[%c0_136, %c24, %c0_137] : memref<1x64x8xbf16, #tpu.memory_space<vmem>>, vector<1x1x8xbf16>
    %146 = vector.shape_cast %145 : vector<1x1x8xbf16> to vector<1x8xbf16>
    %c0_138 = arith.constant 0 : index
    %c42 = arith.constant 42 : index
    %c0_139 = arith.constant 0 : index
    %147 = vector.load %arg2[%c0_138, %c42, %c0_139] : memref<1x240x8xbf16, #tpu.memory_space<vmem>>, vector<1x128x8xbf16>
    %148 = vector.shape_cast %147 : vector<1x128x8xbf16> to vector<128x8xbf16>
    %cst_140 = arith.constant dense<0.000000e+00> : vector<1x128xf32>
    %149 = tpu.matmul %146, %148, %cst_140 {dimension_numbers = #tpu.dot_dimension_numbers<[1], [1], [0], [0], [0, 0, 1, 0], [], []>} : vector<1x8xbf16>, vector<128x8xbf16>, vector<1x128xf32> -> vector<1x128xf32>
    %150 = arith.addf %144, %149 : vector<1x128xf32>
    %c0_141 = arith.constant 0 : index
    %c25 = arith.constant 25 : index
    %c0_142 = arith.constant 0 : index
    %151 = vector.load %arg1[%c0_141, %c25, %c0_142] : memref<1x64x8xbf16, #tpu.memory_space<vmem>>, vector<1x1x8xbf16>
    %152 = vector.shape_cast %151 : vector<1x1x8xbf16> to vector<1x8xbf16>
    %c0_143 = arith.constant 0 : index
    %c43 = arith.constant 43 : index
    %c0_144 = arith.constant 0 : index
    %153 = vector.load %arg2[%c0_143, %c43, %c0_144] : memref<1x240x8xbf16, #tpu.memory_space<vmem>>, vector<1x128x8xbf16>
    %154 = vector.shape_cast %153 : vector<1x128x8xbf16> to vector<128x8xbf16>
    %cst_145 = arith.constant dense<0.000000e+00> : vector<1x128xf32>
    %155 = tpu.matmul %152, %154, %cst_145 {dimension_numbers = #tpu.dot_dimension_numbers<[1], [1], [0], [0], [0, 0, 1, 0], [], []>} : vector<1x8xbf16>, vector<128x8xbf16>, vector<1x128xf32> -> vector<1x128xf32>
    %156 = arith.addf %150, %155 : vector<1x128xf32>
    %c0_146 = arith.constant 0 : index
    %c26 = arith.constant 26 : index
    %c0_147 = arith.constant 0 : index
    %157 = vector.load %arg1[%c0_146, %c26, %c0_147] : memref<1x64x8xbf16, #tpu.memory_space<vmem>>, vector<1x1x8xbf16>
    %158 = vector.shape_cast %157 : vector<1x1x8xbf16> to vector<1x8xbf16>
    %c0_148 = arith.constant 0 : index
    %c44 = arith.constant 44 : index
    %c0_149 = arith.constant 0 : index
    %159 = vector.load %arg2[%c0_148, %c44, %c0_149] : memref<1x240x8xbf16, #tpu.memory_space<vmem>>, vector<1x128x8xbf16>
    %160 = vector.shape_cast %159 : vector<1x128x8xbf16> to vector<128x8xbf16>
    %cst_150 = arith.constant dense<0.000000e+00> : vector<1x128xf32>
    %161 = tpu.matmul %158, %160, %cst_150 {dimension_numbers = #tpu.dot_dimension_numbers<[1], [1], [0], [0], [0, 0, 1, 0], [], []>} : vector<1x8xbf16>, vector<128x8xbf16>, vector<1x128xf32> -> vector<1x128xf32>
    %162 = arith.addf %156, %161 : vector<1x128xf32>
    %c0_151 = arith.constant 0 : index
    %c27 = arith.constant 27 : index
    %c0_152 = arith.constant 0 : index
    %163 = vector.load %arg1[%c0_151, %c27, %c0_152] : memref<1x64x8xbf16, #tpu.memory_space<vmem>>, vector<1x1x8xbf16>
    %164 = vector.shape_cast %163 : vector<1x1x8xbf16> to vector<1x8xbf16>
    %c0_153 = arith.constant 0 : index
    %c45 = arith.constant 45 : index
    %c0_154 = arith.constant 0 : index
    %165 = vector.load %arg2[%c0_153, %c45, %c0_154] : memref<1x240x8xbf16, #tpu.memory_space<vmem>>, vector<1x128x8xbf16>
    %166 = vector.shape_cast %165 : vector<1x128x8xbf16> to vector<128x8xbf16>
    %cst_155 = arith.constant dense<0.000000e+00> : vector<1x128xf32>
    %167 = tpu.matmul %164, %166, %cst_155 {dimension_numbers = #tpu.dot_dimension_numbers<[1], [1], [0], [0], [0, 0, 1, 0], [], []>} : vector<1x8xbf16>, vector<128x8xbf16>, vector<1x128xf32> -> vector<1x128xf32>
    %168 = arith.addf %162, %167 : vector<1x128xf32>
    %c0_156 = arith.constant 0 : index
    %c28_157 = arith.constant 28 : index
    %c0_158 = arith.constant 0 : index
    %169 = vector.load %arg1[%c0_156, %c28_157, %c0_158] : memref<1x64x8xbf16, #tpu.memory_space<vmem>>, vector<1x1x8xbf16>
    %170 = vector.shape_cast %169 : vector<1x1x8xbf16> to vector<1x8xbf16>
    %c0_159 = arith.constant 0 : index
    %c46 = arith.constant 46 : index
    %c0_160 = arith.constant 0 : index
    %171 = vector.load %arg2[%c0_159, %c46, %c0_160] : memref<1x240x8xbf16, #tpu.memory_space<vmem>>, vector<1x128x8xbf16>
    %172 = vector.shape_cast %171 : vector<1x128x8xbf16> to vector<128x8xbf16>
    %cst_161 = arith.constant dense<0.000000e+00> : vector<1x128xf32>
    %173 = tpu.matmul %170, %172, %cst_161 {dimension_numbers = #tpu.dot_dimension_numbers<[1], [1], [0], [0], [0, 0, 1, 0], [], []>} : vector<1x8xbf16>, vector<128x8xbf16>, vector<1x128xf32> -> vector<1x128xf32>
    %174 = arith.addf %168, %173 : vector<1x128xf32>
    %c0_162 = arith.constant 0 : index
    %c29_163 = arith.constant 29 : index
    %c0_164 = arith.constant 0 : index
    %175 = vector.load %arg1[%c0_162, %c29_163, %c0_164] : memref<1x64x8xbf16, #tpu.memory_space<vmem>>, vector<1x1x8xbf16>
    %176 = vector.shape_cast %175 : vector<1x1x8xbf16> to vector<1x8xbf16>
    %c0_165 = arith.constant 0 : index
    %c47 = arith.constant 47 : index
    %c0_166 = arith.constant 0 : index
    %177 = vector.load %arg2[%c0_165, %c47, %c0_166] : memref<1x240x8xbf16, #tpu.memory_space<vmem>>, vector<1x128x8xbf16>
    %178 = vector.shape_cast %177 : vector<1x128x8xbf16> to vector<128x8xbf16>
    %cst_167 = arith.constant dense<0.000000e+00> : vector<1x128xf32>
    %179 = tpu.matmul %176, %178, %cst_167 {dimension_numbers = #tpu.dot_dimension_numbers<[1], [1], [0], [0], [0, 0, 1, 0], [], []>} : vector<1x8xbf16>, vector<128x8xbf16>, vector<1x128xf32> -> vector<1x128xf32>
    %180 = arith.addf %174, %179 : vector<1x128xf32>
    %c0_168 = arith.constant 0 : index
    %c30_169 = arith.constant 30 : index
    %c0_170 = arith.constant 0 : index
    %181 = vector.load %arg1[%c0_168, %c30_169, %c0_170] : memref<1x64x8xbf16, #tpu.memory_space<vmem>>, vector<1x1x8xbf16>
    %182 = vector.shape_cast %181 : vector<1x1x8xbf16> to vector<1x8xbf16>
    %c0_171 = arith.constant 0 : index
    %c48 = arith.constant 48 : index
    %c0_172 = arith.constant 0 : index
    %183 = vector.load %arg2[%c0_171, %c48, %c0_172] : memref<1x240x8xbf16, #tpu.memory_space<vmem>>, vector<1x128x8xbf16>
    %184 = vector.shape_cast %183 : vector<1x128x8xbf16> to vector<128x8xbf16>
    %cst_173 = arith.constant dense<0.000000e+00> : vector<1x128xf32>
    %185 = tpu.matmul %182, %184, %cst_173 {dimension_numbers = #tpu.dot_dimension_numbers<[1], [1], [0], [0], [0, 0, 1, 0], [], []>} : vector<1x8xbf16>, vector<128x8xbf16>, vector<1x128xf32> -> vector<1x128xf32>
    %186 = arith.addf %180, %185 : vector<1x128xf32>
    %c0_174 = arith.constant 0 : index
    %c31_175 = arith.constant 31 : index
    %c0_176 = arith.constant 0 : index
    %187 = vector.load %arg1[%c0_174, %c31_175, %c0_176] : memref<1x64x8xbf16, #tpu.memory_space<vmem>>, vector<1x1x8xbf16>
    %188 = vector.shape_cast %187 : vector<1x1x8xbf16> to vector<1x8xbf16>
    %c0_177 = arith.constant 0 : index
    %c49 = arith.constant 49 : index
    %c0_178 = arith.constant 0 : index
    %189 = vector.load %arg2[%c0_177, %c49, %c0_178] : memref<1x240x8xbf16, #tpu.memory_space<vmem>>, vector<1x128x8xbf16>
    %190 = vector.shape_cast %189 : vector<1x128x8xbf16> to vector<128x8xbf16>
    %cst_179 = arith.constant dense<0.000000e+00> : vector<1x128xf32>
    %191 = tpu.matmul %188, %190, %cst_179 {dimension_numbers = #tpu.dot_dimension_numbers<[1], [1], [0], [0], [0, 0, 1, 0], [], []>} : vector<1x8xbf16>, vector<128x8xbf16>, vector<1x128xf32> -> vector<1x128xf32>
    %192 = arith.addf %186, %191 : vector<1x128xf32>
    %c0_180 = arith.constant 0 : index
    %c32_181 = arith.constant 32 : index
    %c0_182 = arith.constant 0 : index
    %193 = vector.load %arg1[%c0_180, %c32_181, %c0_182] : memref<1x64x8xbf16, #tpu.memory_space<vmem>>, vector<1x1x8xbf16>
    %194 = vector.shape_cast %193 : vector<1x1x8xbf16> to vector<1x8xbf16>
    %c0_183 = arith.constant 0 : index
    %c56 = arith.constant 56 : index
    %c0_184 = arith.constant 0 : index
    %195 = vector.load %arg2[%c0_183, %c56, %c0_184] : memref<1x240x8xbf16, #tpu.memory_space<vmem>>, vector<1x128x8xbf16>
    %196 = vector.shape_cast %195 : vector<1x128x8xbf16> to vector<128x8xbf16>
    %cst_185 = arith.constant dense<0.000000e+00> : vector<1x128xf32>
    %197 = tpu.matmul %194, %196, %cst_185 {dimension_numbers = #tpu.dot_dimension_numbers<[1], [1], [0], [0], [0, 0, 1, 0], [], []>} : vector<1x8xbf16>, vector<128x8xbf16>, vector<1x128xf32> -> vector<1x128xf32>
    %198 = arith.addf %192, %197 : vector<1x128xf32>
    %c0_186 = arith.constant 0 : index
    %c33_187 = arith.constant 33 : index
    %c0_188 = arith.constant 0 : index
    %199 = vector.load %arg1[%c0_186, %c33_187, %c0_188] : memref<1x64x8xbf16, #tpu.memory_space<vmem>>, vector<1x1x8xbf16>
    %200 = vector.shape_cast %199 : vector<1x1x8xbf16> to vector<1x8xbf16>
    %c0_189 = arith.constant 0 : index
    %c57 = arith.constant 57 : index
    %c0_190 = arith.constant 0 : index
    %201 = vector.load %arg2[%c0_189, %c57, %c0_190] : memref<1x240x8xbf16, #tpu.memory_space<vmem>>, vector<1x128x8xbf16>
    %202 = vector.shape_cast %201 : vector<1x128x8xbf16> to vector<128x8xbf16>
    %cst_191 = arith.constant dense<0.000000e+00> : vector<1x128xf32>
    %203 = tpu.matmul %200, %202, %cst_191 {dimension_numbers = #tpu.dot_dimension_numbers<[1], [1], [0], [0], [0, 0, 1, 0], [], []>} : vector<1x8xbf16>, vector<128x8xbf16>, vector<1x128xf32> -> vector<1x128xf32>
    %204 = arith.addf %198, %203 : vector<1x128xf32>
    %c0_192 = arith.constant 0 : index
    %c34_193 = arith.constant 34 : index
    %c0_194 = arith.constant 0 : index
    %205 = vector.load %arg1[%c0_192, %c34_193, %c0_194] : memref<1x64x8xbf16, #tpu.memory_space<vmem>>, vector<1x1x8xbf16>
    %206 = vector.shape_cast %205 : vector<1x1x8xbf16> to vector<1x8xbf16>
    %c0_195 = arith.constant 0 : index
    %c58 = arith.constant 58 : index
    %c0_196 = arith.constant 0 : index
    %207 = vector.load %arg2[%c0_195, %c58, %c0_196] : memref<1x240x8xbf16, #tpu.memory_space<vmem>>, vector<1x128x8xbf16>
    %208 = vector.shape_cast %207 : vector<1x128x8xbf16> to vector<128x8xbf16>
    %cst_197 = arith.constant dense<0.000000e+00> : vector<1x128xf32>
    %209 = tpu.matmul %206, %208, %cst_197 {dimension_numbers = #tpu.dot_dimension_numbers<[1], [1], [0], [0], [0, 0, 1, 0], [], []>} : vector<1x8xbf16>, vector<128x8xbf16>, vector<1x128xf32> -> vector<1x128xf32>
    %210 = arith.addf %204, %209 : vector<1x128xf32>
    %c0_198 = arith.constant 0 : index
    %c35_199 = arith.constant 35 : index
    %c0_200 = arith.constant 0 : index
    %211 = vector.load %arg1[%c0_198, %c35_199, %c0_200] : memref<1x64x8xbf16, #tpu.memory_space<vmem>>, vector<1x1x8xbf16>
    %212 = vector.shape_cast %211 : vector<1x1x8xbf16> to vector<1x8xbf16>
    %c0_201 = arith.constant 0 : index
    %c59 = arith.constant 59 : index
    %c0_202 = arith.constant 0 : index
    %213 = vector.load %arg2[%c0_201, %c59, %c0_202] : memref<1x240x8xbf16, #tpu.memory_space<vmem>>, vector<1x128x8xbf16>
    %214 = vector.shape_cast %213 : vector<1x128x8xbf16> to vector<128x8xbf16>
    %cst_203 = arith.constant dense<0.000000e+00> : vector<1x128xf32>
    %215 = tpu.matmul %212, %214, %cst_203 {dimension_numbers = #tpu.dot_dimension_numbers<[1], [1], [0], [0], [0, 0, 1, 0], [], []>} : vector<1x8xbf16>, vector<128x8xbf16>, vector<1x128xf32> -> vector<1x128xf32>
    %216 = arith.addf %210, %215 : vector<1x128xf32>
    %c0_204 = arith.constant 0 : index
    %c36 = arith.constant 36 : index
    %c0_205 = arith.constant 0 : index
    %217 = vector.load %arg1[%c0_204, %c36, %c0_205] : memref<1x64x8xbf16, #tpu.memory_space<vmem>>, vector<1x1x8xbf16>
    %218 = vector.shape_cast %217 : vector<1x1x8xbf16> to vector<1x8xbf16>
    %c0_206 = arith.constant 0 : index
    %c60 = arith.constant 60 : index
    %c0_207 = arith.constant 0 : index
    %219 = vector.load %arg2[%c0_206, %c60, %c0_207] : memref<1x240x8xbf16, #tpu.memory_space<vmem>>, vector<1x128x8xbf16>
    %220 = vector.shape_cast %219 : vector<1x128x8xbf16> to vector<128x8xbf16>
    %cst_208 = arith.constant dense<0.000000e+00> : vector<1x128xf32>
    %221 = tpu.matmul %218, %220, %cst_208 {dimension_numbers = #tpu.dot_dimension_numbers<[1], [1], [0], [0], [0, 0, 1, 0], [], []>} : vector<1x8xbf16>, vector<128x8xbf16>, vector<1x128xf32> -> vector<1x128xf32>
    %222 = arith.addf %216, %221 : vector<1x128xf32>
    %c0_209 = arith.constant 0 : index
    %c37 = arith.constant 37 : index
    %c0_210 = arith.constant 0 : index
    %223 = vector.load %arg1[%c0_209, %c37, %c0_210] : memref<1x64x8xbf16, #tpu.memory_space<vmem>>, vector<1x1x8xbf16>
    %224 = vector.shape_cast %223 : vector<1x1x8xbf16> to vector<1x8xbf16>
    %c0_211 = arith.constant 0 : index
    %c61 = arith.constant 61 : index
    %c0_212 = arith.constant 0 : index
    %225 = vector.load %arg2[%c0_211, %c61, %c0_212] : memref<1x240x8xbf16, #tpu.memory_space<vmem>>, vector<1x128x8xbf16>
    %226 = vector.shape_cast %225 : vector<1x128x8xbf16> to vector<128x8xbf16>
    %cst_213 = arith.constant dense<0.000000e+00> : vector<1x128xf32>
    %227 = tpu.matmul %224, %226, %cst_213 {dimension_numbers = #tpu.dot_dimension_numbers<[1], [1], [0], [0], [0, 0, 1, 0], [], []>} : vector<1x8xbf16>, vector<128x8xbf16>, vector<1x128xf32> -> vector<1x128xf32>
    %228 = arith.addf %222, %227 : vector<1x128xf32>
    %c0_214 = arith.constant 0 : index
    %c38 = arith.constant 38 : index
    %c0_215 = arith.constant 0 : index
    %229 = vector.load %arg1[%c0_214, %c38, %c0_215] : memref<1x64x8xbf16, #tpu.memory_space<vmem>>, vector<1x1x8xbf16>
    %230 = vector.shape_cast %229 : vector<1x1x8xbf16> to vector<1x8xbf16>
    %c0_216 = arith.constant 0 : index
    %c62 = arith.constant 62 : index
    %c0_217 = arith.constant 0 : index
    %231 = vector.load %arg2[%c0_216, %c62, %c0_217] : memref<1x240x8xbf16, #tpu.memory_space<vmem>>, vector<1x128x8xbf16>
    %232 = vector.shape_cast %231 : vector<1x128x8xbf16> to vector<128x8xbf16>
    %cst_218 = arith.constant dense<0.000000e+00> : vector<1x128xf32>
    %233 = tpu.matmul %230, %232, %cst_218 {dimension_numbers = #tpu.dot_dimension_numbers<[1], [1], [0], [0], [0, 0, 1, 0], [], []>} : vector<1x8xbf16>, vector<128x8xbf16>, vector<1x128xf32> -> vector<1x128xf32>
    %234 = arith.addf %228, %233 : vector<1x128xf32>
    %c0_219 = arith.constant 0 : index
    %c39 = arith.constant 39 : index
    %c0_220 = arith.constant 0 : index
    %235 = vector.load %arg1[%c0_219, %c39, %c0_220] : memref<1x64x8xbf16, #tpu.memory_space<vmem>>, vector<1x1x8xbf16>
    %236 = vector.shape_cast %235 : vector<1x1x8xbf16> to vector<1x8xbf16>
    %c0_221 = arith.constant 0 : index
    %c63 = arith.constant 63 : index
    %c0_222 = arith.constant 0 : index
    %237 = vector.load %arg2[%c0_221, %c63, %c0_222] : memref<1x240x8xbf16, #tpu.memory_space<vmem>>, vector<1x128x8xbf16>
    %238 = vector.shape_cast %237 : vector<1x128x8xbf16> to vector<128x8xbf16>
    %cst_223 = arith.constant dense<0.000000e+00> : vector<1x128xf32>
    %239 = tpu.matmul %236, %238, %cst_223 {dimension_numbers = #tpu.dot_dimension_numbers<[1], [1], [0], [0], [0, 0, 1, 0], [], []>} : vector<1x8xbf16>, vector<128x8xbf16>, vector<1x128xf32> -> vector<1x128xf32>
    %240 = arith.addf %234, %239 : vector<1x128xf32>
    %c0_224 = arith.constant 0 : index
    %c40 = arith.constant 40 : index
    %c0_225 = arith.constant 0 : index
    %241 = vector.load %arg1[%c0_224, %c40, %c0_225] : memref<1x64x8xbf16, #tpu.memory_space<vmem>>, vector<1x1x8xbf16>
    %242 = vector.shape_cast %241 : vector<1x1x8xbf16> to vector<1x8xbf16>
    %c0_226 = arith.constant 0 : index
    %c70 = arith.constant 70 : index
    %c0_227 = arith.constant 0 : index
    %243 = vector.load %arg2[%c0_226, %c70, %c0_227] : memref<1x240x8xbf16, #tpu.memory_space<vmem>>, vector<1x128x8xbf16>
    %244 = vector.shape_cast %243 : vector<1x128x8xbf16> to vector<128x8xbf16>
    %cst_228 = arith.constant dense<0.000000e+00> : vector<1x128xf32>
    %245 = tpu.matmul %242, %244, %cst_228 {dimension_numbers = #tpu.dot_dimension_numbers<[1], [1], [0], [0], [0, 0, 1, 0], [], []>} : vector<1x8xbf16>, vector<128x8xbf16>, vector<1x128xf32> -> vector<1x128xf32>
    %246 = arith.addf %240, %245 : vector<1x128xf32>
    %c0_229 = arith.constant 0 : index
    %c41 = arith.constant 41 : index
    %c0_230 = arith.constant 0 : index
    %247 = vector.load %arg1[%c0_229, %c41, %c0_230] : memref<1x64x8xbf16, #tpu.memory_space<vmem>>, vector<1x1x8xbf16>
    %248 = vector.shape_cast %247 : vector<1x1x8xbf16> to vector<1x8xbf16>
    %c0_231 = arith.constant 0 : index
    %c71 = arith.constant 71 : index
    %c0_232 = arith.constant 0 : index
    %249 = vector.load %arg2[%c0_231, %c71, %c0_232] : memref<1x240x8xbf16, #tpu.memory_space<vmem>>, vector<1x128x8xbf16>
    %250 = vector.shape_cast %249 : vector<1x128x8xbf16> to vector<128x8xbf16>
    %cst_233 = arith.constant dense<0.000000e+00> : vector<1x128xf32>
    %251 = tpu.matmul %248, %250, %cst_233 {dimension_numbers = #tpu.dot_dimension_numbers<[1], [1], [0], [0], [0, 0, 1, 0], [], []>} : vector<1x8xbf16>, vector<128x8xbf16>, vector<1x128xf32> -> vector<1x128xf32>
    %252 = arith.addf %246, %251 : vector<1x128xf32>
    %c0_234 = arith.constant 0 : index
    %c42_235 = arith.constant 42 : index
    %c0_236 = arith.constant 0 : index
    %253 = vector.load %arg1[%c0_234, %c42_235, %c0_236] : memref<1x64x8xbf16, #tpu.memory_space<vmem>>, vector<1x1x8xbf16>
    %254 = vector.shape_cast %253 : vector<1x1x8xbf16> to vector<1x8xbf16>
    %c0_237 = arith.constant 0 : index
    %c72 = arith.constant 72 : index
    %c0_238 = arith.constant 0 : index
    %255 = vector.load %arg2[%c0_237, %c72, %c0_238] : memref<1x240x8xbf16, #tpu.memory_space<vmem>>, vector<1x128x8xbf16>
    %256 = vector.shape_cast %255 : vector<1x128x8xbf16> to vector<128x8xbf16>
    %cst_239 = arith.constant dense<0.000000e+00> : vector<1x128xf32>
    %257 = tpu.matmul %254, %256, %cst_239 {dimension_numbers = #tpu.dot_dimension_numbers<[1], [1], [0], [0], [0, 0, 1, 0], [], []>} : vector<1x8xbf16>, vector<128x8xbf16>, vector<1x128xf32> -> vector<1x128xf32>
    %258 = arith.addf %252, %257 : vector<1x128xf32>
    %c0_240 = arith.constant 0 : index
    %c43_241 = arith.constant 43 : index
    %c0_242 = arith.constant 0 : index
    %259 = vector.load %arg1[%c0_240, %c43_241, %c0_242] : memref<1x64x8xbf16, #tpu.memory_space<vmem>>, vector<1x1x8xbf16>
    %260 = vector.shape_cast %259 : vector<1x1x8xbf16> to vector<1x8xbf16>
    %c0_243 = arith.constant 0 : index
    %c73 = arith.constant 73 : index
    %c0_244 = arith.constant 0 : index
    %261 = vector.load %arg2[%c0_243, %c73, %c0_244] : memref<1x240x8xbf16, #tpu.memory_space<vmem>>, vector<1x128x8xbf16>
    %262 = vector.shape_cast %261 : vector<1x128x8xbf16> to vector<128x8xbf16>
    %cst_245 = arith.constant dense<0.000000e+00> : vector<1x128xf32>
    %263 = tpu.matmul %260, %262, %cst_245 {dimension_numbers = #tpu.dot_dimension_numbers<[1], [1], [0], [0], [0, 0, 1, 0], [], []>} : vector<1x8xbf16>, vector<128x8xbf16>, vector<1x128xf32> -> vector<1x128xf32>
    %264 = arith.addf %258, %263 : vector<1x128xf32>
    %c0_246 = arith.constant 0 : index
    %c44_247 = arith.constant 44 : index
    %c0_248 = arith.constant 0 : index
    %265 = vector.load %arg1[%c0_246, %c44_247, %c0_248] : memref<1x64x8xbf16, #tpu.memory_space<vmem>>, vector<1x1x8xbf16>
    %266 = vector.shape_cast %265 : vector<1x1x8xbf16> to vector<1x8xbf16>
    %c0_249 = arith.constant 0 : index
    %c74 = arith.constant 74 : index
    %c0_250 = arith.constant 0 : index
    %267 = vector.load %arg2[%c0_249, %c74, %c0_250] : memref<1x240x8xbf16, #tpu.memory_space<vmem>>, vector<1x128x8xbf16>
    %268 = vector.shape_cast %267 : vector<1x128x8xbf16> to vector<128x8xbf16>
    %cst_251 = arith.constant dense<0.000000e+00> : vector<1x128xf32>
    %269 = tpu.matmul %266, %268, %cst_251 {dimension_numbers = #tpu.dot_dimension_numbers<[1], [1], [0], [0], [0, 0, 1, 0], [], []>} : vector<1x8xbf16>, vector<128x8xbf16>, vector<1x128xf32> -> vector<1x128xf32>
    %270 = arith.addf %264, %269 : vector<1x128xf32>
    %c0_252 = arith.constant 0 : index
    %c45_253 = arith.constant 45 : index
    %c0_254 = arith.constant 0 : index
    %271 = vector.load %arg1[%c0_252, %c45_253, %c0_254] : memref<1x64x8xbf16, #tpu.memory_space<vmem>>, vector<1x1x8xbf16>
    %272 = vector.shape_cast %271 : vector<1x1x8xbf16> to vector<1x8xbf16>
    %c0_255 = arith.constant 0 : index
    %c75 = arith.constant 75 : index
    %c0_256 = arith.constant 0 : index
    %273 = vector.load %arg2[%c0_255, %c75, %c0_256] : memref<1x240x8xbf16, #tpu.memory_space<vmem>>, vector<1x128x8xbf16>
    %274 = vector.shape_cast %273 : vector<1x128x8xbf16> to vector<128x8xbf16>
    %cst_257 = arith.constant dense<0.000000e+00> : vector<1x128xf32>
    %275 = tpu.matmul %272, %274, %cst_257 {dimension_numbers = #tpu.dot_dimension_numbers<[1], [1], [0], [0], [0, 0, 1, 0], [], []>} : vector<1x8xbf16>, vector<128x8xbf16>, vector<1x128xf32> -> vector<1x128xf32>
    %276 = arith.addf %270, %275 : vector<1x128xf32>
    %c0_258 = arith.constant 0 : index
    %c46_259 = arith.constant 46 : index
    %c0_260 = arith.constant 0 : index
    %277 = vector.load %arg1[%c0_258, %c46_259, %c0_260] : memref<1x64x8xbf16, #tpu.memory_space<vmem>>, vector<1x1x8xbf16>
    %278 = vector.shape_cast %277 : vector<1x1x8xbf16> to vector<1x8xbf16>
    %c0_261 = arith.constant 0 : index
    %c76 = arith.constant 76 : index
    %c0_262 = arith.constant 0 : index
    %279 = vector.load %arg2[%c0_261, %c76, %c0_262] : memref<1x240x8xbf16, #tpu.memory_space<vmem>>, vector<1x128x8xbf16>
    %280 = vector.shape_cast %279 : vector<1x128x8xbf16> to vector<128x8xbf16>
    %cst_263 = arith.constant dense<0.000000e+00> : vector<1x128xf32>
    %281 = tpu.matmul %278, %280, %cst_263 {dimension_numbers = #tpu.dot_dimension_numbers<[1], [1], [0], [0], [0, 0, 1, 0], [], []>} : vector<1x8xbf16>, vector<128x8xbf16>, vector<1x128xf32> -> vector<1x128xf32>
    %282 = arith.addf %276, %281 : vector<1x128xf32>
    %c0_264 = arith.constant 0 : index
    %c47_265 = arith.constant 47 : index
    %c0_266 = arith.constant 0 : index
    %283 = vector.load %arg1[%c0_264, %c47_265, %c0_266] : memref<1x64x8xbf16, #tpu.memory_space<vmem>>, vector<1x1x8xbf16>
    %284 = vector.shape_cast %283 : vector<1x1x8xbf16> to vector<1x8xbf16>
    %c0_267 = arith.constant 0 : index
    %c77 = arith.constant 77 : index
    %c0_268 = arith.constant 0 : index
    %285 = vector.load %arg2[%c0_267, %c77, %c0_268] : memref<1x240x8xbf16, #tpu.memory_space<vmem>>, vector<1x128x8xbf16>
    %286 = vector.shape_cast %285 : vector<1x128x8xbf16> to vector<128x8xbf16>
    %cst_269 = arith.constant dense<0.000000e+00> : vector<1x128xf32>
    %287 = tpu.matmul %284, %286, %cst_269 {dimension_numbers = #tpu.dot_dimension_numbers<[1], [1], [0], [0], [0, 0, 1, 0], [], []>} : vector<1x8xbf16>, vector<128x8xbf16>, vector<1x128xf32> -> vector<1x128xf32>
    %288 = arith.addf %282, %287 : vector<1x128xf32>
    %c0_270 = arith.constant 0 : index
    %c48_271 = arith.constant 48 : index
    %c0_272 = arith.constant 0 : index
    %289 = vector.load %arg1[%c0_270, %c48_271, %c0_272] : memref<1x64x8xbf16, #tpu.memory_space<vmem>>, vector<1x1x8xbf16>
    %290 = vector.shape_cast %289 : vector<1x1x8xbf16> to vector<1x8xbf16>
    %c0_273 = arith.constant 0 : index
    %c84 = arith.constant 84 : index
    %c0_274 = arith.constant 0 : index
    %291 = vector.load %arg2[%c0_273, %c84, %c0_274] : memref<1x240x8xbf16, #tpu.memory_space<vmem>>, vector<1x128x8xbf16>
    %292 = vector.shape_cast %291 : vector<1x128x8xbf16> to vector<128x8xbf16>
    %cst_275 = arith.constant dense<0.000000e+00> : vector<1x128xf32>
    %293 = tpu.matmul %290, %292, %cst_275 {dimension_numbers = #tpu.dot_dimension_numbers<[1], [1], [0], [0], [0, 0, 1, 0], [], []>} : vector<1x8xbf16>, vector<128x8xbf16>, vector<1x128xf32> -> vector<1x128xf32>
    %294 = arith.addf %288, %293 : vector<1x128xf32>
    %c0_276 = arith.constant 0 : index
    %c49_277 = arith.constant 49 : index
    %c0_278 = arith.constant 0 : index
    %295 = vector.load %arg1[%c0_276, %c49_277, %c0_278] : memref<1x64x8xbf16, #tpu.memory_space<vmem>>, vector<1x1x8xbf16>
    %296 = vector.shape_cast %295 : vector<1x1x8xbf16> to vector<1x8xbf16>
    %c0_279 = arith.constant 0 : index
    %c85 = arith.constant 85 : index
    %c0_280 = arith.constant 0 : index
    %297 = vector.load %arg2[%c0_279, %c85, %c0_280] : memref<1x240x8xbf16, #tpu.memory_space<vmem>>, vector<1x128x8xbf16>
    %298 = vector.shape_cast %297 : vector<1x128x8xbf16> to vector<128x8xbf16>
    %cst_281 = arith.constant dense<0.000000e+00> : vector<1x128xf32>
    %299 = tpu.matmul %296, %298, %cst_281 {dimension_numbers = #tpu.dot_dimension_numbers<[1], [1], [0], [0], [0, 0, 1, 0], [], []>} : vector<1x8xbf16>, vector<128x8xbf16>, vector<1x128xf32> -> vector<1x128xf32>
    %300 = arith.addf %294, %299 : vector<1x128xf32>
    %c0_282 = arith.constant 0 : index
    %c50 = arith.constant 50 : index
    %c0_283 = arith.constant 0 : index
    %301 = vector.load %arg1[%c0_282, %c50, %c0_283] : memref<1x64x8xbf16, #tpu.memory_space<vmem>>, vector<1x1x8xbf16>
    %302 = vector.shape_cast %301 : vector<1x1x8xbf16> to vector<1x8xbf16>
    %c0_284 = arith.constant 0 : index
    %c86 = arith.constant 86 : index
    %c0_285 = arith.constant 0 : index
    %303 = vector.load %arg2[%c0_284, %c86, %c0_285] : memref<1x240x8xbf16, #tpu.memory_space<vmem>>, vector<1x128x8xbf16>
    %304 = vector.shape_cast %303 : vector<1x128x8xbf16> to vector<128x8xbf16>
    %cst_286 = arith.constant dense<0.000000e+00> : vector<1x128xf32>
    %305 = tpu.matmul %302, %304, %cst_286 {dimension_numbers = #tpu.dot_dimension_numbers<[1], [1], [0], [0], [0, 0, 1, 0], [], []>} : vector<1x8xbf16>, vector<128x8xbf16>, vector<1x128xf32> -> vector<1x128xf32>
    %306 = arith.addf %300, %305 : vector<1x128xf32>
    %c0_287 = arith.constant 0 : index
    %c51 = arith.constant 51 : index
    %c0_288 = arith.constant 0 : index
    %307 = vector.load %arg1[%c0_287, %c51, %c0_288] : memref<1x64x8xbf16, #tpu.memory_space<vmem>>, vector<1x1x8xbf16>
    %308 = vector.shape_cast %307 : vector<1x1x8xbf16> to vector<1x8xbf16>
    %c0_289 = arith.constant 0 : index
    %c87 = arith.constant 87 : index
    %c0_290 = arith.constant 0 : index
    %309 = vector.load %arg2[%c0_289, %c87, %c0_290] : memref<1x240x8xbf16, #tpu.memory_space<vmem>>, vector<1x128x8xbf16>
    %310 = vector.shape_cast %309 : vector<1x128x8xbf16> to vector<128x8xbf16>
    %cst_291 = arith.constant dense<0.000000e+00> : vector<1x128xf32>
    %311 = tpu.matmul %308, %310, %cst_291 {dimension_numbers = #tpu.dot_dimension_numbers<[1], [1], [0], [0], [0, 0, 1, 0], [], []>} : vector<1x8xbf16>, vector<128x8xbf16>, vector<1x128xf32> -> vector<1x128xf32>
    %312 = arith.addf %306, %311 : vector<1x128xf32>
    %c0_292 = arith.constant 0 : index
    %c52 = arith.constant 52 : index
    %c0_293 = arith.constant 0 : index
    %313 = vector.load %arg1[%c0_292, %c52, %c0_293] : memref<1x64x8xbf16, #tpu.memory_space<vmem>>, vector<1x1x8xbf16>
    %314 = vector.shape_cast %313 : vector<1x1x8xbf16> to vector<1x8xbf16>
    %c0_294 = arith.constant 0 : index
    %c88 = arith.constant 88 : index
    %c0_295 = arith.constant 0 : index
    %315 = vector.load %arg2[%c0_294, %c88, %c0_295] : memref<1x240x8xbf16, #tpu.memory_space<vmem>>, vector<1x128x8xbf16>
    %316 = vector.shape_cast %315 : vector<1x128x8xbf16> to vector<128x8xbf16>
    %cst_296 = arith.constant dense<0.000000e+00> : vector<1x128xf32>
    %317 = tpu.matmul %314, %316, %cst_296 {dimension_numbers = #tpu.dot_dimension_numbers<[1], [1], [0], [0], [0, 0, 1, 0], [], []>} : vector<1x8xbf16>, vector<128x8xbf16>, vector<1x128xf32> -> vector<1x128xf32>
    %318 = arith.addf %312, %317 : vector<1x128xf32>
    %c0_297 = arith.constant 0 : index
    %c53 = arith.constant 53 : index
    %c0_298 = arith.constant 0 : index
    %319 = vector.load %arg1[%c0_297, %c53, %c0_298] : memref<1x64x8xbf16, #tpu.memory_space<vmem>>, vector<1x1x8xbf16>
    %320 = vector.shape_cast %319 : vector<1x1x8xbf16> to vector<1x8xbf16>
    %c0_299 = arith.constant 0 : index
    %c89 = arith.constant 89 : index
    %c0_300 = arith.constant 0 : index
    %321 = vector.load %arg2[%c0_299, %c89, %c0_300] : memref<1x240x8xbf16, #tpu.memory_space<vmem>>, vector<1x128x8xbf16>
    %322 = vector.shape_cast %321 : vector<1x128x8xbf16> to vector<128x8xbf16>
    %cst_301 = arith.constant dense<0.000000e+00> : vector<1x128xf32>
    %323 = tpu.matmul %320, %322, %cst_301 {dimension_numbers = #tpu.dot_dimension_numbers<[1], [1], [0], [0], [0, 0, 1, 0], [], []>} : vector<1x8xbf16>, vector<128x8xbf16>, vector<1x128xf32> -> vector<1x128xf32>
    %324 = arith.addf %318, %323 : vector<1x128xf32>
    %c0_302 = arith.constant 0 : index
    %c54 = arith.constant 54 : index
    %c0_303 = arith.constant 0 : index
    %325 = vector.load %arg1[%c0_302, %c54, %c0_303] : memref<1x64x8xbf16, #tpu.memory_space<vmem>>, vector<1x1x8xbf16>
    %326 = vector.shape_cast %325 : vector<1x1x8xbf16> to vector<1x8xbf16>
    %c0_304 = arith.constant 0 : index
    %c90 = arith.constant 90 : index
    %c0_305 = arith.constant 0 : index
    %327 = vector.load %arg2[%c0_304, %c90, %c0_305] : memref<1x240x8xbf16, #tpu.memory_space<vmem>>, vector<1x128x8xbf16>
    %328 = vector.shape_cast %327 : vector<1x128x8xbf16> to vector<128x8xbf16>
    %cst_306 = arith.constant dense<0.000000e+00> : vector<1x128xf32>
    %329 = tpu.matmul %326, %328, %cst_306 {dimension_numbers = #tpu.dot_dimension_numbers<[1], [1], [0], [0], [0, 0, 1, 0], [], []>} : vector<1x8xbf16>, vector<128x8xbf16>, vector<1x128xf32> -> vector<1x128xf32>
    %330 = arith.addf %324, %329 : vector<1x128xf32>
    %c0_307 = arith.constant 0 : index
    %c55 = arith.constant 55 : index
    %c0_308 = arith.constant 0 : index
    %331 = vector.load %arg1[%c0_307, %c55, %c0_308] : memref<1x64x8xbf16, #tpu.memory_space<vmem>>, vector<1x1x8xbf16>
    %332 = vector.shape_cast %331 : vector<1x1x8xbf16> to vector<1x8xbf16>
    %c0_309 = arith.constant 0 : index
    %c91 = arith.constant 91 : index
    %c0_310 = arith.constant 0 : index
    %333 = vector.load %arg2[%c0_309, %c91, %c0_310] : memref<1x240x8xbf16, #tpu.memory_space<vmem>>, vector<1x128x8xbf16>
    %334 = vector.shape_cast %333 : vector<1x128x8xbf16> to vector<128x8xbf16>
    %cst_311 = arith.constant dense<0.000000e+00> : vector<1x128xf32>
    %335 = tpu.matmul %332, %334, %cst_311 {dimension_numbers = #tpu.dot_dimension_numbers<[1], [1], [0], [0], [0, 0, 1, 0], [], []>} : vector<1x8xbf16>, vector<128x8xbf16>, vector<1x128xf32> -> vector<1x128xf32>
    %336 = arith.addf %330, %335 : vector<1x128xf32>
    %c0_312 = arith.constant 0 : index
    %c56_313 = arith.constant 56 : index
    %c0_314 = arith.constant 0 : index
    %337 = vector.load %arg1[%c0_312, %c56_313, %c0_314] : memref<1x64x8xbf16, #tpu.memory_space<vmem>>, vector<1x1x8xbf16>
    %338 = vector.shape_cast %337 : vector<1x1x8xbf16> to vector<1x8xbf16>
    %c0_315 = arith.constant 0 : index
    %c98 = arith.constant 98 : index
    %c0_316 = arith.constant 0 : index
    %339 = vector.load %arg2[%c0_315, %c98, %c0_316] : memref<1x240x8xbf16, #tpu.memory_space<vmem>>, vector<1x128x8xbf16>
    %340 = vector.shape_cast %339 : vector<1x128x8xbf16> to vector<128x8xbf16>
    %cst_317 = arith.constant dense<0.000000e+00> : vector<1x128xf32>
    %341 = tpu.matmul %338, %340, %cst_317 {dimension_numbers = #tpu.dot_dimension_numbers<[1], [1], [0], [0], [0, 0, 1, 0], [], []>} : vector<1x8xbf16>, vector<128x8xbf16>, vector<1x128xf32> -> vector<1x128xf32>
    %342 = arith.addf %336, %341 : vector<1x128xf32>
    %c0_318 = arith.constant 0 : index
    %c57_319 = arith.constant 57 : index
    %c0_320 = arith.constant 0 : index
    %343 = vector.load %arg1[%c0_318, %c57_319, %c0_320] : memref<1x64x8xbf16, #tpu.memory_space<vmem>>, vector<1x1x8xbf16>
    %344 = vector.shape_cast %343 : vector<1x1x8xbf16> to vector<1x8xbf16>
    %c0_321 = arith.constant 0 : index
    %c99 = arith.constant 99 : index
    %c0_322 = arith.constant 0 : index
    %345 = vector.load %arg2[%c0_321, %c99, %c0_322] : memref<1x240x8xbf16, #tpu.memory_space<vmem>>, vector<1x128x8xbf16>
    %346 = vector.shape_cast %345 : vector<1x128x8xbf16> to vector<128x8xbf16>
    %cst_323 = arith.constant dense<0.000000e+00> : vector<1x128xf32>
    %347 = tpu.matmul %344, %346, %cst_323 {dimension_numbers = #tpu.dot_dimension_numbers<[1], [1], [0], [0], [0, 0, 1, 0], [], []>} : vector<1x8xbf16>, vector<128x8xbf16>, vector<1x128xf32> -> vector<1x128xf32>
    %348 = arith.addf %342, %347 : vector<1x128xf32>
    %c0_324 = arith.constant 0 : index
    %c58_325 = arith.constant 58 : index
    %c0_326 = arith.constant 0 : index
    %349 = vector.load %arg1[%c0_324, %c58_325, %c0_326] : memref<1x64x8xbf16, #tpu.memory_space<vmem>>, vector<1x1x8xbf16>
    %350 = vector.shape_cast %349 : vector<1x1x8xbf16> to vector<1x8xbf16>
    %c0_327 = arith.constant 0 : index
    %c100 = arith.constant 100 : index
    %c0_328 = arith.constant 0 : index
    %351 = vector.load %arg2[%c0_327, %c100, %c0_328] : memref<1x240x8xbf16, #tpu.memory_space<vmem>>, vector<1x128x8xbf16>
    %352 = vector.shape_cast %351 : vector<1x128x8xbf16> to vector<128x8xbf16>
    %cst_329 = arith.constant dense<0.000000e+00> : vector<1x128xf32>
    %353 = tpu.matmul %350, %352, %cst_329 {dimension_numbers = #tpu.dot_dimension_numbers<[1], [1], [0], [0], [0, 0, 1, 0], [], []>} : vector<1x8xbf16>, vector<128x8xbf16>, vector<1x128xf32> -> vector<1x128xf32>
    %354 = arith.addf %348, %353 : vector<1x128xf32>
    %c0_330 = arith.constant 0 : index
    %c59_331 = arith.constant 59 : index
    %c0_332 = arith.constant 0 : index
    %355 = vector.load %arg1[%c0_330, %c59_331, %c0_332] : memref<1x64x8xbf16, #tpu.memory_space<vmem>>, vector<1x1x8xbf16>
    %356 = vector.shape_cast %355 : vector<1x1x8xbf16> to vector<1x8xbf16>
    %c0_333 = arith.constant 0 : index
    %c101 = arith.constant 101 : index
    %c0_334 = arith.constant 0 : index
    %357 = vector.load %arg2[%c0_333, %c101, %c0_334] : memref<1x240x8xbf16, #tpu.memory_space<vmem>>, vector<1x128x8xbf16>
    %358 = vector.shape_cast %357 : vector<1x128x8xbf16> to vector<128x8xbf16>
    %cst_335 = arith.constant dense<0.000000e+00> : vector<1x128xf32>
    %359 = tpu.matmul %356, %358, %cst_335 {dimension_numbers = #tpu.dot_dimension_numbers<[1], [1], [0], [0], [0, 0, 1, 0], [], []>} : vector<1x8xbf16>, vector<128x8xbf16>, vector<1x128xf32> -> vector<1x128xf32>
    %360 = arith.addf %354, %359 : vector<1x128xf32>
    %c0_336 = arith.constant 0 : index
    %c60_337 = arith.constant 60 : index
    %c0_338 = arith.constant 0 : index
    %361 = vector.load %arg1[%c0_336, %c60_337, %c0_338] : memref<1x64x8xbf16, #tpu.memory_space<vmem>>, vector<1x1x8xbf16>
    %362 = vector.shape_cast %361 : vector<1x1x8xbf16> to vector<1x8xbf16>
    %c0_339 = arith.constant 0 : index
    %c102 = arith.constant 102 : index
    %c0_340 = arith.constant 0 : index
    %363 = vector.load %arg2[%c0_339, %c102, %c0_340] : memref<1x240x8xbf16, #tpu.memory_space<vmem>>, vector<1x128x8xbf16>
    %364 = vector.shape_cast %363 : vector<1x128x8xbf16> to vector<128x8xbf16>
    %cst_341 = arith.constant dense<0.000000e+00> : vector<1x128xf32>
    %365 = tpu.matmul %362, %364, %cst_341 {dimension_numbers = #tpu.dot_dimension_numbers<[1], [1], [0], [0], [0, 0, 1, 0], [], []>} : vector<1x8xbf16>, vector<128x8xbf16>, vector<1x128xf32> -> vector<1x128xf32>
    %366 = arith.addf %360, %365 : vector<1x128xf32>
    %c0_342 = arith.constant 0 : index
    %c61_343 = arith.constant 61 : index
    %c0_344 = arith.constant 0 : index
    %367 = vector.load %arg1[%c0_342, %c61_343, %c0_344] : memref<1x64x8xbf16, #tpu.memory_space<vmem>>, vector<1x1x8xbf16>
    %368 = vector.shape_cast %367 : vector<1x1x8xbf16> to vector<1x8xbf16>
    %c0_345 = arith.constant 0 : index
    %c103 = arith.constant 103 : index
    %c0_346 = arith.constant 0 : index
    %369 = vector.load %arg2[%c0_345, %c103, %c0_346] : memref<1x240x8xbf16, #tpu.memory_space<vmem>>, vector<1x128x8xbf16>
    %370 = vector.shape_cast %369 : vector<1x128x8xbf16> to vector<128x8xbf16>
    %cst_347 = arith.constant dense<0.000000e+00> : vector<1x128xf32>
    %371 = tpu.matmul %368, %370, %cst_347 {dimension_numbers = #tpu.dot_dimension_numbers<[1], [1], [0], [0], [0, 0, 1, 0], [], []>} : vector<1x8xbf16>, vector<128x8xbf16>, vector<1x128xf32> -> vector<1x128xf32>
    %372 = arith.addf %366, %371 : vector<1x128xf32>
    %c0_348 = arith.constant 0 : index
    %c62_349 = arith.constant 62 : index
    %c0_350 = arith.constant 0 : index
    %373 = vector.load %arg1[%c0_348, %c62_349, %c0_350] : memref<1x64x8xbf16, #tpu.memory_space<vmem>>, vector<1x1x8xbf16>
    %374 = vector.shape_cast %373 : vector<1x1x8xbf16> to vector<1x8xbf16>
    %c0_351 = arith.constant 0 : index
    %c104 = arith.constant 104 : index
    %c0_352 = arith.constant 0 : index
    %375 = vector.load %arg2[%c0_351, %c104, %c0_352] : memref<1x240x8xbf16, #tpu.memory_space<vmem>>, vector<1x128x8xbf16>
    %376 = vector.shape_cast %375 : vector<1x128x8xbf16> to vector<128x8xbf16>
    %cst_353 = arith.constant dense<0.000000e+00> : vector<1x128xf32>
    %377 = tpu.matmul %374, %376, %cst_353 {dimension_numbers = #tpu.dot_dimension_numbers<[1], [1], [0], [0], [0, 0, 1, 0], [], []>} : vector<1x8xbf16>, vector<128x8xbf16>, vector<1x128xf32> -> vector<1x128xf32>
    %378 = arith.addf %372, %377 : vector<1x128xf32>
    %c0_354 = arith.constant 0 : index
    %c63_355 = arith.constant 63 : index
    %c0_356 = arith.constant 0 : index
    %379 = vector.load %arg1[%c0_354, %c63_355, %c0_356] : memref<1x64x8xbf16, #tpu.memory_space<vmem>>, vector<1x1x8xbf16>
    %380 = vector.shape_cast %379 : vector<1x1x8xbf16> to vector<1x8xbf16>
    %c0_357 = arith.constant 0 : index
    %c105 = arith.constant 105 : index
    %c0_358 = arith.constant 0 : index
    %381 = vector.load %arg2[%c0_357, %c105, %c0_358] : memref<1x240x8xbf16, #tpu.memory_space<vmem>>, vector<1x128x8xbf16>
    %382 = vector.shape_cast %381 : vector<1x128x8xbf16> to vector<128x8xbf16>
    %cst_359 = arith.constant dense<0.000000e+00> : vector<1x128xf32>
    %383 = tpu.matmul %380, %382, %cst_359 {dimension_numbers = #tpu.dot_dimension_numbers<[1], [1], [0], [0], [0, 0, 1, 0], [], []>} : vector<1x8xbf16>, vector<128x8xbf16>, vector<1x128xf32> -> vector<1x128xf32>
    %384 = arith.addf %378, %383 : vector<1x128xf32>
    %cst_360 = arith.constant 1.000000e-03 : f32
    %385 = vector.broadcast %cst_360 : f32 to vector<1x128xf32>
    %386 = arith.mulf %384, %385 : vector<1x128xf32>
    %c0_361 = arith.constant 0 : index
    %c0_362 = arith.constant 0 : index
    %c0_363 = arith.constant 0 : index
    %387 = vector.load %arg3[%c0_361, %c0_362, %c0_363] : memref<1x1x128xf32, #tpu.memory_space<vmem>>, vector<1x1x128xf32>
    %388 = vector.shape_cast %387 : vector<1x1x128xf32> to vector<1x128xf32>
    %389 = vector.shape_cast %386 : vector<1x128xf32> to vector<1x1x128xf32>
    tpu.vector_store %arg3[%c0_361, %c0_362, %c0_363], %389 {strides = array<i32>} : memref<1x1x128xf32, #tpu.memory_space<vmem>>, vector<1x1x128xf32>,
    return
  }
  func.func @transform_0(%arg0: i32) -> (i32, i32, i32) {
    %c0_i32 = arith.constant 0 : i32
    %c0_i32_0 = arith.constant 0 : i32
    %c0_i32_1 = arith.constant 0 : i32
    return %arg0, %c0_i32, %c0_i32_0 : i32, i32, i32
  }
  func.func @transform_1(%arg0: i32) -> (i32, i32, i32) {
    %c0_i32 = arith.constant 0 : i32
    %c0_i32_0 = arith.constant 0 : i32
    %c0_i32_1 = arith.constant 0 : i32
    return %arg0, %c0_i32, %c0_i32_0 : i32, i32, i32
  }
  func.func @transform_2(%arg0: i32) -> (i32, i32, i32) {
    %c0_i32 = arith.constant 0 : i32
    %c0_i32_0 = arith.constant 0 : i32
    %c0_i32_1 = arith.constant 0 : i32
    return %arg0, %c0_i32, %c0_i32_0 : i32, i32, i32
  }
}

</mosaic_0001>

<bundles_post_ra>
// kernel: net_forward.3
= control target key start
LH: loop header
LB: loop body
LE: loop exit
PB: predicated region body
PF: predicated region fallthrough
CT: control target
= control target key end

     0   :  { %s1348_s12 = smov 0   ;;  %s1687_s0 = inlined_call_operand.vmem [shape: bf16[2,104,3], index: 0, kind: input, shape index: {}]   ;;  %s1688_s1 = inlined_call_operand.vmem [shape: bf16[9,3,8], index: 1, kind: input, shape index: {}]   ;;  %s1689_s2 = inlined_call_operand.vmem [shape: f32[1,8], index: 2, kind: input, shape index: {}]   ;;  %s1690_s3 = inlined_call_operand.vmem [shape: bf16[2,80,8], index: 3, kind: output, shape index: {}]  }
   0x1 LB: > { %s1175_s13 = sadd.s32 4294967295, %s1325_s12   ;;  %p1179_p0 = scmp.ge.s32.totalorder %s1325_s12, 1  ;;  %s1325_s12 = sphi %s1348_s12, %s13_s12  }
   0x2   : > { %p137_p1 = scmp.lt.s32.totalorder %s1325_s12, 3 }
   0x4   : > { %p138_p2 = pnand %p1179_p0, %p137_p1 }
   0x5   : > { %p161_p3 = scmp.lt.s32.totalorder (!%p138_p2), %s1175_s13, 1 }
   0x6   : > { %141 = sbr.rel (%p138_p2) target bundleno = 352 (0x160), region = 32 }
   0xb   : > { %v1182_v0 = vld [vmem:[%s1688_s1 + $0x2] sm:$0x3]  ;;  %vm275_vm0 = vcmask 1040384   ;;  %vm276_vm1 = vcmask 1041408   ;;  %v1327_v1 = vmov 65535   ;;  %s1692_s13 = smov (!%p161_p3, %s1175_s13), 1 }
   0xc   : > { %v277_v2 = vsel %vm275_vm0, 4294967295, %v1327_v1  ;;  %v1209_v3 = vld [vmem:[%s1688_s1 + $0x4] sm:$0x3]  ;;  %v182_v5 = vld [vmem:[%s1688_s1] sm:$0x3]  ;;  %s1307_s24 = smul.u32 52, %s1692_s13 }
   0xd   : > { %v1362_v4 = vsel %vm276_vm1, %v277_v2, 0  ;;  %v1215_v6 = vld [vmem:[%s1688_s1 + $0x6] sm:$0x3]  ;;  %v1237_v10 = vld [vmem:[%s1688_s1 + $0x8] sm:$0x3]  ;;  %vm259_vm3 = vcmask 23552  }
   0xe   : > { %v280_v7 = vand.u32 %v1182_v0, %v1362_v4  ;;  %v397_v8 = vand.u32 %v1209_v3, %v1362_v4  ;;  %v327_v9 = vand.u32 %v1362_v4, %v182_v5  ;;  %v511_v11 = vand.u32 %v1215_v6, %v1362_v4  ;;  %s1384_s27 = scalar_lea.vmem %s1687_s0, %s1307_s24  ;;  %v1249_v47 = vld [vmem:[%s1688_s1 + $0xc] sm:$0x3]  ;;  %v1271_v50 = vld [vmem:[%s1688_s1 + $0xe] sm:$0x3]  ;;  %v1243_v51 = vld [vmem:[%s1688_s1 + $0xa] sm:$0x3] }
   0xf   : > { %v633_v12 = vand.u32 %v1237_v10, %v1362_v4  ;;  %v1387_v13 = vld [vmem:[%s1384_s27 + $0x8] sm:$0xff]  ;;  %v1390_v14 = vld [vmem:[%s1384_s27 + $0x10] sm:$0xff]  ;;  %v1393_v15 = vld [vmem:[%s1384_s27 + $0x18] sm:$0xff]  ;;  %vm214_vm2 = vsmask.f32 7424  ;;  %v827_v49 = vand.u32 %v1249_v47, %v1362_v4  ;;  %v949_v60 = vand.u32 %v1271_v50, %v1362_v4  ;;  %s1308_s11 = smul.u32 40, %s1692_s13 }
  0x10   : > { %1304 = vmatpush.bf16.msra.mxu1 %v280_v7  ;;  %1305 = vmatpush.bf16.msra.mxu2 %v280_v7  ;;  %v1396_v16 = vld [vmem:[%s1384_s27 + $0x20] sm:$0xff]  ;;  %v183_v17 = vld [vmem:[%s1384_s27 + $0x28] sm:$0x1]  ;;  %v223_v18 = vshll.u32 %v1387_v13, 16  ;;  %v227_v19 = vshrl.u32 %v1387_v13, 16  ;;  %v231_v20 = vshll.u32 %v1390_v14, 16  ;;  %v713_v61 = vand.u32 %v1243_v51, %v1362_v4 }
  0x11   : > { %1306 = vmatpush.bf16.msra.mxu3 %v280_v7  ;;  %289 = vmatpush.bf16.msra.mxu0 %v280_v7  ;;  %v235_v21 = vshrl.u32 %v1390_v14, 16  ;;  %v1404_v22 = vld [vmem:[%s1384_s27] sm:$0xff]   ;;  %v239_v23 = vshll.u32 %v1393_v15, 16  ;;  %v207_v24 = vunpack.c.l.b16 %v183_v17  ;;  %v247_v25 = vshll.u32 %v1396_v16, 16  ;;  %v1411_v28 = vld [vmem:[%s1384_s27 + $0x8] sm:$0xff]   ;;  %s1645_s16 = scalar_lea.vmem %s1690_s3, %s1308_s11 }
  0x12   : > { %v251_v26 = vshrl.u32 %v1396_v16, 16  ;;  %v443_v27 = vld [vmem:[%s1384_s27 + $0x4] sm:$0xe]  ;;  %v225_v29 = vrot.slane %v223_v18, 1  ;;  %v233_v30 = vrot.slane %v231_v20, 1  ;;  %v216_v31 = vshrl.u32 %v1404_v22, 16 }
  0x13   : > { %v241_v32 = vrot.slane %v239_v23, 1  ;;  %v1414_v33 = vpack.c.b16 %v207_v24, %v207_v24  ;;  %v249_v34 = vrot.slane %v247_v25, 1  ;;  %v218_v35 = vshll.u32 %v1404_v22, 16  ;;  %v1438_v54 = vld [vmem:[%s1384_s27 + $0xc] sm:$0xff]  ;;  %v1302_v17 = vld [vmem:[%s1384_s27] sm:$0xe] }
  0x14   : > { %406 = vmatpush.bf16.msrb.mxu2 %v397_v8  ;;  %336 = vmatpush.bf16.msrb.mxu1 %v327_v9  ;;  %v229_v36 = vor.u32 %v227_v19, %v225_v29  ;;  %v237_v37 = vor.u32 %v235_v21, %v233_v30  ;;  %v467_v38 = vunpack.c.l.b16 %v443_v27  ;;  %v468_v39 = vunpack.c.l.b16 %v1411_v28  ;;  %v1277_v57 = vld [vmem:[%s1688_s1 + $0x10] sm:$0x3]  ;;  %v1461_v18 = vld [vmem:[%s1384_s27 + $0x14] sm:$0xff]  ;;  %v679_v51 = vld [vmem:[%s1384_s27 + $0x4] sm:$0xc] }
  0x15   : > { %520 = vmatpush.bf16.msrb.mxu3 %v511_v11  ;;  %642 = vmatpush.bf16.msrb.mxu0 %v633_v12  ;;  %v253_v40 = vor.u32 %v251_v26, %v249_v34  ;;  %v255_v41 = vshll.u32 %v1414_v33, 16  ;;  %v220_v42 = vrot.slane %v218_v35, 1  ;;  %v573_v58 = vshrl.u32 %v1438_v54, 16  ;;  %v1301_v12 = vld [vmem:[%s1384_s27] sm:$0xf0] }
  0x16   : > { %v234_v43 = vsel %vm214_vm2, %v229_v36, %v233_v30  ;;  %v242_v44 = vsel %vm214_vm2, %v237_v37, %v241_v32  ;;  %v478_v48 = vpack.c.b16 %v468_v39, %v467_v38  ;;  %v576_v59 = vshll.u32 %v1438_v54, 16 }
  0x17   : > { %1200 = vmatmul.msk.bf16.vlgmr.msra.gmra.mxu1 %vm259_vm3, %v234_v43  ;;  %1201 = vmatmul.msk.bf16.vlgmr.msra.gmra.mxu2 %vm259_vm3, %v242_v44  ;;  %v257_v45 = vrot.slane %v255_v41, 1  ;;  %v221_v46 = vor.u32 %v220_v42, %v216_v31  ;;  %v243_v62 = vshrl.u32 %v1393_v15, 16  ;;  %v1029_v63 = vand.u32 %v1277_v57, %v1362_v4  ;;  %v1491_v44 = vld [vmem:[%s1384_s27 + $0x24] sm:$0xff] }
  0x18   : > { %v565_v55 = vshrl.u32 %v478_v48, 16  ;;  %v568_v56 = vshll.u32 %v478_v48, 16  ;;  %836 = vmatpush.bf16.msra.mxu2 %v827_v49  ;;  %722 = vmatpush.bf16.msra.mxu1 %v713_v61  ;;  %v575_v2 = vrot.slane %v573_v58, 1  ;;  %v578_v3 = vrot.slane %v576_v59, 2 }
  0x19   : > { %v258_v52 = vsel %vm214_vm2, %v253_v40, %v257_v45  ;;  %v226_v53 = vsel %vm214_vm2, %v221_v46, %v225_v29  ;;  %v245_v5 = vor.u32 %v243_v62, %v241_v32  ;;  %v484_v6 = vrot.slane %v478_v48, 1  ;;  %v1476_v32 = vld [vmem:[%s1384_s27 + $0x1c] sm:$0xff] }
  0x1a   : > { %1203 = vmatmul.msk.bf16.vlgmr.msra.gmra.mxu3 %vm259_vm3, %v258_v52  ;;  %1199 = vmatmul.msk.bf16.vlgmr.msra.gmra.mxu0 %vm259_vm3, %v226_v53  ;;  %v567_v0 = vrot.slane %v565_v55, 1  ;;  %v570_v1 = vrot.slane %v568_v56, 2  ;;  %v485_v7 = vrot.slane %v1438_v54, 1  ;;  %v579_v9 = vor.u32 %v578_v3, %v575_v2  ;;  %v557_v55 = vld [vmem:[%s1384_s27 + $0x2c] sm:$0x3] }
  0x1b   : > { %958 = vmatpush.bf16.msra.mxu3 %v949_v60  ;;  %1038 = vmatpush.bf16.msra.mxu0 %v1029_v63  ;;  %v250_v10 = vsel %vm214_vm2, %v245_v5, %v249_v34  ;;  %vm369_vm4 = vcmask 1046528   ;;  %vm563_vm5 = vsmask.f32 6400  ;;  %v582_v19 = vshrl.u32 %v1461_v18, 16 }
  0x1c   : > { %v571_v8 = vor.u32 %v570_v1, %v567_v0  ;;  %v486_v4 = vsel %vm369_vm4, %v484_v6, %v485_v7  ;;  %v585_v20 = vshll.u32 %v1461_v18, 16  ;;  %v1303_v21 = vor.u32 %v1302_v17, %v1301_v12  ;;  %v453_v1 = vld [vmem:[%s1384_s27 + $0x2c] sm:$0x1] }
  0x1d   : > { %v584_v23 = vrot.slane %v582_v19, 1  ;;  %v371_v25 = vrot.slane %v1387_v13, 1  ;;  %v487_v26 = vrot.slane %v1461_v18, 1  ;;  %v591_v34 = vshrl.u32 %v1476_v32, 16  ;;  %v1293_v19 = vld [vmem:[%s1384_s27 + $0x10] sm:$0xff] }
  0x1e   : > { %v580_v11 = vsel %vm563_vm5, %v571_v8, %v579_v9  ;;  %v370_v24 = vrot.slane %v1303_v21, 1  ;;  %v594_v35 = vshll.u32 %v1476_v32, 16  ;;  %v489_v38 = vrot.slane %v1476_v32, 1 }
  0x1f   : > { %v488_v30 = vsel %vm369_vm4, %v485_v7, %v487_v26  ;;  %v593_v36 = vrot.slane %v591_v34, 1  ;;  %v377_v45 = vrot.slane %v1396_v16, 1  ;;  %v379_v46 = vrot.slane %v1414_v33, 1 }
  0x20   : > { %v372_v29 = vsel %vm369_vm4, %v370_v24, %v371_v25  ;;  %v596_v37 = vrot.slane %v594_v35, 2  ;;  %v490_v42 = vsel %vm369_vm4, %v487_v26, %v489_v38  ;;  %v600_v47 = vshrl.u32 %v1491_v44, 16 }
  0x21   : > { %v1500_v48 = vsel %vm369_vm4, %v377_v45, %v379_v46  ;;  %v375_v52 = vrot.slane %v1393_v15, 1  ;;  %v683_v53 = vunpack.c.l.b16 %v679_v51  ;;  %v491_v33 = vrot.slane %v1491_v44, 1 }
  0x22   : > { %v597_v40 = vor.u32 %v596_v37, %v593_v36  ;;  %v602_v49 = vrot.slane %v600_v47, 1  ;;  %v561_v58 = vunpack.c.l.b16 %v557_v55  ;;  %v687_v61 = vrot.slane %v1438_v54, 2 }
  0x23   : > { %v684_v56 = vpack.c.b16 %v468_v39, %v683_v53  ;;  %vm685_vm6 = vcmask 1045504   ;;  %v492_v39 = vsel %vm369_vm4, %v489_v38, %v491_v33  ;;  %v689_v54 = vrot.slane %v1461_v18, 2  ;;  %v1553_v53 = vld [vmem:[%s1384_s27 + $0x20] sm:$0xff] }
  0x24   : > { %v1516_v0 = vpack.c.b16 %v561_v58, %v561_v58  ;;  %v477_v2 = vunpack.c.l.b16 %v453_v1  ;;  %v784_v12 = vunpack.c.h.b16 %v1411_v28  ;;  %v378_v17 = vsel %vm369_vm4, %v375_v52, %v377_v45 }
  0x25   : > { %v686_v60 = vrot.slane %v684_v56, 2  ;;  %v690_v5 = vsel %vm685_vm6, %v687_v61, %v689_v54  ;;  %v889_v24 = vshrl.u32 %v1293_v19, 16  ;;  %v892_v26 = vshll.u32 %v1293_v19, 16 }
  0x26   : > { %v612_v3 = vshll.u32 %v1516_v0, 16  ;;  %v483_v6 = vpack.c.b16 %v477_v2, %v477_v2  ;;  %vm879_vm7 = vsmask.f32 5376  ;;  %vm1001_vm8 = vcmask 1044480  }
  0x27   : > { %1202 = vmatmul.msk.bf16.gmra.mxu2 %vm259_vm3, %v250_v10  ;;  %1204 = vmatmul.msk.bf16.vlgmr.msrb.gmra.mxu1 %vm259_vm3, %v1404_v22  ;;  %v587_v22 = vrot.slane %v585_v20, 2  ;;  %v688_v62 = vsel %vm685_vm6, %v686_v60, %v687_v61  ;;  %v907_v55 = vshrl.u32 %v1553_v53, 16  ;;  %v910_v56 = vshll.u32 %v1553_v53, 16 }
  0x28   : > { %v614_v8 = vrot.slane %v612_v3, 2  ;;  %v493_v10 = vrot.slane %v483_v6, 1  ;;  %v691_v58 = vrot.slane %v1476_v32, 2  ;;  %v1007_v61 = vrot.slane %v1553_v53, 3 }
  0x29   : > { %v588_v27 = vor.u32 %v587_v22, %v584_v23  ;;  %v995_v22 = vld [vmem:[%s1384_s27 + $0x8] sm:$0x8]  ;;  %vm1109_vm9 = vcmask 60416  }
  0x2a   : > { %1232 = vmatmul.msk.bf16.vlgmr.msrb.gmra.mxu3 %vm259_vm3, %v486_v4  ;;  %1238 = vmatmul.msk.bf16.vlgmr.msrb.gmra.mxu0 %vm259_vm3, %v580_v11  ;;  %v494_v20 = vsel %vm369_vm4, %v491_v33, %v493_v10  ;;  %v909_v33 = vrot.slane %v907_v55, 2  ;;  %v693_v10 = vrot.slane %v1491_v44, 2 }
  0x2b   : > { %v589_v31 = vsel %vm563_vm5, %v579_v9, %v588_v27  ;;  %v598_v43 = vsel %vm563_vm5, %v588_v27, %v597_v40  ;;  %v759_v9 = vld [vmem:[%s1384_s27 + $0x8] sm:$0xc]  ;;  %v999_v27 = vunpack.c.l.b16 %v995_v22 }
  0x2c   : > { %v783_v11 = vunpack.c.l.b16 %v759_v9 }
  0x2d   : > { %v1000_v34 = vpack.c.b16 %v784_v12, %v999_v27 }
  0x2e   : > { %v794_v23 = vpack.c.b16 %v784_v12, %v783_v11  ;;  %v873_v11 = vld [vmem:[%s1384_s27 + $0x30] sm:$0x7] }
  0x2f   : > { %v1002_v37 = vrot.slane %v1000_v34, 3 }
  0x30   : > { %v881_v28 = vshrl.u32 %v794_v23, 16  ;;  %v800_v47 = vrot.slane %v794_v23, 2 }
  0x37   : > { %1205 = vmatmul.msk.bf16.gmra.mxu1 %vm259_vm3, %v1387_v13  ;;  %1210 = vmatmul.msk.bf16.vlgmr.msrb.gmra.mxu2 %vm259_vm3, %v372_v29  ;;  %v373_v13 = vrot.slane %v1390_v14, 1  ;;  %v891_v29 = vrot.slane %v889_v24, 2 }
  0x39   : > { %v374_v41 = vsel %vm369_vm4, %v371_v25, %v373_v13  ;;  %v376_v59 = vsel %vm369_vm4, %v373_v13, %v375_v52  ;;  %v884_v25 = vshll.u32 %v794_v23, 16  ;;  %v1003_v13 = vrot.slane %v1293_v19, 3 }
  0x3a   : > { %1233 = vmatmul.msk.bf16.gmra.mxu3 %vm259_vm3, %v488_v30  ;;  %1239 = vmatmul.msk.bf16.gmra.mxu0 %vm259_vm3, %v589_v31  ;;  %v894_v31 = vrot.slane %v892_v26, 3  ;;  %v694_v23 = vsel %vm685_vm6, %v691_v58, %v693_v10 }
  0x3b   : > { %v886_v30 = vrot.slane %v884_v25, 3 }
  0x3c   : > { %v895_v36 = vor.u32 %v894_v31, %v891_v29 }
  0x47   : > { %1206 = vmatmul.msk.bf16.gmra.mxu1 %vm259_vm3, %v1390_v14  ;;  %1211 = vmatmul.msk.bf16.gmra.mxu2 %vm259_vm3, %v374_v41  ;;  %v603_v14 = vshll.u32 %v1491_v44, 16  ;;  %v1294_v41 = vld [vmem:[%s1384_s27 + $0x18] sm:$0xff] }
  0x49   : > { %v605_v50 = vrot.slane %v603_v14, 2  ;;  %v801_v14 = vrot.slane %v1293_v19, 2 }
  0x4a   : > { %1234 = vmatmul.msk.bf16.gmra.mxu3 %vm259_vm3, %v490_v42  ;;  %1240 = vmatmul.msk.bf16.gmra.mxu0 %vm259_vm3, %v598_v43  ;;  %v898_v42 = vshrl.u32 %v1294_v41, 16  ;;  %v901_v43 = vshll.u32 %v1294_v41, 16 }
  0x4b   : > { %v606_v57 = vor.u32 %v605_v50, %v602_v49  ;;  %v802_v50 = vsel %vm685_vm6, %v800_v47, %v801_v14 }
  0x4c   : > { %v900_v45 = vrot.slane %v898_v42, 2  ;;  %v903_v46 = vrot.slane %v901_v43, 3 }
  0x4d   : > { %v607_v63 = vsel %vm563_vm5, %v597_v40, %v606_v57  ;;  %v1004_v40 = vsel %vm1001_vm8, %v1002_v37, %v1003_v13 }
  0x4e   : > { %v904_v49 = vor.u32 %v903_v46, %v900_v45 }
  0x50   : > { %v905_v51 = vsel %vm879_vm7, %v895_v36, %v904_v49 }
  0x57   : > { %1207 = vmatmul.msk.bf16.gmra.mxu1 %vm259_vm3, %v1393_v15  ;;  %1212 = vmatmul.msk.bf16.gmra.mxu2 %vm259_vm3, %v376_v59  ;;  %v609_v15 = vshrl.u32 %v1516_v0, 16  ;;  %v803_v59 = vrot.slane %v1294_v41, 2 }
  0x59   : > { %v611_v7 = vrot.slane %v609_v15, 1  ;;  %v1570_v15 = vld [vmem:[%s1384_s27 + $0x28] sm:$0xff] }
  0x5a   : > { %1235 = vmatmul.msk.bf16.gmra.mxu3 %vm259_vm3, %v492_v39  ;;  %1241 = vmatmul.msk.bf16.gmra.mxu0 %vm259_vm3, %v607_v63  ;;  %v692_v39 = vsel %vm685_vm6, %v689_v54, %v691_v58  ;;  %v804_v63 = vsel %vm685_vm6, %v801_v14, %v803_v59  ;;  %v916_v18 = vshrl.u32 %v1570_v15, 16  ;;  %v919_v54 = vshll.u32 %v1570_v15, 16 }
  0x5b   : > { %v615_v4 = vor.u32 %v614_v8, %v611_v7  ;;  %v1009_v19 = vrot.slane %v1570_v15, 3 }
  0x5c   : > { %v918_v8 = vrot.slane %v916_v18, 2  ;;  %v921_v9 = vrot.slane %v919_v54, 3 }
  0x5d   : > { %v616_v21 = vsel %vm563_vm5, %v606_v57, %v615_v4  ;;  %v912_v57 = vrot.slane %v910_v56, 3  ;;  %v805_v4 = vrot.slane %v1553_v53, 2  ;;  %v1010_v26 = vsel %vm1001_vm8, %v1007_v61, %v1009_v19 }
  0x5f   : > { %v913_v60 = vor.u32 %v912_v57, %v909_v33  ;;  %v806_v22 = vsel %vm685_vm6, %v803_v59, %v805_v4 }
  0x61   : > { %v914_v1 = vsel %vm879_vm7, %v904_v49, %v913_v60 }
  0x67   : > { %1208 = vmatmul.msk.bf16.gmra.mxu1 %vm259_vm3, %v1396_v16  ;;  %1213 = vmatmul.msk.bf16.gmra.mxu2 %vm259_vm3, %v378_v17  ;;  %v883_v16 = vrot.slane %v881_v28, 2  ;;  %v922_v17 = vor.u32 %v921_v9, %v918_v8 }
  0x69   : > { %v887_v35 = vor.u32 %v886_v30, %v883_v16  ;;  %v923_v44 = vsel %vm879_vm7, %v913_v60, %v922_v17 }
  0x6a   : > { %1236 = vmatmul.msk.bf16.gmra.mxu3 %vm259_vm3, %v494_v20  ;;  %1242 = vmatmul.msk.bf16.gmra.mxu0 %vm259_vm3, %v616_v21  ;;  %v877_v20 = vunpack.c.l.b16 %v873_v11 }
  0x6b   : > { %v896_v38 = vsel %vm879_vm7, %v887_v35, %v895_v36 }
  0x6c   : > { %v878_v27 = vpack.c.b16 %v877_v20, %v877_v20 }
  0x6e   : > { %v925_v16 = vshrl.u32 %v878_v27, 16  ;;  %v928_v30 = vshll.u32 %v878_v27, 16  ;;  %v1011_v43 = vrot.slane %v878_v27, 3 }
  0x70   : > { %v927_v37 = vrot.slane %v925_v16, 2 }
  0x77   : > { %1214 = vmatmul.msk.bf16.gmra.mxu2 %vm259_vm3, %v1500_v48  ;;  %1244 = vmatmul.msk.bf16.vlgmr.msra.gmra.mxu1 %vm259_vm3, %v688_v62  ;;  %v1005_v48 = vrot.slane %v1294_v41, 3 }
  0x79   : > { %v1006_v52 = vsel %vm1001_vm8, %v1003_v13, %v1005_v48  ;;  %v1008_v32 = vsel %vm1001_vm8, %v1005_v48, %v1007_v61  ;;  %v930_v13 = vrot.slane %v928_v30, 3  ;;  %v769_v48 = vld [vmem:[%s1384_s27 + $0x30] sm:$0x3] }
  0x7a   : > { %1272 = vmatmul.msk.bf16.vlgmr.msra.gmra.mxu3 %vm259_vm3, %v896_v38  ;;  %1278 = vmatmul.msk.bf16.vlgmr.msra.gmra.mxu0 %vm259_vm3, %v1004_v40  ;;  %v695_v38 = vrot.slane %v1516_v0, 2  ;;  %v807_v40 = vrot.slane %v1570_v15, 2 }
  0x7b   : > { %v931_v42 = vor.u32 %v930_v13, %v927_v37 }
  0x7c   : > { %v696_v46 = vsel %vm685_vm6, %v693_v10, %v695_v38  ;;  %v808_v47 = vsel %vm685_vm6, %v805_v4, %v807_v40 }
  0x87   : > { %1245 = vmatmul.msk.bf16.gmra.mxu1 %vm259_vm3, %v690_v5  ;;  %1266 = vmatmul.msk.bf16.vlgmr.msra.gmra.mxu2 %vm259_vm3, %v802_v50  ;;  %v932_v50 = vsel %vm879_vm7, %v922_v17, %v931_v42 }
  0x8a   : > { %1273 = vmatmul.msk.bf16.gmra.mxu3 %vm259_vm3, %v905_v51  ;;  %1279 = vmatmul.msk.bf16.gmra.mxu0 %vm259_vm3, %v1006_v52  ;;  %v1012_v51 = vsel %vm1001_vm8, %v1009_v19, %v1011_v43  ;;  %v793_v52 = vunpack.c.l.b16 %v769_v48 }
  0x8c   : > { %v799_v33 = vpack.c.b16 %v793_v52, %v793_v52 }
  0x94   : > { %v296_v62 = vpop.f32.mrf.mxu1 }
  0x97   : > { %1246 = vmatmul.msk.bf16.gmra.mxu1 %vm259_vm3, %v692_v39  ;;  %1267 = vmatmul.msk.bf16.gmra.mxu2 %vm259_vm3, %v804_v63  ;;  %v291_v2 = vpop.f32.mrf.mxu0 }
  0x9a   : > { %v1572_v3 = vpop.f32.mrf.mxu2  ;;  %1274 = vmatmul.msk.bf16.gmra.mxu3 %vm259_vm3, %v914_v1  ;;  %1280 = vmatmul.msk.bf16.gmra.mxu0 %vm259_vm3, %v1008_v32 }
  0x9c   : > { %v298_v5 = vpop.f32.mrf.mxu1 }
  0x9d   : > { %v1578_v6 = vpop.f32.mrf.mxu3 }
  0x9f   : > { %v293_v7 = vpop.f32.mrf.mxu0 }
  0xa2   : > { %v1583_v12 = vpop.f32.mrf.mxu2 }
  0xa4   : > { %v338_v21 = vpop.f32.mrf.mxu1 }
  0xa5   : > { %v339_v24 = vadd.f32 %v338_v21, %v291_v2  ;;  %v1588_v28 = vpop.f32.mrf.mxu3 }
  0xa7   : > { %1247 = vmatmul.msk.bf16.gmra.mxu1 %vm259_vm3, %v694_v23  ;;  %1268 = vmatmul.msk.bf16.gmra.mxu2 %vm259_vm3, %v806_v22  ;;  %v644_v25 = vpop.f32.mrf.mxu0 }
  0xaa   : > { %v306_v29 = vpop.f32.mrf.mxu2  ;;  %1275 = vmatmul.msk.bf16.gmra.mxu3 %vm259_vm3, %v923_v44  ;;  %1281 = vmatmul.msk.bf16.gmra.mxu0 %vm259_vm3, %v1010_v26 }
  0xac   : > { %v340_v31 = vpop.f32.mrf.mxu1 }
  0xad   : > { %v341_v34 = vadd.f32 %v340_v31, %v293_v7  ;;  %v522_v35 = vpop.f32.mrf.mxu3 }
  0xaf   : > { %v646_v36 = vpop.f32.mrf.mxu0 }
  0xb2   : > { %v308_v41 = vpop.f32.mrf.mxu2 }
  0xb4   : > { %v343_v45 = vpop.f32.mrf.mxu1 }
  0xb5   : > { %v344_v14 = vadd.f32 %v343_v45, %v296_v62  ;;  %v524_v49 = vpop.f32.mrf.mxu3  ;;  %v809_v62 = vrot.slane %v799_v33, 2 }
  0xb7   : > { %1248 = vmatmul.msk.bf16.gmra.mxu1 %vm259_vm3, %v696_v46  ;;  %1269 = vmatmul.msk.bf16.gmra.mxu2 %vm259_vm3, %v808_v47  ;;  %v649_v0 = vpop.f32.mrf.mxu0  ;;  %v810_v2 = vsel %vm685_vm6, %v807_v40, %v809_v62 }
  0xba   : > { %v408_v53 = vpop.f32.mrf.mxu2  ;;  %1276 = vmatmul.msk.bf16.gmra.mxu3 %vm259_vm3, %v932_v50  ;;  %1282 = vmatmul.msk.bf16.gmra.mxu0 %vm259_vm3, %v1012_v51 }
  0xbb   : > { %v433_v55 = vadd.f32 %v408_v53, %v339_v24 }
  0xbc   : > { %v345_v56 = vpop.f32.mrf.mxu1 }
  0xbd   : > { %v547_v57 = vadd.f32 %v522_v35, %v433_v55  ;;  %v346_v58 = vadd.f32 %v345_v56, %v298_v5  ;;  %v527_v59 = vpop.f32.mrf.mxu3 }
  0xbf   : > { %v651_v60 = vpop.f32.mrf.mxu0  ;;  %v1607_v61 = vadd.f32 %v644_v25, %v547_v57 }
  0xc2   : > { %v410_v39 = vpop.f32.mrf.mxu2 }
  0xc3   : > { %v434_v63 = vadd.f32 %v410_v39, %v341_v34 }
  0xc4   : > { %v348_v1 = vpop.f32.mrf.mxu1 }
  0xc5   : > { %v548_v32 = vadd.f32 %v524_v49, %v434_v63  ;;  %v349_v15 = vadd.f32 %v348_v1, %v1572_v3  ;;  %v529_v18 = vpop.f32.mrf.mxu3 }
  0xc7   : > { %1270 = vmatmul.msk.bf16.gmra.mxu2 %vm259_vm3, %v810_v2  ;;  %v654_v54 = vpop.f32.mrf.mxu0  ;;  %v1612_v7 = vadd.f32 %v646_v36, %v548_v32 }
  0xca   : > { %v413_v5 = vpop.f32.mrf.mxu2 }
  0xcb   : > { %v435_v8 = vadd.f32 %v413_v5, %v344_v14 }
  0xcc   : > { %v350_v9 = vpop.f32.mrf.mxu1 }
  0xcd   : > { %v549_v10 = vadd.f32 %v527_v59, %v435_v8  ;;  %v351_v4 = vadd.f32 %v350_v9, %v1583_v12  ;;  %v532_v11 = vpop.f32.mrf.mxu3  ;;  %v1637_v9 = vld [vmem:[%s1689_s2] ss:$0 sm:$0xff] }
  0xcf   : > { %v656_v17 = vpop.f32.mrf.mxu0  ;;  %v1615_v19 = vadd.f32 %v649_v0, %v549_v10 }
  0xd2   : > { %v415_v20 = vpop.f32.mrf.mxu2 }
  0xd3   : > { %v436_v21 = vadd.f32 %v415_v20, %v346_v58 }
  0xd4   : > { %v353_v23 = vpop.f32.mrf.mxu1 }
  0xd5   : > { %v550_v3 = vadd.f32 %v529_v18, %v436_v21  ;;  %v354_v22 = vadd.f32 %v353_v23, %v306_v29  ;;  %v534_v24 = vpop.f32.mrf.mxu3 }
  0xd7   : > { %v659_v44 = vpop.f32.mrf.mxu0  ;;  %v1617_v25 = vadd.f32 %v651_v60, %v550_v3 }
  0xda   : > { %v418_v26 = vpop.f32.mrf.mxu2 }
  0xdb   : > { %v437_v27 = vadd.f32 %v418_v26, %v349_v15 }
  0xdc   : > { %v355_v16 = vpop.f32.mrf.mxu1 }
  0xdd   : > { %v551_v30 = vadd.f32 %v532_v11, %v437_v27  ;;  %v356_v31 = vadd.f32 %v355_v16, %v308_v41  ;;  %v537_v34 = vpop.f32.mrf.mxu3 }
  0xdf   : > { %v661_v12 = vpop.f32.mrf.mxu0  ;;  %v1619_v35 = vadd.f32 %v654_v54, %v551_v30 }
  0xe2   : > { %v420_v36 = vpop.f32.mrf.mxu2 }
  0xe3   : > { %v438_v37 = vadd.f32 %v420_v36, %v351_v4 }
  0xe4   : > { %v358_v13 = vpop.f32.mrf.mxu1 }
  0xe5   : > { %v552_v38 = vadd.f32 %v534_v24, %v438_v37  ;;  %v359_v40 = vadd.f32 %v358_v13, %v1578_v6  ;;  %v539_v29 = vpop.f32.mrf.mxu3 }
  0xe7   : > { %v1622_v42 = vadd.f32 %v656_v17, %v552_v38  ;;  %v664_v43 = vpop.f32.mrf.mxu0 }
  0xea   : > { %v423_v45 = vpop.f32.mrf.mxu2 }
  0xeb   : > { %v439_v46 = vadd.f32 %v423_v45, %v354_v22 }
  0xec   : > { %v360_v47 = vpop.f32.mrf.mxu1 }
  0xed   : > { %v553_v14 = vadd.f32 %v537_v34, %v439_v46  ;;  %v361_v41 = vadd.f32 %v360_v47, %v1588_v28  ;;  %v542_v49 = vpop.f32.mrf.mxu3 }
  0xef   : > { %v1625_v48 = vadd.f32 %v659_v44, %v553_v14  ;;  %v666_v0 = vpop.f32.mrf.mxu0 }
  0xf2   : > { %v425_v50 = vpop.f32.mrf.mxu2 }
  0xf3   : > { %v440_v51 = vadd.f32 %v425_v50, %v356_v31 }
  0xf4   : > { %v724_v52 = vpop.f32.mrf.mxu1 }
  0xf5   : > { %v554_v53 = vadd.f32 %v539_v29, %v440_v51  ;;  %v544_v55 = vpop.f32.mrf.mxu3  ;;  %v749_v18 = vadd.f32 %v724_v52, %v1607_v61 }
  0xf7   : > { %v1627_v6 = vadd.f32 %v661_v12, %v554_v53  ;;  %v1040_v57 = vpop.f32.mrf.mxu0 }
  0xfa   : > { %v428_v56 = vpop.f32.mrf.mxu2 }
  0xfb   : > { %v441_v33 = vadd.f32 %v428_v56, %v359_v40 }
  0xfc   : > { %v726_v60 = vpop.f32.mrf.mxu1 }
  0xfd   : > { %v555_v58 = vadd.f32 %v542_v49, %v441_v33  ;;  %v960_v59 = vpop.f32.mrf.mxu3  ;;  %v750_v17 = vadd.f32 %v726_v60, %v1612_v7 }
  0xff   : > { %v1629_v62 = vadd.f32 %v664_v43, %v555_v58  ;;  %v1042_v2 = vpop.f32.mrf.mxu0 }
 0x102   : > { %v430_v28 = vpop.f32.mrf.mxu2 }
 0x103   : > { %v442_v39 = vadd.f32 %v430_v28, %v361_v41 }
 0x104   : > { %v729_v15 = vpop.f32.mrf.mxu1 }
 0x105   : > { %v556_v63 = vadd.f32 %v544_v55, %v442_v39  ;;  %v962_v1 = vpop.f32.mrf.mxu3  ;;  %v751_v26 = vadd.f32 %v729_v15, %v1615_v19 }
 0x107   : > { %v1631_v32 = vadd.f32 %v666_v0, %v556_v63  ;;  %v1045_v11 = vpop.f32.mrf.mxu0 }
 0x10a   : > { %v838_v54 = vpop.f32.mrf.mxu2 }
 0x10b   : > { %v863_v5 = vadd.f32 %v838_v54, %v749_v18 }
 0x10c   : > { %v731_v21 = vpop.f32.mrf.mxu1 }
 0x10d   : > { %v985_v8 = vadd.f32 %v960_v59, %v863_v5  ;;  %v965_v10 = vpop.f32.mrf.mxu3  ;;  %v752_v38 = vadd.f32 %v731_v21, %v1617_v25 }
 0x10f   : > { %v1065_v4 = vadd.f32 %v1040_v57, %v985_v8  ;;  %v1047_v30 = vpop.f32.mrf.mxu0 }
 0x111   : > { %v1079_v20 = vadd.f32 %v1637_v9, %v1065_v4 }
 0x112   : > { %v840_v23 = vpop.f32.mrf.mxu2 }
 0x113   : > { %v1089_v3 = vmax.f32 %v1079_v20, 0.0  ;;  %v864_v61 = vadd.f32 %v840_v23, %v750_v17 }
 0x114   : > { %v734_v12 = vpop.f32.mrf.mxu1 }
 0x115   : > { %v1099_v22 = vpack.c.bf16 %v1089_v3, %v1089_v3  ;;  %v986_v24 = vadd.f32 %v962_v1, %v864_v61  ;;  %v967_v7 = vpop.f32.mrf.mxu3  ;;  %v753_v50 = vadd.f32 %v734_v12, %v1619_v35 }
 0x117   : > { %1110 = vst.msk [vmem:[%s1645_s16] sm:$0xf] %vm1109_vm9, %v1099_v22  ;;  %v1066_v44 = vadd.f32 %v1042_v2, %v986_v24  ;;  %v1050_v46 = vpop.f32.mrf.mxu0 }
 0x119   : > { %v1080_v27 = vadd.f32 %v1637_v9, %v1066_v44 }
 0x11a   : > { %v843_v16 = vpop.f32.mrf.mxu2 }
 0x11b   : > { %v1090_v31 = vmax.f32 %v1080_v27, 0.0  ;;  %v865_v34 = vadd.f32 %v843_v16, %v751_v26 }
 0x11c   : > { %v736_v41 = vpop.f32.mrf.mxu1 }
 0x11d   : > { %v1100_v36 = vpack.c.bf16 %v1090_v31, %v1090_v31  ;;  %v987_v37 = vadd.f32 %v965_v10, %v865_v34  ;;  %v970_v43 = vpop.f32.mrf.mxu3  ;;  %v754_v59 = vadd.f32 %v736_v41, %v1622_v42 }
 0x11f   : > { %1111 = vst.msk [vmem:[%s1645_s16 + $0x4] sm:$0xf] %vm1109_vm9, %v1100_v36  ;;  %v1067_v13 = vadd.f32 %v1045_v11, %v987_v37  ;;  %v1052_v33 = vpop.f32.mrf.mxu0 }
 0x121   : > { %v1081_v40 = vadd.f32 %v1637_v9, %v1067_v13 }
 0x122   : > { %v845_v29 = vpop.f32.mrf.mxu2 }
 0x123   : > { %v1091_v19 = vmax.f32 %v1081_v40, 0.0  ;;  %v866_v45 = vadd.f32 %v845_v29, %v752_v38 }
 0x124   : > { %v739_v58 = vpop.f32.mrf.mxu1 }
 0x125   : > { %v1101_v47 = vpack.c.bf16 %v1091_v19, %v1091_v19  ;;  %v988_v14 = vadd.f32 %v967_v7, %v866_v45  ;;  %v972_v53 = vpop.f32.mrf.mxu3  ;;  %v755_v54 = vadd.f32 %v739_v58, %v1625_v48 }
 0x127   : > { %1112 = vst.msk [vmem:[%s1645_s16 + $0x8] sm:$0xf] %vm1109_vm9, %v1101_v47  ;;  %v1068_v49 = vadd.f32 %v1047_v30, %v988_v14  ;;  %v1055_v18 = vpop.f32.mrf.mxu0 }
 0x129   : > { %v1082_v0 = vadd.f32 %v1637_v9, %v1068_v49 }
 0x12a   : > { %v848_v51 = vpop.f32.mrf.mxu2 }
 0x12b   : > { %v1092_v25 = vmax.f32 %v1082_v0, 0.0  ;;  %v867_v52 = vadd.f32 %v848_v51, %v753_v50 }
 0x12c   : > { %v741_v8 = vpop.f32.mrf.mxu1 }
 0x12d   : > { %v1102_v55 = vpack.c.bf16 %v1092_v25, %v1092_v25  ;;  %v989_v56 = vadd.f32 %v970_v43, %v867_v52  ;;  %v975_v2 = vpop.f32.mrf.mxu3  ;;  %v756_v23 = vadd.f32 %v741_v8, %v1627_v6 }
 0x12f   : > { %1113 = vst.msk [vmem:[%s1645_s16 + $0xc] sm:$0xf] %vm1109_vm9, %v1102_v55  ;;  %v1069_v57 = vadd.f32 %v1050_v46, %v989_v56  ;;  %v1057_v61 = vpop.f32.mrf.mxu0 }
 0x131   : > { %v1083_v60 = vadd.f32 %v1637_v9, %v1069_v57 }
 0x132   : > { %v850_v28 = vpop.f32.mrf.mxu2 }
 0x133   : > { %v1093_v35 = vmax.f32 %v1083_v60, 0.0  ;;  %v868_v39 = vadd.f32 %v850_v28, %v754_v59 }
 0x134   : > { %v744_v44 = vpop.f32.mrf.mxu1 }
 0x135   : > { %v1103_v63 = vpack.c.bf16 %v1093_v35, %v1093_v35  ;;  %v990_v1 = vadd.f32 %v972_v53, %v868_v39  ;;  %v977_v21 = vpop.f32.mrf.mxu3  ;;  %v757_v16 = vadd.f32 %v744_v44, %v1629_v62 }
 0x137   : > { %1114 = vst.msk [vmem:[%s1645_s16 + $0x10] sm:$0xf] %vm1109_vm9, %v1103_v63  ;;  %v1070_v15 = vadd.f32 %v1052_v33, %v990_v1  ;;  %v1060_v36 = vpop.f32.mrf.mxu0 }
 0x139   : > { %v1084_v5 = vadd.f32 %v1637_v9, %v1070_v15 }
 0x13a   : > { %v853_v10 = vpop.f32.mrf.mxu2 }
 0x13b   : > { %v1094_v42 = vmax.f32 %v1084_v5, 0.0  ;;  %v869_v4 = vadd.f32 %v853_v10, %v755_v54 }
 0x13c   : > { %v746_v38 = vpop.f32.mrf.mxu1 }
 0x13d   : > { %v1104_v11 = vpack.c.bf16 %v1094_v42, %v1094_v42  ;;  %v991_v17 = vadd.f32 %v975_v2, %v869_v4  ;;  %v980_v31 = vpop.f32.mrf.mxu3  ;;  %v758_v29 = vadd.f32 %v746_v38, %v1631_v32 }
 0x13f   : > { %1115 = vst.msk [vmem:[%s1645_s16 + $0x14] sm:$0xf] %vm1109_vm9, %v1104_v11  ;;  %v1071_v20 = vadd.f32 %v1055_v18, %v991_v17  ;;  %v1062_v41 = vpop.f32.mrf.mxu0 }
 0x141   : > { %v1085_v3 = vadd.f32 %v1637_v9, %v1071_v20 }
 0x142   : > { %v855_v22 = vpop.f32.mrf.mxu2 }
 0x143   : > { %v1095_v48 = vmax.f32 %v1085_v3, 0.0  ;;  %v870_v24 = vadd.f32 %v855_v22, %v756_v23 }
 0x145   : > { %v1105_v7 = vpack.c.bf16 %v1095_v48, %v1095_v48  ;;  %v992_v26 = vadd.f32 %v977_v21, %v870_v24  ;;  %v982_v46 = vpop.f32.mrf.mxu3 }
 0x147   : > { %1116 = vst.msk [vmem:[%s1645_s16 + $0x18] sm:$0xf] %vm1109_vm9, %v1105_v7  ;;  %v1072_v27 = vadd.f32 %v1057_v61, %v992_v26 }
 0x149   : > { %v1086_v30 = vadd.f32 %v1637_v9, %v1072_v27 }
 0x14a   : > { %v858_v34 = vpop.f32.mrf.mxu2 }
 0x14b   : > { %v1096_v6 = vmax.f32 %v1086_v30, 0.0  ;;  %v871_v12 = vadd.f32 %v858_v34, %v757_v16 }
 0x14d   : > { %v1106_v37 = vpack.c.bf16 %v1096_v6, %v1096_v6  ;;  %v993_v13 = vadd.f32 %v980_v31, %v871_v12 }
 0x14f   : > { %1117 = vst.msk [vmem:[%s1645_s16 + $0x1c] sm:$0xf] %vm1109_vm9, %v1106_v37  ;;  %v1073_v40 = vadd.f32 %v1060_v36, %v993_v13 }
 0x151   : > { %v1087_v43 = vadd.f32 %v1637_v9, %v1073_v40 }
 0x152   : > { %v860_v62 = vpop.f32.mrf.mxu2 }
 0x153   : > { %v1097_v19 = vmax.f32 %v1087_v43, 0.0  ;;  %v872_v45 = vadd.f32 %v860_v62, %v758_v29 }
 0x155   : > { %v1107_v47 = vpack.c.bf16 %v1097_v19, %v1097_v19  ;;  %v994_v14 = vadd.f32 %v982_v46, %v872_v45 }
 0x157   : > { %1118 = vst.msk [vmem:[%s1645_s16 + $0x20] sm:$0xf] %vm1109_vm9, %v1107_v47  ;;  %v1074_v49 = vadd.f32 %v1062_v41, %v994_v14 }
 0x159   : > { %v1088_v50 = vadd.f32 %v1637_v9, %v1074_v49 }
 0x15b   : > { %v1098_v0 = vmax.f32 %v1088_v50, 0.0 }
 0x15d   : > { %v1108_v51 = vpack.c.bf16 %v1098_v0, %v1098_v0 }
 0x15f   : > { %1119 = vst.msk [vmem:[%s1645_s16 + $0x24] sm:$0xf] %vm1109_vm9, %v1108_v51 }
 0x160 PF: > { %s13_s12 = sadd.s32 1, %s1325_s12  }
 0x161   : > { %p10_p4 = scmp.ge.s32.totalorder %s13_s12, 4  }
 0x163   :  { %12 = sbr.rel (!%p10_p4) target bundleno = 1 (0x1), region = 70 }

// kernel: net_forward.4
= control target key start
LH: loop header
LB: loop body
LE: loop exit
PB: predicated region body
PF: predicated region fallthrough
CT: control target
= control target key end

     0   :  { %s3160_s12 = smov 0   ;;  %s4027_s0 = inlined_call_operand.vmem [shape: bf16[2,264,3], index: 0, kind: input, shape index: {}]   ;;  %s4028_s1 = inlined_call_operand.vmem [shape: bf16[9,3,8], index: 1, kind: input, shape index: {}]   ;;  %s4029_s2 = inlined_call_operand.vmem [shape: f32[1,8], index: 2, kind: input, shape index: {}]   ;;  %s4030_s3 = inlined_call_operand.vmem [shape: bf16[2,224,8], index: 3, kind: output, shape index: {}]  }
   0x1 LB: > { %s2615_s13 = sadd.s32 4294967295, %s3137_s12   ;;  %p2619_p0 = scmp.ge.s32.totalorder %s3137_s12, 1  ;;  %s3137_s12 = sphi %s3160_s12, %s13_s12  }
   0x2   : > { %p137_p1 = scmp.lt.s32.totalorder %s3137_s12, 3 }
   0x4   : > { %p138_p2 = pnand %p2619_p0, %p137_p1 }
   0x6   : > { %141 = sbr.rel (%p138_p2) target bundleno = 675 (0x2a3), region = 32 }
   0xb   : > { %v2622_v0 = vld [vmem:[%s4028_s1 + $0x2] sm:$0x3]  ;;  %vm437_vm0 = vcmask 1040384   ;;  %vm438_vm1 = vcmask 1041408   ;;  %p161_p3 = scmp.lt.s32.totalorder %s2615_s13, 1  ;;  %v3139_v1 = vmov 65535  }
   0xc   : > { %v439_v2 = vsel %vm437_vm0, 4294967295, %v3139_v1  ;;  %v2703_v3 = vld [vmem:[%s4028_s1 + $0x4] sm:$0x3]  ;;  %v200_v5 = vld [vmem:[%s4028_s1] sm:$0x3]  ;;  %vm394_vm3 = vcmask 23552  }
   0xd   : > { %v3174_v4 = vsel %vm438_vm1, %v439_v2, 0  ;;  %s4048_s13 = smov (!%p161_p3, %s2615_s13), 1  ;;  %v2789_v6 = vld [vmem:[%s4028_s1 + $0x8] sm:$0x3]  ;;  %vm277_vm2 = vsmask.f32 7424 }
   0xe   : > { %v442_v7 = vand.u32 %v2622_v0, %v3174_v4  ;;  %v712_v8 = vand.u32 %v2703_v3, %v3174_v4  ;;  %v552_v9 = vand.u32 %v3174_v4, %v200_v5  ;;  %v1336_v10 = vand.u32 %v2789_v6, %v3174_v4  ;;  %s3119_s22 = smul.u32 132, %s4048_s13  ;;  %v2718_v48 = vld [vmem:[%s4028_s1 + $0x6] sm:$0x3] }
   0xf   : > { %v964_v57 = vand.u32 %v2718_v48, %v3174_v4  ;;  %vm639_vm4 = vcmask 1046528   ;;  %s3120_s11 = smul.u32 112, %s4048_s13  ;;  %vm2531_vm5 = vcmask 60416  }
  0x10   : > { %3116 = vmatpush.bf16.msra.mxu1 %v442_v7  ;;  %3117 = vmatpush.bf16.msra.mxu2 %v442_v7  ;;  %s3192_s25 = scalar_lea.vmem %s4027_s0, %s3119_s22 }
  0x11   : > { %451 = vmatpush.bf16.msra.mxu0 %v442_v7  ;;  %v3195_v11 = vld [vmem:[%s3192_s25 + $0x20] sm:$0xff]  ;;  %v3198_v12 = vld [vmem:[%s3192_s25 + $0x28] sm:$0xff]  ;;  %3118 = vmatpush.bf16.msra.mxu3 %v442_v7  ;;  %v3240_v40 = vld [vmem:[%s3192_s25 + $0x30] sm:$0xff]  ;;  %s3846_s13 = scalar_lea.vmem %s4030_s3, %s3120_s11 }
  0x12   : > { %v3201_v13 = vld [vmem:[%s3192_s25 + $0x40] sm:$0xff]  ;;  %v3204_v14 = vld [vmem:[%s3192_s25 + $0x48] sm:$0xff]  ;;  %v310_v17 = vshll.u32 %v3195_v11, 16  ;;  %v314_v18 = vshrl.u32 %v3195_v11, 16  ;;  %v318_v19 = vshll.u32 %v3198_v12, 16  ;;  %v3243_v41 = vld [vmem:[%s3192_s25 + $0x50] sm:$0xff] }
  0x13   : > { %v3207_v15 = vld [vmem:[%s3192_s25] sm:$0xff]   ;;  %v3210_v16 = vld [vmem:[%s3192_s25 + $0x8] sm:$0xff]  ;;  %v342_v20 = vshll.u32 %v3201_v13, 16  ;;  %v346_v21 = vshrl.u32 %v3201_v13, 16  ;;  %v350_v22 = vshll.u32 %v3204_v14, 16  ;;  %v3249_v45 = vld [vmem:[%s3192_s25 + $0x10] sm:$0xff] }
  0x14   : > { %721 = vmatpush.bf16.msrb.mxu2 %v712_v8  ;;  %561 = vmatpush.bf16.msrb.mxu1 %v552_v9  ;;  %v279_v23 = vshrl.u32 %v3207_v15, 16  ;;  %v281_v24 = vshll.u32 %v3207_v15, 16  ;;  %v3220_v25 = vrot.slane %v310_v17, 1  ;;  %v320_v26 = vrot.slane %v318_v19, 1  ;;  %v3228_v34 = vld [vmem:[%s3192_s25 + $0x60] sm:$0xff]  ;;  %v3231_v35 = vld [vmem:[%s3192_s25 + $0x68] sm:$0xff] }
  0x15   : > { %1345 = vmatpush.bf16.msrb.mxu0 %v1336_v10  ;;  %v3222_v27 = vrot.slane %v342_v20, 1  ;;  %v286_v28 = vshll.u32 %v3210_v16, 16  ;;  %v352_v29 = vrot.slane %v350_v22, 1  ;;  %v374_v42 = vshll.u32 %v3228_v34, 16  ;;  %v201_v49 = vld [vmem:[%s3192_s25 + $0x70] sm:$0x1]  ;;  %973 = vmatpush.bf16.msrb.mxu3 %v964_v57 }
  0x16   : > { %v283_v30 = vrot.slane %v281_v24, 1  ;;  %v316_v31 = vor.u32 %v314_v18, %v3220_v25  ;;  %v378_v43 = vshrl.u32 %v3228_v34, 16  ;;  %v382_v44 = vshll.u32 %v3231_v35, 16  ;;  %v3278_v9 = vld [vmem:[%s3192_s25 + $0x38] sm:$0xff] }
  0x17   : > { %v348_v32 = vor.u32 %v346_v21, %v3222_v27  ;;  %v288_v33 = vrot.slane %v286_v28, 1  ;;  %v3251_v46 = vrot.slane %v374_v42, 1  ;;  %v322_v50 = vshrl.u32 %v3198_v12, 16  ;;  %v3281_v10 = vld [vmem:[%s3192_s25 + $0x58] sm:$0xff]  ;;  %v2871_v42 = vld [vmem:[%s4028_s1 + $0xc] sm:$0x3] }
  0x18   : > { %v284_v36 = vor.u32 %v283_v30, %v279_v23  ;;  %v321_v37 = vsel %vm277_vm2, %v316_v31, %v320_v26  ;;  %v384_v47 = vrot.slane %v382_v44, 1  ;;  %v326_v51 = vshll.u32 %v3240_v40, 16  ;;  %v3284_v19 = vld [vmem:[%s3192_s25 + $0x18] sm:$0xff]  ;;  %v2942_v44 = vld [vmem:[%s4028_s1 + $0xe] sm:$0x3] }
  0x19   : > { %v353_v38 = vsel %vm277_vm2, %v348_v32, %v352_v29  ;;  %2679 = vmatmul.msk.bf16.vlgmr.msra.gmra.mxu1 %vm394_vm3, %v321_v37  ;;  %v354_v52 = vshrl.u32 %v3204_v14, 16  ;;  %v358_v53 = vshll.u32 %v3243_v41, 16  ;;  %v380_v54 = vor.u32 %v378_v43, %v3251_v46 }
  0x1a   : > { %2683 = vmatmul.msk.bf16.vlgmr.msra.gmra.mxu2 %vm394_vm3, %v353_v38  ;;  %v289_v39 = vsel %vm277_vm2, %v284_v36, %v288_v33  ;;  %v290_v55 = vshrl.u32 %v3210_v16, 16  ;;  %v294_v56 = vshll.u32 %v3249_v45, 16  ;;  %v261_v58 = vunpack.c.l.b16 %v201_v49 }
  0x1b   : > { %2675 = vmatmul.msk.bf16.vlgmr.msra.gmra.mxu0 %vm394_vm3, %v289_v39  ;;  %v385_v59 = vsel %vm277_vm2, %v380_v54, %v384_v47  ;;  %v324_v60 = vor.u32 %v322_v50, %v320_v26  ;;  %v328_v61 = vrot.slane %v326_v51, 1  ;;  %v356_v62 = vor.u32 %v354_v52, %v352_v29  ;;  %v3009_v50 = vld [vmem:[%s4028_s1 + $0x10] sm:$0x3]  ;;  %v3039_v52 = vld [vmem:[%s3192_s25 + $0x8] sm:$0xff] }
  0x1c   : > { %2687 = vmatmul.msk.bf16.vlgmr.msra.gmra.mxu3 %vm394_vm3, %v385_v59  ;;  %v360_v63 = vrot.slane %v358_v53, 1  ;;  %v3267_v0 = vpack.c.b16 %v261_v58, %v261_v58  ;;  %v292_v1 = vor.u32 %v290_v55, %v288_v33  ;;  %v296_v2 = vrot.slane %v294_v56, 1 }
  0x1d   : > { %v329_v3 = vsel %vm277_vm2, %v324_v60, %v328_v61  ;;  %v386_v6 = vshrl.u32 %v3231_v35, 16  ;;  %v330_v20 = vshrl.u32 %v3240_v40, 16  ;;  %v334_v21 = vshll.u32 %v3278_v9, 16 }
  0x1e   : > { %v361_v5 = vsel %vm277_vm2, %v356_v62, %v360_v63  ;;  %v390_v7 = vshll.u32 %v3267_v0, 16  ;;  %v297_v8 = vsel %vm277_vm2, %v292_v1, %v296_v2  ;;  %v362_v22 = vshrl.u32 %v3243_v41, 16  ;;  %v3105_v62 = vld [vmem:[%s3192_s25] sm:$0xf0]  ;;  %v3334_v1 = vld [vmem:[%s3192_s25 + $0x10] sm:$0xff] }
  0x1f   : > { %v388_v17 = vor.u32 %v386_v6, %v384_v47  ;;  %v366_v23 = vshll.u32 %v3281_v10, 16  ;;  %v298_v26 = vshrl.u32 %v3249_v45, 16  ;;  %v302_v28 = vshll.u32 %v3284_v19, 16  ;;  %v2856_v47 = vld [vmem:[%s4028_s1 + $0xa] sm:$0x3] }
  0x20   : > { %v392_v18 = vrot.slane %v390_v7, 1  ;;  %v332_v29 = vor.u32 %v330_v20, %v328_v61  ;;  %v336_v30 = vrot.slane %v334_v21, 1  ;;  %v364_v31 = vor.u32 %v362_v22, %v360_v63  ;;  %v3108_v61 = vld [vmem:[%s3192_s25 + $0x8] sm:$0xff]   ;;  %v3106_v63 = vld [vmem:[%s3192_s25] sm:$0xe]  ;;  %v3347_v21 = vld [vmem:[%s3192_s25 + $0x18] sm:$0xff] }
  0x21   : > { %v368_v32 = vrot.slane %v366_v23, 1  ;;  %v300_v33 = vor.u32 %v298_v26, %v296_v2  ;;  %v304_v36 = vrot.slane %v302_v28, 1  ;;  %v1775_v43 = vand.u32 %v2871_v42, %v3174_v4  ;;  %v3041_v22 = vld [vmem:[%s3192_s25 + $0x18] sm:$0xff] }
  0x22   : > { %v393_v24 = vsel %vm277_vm2, %v388_v17, %v392_v18  ;;  %v337_v37 = vsel %vm277_vm2, %v332_v29, %v336_v30  ;;  %v2147_v48 = vand.u32 %v2942_v44, %v3174_v4  ;;  %v1523_v49 = vand.u32 %v2856_v47, %v3174_v4  ;;  %v3043_v44 = vld [vmem:[%s3192_s25 + $0x28] sm:$0xff] }
  0x23   : > { %v369_v38 = vsel %vm277_vm2, %v364_v31, %v368_v32  ;;  %v305_v39 = vsel %vm277_vm2, %v300_v33, %v304_v36  ;;  %1784 = vmatpush.bf16.msra.mxu2 %v1775_v43  ;;  %v2334_v51 = vand.u32 %v3009_v50, %v3174_v4  ;;  %v338_v53 = vshrl.u32 %v3278_v9, 16  ;;  %v3361_v31 = vld [vmem:[%s3192_s25 + $0x20] sm:$0xff]  ;;  %v3375_v43 = vld [vmem:[%s3192_s25 + $0x28] sm:$0xff] }
  0x24   : > { %2156 = vmatpush.bf16.msra.mxu3 %v2147_v48  ;;  %1532 = vmatpush.bf16.msra.mxu1 %v1523_v49  ;;  %v370_v54 = vshrl.u32 %v3281_v10, 16  ;;  %v306_v55 = vshrl.u32 %v3284_v19, 16  ;;  %v1180_v2 = vshll.u32 %v3108_v61, 16  ;;  %v641_v7 = vrot.slane %v3210_v16, 1 }
  0x25   : > { %2343 = vmatpush.bf16.msra.mxu0 %v2334_v51  ;;  %v340_v56 = vor.u32 %v338_v53, %v336_v30  ;;  %v1189_v23 = vshrl.u32 %v3334_v1, 16  ;;  %v643_v26 = vrot.slane %v3249_v45, 1  ;;  %v1197_v33 = vshrl.u32 %v3347_v21, 16  ;;  %v3389_v53 = vld [vmem:[%s3192_s25 + $0x30] sm:$0xff] }
  0x26   : > { %v372_v57 = vor.u32 %v370_v54, %v368_v32  ;;  %v308_v58 = vor.u32 %v306_v55, %v304_v36  ;;  %v3042_v32 = vld [vmem:[%s3192_s25 + $0x20] sm:$0xff]  ;;  %v1201_v36 = vshll.u32 %v3361_v31, 16  ;;  %v1205_v47 = vshrl.u32 %v3361_v31, 16  ;;  %v3044_v54 = vld [vmem:[%s3192_s25 + $0x30] sm:$0xff] }
  0x27   : > { %v345_v4 = vsel %vm277_vm2, %v340_v56, %v3222_v27  ;;  %v3107_v27 = vor.u32 %v3106_v63, %v3105_v62  ;;  %v1209_v48 = vshll.u32 %v3375_v43, 16  ;;  %v647_v49 = vrot.slane %v3195_v11, 1  ;;  %v3407_v62 = vld [vmem:[%s3192_s25 + $0x38] sm:$0xff] }
  0x28   : > { %v377_v59 = vsel %vm277_vm2, %v372_v57, %v3251_v46  ;;  %v313_v60 = vsel %vm277_vm2, %v308_v58, %v3220_v25  ;;  %v1178_v46 = vshrl.u32 %v3108_v61, 16  ;;  %v1185_v25 = vshll.u32 %v3334_v1, 16 }
  0x29   : > { %2680 = vmatmul.msk.bf16.gmra.mxu1 %vm394_vm3, %v329_v3  ;;  %v3040_v3 = vld [vmem:[%s3192_s25 + $0x10] sm:$0xff]  ;;  %v640_v6 = vrot.slane %v3107_v27, 1  ;;  %v1211_v51 = vrot.slane %v1209_v48, 1  ;;  %v1213_v55 = vshrl.u32 %v3375_v43, 16  ;;  %v1217_v56 = vshll.u32 %v3389_v53, 16 }
  0x2a   : > { %2684 = vmatmul.msk.bf16.gmra.mxu2 %vm394_vm3, %v361_v5  ;;  %v1182_v5 = vrot.slane %v1180_v2, 1  ;;  %v1187_v17 = vrot.slane %v1185_v25, 1  ;;  %v649_v57 = vrot.slane %v3198_v12, 1  ;;  %v3045_v2 = vld [vmem:[%s3192_s25 + $0x38] sm:$0xff] }
  0x2b   : > { %2676 = vmatmul.msk.bf16.gmra.mxu0 %vm394_vm3, %v297_v8  ;;  %v642_v18 = vsel %vm639_vm4, %v640_v6, %v641_v7  ;;  %v1215_v58 = vor.u32 %v1213_v55, %v1211_v51 }
  0x2c   : > { %2688 = vmatmul.msk.bf16.gmra.mxu3 %vm394_vm3, %v393_v24  ;;  %v1183_v8 = vor.u32 %v1182_v5, %v1178_v46  ;;  %v1193_v24 = vshll.u32 %v3347_v21, 16  ;;  %v1191_v28 = vor.u32 %v1189_v23, %v1187_v17  ;;  %v1221_v46 = vshrl.u32 %v3389_v53, 16  ;;  %v3435_v23 = vld [vmem:[%s3192_s25 + $0x40] sm:$0xff] }
  0x2d   : > { %v1225_v5 = vshll.u32 %v3407_v62, 16 }
  0x2e   : > { %v1188_v20 = vsel %vm277_vm2, %v1183_v8, %v1187_v17  ;;  %v1195_v29 = vrot.slane %v1193_v24, 1 }
  0x2f   : > { %v1227_v6 = vrot.slane %v1225_v5, 1 }
  0x30   : > { %v1196_v30 = vsel %vm277_vm2, %v1191_v28, %v1195_v29  ;;  %v3046_v28 = vld [vmem:[%s3192_s25 + $0x40] sm:$0xff] }
  0x39   : > { %2681 = vmatmul.msk.bf16.gmra.mxu1 %vm394_vm3, %v337_v37  ;;  %v645_v37 = vrot.slane %v3284_v19, 1 }
  0x3a   : > { %2685 = vmatmul.msk.bf16.gmra.mxu2 %vm394_vm3, %v369_v38  ;;  %v1199_v38 = vor.u32 %v1197_v33, %v1195_v29 }
  0x3b   : > { %2677 = vmatmul.msk.bf16.gmra.mxu0 %vm394_vm3, %v305_v39  ;;  %v1203_v39 = vrot.slane %v1201_v36, 1 }
  0x3c   : > { %2775 = vmatmul.msk.bf16.vlgmr.msrb.gmra.mxu3 %vm394_vm3, %v3039_v52 }
  0x3d   : > { %v1204_v42 = vsel %vm277_vm2, %v1199_v38, %v1203_v39  ;;  %v1207_v50 = vor.u32 %v1205_v47, %v1203_v39  ;;  %v3465_v47 = vld [vmem:[%s3192_s25 + $0x48] sm:$0xff] }
  0x3f   : > { %v1212_v52 = vsel %vm277_vm2, %v1207_v50, %v1211_v51  ;;  %v3047_v50 = vld [vmem:[%s3192_s25 + $0x48] sm:$0xff] }
  0x49   : > { %2682 = vmatmul.msk.bf16.gmra.mxu1 %vm394_vm3, %v345_v4  ;;  %v1219_v4 = vrot.slane %v1217_v56, 1 }
  0x4a   : > { %2686 = vmatmul.msk.bf16.gmra.mxu2 %vm394_vm3, %v377_v59  ;;  %v650_v59 = vsel %vm639_vm4, %v647_v49, %v649_v57 }
  0x4b   : > { %2678 = vmatmul.msk.bf16.gmra.mxu0 %vm394_vm3, %v313_v60  ;;  %v1220_v61 = vsel %vm277_vm2, %v1215_v58, %v1219_v4  ;;  %v1223_v25 = vor.u32 %v1221_v46, %v1219_v4  ;;  %v3493_v46 = vld [vmem:[%s3192_s25 + $0x50] sm:$0xff] }
  0x4c   : > { %2776 = vmatmul.msk.bf16.gmra.mxu3 %vm394_vm3, %v3040_v3  ;;  %4034 = vst [vmem:[#allocation3_spill] sm:$0xff] %v3493_v46 }
  0x59   : > { %2689 = vmatmul.msk.bf16.vlgmr.msrb.gmra.mxu1 %vm394_vm3, %v3207_v15  ;;  %v644_v15 = vsel %vm639_vm4, %v641_v7, %v643_v26 }
  0x5a   : > { %2704 = vmatmul.msk.bf16.vlgmr.msrb.gmra.mxu2 %vm394_vm3, %v642_v18 }
  0x5b   : > { %2842 = vmatmul.msk.bf16.vlgmr.msrb.gmra.mxu0 %vm394_vm3, %v1188_v20 }
  0x5c   : > { %2777 = vmatmul.msk.bf16.gmra.mxu3 %vm394_vm3, %v3041_v22  ;;  %v1228_v22 = vsel %vm277_vm2, %v1223_v25, %v1227_v6  ;;  %v3048_v25 = vld [vmem:[%s3192_s25 + $0x50] sm:$0xff] }
  0x69   : > { %2690 = vmatmul.msk.bf16.gmra.mxu1 %vm394_vm3, %v3210_v16  ;;  %v646_v16 = vsel %vm639_vm4, %v643_v26, %v645_v37 }
  0x6a   : > { %2705 = vmatmul.msk.bf16.gmra.mxu2 %vm394_vm3, %v644_v15 }
  0x6b   : > { %2843 = vmatmul.msk.bf16.gmra.mxu0 %vm394_vm3, %v1196_v30  ;;  %v1229_v30 = vshrl.u32 %v3407_v62, 16 }
  0x6c   : > { %2778 = vmatmul.msk.bf16.gmra.mxu3 %vm394_vm3, %v3042_v32  ;;  %v653_v32 = vrot.slane %v3278_v9, 1 }
  0x6d   : > { %v1231_v33 = vor.u32 %v1229_v30, %v1227_v6 }
  0x79   : > { %2691 = vmatmul.msk.bf16.gmra.mxu1 %vm394_vm3, %v3249_v45  ;;  %v648_v45 = vsel %vm639_vm4, %v645_v37, %v647_v49 }
  0x7a   : > { %2706 = vmatmul.msk.bf16.gmra.mxu2 %vm394_vm3, %v646_v16 }
  0x7b   : > { %2844 = vmatmul.msk.bf16.gmra.mxu0 %vm394_vm3, %v1204_v42 }
  0x7c   : > { %2779 = vmatmul.msk.bf16.gmra.mxu3 %vm394_vm3, %v3043_v44 }
  0x89   : > { %2692 = vmatmul.msk.bf16.gmra.mxu1 %vm394_vm3, %v3284_v19 }
  0x8a   : > { %2707 = vmatmul.msk.bf16.gmra.mxu2 %vm394_vm3, %v648_v45 }
  0x8b   : > { %2845 = vmatmul.msk.bf16.gmra.mxu0 %vm394_vm3, %v1212_v52  ;;  %v1237_v52 = vshrl.u32 %v3435_v23, 16 }
  0x8c   : > { %2780 = vmatmul.msk.bf16.gmra.mxu3 %vm394_vm3, %v3044_v54  ;;  %v655_v54 = vrot.slane %v3201_v13, 1 }
  0x96   : > { %v3396_v19 = vpop.f32.mrf.mxu1 }
  0x98   : > { %v3399_v60 = vpop.f32.mrf.mxu0 }
  0x99   : > { %2693 = vmatmul.msk.bf16.gmra.mxu1 %vm394_vm3, %v3195_v11  ;;  %v651_v11 = vrot.slane %v3240_v40, 1 }
  0x9a   : > { %2708 = vmatmul.msk.bf16.gmra.mxu2 %vm394_vm3, %v650_v59  ;;  %v656_v59 = vsel %vm639_vm4, %v653_v32, %v655_v54 }
  0x9b   : > { %2846 = vmatmul.msk.bf16.gmra.mxu0 %vm394_vm3, %v1220_v61  ;;  %v652_v18 = vsel %vm639_vm4, %v649_v57, %v651_v11  ;;  %v654_v16 = vsel %vm639_vm4, %v651_v11, %v653_v32 }
  0x9c   : > { %2781 = vmatmul.msk.bf16.gmra.mxu3 %vm394_vm3, %v3045_v2 }
  0x9d   : > { %v3409_v63 = vpop.f32.mrf.mxu2 }
  0x9e   : > { %v3412_v3 = vpop.f32.mrf.mxu1 }
  0x9f   : > { %v3422_v8 = vpop.f32.mrf.mxu3 }
  0xa0   : > { %v3414_v27 = vpop.f32.mrf.mxu0 }
  0xa5   : > { %v3420_v7 = vpop.f32.mrf.mxu2 }
  0xa6   : > { %v3424_v17 = vpop.f32.mrf.mxu1 }
  0xa7   : > { %v3439_v26 = vpop.f32.mrf.mxu3 }
  0xa8   : > { %v3427_v20 = vpop.f32.mrf.mxu0 }
  0xa9   : > { %2694 = vmatmul.msk.bf16.gmra.mxu1 %vm394_vm3, %v3198_v12  ;;  %v1233_v12 = vshll.u32 %v3435_v23, 16 }
  0xaa   : > { %2709 = vmatmul.msk.bf16.gmra.mxu2 %vm394_vm3, %v652_v18 }
  0xab   : > { %2847 = vmatmul.msk.bf16.gmra.mxu0 %vm394_vm3, %v1228_v22  ;;  %v1235_v36 = vrot.slane %v1233_v12, 1  ;;  %v1245_v22 = vshrl.u32 %v3465_v47, 16 }
  0xac   : > { %2782 = vmatmul.msk.bf16.gmra.mxu3 %vm394_vm3, %v3046_v28  ;;  %v1249_v28 = vshll.u32 %v3493_v46, 16 }
  0xad   : > { %v3437_v24 = vpop.f32.mrf.mxu2  ;;  %v1236_v44 = vsel %vm277_vm2, %v1231_v33, %v1235_v36  ;;  %v1239_v55 = vor.u32 %v1237_v52, %v1235_v36 }
  0xae   : > { %v3442_v29 = vpop.f32.mrf.mxu1  ;;  %v1251_v12 = vrot.slane %v1249_v28, 1  ;;  %v1253_v28 = vshrl.u32 %v3493_v46, 16 }
  0xaf   : > { %v3452_v38 = vpop.f32.mrf.mxu3 }
  0xb0   : > { %v3444_v15 = vpop.f32.mrf.mxu0 }
  0xb5   : > { %v3450_v37 = vpop.f32.mrf.mxu2 }
  0xb6   : > { %v3454_v39 = vpop.f32.mrf.mxu1 }
  0xb7   : > { %v3469_v49 = vpop.f32.mrf.mxu3 }
  0xb8   : > { %v3457_v42 = vpop.f32.mrf.mxu0  ;;  %4033 = vst [vmem:[#allocation2_spill] sm:$0xff] %v3469_v49 }
  0xb9   : > { %2695 = vmatmul.msk.bf16.gmra.mxu1 %vm394_vm3, %v3240_v40  ;;  %v1241_v40 = vshll.u32 %v3465_v47, 16 }
  0xba   : > { %2710 = vmatmul.msk.bf16.gmra.mxu2 %vm394_vm3, %v654_v16 }
  0xbb   : > { %2848 = vmatmul.msk.bf16.gmra.mxu0 %vm394_vm3, %v1236_v44  ;;  %v1243_v56 = vrot.slane %v1241_v40, 1  ;;  %v3516_v40 = vld [vmem:[%s3192_s25 + $0x58] sm:$0xff] }
  0xbc   : > { %2783 = vmatmul.msk.bf16.gmra.mxu3 %vm394_vm3, %v3047_v50 }
  0xbd   : > { %v3467_v48 = vpop.f32.mrf.mxu2  ;;  %v1244_v2 = vsel %vm277_vm2, %v1239_v55, %v1243_v56  ;;  %v1247_v30 = vor.u32 %v1245_v22, %v1243_v56 }
  0xbe   : > { %v3472_v51 = vpop.f32.mrf.mxu1 }
  0xbf   : > { %v975_v58 = vpop.f32.mrf.mxu3  ;;  %v1252_v52 = vsel %vm277_vm2, %v1247_v30, %v1251_v12  ;;  %v1257_v30 = vshll.u32 %v3516_v40, 16 }
  0xc0   : > { %v3474_v45 = vpop.f32.mrf.mxu0 }
  0xc5   : > { %v3480_v57 = vpop.f32.mrf.mxu2 }
  0xc6   : > { %v3482_v4 = vpop.f32.mrf.mxu1 }
  0xc7   : > { %v977_v11 = vpop.f32.mrf.mxu3 }
  0xc8   : > { %v3485_v61 = vpop.f32.mrf.mxu0 }
  0xc9   : > { %2696 = vmatmul.msk.bf16.gmra.mxu1 %vm394_vm3, %v3278_v9  ;;  %v657_v9 = vrot.slane %v3204_v14, 1 }
  0xca   : > { %2711 = vmatmul.msk.bf16.gmra.mxu2 %vm394_vm3, %v656_v59 }
  0xcb   : > { %2849 = vmatmul.msk.bf16.gmra.mxu0 %vm394_vm3, %v1244_v2  ;;  %v658_v16 = vsel %vm639_vm4, %v655_v54, %v657_v9  ;;  %v3049_v2 = vld [vmem:[%s3192_s25 + $0x58] sm:$0xff] }
  0xcc   : > { %2784 = vmatmul.msk.bf16.gmra.mxu3 %vm394_vm3, %v3048_v25 }
  0xcd   : > { %v3495_v5 = vpop.f32.mrf.mxu2 }
  0xce   : > { %v3498_v6 = vpop.f32.mrf.mxu1 }
  0xcf   : > { %v980_v33 = vpop.f32.mrf.mxu3 }
  0xd0   : > { %v3500_v18 = vpop.f32.mrf.mxu0 }
  0xd5   : > { %v3506_v32 = vpop.f32.mrf.mxu2 }
  0xd6   : > { %v563_v36 = vpop.f32.mrf.mxu1 }
  0xd7   : > { %v564_v44 = vadd.f32 %v563_v36, %v3399_v60  ;;  %v982_v56 = vpop.f32.mrf.mxu3  ;;  %v659_v36 = vrot.slane %v3243_v41, 1 }
  0xd8   : > { %v1347_v50 = vpop.f32.mrf.mxu0 }
  0xd9   : > { %2697 = vmatmul.msk.bf16.gmra.mxu1 %vm394_vm3, %v3201_v13 }
  0xda   : > { %2712 = vmatmul.msk.bf16.gmra.mxu2 %vm394_vm3, %v658_v16  ;;  %v1255_v16 = vor.u32 %v1253_v28, %v1251_v12 }
  0xdb   : > { %2850 = vmatmul.msk.bf16.gmra.mxu0 %vm394_vm3, %v1252_v52  ;;  %v1259_v52 = vrot.slane %v1257_v30, 1 }
  0xdc   : > { %2785 = vmatmul.msk.bf16.gmra.mxu3 %vm394_vm3, %v3049_v2 }
  0xdd   : > { %v723_v55 = vpop.f32.mrf.mxu2  ;;  %v1260_v2 = vsel %vm277_vm2, %v1255_v16, %v1259_v52 }
  0xde   : > { %v793_v59 = vadd.f32 %v723_v55, %v564_v44  ;;  %v565_v25 = vpop.f32.mrf.mxu1 }
  0xdf   : > { %v566_v60 = vadd.f32 %v565_v25, %v3414_v27  ;;  %v985_v55 = vpop.f32.mrf.mxu3  ;;  %v660_v27 = vsel %vm639_vm4, %v657_v9, %v659_v36 }
  0xe0   : > { %v1045_v54 = vadd.f32 %v975_v58, %v793_v59  ;;  %v1349_v22 = vpop.f32.mrf.mxu0 }
  0xe2   : > { %v3523_v13 = vadd.f32 %v1347_v50, %v1045_v54  ;;  %v3536_v50 = vld [vmem:[%s3192_s25 + $0x60] sm:$0xff] }
  0xe5   : > { %v725_v44 = vpop.f32.mrf.mxu2 }
  0xe6   : > { %v794_v58 = vadd.f32 %v725_v44, %v566_v60  ;;  %v568_v59 = vpop.f32.mrf.mxu1  ;;  %v1261_v44 = vshrl.u32 %v3516_v40, 16 }
  0xe7   : > { %v569_v49 = vadd.f32 %v568_v59, %v3427_v20  ;;  %v987_v60 = vpop.f32.mrf.mxu3 }
  0xe8   : > { %v1046_v25 = vadd.f32 %v977_v11, %v794_v58  ;;  %v1352_v46 = vpop.f32.mrf.mxu0  ;;  %v3050_v11 = vld [vmem:[%s3192_s25 + $0x60] sm:$0xff]  ;;  %v661_v58 = vrot.slane %v3281_v10, 1  ;;  %v1263_v59 = vor.u32 %v1261_v44, %v1259_v52  ;;  %v3556_v52 = vld [vmem:[%s3192_s25 + $0x68] sm:$0xff] }
  0xe9   : > { %2698 = vmatmul.msk.bf16.gmra.mxu1 %vm394_vm3, %v3204_v14  ;;  %v1265_v14 = vshll.u32 %v3536_v50, 16  ;;  %4036 = vst [vmem:[#allocation5_spill] sm:$0xff] %v3556_v52 }
  0xea   : > { %2713 = vmatmul.msk.bf16.gmra.mxu2 %vm394_vm3, %v660_v27  ;;  %v3532_v12 = vadd.f32 %v1349_v22, %v1046_v25 }
  0xeb   : > { %2851 = vmatmul.msk.bf16.gmra.mxu0 %vm394_vm3, %v1260_v2  ;;  %v1267_v27 = vrot.slane %v1265_v14, 1 }
  0xec   : > { %2786 = vmatmul.msk.bf16.gmra.mxu3 %vm394_vm3, %v3050_v11 }
  0xed   : > { %v728_v54 = vpop.f32.mrf.mxu2  ;;  %v1268_v11 = vsel %vm277_vm2, %v1263_v59, %v1267_v27 }
  0xee   : > { %v795_v9 = vadd.f32 %v728_v54, %v569_v49  ;;  %v570_v28 = vpop.f32.mrf.mxu1 }
  0xef   : > { %v571_v30 = vadd.f32 %v570_v28, %v3444_v15  ;;  %v990_v25 = vpop.f32.mrf.mxu3  ;;  %v662_v15 = vsel %vm639_vm4, %v659_v36, %v661_v58 }
  0xf0   : > { %v1047_v20 = vadd.f32 %v980_v33, %v795_v9  ;;  %v1354_v16 = vpop.f32.mrf.mxu0 }
  0xf2   : > { %v3543_v22 = vadd.f32 %v1352_v46, %v1047_v20 }
  0xf5   : > { %v730_v49 = vpop.f32.mrf.mxu2 }
  0xf6   : > { %v796_v33 = vadd.f32 %v730_v49, %v571_v30  ;;  %v573_v2 = vpop.f32.mrf.mxu1  ;;  %v1269_v49 = vshrl.u32 %v3536_v50, 16 }
  0xf7   : > { %v574_v9 = vadd.f32 %v573_v2, %v3457_v42  ;;  %v992_v30 = vpop.f32.mrf.mxu3 }
  0xf8   : > { %v1048_v54 = vadd.f32 %v982_v56, %v796_v33  ;;  %v1357_v28 = vpop.f32.mrf.mxu0  ;;  %v3051_v56 = vld [vmem:[%s3192_s25 + $0x68] sm:$0xff]  ;;  %v663_v33 = vrot.slane %v3228_v34, 1  ;;  %v1271_v2 = vor.u32 %v1269_v49, %v1267_v27 }
  0xf9   : > { %2699 = vmatmul.msk.bf16.gmra.mxu1 %vm394_vm3, %v3243_v41  ;;  %v1273_v41 = vshll.u32 %v3556_v52, 16 }
  0xfa   : > { %2714 = vmatmul.msk.bf16.gmra.mxu2 %vm394_vm3, %v662_v15  ;;  %v3552_v46 = vadd.f32 %v1354_v16, %v1048_v54 }
  0xfb   : > { %2852 = vmatmul.msk.bf16.gmra.mxu0 %vm394_vm3, %v1268_v11  ;;  %v1275_v15 = vrot.slane %v1273_v41, 1 }
  0xfc   : > { %4035 = vst [vmem:[#allocation4_spill] sm:$0xff] %v3552_v46  ;;  %2787 = vmatmul.msk.bf16.gmra.mxu3 %vm394_vm3, %v3051_v56 }
  0xfd   : > { %v733_v20 = vpop.f32.mrf.mxu2  ;;  %v1276_v56 = vsel %vm277_vm2, %v1271_v2, %v1275_v15 }
  0xfe   : > { %v797_v36 = vadd.f32 %v733_v20, %v574_v9  ;;  %v575_v44 = vpop.f32.mrf.mxu1 }
  0xff   : > { %v576_v14 = vadd.f32 %v575_v44, %v3474_v45  ;;  %v995_v9 = vpop.f32.mrf.mxu3  ;;  %v664_v45 = vsel %vm639_vm4, %v661_v58, %v663_v33 }
 0x100   : > { %v1049_v42 = vadd.f32 %v985_v55, %v797_v36  ;;  %v1359_v59 = vpop.f32.mrf.mxu0 }
 0x102   : > { %v3563_v16 = vadd.f32 %v1357_v28, %v1049_v42  ;;  %v3576_v28 = vld [vmem:[%s3192_s25 + $0x70] sm:$0xff] }
 0x104   : > { %4037 = vst [vmem:[#allocation6_spill] sm:$0xff] %v3563_v16 }
 0x105   : > { %v735_v54 = vpop.f32.mrf.mxu2 }
 0x106   : > { %v798_v55 = vadd.f32 %v735_v54, %v576_v14  ;;  %v578_v11 = vpop.f32.mrf.mxu1  ;;  %v3112_v54 = vld [vmem:[%s3192_s25 + $0x10] sm:$0xff]  }
 0x107   : > { %v579_v36 = vadd.f32 %v578_v11, %v3485_v61  ;;  %v3052_v61 = vld [vmem:[%s3192_s25 + $0x70] sm:$0xff]  ;;  %v665_v11 = vrot.slane %v3231_v35, 1 }
 0x108   : > { %v1050_v20 = vadd.f32 %v987_v60, %v798_v55  ;;  %v1362_v44 = vpop.f32.mrf.mxu0  ;;  %v997_v60 = vpop.f32.mrf.mxu3 }
 0x109   : > { %2700 = vmatmul.msk.bf16.gmra.mxu1 %vm394_vm3, %v3281_v10  ;;  %v1277_v10 = vshrl.u32 %v3556_v52, 16  ;;  %v1989_v52 = vshrl.u32 %v3112_v54, 16 }
 0x10a   : > { %2715 = vmatmul.msk.bf16.gmra.mxu2 %vm394_vm3, %v664_v45  ;;  %v3572_v27 = vadd.f32 %v1359_v59, %v1050_v20  ;;  %v1281_v59 = vshll.u32 %v3576_v28, 16  ;;  %v3588_v45 = vld [vmem:[%s3192_s25 + $0x18] sm:$0xff]  ;;  %v1991_v20 = vshll.u32 %v3112_v54, 16 }
 0x10b   : > { %2853 = vmatmul.msk.bf16.gmra.mxu0 %vm394_vm3, %v1276_v56 }
 0x10c   : > { %4038 = vst [vmem:[#allocation7_spill] sm:$0xff] %v3572_v27  ;;  %2788 = vmatmul.msk.bf16.gmra.mxu3 %vm394_vm3, %v3052_v61  ;;  %v1283_v56 = vrot.slane %v1281_v59, 1  ;;  %v666_v27 = vsel %vm639_vm4, %v663_v33, %v665_v11  ;;  %v1993_v16 = vrot.slane %v1991_v20, 1 }
 0x10d   : > { %v738_v58 = vpop.f32.mrf.mxu2 }
 0x10e   : > { %v799_v42 = vadd.f32 %v738_v58, %v579_v36  ;;  %v580_v14 = vpop.f32.mrf.mxu1  ;;  %v1279_v36 = vor.u32 %v1277_v10, %v1275_v15 }
 0x10f   : > { %v581_v41 = vadd.f32 %v580_v14, %v3500_v18  ;;  %v1101_v18 = vld [vmem:[%s3192_s25 + $0x78] sm:$0x1] }
 0x110   : > { %v1051_v49 = vadd.f32 %v990_v25, %v799_v42  ;;  %v1364_v2 = vpop.f32.mrf.mxu0  ;;  %v3590_v58 = vpop.f32.mrf.mxu3  ;;  %v1161_v46 = vunpack.c.l.b16 %v1101_v18 }
 0x112   : > { %v3584_v55 = vadd.f32 %v1362_v44, %v1051_v49  ;;  %v1996_v44 = vshll.u32 %v3588_v45, 16  ;;  %v3603_v59 = vpack.c.b16 %v1161_v46, %v1161_v46  ;;  %v3613_v46 = vld [vmem:[%s3192_s25 + $0x20] sm:$0xff] }
 0x114   : > { %4039 = vst [vmem:[#allocation8_spill] sm:$0xff] %v3584_v55  ;;  %v1284_v55 = vsel %vm277_vm2, %v1279_v36, %v1283_v56  ;;  %v1998_v33 = vrot.slane %v1996_v44, 1 }
 0x115   : > { %v740_v25 = vpop.f32.mrf.mxu2 }
 0x116   : > { %v800_v42 = vadd.f32 %v740_v25, %v581_v41  ;;  %v583_v14 = vpop.f32.mrf.mxu1  ;;  %v1994_v41 = vor.u32 %v1993_v16, %v1989_v52 }
 0x117   : > { %v584_v10 = vadd.f32 %v583_v14, %v3396_v19  ;;  %v667_v19 = vrot.slane %v3267_v0, 1  ;;  %v2004_v0 = vshll.u32 %v3613_v46, 16 }
 0x118   : > { %v1052_v61 = vadd.f32 %v992_v30, %v800_v42  ;;  %v1367_v49 = vpop.f32.mrf.mxu0  ;;  %v1002_v54 = vpop.f32.mrf.mxu3  ;;  %v1999_v25 = vsel %vm277_vm2, %v1994_v41, %v1998_v33 }
 0x119   : > { %2701 = vmatmul.msk.bf16.gmra.mxu1 %vm394_vm3, %v3228_v34  ;;  %v668_v41 = vsel %vm639_vm4, %v665_v11, %v667_v19 }
 0x11a   : > { %2716 = vmatmul.msk.bf16.gmra.mxu2 %vm394_vm3, %v666_v27  ;;  %v3599_v15 = vadd.f32 %v1364_v2, %v1052_v61  ;;  %v1285_v27 = vshrl.u32 %v3576_v28, 16  ;;  %v1289_v2 = vshll.u32 %v3603_v59, 16 }
 0x11b   : > { %2854 = vmatmul.msk.bf16.gmra.mxu0 %vm394_vm3, %v1284_v55 }
 0x11c   : > { %2995 = vmatmul.msk.bf16.vlgmr.msra.gmra.mxu3 %vm394_vm3, %v1999_v25  ;;  %v1287_v55 = vor.u32 %v1285_v27, %v1283_v56  ;;  %v1291_v42 = vrot.slane %v1289_v2, 1  ;;  %v3109_v25 = vld [vmem:[%s3192_s25 + $0x8] sm:$0xf0]  ;;  %v3113_v27 = vld [vmem:[%s3192_s25 + $0x10] sm:$0xf0] }
 0x11d   : > { %v743_v30 = vpop.f32.mrf.mxu2  ;;  %v3114_v2 = vld [vmem:[%s3192_s25 + $0x10] sm:$0xe] }
 0x11e   : > { %v801_v20 = vadd.f32 %v743_v30, %v584_v10  ;;  %v585_v36 = vpop.f32.mrf.mxu1 }
 0x11f   : > { %v586_v16 = vadd.f32 %v585_v36, %v3412_v3  ;;  %v1292_v3 = vsel %vm277_vm2, %v1287_v55, %v1291_v42 }
 0x120   : > { %v1053_v34 = vadd.f32 %v995_v9, %v801_v20  ;;  %v1369_v18 = vpop.f32.mrf.mxu0  ;;  %v1005_v44 = vpop.f32.mrf.mxu3  ;;  %v2006_v20 = vrot.slane %v2004_v0, 1 }
 0x122   : > { %v3609_v52 = vadd.f32 %v1367_v49, %v1053_v34  ;;  %v2000_v49 = vshrl.u32 %v3588_v45, 16  ;;  %v3110_v34 = vld [vmem:[%s3192_s25 + $0x8] sm:$0xe] }
 0x124   : > { %v2002_v11 = vor.u32 %v2000_v49, %v1998_v33  ;;  %v3115_v33 = vor.u32 %v3114_v2, %v3113_v27 }
 0x125   : > { %v745_v14 = vpop.f32.mrf.mxu2 }
 0x126   : > { %v802_v9 = vadd.f32 %v745_v14, %v586_v16  ;;  %v588_v61 = vpop.f32.mrf.mxu1  ;;  %v2262_v0 = vrot.slane %v3115_v33, 1 }
 0x127   : > { %v589_v36 = vadd.f32 %v588_v61, %v3424_v17  ;;  %v1452_v61 = vrot.slane %v3334_v1, 1 }
 0x128   : > { %v1054_v10 = vadd.f32 %v997_v60, %v802_v9  ;;  %v1372_v30 = vpop.f32.mrf.mxu0  ;;  %v1007_v19 = vpop.f32.mrf.mxu3 }
 0x129   : > { %2702 = vmatmul.msk.bf16.gmra.mxu1 %vm394_vm3, %v3231_v35  ;;  %v3111_v35 = vor.u32 %v3110_v34, %v3109_v25 }
 0x12a   : > { %2717 = vmatmul.msk.bf16.gmra.mxu2 %vm394_vm3, %v668_v41  ;;  %v3623_v56 = vadd.f32 %v1369_v18, %v1054_v10  ;;  %v2007_v18 = vsel %vm277_vm2, %v2002_v11, %v2006_v20  ;;  %v3638_v41 = vld [vmem:[%s3192_s25 + $0x28] sm:$0xff]  ;;  %v2263_v10 = vrot.slane %v3588_v45, 1 }
 0x12b   : > { %2855 = vmatmul.msk.bf16.gmra.mxu0 %vm394_vm3, %v1292_v3  ;;  %v1451_v9 = vrot.slane %v3111_v35, 1 }
 0x12c   : > { %2996 = vmatmul.msk.bf16.gmra.mxu3 %vm394_vm3, %v2007_v18  ;;  %v2264_v2 = vsel %vm639_vm4, %v2262_v0, %v2263_v10 }
 0x12d   : > { %v748_v60 = vpop.f32.mrf.mxu2  ;;  %v1453_v34 = vsel %vm639_vm4, %v1451_v9, %v1452_v61 }
 0x12e   : > { %v803_v16 = vadd.f32 %v748_v60, %v589_v36  ;;  %v590_v55 = vpop.f32.mrf.mxu1  ;;  %v2012_v60 = vshll.u32 %v3638_v41, 16 }
 0x12f   : > { %v591_v49 = vadd.f32 %v590_v55, %v3442_v29 }
 0x130   : > { %v1055_v42 = vadd.f32 %v3590_v58, %v803_v16  ;;  %v1374_v14 = vpop.f32.mrf.mxu0  ;;  %v1010_v11 = vpop.f32.mrf.mxu3  ;;  %v3066_v58 = vld [vmem:[%s3192_s25 + $0x10] sm:$0xff]  ;;  %v2014_v16 = vrot.slane %v2012_v60, 1  ;;  %v2016_v60 = vshrl.u32 %v3638_v41, 16 }
 0x132   : > { %v3634_v17 = vadd.f32 %v1372_v30, %v1055_v42  ;;  %v2008_v30 = vshrl.u32 %v3613_v46, 16 }
 0x134   : > { %v2010_v45 = vor.u32 %v2008_v30, %v2006_v20 }
 0x135   : > { %v750_v3 = vpop.f32.mrf.mxu2 }
 0x136   : > { %v804_v36 = vadd.f32 %v750_v3, %v591_v49  ;;  %v593_v25 = vpop.f32.mrf.mxu1  ;;  %v2015_v33 = vsel %vm277_vm2, %v2010_v45, %v2014_v16  ;;  %v3659_v3 = vld [vmem:[%s3192_s25 + $0x30] sm:$0xff] }
 0x137   : > { %v594_v55 = vadd.f32 %v593_v25, %v3454_v39  ;;  %v2265_v39 = vrot.slane %v3613_v46, 1  ;;  %v2018_v46 = vor.u32 %v2016_v60, %v2014_v16  ;;  %v2024_v60 = vshrl.u32 %v3659_v3, 16 }
 0x138   : > { %v1056_v27 = vadd.f32 %v1002_v54, %v804_v36  ;;  %v1377_v1 = vpop.f32.mrf.mxu0  ;;  %v1012_v18 = vpop.f32.mrf.mxu3 }
 0x139   : > { %2857 = vmatmul.msk.bf16.vlgmr.msra.gmra.mxu1 %vm394_vm3, %v1453_v34  ;;  %v3067_v34 = vld [vmem:[%s3192_s25 + $0x18] sm:$0xff] }
 0x13a   : > { %2928 = vmatmul.msk.bf16.vlgmr.msra.gmra.mxu2 %vm394_vm3, %v3066_v58  ;;  %v3649_v29 = vadd.f32 %v1374_v14, %v1056_v27  ;;  %v1454_v14 = vrot.slane %v3347_v21, 1  ;;  %v2020_v27 = vshll.u32 %v3659_v3, 16  ;;  %v2266_v21 = vsel %vm639_vm4, %v2263_v10, %v2265_v39 }
 0x13b   : > { %3010 = vmatmul.msk.bf16.vlgmr.msra.gmra.mxu0 %vm394_vm3, %v2264_v2 }
 0x13c   : > { %2997 = vmatmul.msk.bf16.gmra.mxu3 %vm394_vm3, %v2015_v33  ;;  %v2022_v45 = vrot.slane %v2020_v27, 1 }
 0x13d   : > { %v753_v35 = vpop.f32.mrf.mxu2 }
 0x13e   : > { %v805_v54 = vadd.f32 %v753_v35, %v594_v55  ;;  %v595_v42 = vpop.f32.mrf.mxu1  ;;  %v2023_v10 = vsel %vm277_vm2, %v2018_v46, %v2022_v45 }
 0x13f   : > { %v596_v20 = vadd.f32 %v595_v42, %v3472_v51 }
 0x140   : > { %v1057_v9 = vadd.f32 %v1005_v44, %v805_v54  ;;  %v1379_v49 = vpop.f32.mrf.mxu0  ;;  %v1015_v58 = vpop.f32.mrf.mxu3  ;;  %v1455_v44 = vsel %vm639_vm4, %v1452_v61, %v1454_v14 }
 0x142   : > { %v3655_v0 = vadd.f32 %v1377_v1, %v1057_v9 }
 0x145   : > { %v755_v36 = vpop.f32.mrf.mxu2 }
 0x146   : > { %v806_v25 = vadd.f32 %v755_v36, %v596_v20  ;;  %v598_v30 = vpop.f32.mrf.mxu1  ;;  %v3680_v20 = vld [vmem:[%s3192_s25 + $0x38] sm:$0xff] }
 0x147   : > { %v599_v61 = vadd.f32 %v598_v30, %v3482_v4  ;;  %v2267_v4 = vrot.slane %v3638_v41, 1  ;;  %v3068_v30 = vld [vmem:[%s3192_s25 + $0x20] sm:$0xff]  ;;  %v2028_v27 = vshll.u32 %v3680_v20, 16  ;;  %v2026_v41 = vor.u32 %v2024_v60, %v2022_v45 }
 0x148   : > { %v1058_v1 = vadd.f32 %v1007_v19, %v806_v25  ;;  %v1382_v2 = vpop.f32.mrf.mxu0  ;;  %v1017_v35 = vpop.f32.mrf.mxu3 }
 0x149   : > { %2858 = vmatmul.msk.bf16.gmra.mxu1 %vm394_vm3, %v1455_v44 }
 0x14a   : > { %2929 = vmatmul.msk.bf16.gmra.mxu2 %vm394_vm3, %v3067_v34  ;;  %v3670_v51 = vadd.f32 %v1379_v49, %v1058_v1  ;;  %v1456_v49 = vrot.slane %v3361_v31, 1  ;;  %v2268_v31 = vsel %vm639_vm4, %v2265_v39, %v2267_v4 }
 0x14b   : > { %3011 = vmatmul.msk.bf16.gmra.mxu0 %vm394_vm3, %v2266_v21  ;;  %v2030_v21 = vrot.slane %v2028_v27, 1 }
 0x14c   : > { %2998 = vmatmul.msk.bf16.gmra.mxu3 %vm394_vm3, %v2023_v10 }
 0x14d   : > { %v758_v55 = vpop.f32.mrf.mxu2  ;;  %v2031_v39 = vsel %vm277_vm2, %v2026_v41, %v2030_v21 }
 0x14e   : > { %v807_v19 = vadd.f32 %v758_v55, %v599_v61  ;;  %v600_v54 = vpop.f32.mrf.mxu1 }
 0x14f   : > { %v601_v16 = vadd.f32 %v600_v54, %v3498_v6 }
 0x150   : > { %v1059_v42 = vadd.f32 %v1010_v11, %v807_v19  ;;  %v1384_v33 = vpop.f32.mrf.mxu0  ;;  %v1020_v25 = vpop.f32.mrf.mxu3  ;;  %v1457_v11 = vsel %vm639_vm4, %v1454_v14, %v1456_v49 }
 0x152   : > { %v3676_v9 = vadd.f32 %v1382_v2, %v1059_v42  ;;  %v1458_v42 = vrot.slane %v3375_v43, 1 }
 0x155   : > { %v760_v36 = vpop.f32.mrf.mxu2 }
 0x156   : > { %v808_v34 = vadd.f32 %v760_v36, %v601_v16  ;;  %v603_v44 = vpop.f32.mrf.mxu1 }
 0x157   : > { %v604_v14 = vadd.f32 %v603_v44, %v3409_v63  ;;  %v2269_v63 = vrot.slane %v3659_v3, 1 }
 0x158   : > { %v1060_v1 = vadd.f32 %v1012_v18, %v808_v34  ;;  %v1387_v2 = vpop.f32.mrf.mxu0  ;;  %v1022_v61 = vpop.f32.mrf.mxu3 }
 0x159   : > { %2859 = vmatmul.msk.bf16.gmra.mxu1 %vm394_vm3, %v1457_v11  ;;  %v2032_v11 = vshrl.u32 %v3680_v20, 16  ;;  %v2270_v43 = vsel %vm639_vm4, %v2267_v4, %v2269_v63 }
 0x15a   : > { %2930 = vmatmul.msk.bf16.gmra.mxu2 %vm394_vm3, %v3068_v30  ;;  %v3691_v6 = vadd.f32 %v1384_v33, %v1060_v1  ;;  %v3701_v33 = vld [vmem:[%s3192_s25 + $0x40] sm:$0xff]  ;;  %v3069_v30 = vld [vmem:[%s3192_s25 + $0x28] sm:$0xff] }
 0x15b   : > { %3012 = vmatmul.msk.bf16.gmra.mxu0 %vm394_vm3, %v2268_v31  ;;  %v2036_v60 = vshll.u32 %v3701_v33, 16  ;;  %v2034_v3 = vor.u32 %v2032_v11, %v2030_v21 }
 0x15c   : > { %2999 = vmatmul.msk.bf16.gmra.mxu3 %vm394_vm3, %v2031_v39  ;;  %v1460_v39 = vrot.slane %v3389_v53, 1 }
 0x15d   : > { %v763_v46 = vpop.f32.mrf.mxu2 }
 0x15e   : > { %v809_v18 = vadd.f32 %v763_v46, %v604_v14  ;;  %v605_v55 = vpop.f32.mrf.mxu1 }
 0x15f   : > { %v606_v45 = vadd.f32 %v605_v55, %v3420_v7 }
 0x160   : > { %v1061_v19 = vadd.f32 %v1015_v58, %v809_v18  ;;  %v1389_v54 = vpop.f32.mrf.mxu0  ;;  %v1025_v36 = vpop.f32.mrf.mxu3  ;;  %v1459_v58 = vsel %vm639_vm4, %v1456_v49, %v1458_v42 }
 0x162   : > { %v3697_v10 = vadd.f32 %v1387_v2, %v1061_v19  ;;  %v2038_v2 = vrot.slane %v2036_v60, 1  ;;  %v3722_v19 = vld [vmem:[%s3192_s25 + $0x48] sm:$0xff] }
 0x164   : > { %v2039_v4 = vsel %vm277_vm2, %v2034_v3, %v2038_v2 }
 0x165   : > { %v765_v16 = vpop.f32.mrf.mxu2 }
 0x166   : > { %v810_v34 = vadd.f32 %v765_v16, %v606_v45  ;;  %v608_v44 = vpop.f32.mrf.mxu1 }
 0x167   : > { %v609_v49 = vadd.f32 %v608_v44, %v3437_v24  ;;  %v2271_v24 = vrot.slane %v3680_v20, 1  ;;  %v2040_v44 = vshrl.u32 %v3701_v33, 16 }
 0x168   : > { %v1062_v27 = vadd.f32 %v1017_v35, %v810_v34  ;;  %v1392_v1 = vpop.f32.mrf.mxu0  ;;  %v1027_v41 = vpop.f32.mrf.mxu3  ;;  %v3070_v34 = vld [vmem:[%s3192_s25 + $0x30] sm:$0xff] }
 0x169   : > { %2860 = vmatmul.msk.bf16.gmra.mxu1 %vm394_vm3, %v1459_v58  ;;  %v2044_v58 = vshll.u32 %v3722_v19, 16  ;;  %v2272_v53 = vsel %vm639_vm4, %v2269_v63, %v2271_v24  ;;  %v2042_v20 = vor.u32 %v2040_v44, %v2038_v2 }
 0x16a   : > { %2931 = vmatmul.msk.bf16.gmra.mxu2 %vm394_vm3, %v3069_v30  ;;  %v3712_v7 = vadd.f32 %v1389_v54, %v1062_v27 }
 0x16b   : > { %3013 = vmatmul.msk.bf16.gmra.mxu0 %vm394_vm3, %v2270_v43  ;;  %v2046_v27 = vrot.slane %v2044_v58, 1 }
 0x16c   : > { %3000 = vmatmul.msk.bf16.gmra.mxu3 %vm394_vm3, %v2039_v4  ;;  %v3743_v4 = vld [vmem:[%s3192_s25 + $0x50] sm:$0xff] }
 0x16d   : > { %v768_v31 = vpop.f32.mrf.mxu2  ;;  %v2047_v63 = vsel %vm277_vm2, %v2042_v20, %v2046_v27 }
 0x16e   : > { %v811_v35 = vadd.f32 %v768_v31, %v609_v49  ;;  %v610_v14 = vpop.f32.mrf.mxu1 }
 0x16f   : > { %v611_v21 = vadd.f32 %v610_v14, %v3450_v37  ;;  %v1462_v14 = vrot.slane %v3407_v62, 1 }
 0x170   : > { %v1063_v46 = vadd.f32 %v1020_v25, %v811_v35  ;;  %v1394_v18 = vpop.f32.mrf.mxu0  ;;  %v1030_v45 = vpop.f32.mrf.mxu3  ;;  %v1461_v25 = vsel %vm639_vm4, %v1458_v42, %v1460_v39 }
 0x172   : > { %v3718_v55 = vadd.f32 %v1392_v1, %v1063_v46 }
 0x175   : > { %v770_v54 = vpop.f32.mrf.mxu2 }
 0x176   : > { %v812_v16 = vadd.f32 %v770_v54, %v611_v21  ;;  %v613_v30 = vpop.f32.mrf.mxu1  ;;  %v3071_v54 = vld [vmem:[%s3192_s25 + $0x38] sm:$0xff] }
 0x177   : > { %v614_v42 = vadd.f32 %v613_v30, %v3467_v48  ;;  %v2273_v48 = vrot.slane %v3701_v33, 1  ;;  %v2052_v30 = vshll.u32 %v3743_v4, 16 }
 0x178   : > { %v1064_v11 = vadd.f32 %v1022_v61, %v812_v16  ;;  %v1397_v60 = vpop.f32.mrf.mxu0  ;;  %v1032_v43 = vpop.f32.mrf.mxu3 }
 0x179   : > { %2861 = vmatmul.msk.bf16.gmra.mxu1 %vm394_vm3, %v1461_v25  ;;  %v2274_v62 = vsel %vm639_vm4, %v2271_v24, %v2273_v48  ;;  %v2054_v58 = vrot.slane %v2052_v30, 1 }
 0x17a   : > { %2932 = vmatmul.msk.bf16.gmra.mxu2 %vm394_vm3, %v3070_v34  ;;  %v3733_v37 = vadd.f32 %v1394_v18, %v1064_v11  ;;  %v2048_v34 = vshrl.u32 %v3722_v19, 16 }
 0x17b   : > { %3014 = vmatmul.msk.bf16.gmra.mxu0 %vm394_vm3, %v2272_v53 }
 0x17c   : > { %3001 = vmatmul.msk.bf16.gmra.mxu3 %vm394_vm3, %v2047_v63  ;;  %v2050_v33 = vor.u32 %v2048_v34, %v2046_v27 }
 0x17d   : > { %v773_v1 = vpop.f32.mrf.mxu2 }
 0x17e   : > { %v813_v61 = vadd.f32 %v773_v1, %v614_v42  ;;  %v615_v3 = vpop.f32.mrf.mxu1  ;;  %v2055_v24 = vsel %vm277_vm2, %v2050_v33, %v2054_v58 }
 0x17f   : > { %v616_v2 = vadd.f32 %v615_v3, %v3480_v57  ;;  %v3764_v3 = vld [vmem:[%s3192_s25 + $0x58] sm:$0xff] }
 0x180   : > { %v1065_v49 = vadd.f32 %v1025_v36, %v813_v61  ;;  %v1399_v31 = vpop.f32.mrf.mxu0  ;;  %v1035_v18 = vpop.f32.mrf.mxu3  ;;  %v1463_v36 = vsel %vm639_vm4, %v1460_v39, %v1462_v14  ;;  %v1464_v61 = vrot.slane %v3435_v23, 1 }
 0x182   : > { %v3739_v35 = vadd.f32 %v1397_v60, %v1065_v49 }
 0x185   : > { %v775_v46 = vpop.f32.mrf.mxu2 }
 0x186   : > { %v814_v21 = vadd.f32 %v775_v46, %v616_v2  ;;  %v618_v16 = vpop.f32.mrf.mxu1  ;;  %v3072_v2 = vld [vmem:[%s3192_s25 + $0x40] sm:$0xff] }
 0x187   : > { %v619_v39 = vadd.f32 %v618_v16, %v3495_v5  ;;  %v2275_v5 = vrot.slane %v3722_v19, 1 }
 0x188   : > { %v1066_v25 = vadd.f32 %v1027_v41, %v814_v21  ;;  %v1402_v44 = vpop.f32.mrf.mxu0  ;;  %v1037_v60 = vpop.f32.mrf.mxu3  ;;  %v2056_v21 = vshrl.u32 %v3743_v4, 16 }
 0x189   : > { %2862 = vmatmul.msk.bf16.gmra.mxu1 %vm394_vm3, %v1463_v36  ;;  %v2276_v23 = vsel %vm639_vm4, %v2273_v48, %v2275_v5 }
 0x18a   : > { %2933 = vmatmul.msk.bf16.gmra.mxu2 %vm394_vm3, %v3071_v54  ;;  %v3754_v57 = vadd.f32 %v1399_v31, %v1066_v25  ;;  %v2060_v54 = vshll.u32 %v3764_v3, 16  ;;  %v2058_v19 = vor.u32 %v2056_v21, %v2054_v58 }
 0x18b   : > { %3015 = vmatmul.msk.bf16.gmra.mxu0 %vm394_vm3, %v2274_v62 }
 0x18c   : > { %3002 = vmatmul.msk.bf16.gmra.mxu3 %vm394_vm3, %v2055_v24  ;;  %v2062_v34 = vrot.slane %v2060_v54, 1 }
 0x18d   : > { %v778_v11 = vpop.f32.mrf.mxu2 }
 0x18e   : > { %v815_v41 = vadd.f32 %v778_v11, %v619_v39  ;;  %v620_v53 = vpop.f32.mrf.mxu1  ;;  %v2063_v48 = vsel %vm277_vm2, %v2058_v19, %v2062_v34  ;;  %v1466_v11 = vrot.slane %v3465_v47, 1 }
 0x18f   : > { %v621_v27 = vadd.f32 %v620_v53, %v3506_v32 }
 0x190   : > { %v1067_v20 = vadd.f32 %v1030_v45, %v815_v41  ;;  %v1404_v42 = vpop.f32.mrf.mxu0  ;;  %v1040_v49 = vpop.f32.mrf.mxu3  ;;  %v1465_v45 = vsel %vm639_vm4, %v1462_v14, %v1464_v61  ;;  %v3785_v41 = vld [vmem:[%s3192_s25 + $0x60] sm:$0xff] }
 0x192   : > { %v3760_v1 = vadd.f32 %v1402_v44, %v1067_v20 }
 0x195   : > { %v780_v63 = vpop.f32.mrf.mxu2 }
 0x196   : > { %v816_v31 = vadd.f32 %v780_v63, %v621_v27  ;;  %v623_v46 = vpop.f32.mrf.mxu1  ;;  %v2064_v63 = vshrl.u32 %v3764_v3, 16 }
 0x197   : > { %v624_v14 = vadd.f32 %v623_v46, %v3422_v8  ;;  %v2277_v8 = vrot.slane %v3743_v4, 1 }
 0x198   : > { %v1068_v16 = vadd.f32 %v1032_v43, %v816_v31  ;;  %v1407_v36 = vpop.f32.mrf.mxu0  ;;  %v1042_v25 = vpop.f32.mrf.mxu3  ;;  %v2068_v31 = vshll.u32 %v3785_v41, 16  ;;  %v2066_v4 = vor.u32 %v2064_v63, %v2062_v34  ;;  %v4041_v34 = vld [vmem:[#allocation2_spill] sm:$0xff] }
 0x199   : > { %2863 = vmatmul.msk.bf16.gmra.mxu1 %vm394_vm3, %v1465_v45  ;;  %v2278_v47 = vsel %vm639_vm4, %v2275_v5, %v2277_v8 }
 0x19a   : > { %2934 = vmatmul.msk.bf16.gmra.mxu2 %vm394_vm3, %v3072_v2  ;;  %v3775_v32 = vadd.f32 %v1404_v42, %v1068_v16  ;;  %v3073_v42 = vld [vmem:[%s3192_s25 + $0x48] sm:$0xff]  ;;  %v2070_v45 = vrot.slane %v2068_v31, 1 }
 0x19b   : > { %3016 = vmatmul.msk.bf16.gmra.mxu0 %vm394_vm3, %v2276_v23 }
 0x19c   : > { %3003 = vmatmul.msk.bf16.gmra.mxu3 %vm394_vm3, %v2063_v48  ;;  %v2071_v5 = vsel %vm277_vm2, %v2066_v4, %v2070_v45 }
 0x19d   : > { %v783_v30 = vpop.f32.mrf.mxu2 }
 0x19e   : > { %v817_v43 = vadd.f32 %v783_v30, %v624_v14  ;;  %v625_v44 = vpop.f32.mrf.mxu1  ;;  %v4040_v14 = vld [vmem:[#allocation3_spill] sm:$0xff] }
 0x19f   : > { %v626_v58 = vadd.f32 %v625_v44, %v3439_v26  ;;  %v1468_v30 = vrot.slane %v4040_v14, 1 }
 0x1a0   : > { %v1069_v62 = vadd.f32 %v1035_v18, %v817_v43  ;;  %v1409_v33 = vpop.f32.mrf.mxu0  ;;  %v2158_v24 = vpop.f32.mrf.mxu3  ;;  %v1467_v18 = vsel %vm639_vm4, %v1464_v61, %v1466_v11  ;;  %v3806_v43 = vld [vmem:[%s3192_s25 + $0x68] sm:$0xff] }
 0x1a2   : > { %v3781_v39 = vadd.f32 %v1407_v36, %v1069_v62 }
 0x1a5   : > { %v785_v53 = vpop.f32.mrf.mxu2 }
 0x1a6   : > { %v818_v20 = vadd.f32 %v785_v53, %v626_v58  ;;  %v628_v27 = vpop.f32.mrf.mxu1  ;;  %v3074_v58 = vld [vmem:[%s3192_s25 + $0x50] sm:$0xff] }
 0x1a7   : > { %v629_v61 = vadd.f32 %v628_v27, %v3452_v38  ;;  %v2279_v38 = vrot.slane %v3764_v3, 1 }
 0x1a8   : > { %v1070_v2 = vadd.f32 %v1037_v60, %v818_v20  ;;  %v1412_v46 = vpop.f32.mrf.mxu0  ;;  %v2160_v54 = vpop.f32.mrf.mxu3  ;;  %v2072_v20 = vshrl.u32 %v3785_v41, 16 }
 0x1a9   : > { %2864 = vmatmul.msk.bf16.gmra.mxu1 %vm394_vm3, %v1467_v18  ;;  %v2280_v63 = vsel %vm639_vm4, %v2277_v8, %v2279_v38 }
 0x1aa   : > { %2935 = vmatmul.msk.bf16.gmra.mxu2 %vm394_vm3, %v3073_v42  ;;  %v3796_v26 = vadd.f32 %v1409_v33, %v1070_v2  ;;  %v2076_v42 = vshll.u32 %v3806_v43, 16  ;;  %v2074_v31 = vor.u32 %v2072_v20, %v2070_v45  ;;  %v3835_v45 = vld [vmem:[%s3192_s25 + $0x70] sm:$0xff] }
 0x1ab   : > { %3017 = vmatmul.msk.bf16.gmra.mxu0 %vm394_vm3, %v2278_v47 }
 0x1ac   : > { %3004 = vmatmul.msk.bf16.gmra.mxu3 %vm394_vm3, %v2071_v5 }
 0x1ad   : > { %v788_v21 = vpop.f32.mrf.mxu2 }
 0x1ae   : > { %v819_v60 = vadd.f32 %v788_v21, %v629_v61  ;;  %v630_v16 = vpop.f32.mrf.mxu1  ;;  %v3829_v21 = vld [vmem:[%s4029_s2] ss:$0 sm:$0xff] }
 0x1af   : > { %v631_v44 = vadd.f32 %v630_v16, %v4041_v34 }
 0x1b0   : > { %v1071_v36 = vadd.f32 %v1040_v49, %v819_v60  ;;  %v1414_v23 = vpop.f32.mrf.mxu0  ;;  %v3810_v62 = vpop.f32.mrf.mxu3  ;;  %v1469_v49 = vsel %vm639_vm4, %v1466_v11, %v1468_v30  ;;  %v2078_v11 = vrot.slane %v2076_v42, 1 }
 0x1b2   : > { %v3802_v19 = vadd.f32 %v1412_v46, %v1071_v36  ;;  %v2079_v8 = vsel %vm277_vm2, %v2074_v31, %v2078_v11 }
 0x1b5   : > { %v790_v48 = vpop.f32.mrf.mxu2 }
 0x1b6   : > { %v820_v33 = vadd.f32 %v790_v48, %v631_v44  ;;  %v1534_v53 = vpop.f32.mrf.mxu1  ;;  %v3075_v48 = vld [vmem:[%s3192_s25 + $0x58] sm:$0xff] }
 0x1b7   : > { %v1604_v2 = vadd.f32 %v1534_v53, %v3523_v13  ;;  %v1470_v13 = vrot.slane %v3516_v40, 1 }
 0x1b8   : > { %v1072_v27 = vadd.f32 %v1042_v25, %v820_v33  ;;  %v2345_v18 = vpop.f32.mrf.mxu0  ;;  %v3823_v47 = vpop.f32.mrf.mxu3 }
 0x1b9   : > { %2865 = vmatmul.msk.bf16.gmra.mxu1 %vm394_vm3, %v1469_v49  ;;  %v1471_v33 = vsel %vm639_vm4, %v1468_v30, %v1470_v13 }
 0x1ba   : > { %2936 = vmatmul.msk.bf16.gmra.mxu2 %vm394_vm3, %v3074_v58  ;;  %v3819_v3 = vadd.f32 %v1414_v23, %v1072_v27 }
 0x1bb   : > { %3018 = vmatmul.msk.bf16.gmra.mxu0 %vm394_vm3, %v2280_v63 }
 0x1bc   : > { %3005 = vmatmul.msk.bf16.gmra.mxu3 %vm394_vm3, %v2079_v8 }
 0x1bd   : > { %v1786_v46 = vpop.f32.mrf.mxu2 }
 0x1be   : > { %v1856_v25 = vadd.f32 %v1786_v46, %v1604_v2  ;;  %v1536_v4 = vpop.f32.mrf.mxu1 }
 0x1bf   : > { %v1605_v36 = vadd.f32 %v1536_v4, %v3532_v12  ;;  %v2080_v12 = vshrl.u32 %v3806_v43, 16 }
 0x1c0   : > { %v2228_v61 = vadd.f32 %v2158_v24, %v1856_v25  ;;  %v2347_v60 = vpop.f32.mrf.mxu0  ;;  %v2281_v24 = vrot.slane %v3785_v41, 1  ;;  %v3840_v14 = vpop.f32.mrf.mxu3  ;;  %v2084_v41 = vshll.u32 %v3835_v45, 16 }
 0x1c1   : > { %v2082_v30 = vor.u32 %v2080_v12, %v2078_v11 }
 0x1c2   : > { %v2415_v16 = vadd.f32 %v2345_v18, %v2228_v61  ;;  %v2282_v20 = vsel %vm639_vm4, %v2279_v38, %v2281_v24  ;;  %v2086_v27 = vrot.slane %v2084_v41, 1 }
 0x1c4   : > { %v2447_v5 = vadd.f32 %v3829_v21, %v2415_v16  ;;  %v2087_v25 = vsel %vm277_vm2, %v2082_v30, %v2086_v27 }
 0x1c5   : > { %v1788_v23 = vpop.f32.mrf.mxu2 }
 0x1c6   : > { %v2475_v34 = vmax.f32 %v2447_v5, 0.0  ;;  %v1857_v44 = vadd.f32 %v1788_v23, %v1605_v36  ;;  %v1539_v40 = vpop.f32.mrf.mxu1  ;;  %v4042_v5 = vld [vmem:[#allocation4_spill] sm:$0xff]  ;;  %v2283_v23 = vrot.slane %v3806_v43, 1 }
 0x1c8   : > { %v2503_v58 = vpack.c.bf16 %v2475_v34, %v2475_v34  ;;  %v2229_v53 = vadd.f32 %v2160_v54, %v1857_v44  ;;  %v2350_v49 = vpop.f32.mrf.mxu0  ;;  %v1606_v54 = vadd.f32 %v1539_v40, %v3543_v22  ;;  %v3859_v31 = vpop.f32.mrf.mxu3  ;;  %v1472_v22 = vrot.slane %v3536_v50, 1  ;;  %v3076_v40 = vld [vmem:[%s3192_s25 + $0x60] sm:$0xff] }
 0x1c9   : > { %2866 = vmatmul.msk.bf16.gmra.mxu1 %vm394_vm3, %v1471_v33  ;;  %v2088_v50 = vshrl.u32 %v3835_v45, 16  ;;  %v2284_v43 = vsel %vm639_vm4, %v2281_v24, %v2283_v23 }
 0x1ca   : > { %2532 = vst.msk [vmem:[%s3846_s13] sm:$0xf] %vm2531_vm5, %v2503_v58  ;;  %v2416_v42 = vadd.f32 %v2347_v60, %v2229_v53  ;;  %2937 = vmatmul.msk.bf16.gmra.mxu2 %vm394_vm3, %v3075_v48  ;;  %v3868_v60 = vld [vmem:[%s3192_s25 + $0x78] sm:$0xff]  ;;  %v1473_v12 = vsel %vm639_vm4, %v1470_v13, %v1472_v22 }
 0x1cb   : > { %3019 = vmatmul.msk.bf16.gmra.mxu0 %vm394_vm3, %v2282_v20  ;;  %v2092_v41 = vshll.u32 %v3868_v60, 16  ;;  %v2090_v13 = vor.u32 %v2088_v50, %v2086_v27 }
 0x1cc   : > { %v2448_v18 = vadd.f32 %v3829_v21, %v2416_v42  ;;  %3006 = vmatmul.msk.bf16.gmra.mxu3 %vm394_vm3, %v2087_v25 }
 0x1cd   : > { %v1791_v63 = vpop.f32.mrf.mxu2  ;;  %v2094_v42 = vrot.slane %v2092_v41, 1  ;;  %v3077_v41 = vld [vmem:[%s3192_s25 + $0x68] sm:$0xff] }
 0x1ce   : > { %v2476_v38 = vmax.f32 %v2448_v18, 0.0  ;;  %v1858_v2 = vadd.f32 %v1791_v63, %v1606_v54  ;;  %v1541_v46 = vpop.f32.mrf.mxu1  ;;  %v4043_v18 = vld [vmem:[#allocation6_spill] sm:$0xff] }
 0x1cf   : > { %v1607_v36 = vadd.f32 %v1541_v46, %v4042_v5  ;;  %v2095_v25 = vsel %vm277_vm2, %v2090_v13, %v2094_v42 }
 0x1d0   : > { %v2504_v4 = vpack.c.bf16 %v2476_v38, %v2476_v38  ;;  %v2230_v8 = vadd.f32 %v3810_v62, %v1858_v2  ;;  %v2352_v61 = vpop.f32.mrf.mxu0  ;;  %v3873_v44 = vpop.f32.mrf.mxu3 }
 0x1d2   : > { %2533 = vst.msk [vmem:[%s3846_s13 + $0x4] sm:$0xf] %vm2531_vm5, %v2504_v4  ;;  %v2417_v11 = vadd.f32 %v2350_v49, %v2230_v8 }
 0x1d4   : > { %v2449_v16 = vadd.f32 %v3829_v21, %v2417_v11 }
 0x1d5   : > { %v1793_v34 = vpop.f32.mrf.mxu2 }
 0x1d6   : > { %v2477_v62 = vmax.f32 %v2449_v16, 0.0  ;;  %v1859_v48 = vadd.f32 %v1793_v34, %v1607_v36  ;;  %v1544_v33 = vpop.f32.mrf.mxu1  ;;  %v4044_v16 = vld [vmem:[#allocation5_spill] sm:$0xff] }
 0x1d7   : > { %v1608_v54 = vadd.f32 %v1544_v33, %v4043_v18  ;;  %v1474_v5 = vrot.slane %v4044_v16, 1 }
 0x1d8   : > { %v2505_v58 = vpack.c.bf16 %v2477_v62, %v2477_v62  ;;  %v2231_v53 = vadd.f32 %v3823_v47, %v1859_v48  ;;  %v2355_v49 = vpop.f32.mrf.mxu0  ;;  %v1912_v47 = vld [vmem:[%s3192_s25 + $0x80] sm:$0x1]  ;;  %v3889_v38 = vpop.f32.mrf.mxu3  ;;  %v4045_v62 = vld [vmem:[#allocation7_spill] sm:$0xff] }
 0x1d9   : > { %2867 = vmatmul.msk.bf16.gmra.mxu1 %vm394_vm3, %v1473_v12  ;;  %v1972_v4 = vunpack.c.l.b16 %v1912_v47 }
 0x1da   : > { %2534 = vst.msk [vmem:[%s3846_s13 + $0x8] sm:$0xf] %vm2531_vm5, %v2505_v58  ;;  %v2418_v20 = vadd.f32 %v2352_v61, %v2231_v53  ;;  %2938 = vmatmul.msk.bf16.gmra.mxu2 %vm394_vm3, %v3076_v40  ;;  %v2285_v40 = vrot.slane %v3835_v45, 1  ;;  %v1475_v53 = vsel %vm639_vm4, %v1472_v22, %v1474_v5 }
 0x1db   : > { %3020 = vmatmul.msk.bf16.gmra.mxu0 %vm394_vm3, %v2284_v43  ;;  %v3897_v36 = vpack.c.b16 %v1972_v4, %v1972_v4 }
 0x1dc   : > { %v2450_v30 = vadd.f32 %v3829_v21, %v2418_v20  ;;  %3007 = vmatmul.msk.bf16.gmra.mxu3 %vm394_vm3, %v2095_v25  ;;  %v2286_v18 = vsel %vm639_vm4, %v2283_v23, %v2285_v40 }
 0x1dd   : > { %v1796_v63 = vpop.f32.mrf.mxu2  ;;  %v2100_v43 = vshll.u32 %v3897_v36, 16 }
 0x1de   : > { %v2478_v24 = vmax.f32 %v2450_v30, 0.0  ;;  %v1860_v2 = vadd.f32 %v1796_v63, %v1608_v54  ;;  %v1546_v46 = vpop.f32.mrf.mxu1  ;;  %v4046_v63 = vld [vmem:[#allocation8_spill] sm:$0xff] }
 0x1df   : > { %v1609_v48 = vadd.f32 %v1546_v46, %v4045_v62  ;;  %v2102_v54 = vrot.slane %v2100_v43, 1  ;;  %v2287_v62 = vrot.slane %v3868_v60, 1 }
 0x1e0   : > { %v2506_v8 = vpack.c.bf16 %v2478_v24, %v2478_v24  ;;  %v2232_v61 = vadd.f32 %v3840_v14, %v1860_v2  ;;  %v2357_v27 = vpop.f32.mrf.mxu0  ;;  %v2178_v12 = vpop.f32.mrf.mxu3 }
 0x1e2   : > { %2535 = vst.msk [vmem:[%s3846_s13 + $0xc] sm:$0xf] %vm2531_vm5, %v2506_v8  ;;  %v2419_v11 = vadd.f32 %v2355_v49, %v2232_v61  ;;  %v2096_v49 = vshrl.u32 %v3868_v60, 16 }
 0x1e4   : > { %v2451_v34 = vadd.f32 %v3829_v21, %v2419_v11  ;;  %v2098_v22 = vor.u32 %v2096_v49, %v2094_v42  ;;  %v1476_v11 = vrot.slane %v3576_v28, 1  ;;  %v2288_v28 = vsel %vm639_vm4, %v2285_v40, %v2287_v62 }
 0x1e5   : > { %v1798_v33 = vpop.f32.mrf.mxu2 }
 0x1e6   : > { %v2479_v14 = vmax.f32 %v2451_v34, 0.0  ;;  %v1861_v50 = vadd.f32 %v1798_v33, %v1609_v48  ;;  %v1549_v58 = vpop.f32.mrf.mxu1  ;;  %v2103_v4 = vsel %vm277_vm2, %v2098_v22, %v2102_v54 }
 0x1e7   : > { %v1610_v24 = vadd.f32 %v1549_v58, %v4046_v63  ;;  %v1477_v58 = vsel %vm639_vm4, %v1474_v5, %v1476_v11 }
 0x1e8   : > { %v2507_v20 = vpack.c.bf16 %v2479_v14, %v2479_v14  ;;  %v2233_v13 = vadd.f32 %v3859_v31, %v1861_v50  ;;  %v2360_v30 = vpop.f32.mrf.mxu0  ;;  %v2180_v2 = vpop.f32.mrf.mxu3 }
 0x1e9   : > { %2868 = vmatmul.msk.bf16.gmra.mxu1 %vm394_vm3, %v1475_v53 }
 0x1ea   : > { %2536 = vst.msk [vmem:[%s3846_s13 + $0x10] sm:$0xf] %vm2531_vm5, %v2507_v20  ;;  %v2420_v45 = vadd.f32 %v2357_v27, %v2233_v13  ;;  %2939 = vmatmul.msk.bf16.gmra.mxu2 %vm394_vm3, %v3077_v41 }
 0x1eb   : > { %3021 = vmatmul.msk.bf16.gmra.mxu0 %vm394_vm3, %v2286_v18 }
 0x1ec   : > { %v2452_v47 = vadd.f32 %v3829_v21, %v2420_v45  ;;  %3008 = vmatmul.msk.bf16.gmra.mxu3 %vm394_vm3, %v2103_v4  ;;  %v3079_v4 = vld [vmem:[%s3192_s25 + $0x78] sm:$0xff] }
 0x1ed   : > { %v1801_v31 = vpop.f32.mrf.mxu2 }
 0x1ee   : > { %v2480_v46 = vmax.f32 %v2452_v47, 0.0  ;;  %v1862_v23 = vadd.f32 %v1801_v31, %v1610_v24  ;;  %v1551_v25 = vpop.f32.mrf.mxu1  ;;  %v1478_v47 = vrot.slane %v3603_v59, 1 }
 0x1ef   : > { %v1611_v34 = vadd.f32 %v1551_v25, %v3599_v15 }
 0x1f0   : > { %v2508_v8 = vpack.c.bf16 %v2480_v46, %v2480_v46  ;;  %v2234_v61 = vadd.f32 %v3873_v44, %v1862_v23  ;;  %v2362_v27 = vpop.f32.mrf.mxu0  ;;  %v2183_v33 = vpop.f32.mrf.mxu3  ;;  %v3078_v44 = vld [vmem:[%s3192_s25 + $0x70] sm:$0xff] }
 0x1f2   : > { %2537 = vst.msk [vmem:[%s3846_s13 + $0x14] sm:$0xf] %vm2531_vm5, %v2508_v8  ;;  %v2421_v42 = vadd.f32 %v2360_v30, %v2234_v61 }
 0x1f4   : > { %v2453_v16 = vadd.f32 %v3829_v21, %v2421_v42 }
 0x1f5   : > { %v1803_v48 = vpop.f32.mrf.mxu2 }
 0x1f6   : > { %v2481_v14 = vmax.f32 %v2453_v16, 0.0  ;;  %v1863_v50 = vadd.f32 %v1803_v48, %v1611_v34  ;;  %v1554_v41 = vpop.f32.mrf.mxu1 }
 0x1f7   : > { %v1612_v5 = vadd.f32 %v1554_v41, %v3609_v52  ;;  %v2289_v52 = vrot.slane %v3897_v36, 1 }
 0x1f8   : > { %v2509_v53 = vpack.c.bf16 %v2481_v14, %v2481_v14  ;;  %v2235_v49 = vadd.f32 %v3889_v38, %v1863_v50  ;;  %v2365_v43 = vpop.f32.mrf.mxu0  ;;  %v2185_v13 = vpop.f32.mrf.mxu3 }
 0x1f9   : > { %2869 = vmatmul.msk.bf16.gmra.mxu1 %vm394_vm3, %v1477_v58  ;;  %v2290_v16 = vsel %vm639_vm4, %v2287_v62, %v2289_v52 }
 0x1fa   : > { %2538 = vst.msk [vmem:[%s3846_s13 + $0x18] sm:$0xf] %vm2531_vm5, %v2509_v53  ;;  %v2422_v15 = vadd.f32 %v2362_v27, %v2235_v49  ;;  %2940 = vmatmul.msk.bf16.gmra.mxu2 %vm394_vm3, %v3078_v44 }
 0x1fb   : > { %3022 = vmatmul.msk.bf16.gmra.mxu0 %vm394_vm3, %v2288_v28 }
 0x1fc   : > { %v2454_v60 = vadd.f32 %v3829_v21, %v2422_v15 }
 0x1fd   : > { %v1806_v20 = vpop.f32.mrf.mxu2 }
 0x1fe   : > { %v2482_v38 = vmax.f32 %v2454_v60, 0.0  ;;  %v1864_v30 = vadd.f32 %v1806_v20, %v1612_v5  ;;  %v1556_v40 = vpop.f32.mrf.mxu1 }
 0x1ff   : > { %v1613_v24 = vadd.f32 %v1556_v40, %v3623_v56 }
 0x200   : > { %v2510_v18 = vpack.c.bf16 %v2482_v38, %v2482_v38  ;;  %v2236_v45 = vadd.f32 %v2178_v12, %v1864_v30  ;;  %v2367_v22 = vpop.f32.mrf.mxu0  ;;  %v2188_v46 = vpop.f32.mrf.mxu3  ;;  %v1479_v12 = vsel %vm639_vm4, %v1476_v11, %v1478_v47 }
 0x202   : > { %2539 = vst.msk [vmem:[%s3846_s13 + $0x1c] sm:$0xf] %vm2531_vm5, %v2510_v18  ;;  %v2423_v54 = vadd.f32 %v2365_v43, %v2236_v45 }
 0x204   : > { %v2455_v63 = vadd.f32 %v3829_v21, %v2423_v54 }
 0x205   : > { %v1808_v31 = vpop.f32.mrf.mxu2 }
 0x206   : > { %v2483_v23 = vmax.f32 %v2455_v63, 0.0  ;;  %v1865_v25 = vadd.f32 %v1808_v31, %v1613_v24  ;;  %v1559_v8 = vpop.f32.mrf.mxu1 }
 0x207   : > { %v1614_v36 = vadd.f32 %v1559_v8, %v3634_v17 }
 0x208   : > { %v2511_v61 = vpack.c.bf16 %v2483_v23, %v2483_v23  ;;  %v2237_v27 = vadd.f32 %v2180_v2, %v1865_v25  ;;  %v2370_v42 = vpop.f32.mrf.mxu0  ;;  %v2190_v34 = vpop.f32.mrf.mxu3 }
 0x209   : > { %2870 = vmatmul.msk.bf16.gmra.mxu1 %vm394_vm3, %v1479_v12 }
 0x20a   : > { %2540 = vst.msk [vmem:[%s3846_s13 + $0x20] sm:$0xf] %vm2531_vm5, %v2511_v61  ;;  %v2424_v59 = vadd.f32 %v2367_v22, %v2237_v27  ;;  %2941 = vmatmul.msk.bf16.gmra.mxu2 %vm394_vm3, %v3079_v4 }
 0x20b   : > { %3023 = vmatmul.msk.bf16.gmra.mxu0 %vm394_vm3, %v2290_v16 }
 0x20c   : > { %v2456_v56 = vadd.f32 %v3829_v21, %v2424_v59 }
 0x20d   : > { %v1811_v11 = vpop.f32.mrf.mxu2 }
 0x20e   : > { %v2484_v2 = vmax.f32 %v2456_v56, 0.0  ;;  %v1866_v48 = vadd.f32 %v1811_v11, %v1614_v36  ;;  %v1561_v14 = vpop.f32.mrf.mxu1 }
 0x20f   : > { %v1615_v53 = vadd.f32 %v1561_v14, %v3649_v29 }
 0x210   : > { %v2512_v62 = vpack.c.bf16 %v2484_v2, %v2484_v2  ;;  %v2238_v50 = vadd.f32 %v2183_v33, %v1866_v48  ;;  %v2372_v44 = vpop.f32.mrf.mxu0  ;;  %v2193_v43 = vpop.f32.mrf.mxu3 }
 0x212   : > { %2541 = vst.msk [vmem:[%s3846_s13 + $0x24] sm:$0xf] %vm2531_vm5, %v2512_v62  ;;  %v2425_v41 = vadd.f32 %v2370_v42, %v2238_v50 }
 0x214   : > { %v2457_v58 = vadd.f32 %v3829_v21, %v2425_v41 }
 0x215   : > { %v1813_v49 = vpop.f32.mrf.mxu2 }
 0x216   : > { %v2485_v28 = vmax.f32 %v2457_v58, 0.0  ;;  %v1867_v17 = vadd.f32 %v1813_v49, %v1615_v53  ;;  %v1564_v15 = vpop.f32.mrf.mxu1 }
 0x217   : > { %v1616_v30 = vadd.f32 %v1564_v15, %v3655_v0 }
 0x218   : > { %v2513_v60 = vpack.c.bf16 %v2485_v28, %v2485_v28  ;;  %v2239_v5 = vadd.f32 %v2185_v13, %v1867_v17  ;;  %v2375_v20 = vpop.f32.mrf.mxu0  ;;  %v2195_v22 = vpop.f32.mrf.mxu3 }
 0x21a   : > { %2542 = vst.msk [vmem:[%s3846_s13 + $0x28] sm:$0xf] %vm2531_vm5, %v2513_v60  ;;  %v2426_v33 = vadd.f32 %v2372_v44, %v2239_v5 }
 0x21c   : > { %v2458_v38 = vadd.f32 %v3829_v21, %v2426_v33 }
 0x21d   : > { %v1816_v40 = vpop.f32.mrf.mxu2 }
 0x21e   : > { %v2486_v18 = vmax.f32 %v2458_v38, 0.0  ;;  %v1868_v45 = vadd.f32 %v1816_v40, %v1616_v30  ;;  %v1566_v29 = vpop.f32.mrf.mxu1 }
 0x21f   : > { %v1617_v52 = vadd.f32 %v1566_v29, %v3670_v51 }
 0x220   : > { %v2514_v54 = vpack.c.bf16 %v2486_v18, %v2486_v18  ;;  %v2240_v47 = vadd.f32 %v2188_v46, %v1868_v45  ;;  %v2377_v63 = vpop.f32.mrf.mxu0  ;;  %v2198_v61 = vpop.f32.mrf.mxu3 }
 0x222   : > { %2543 = vst.msk [vmem:[%s3846_s13 + $0x2c] sm:$0xf] %vm2531_vm5, %v2514_v54  ;;  %v2427_v13 = vadd.f32 %v2375_v20, %v2240_v47 }
 0x224   : > { %v2459_v24 = vadd.f32 %v3829_v21, %v2427_v13 }
 0x225   : > { %v1818_v31 = vpop.f32.mrf.mxu2 }
 0x226   : > { %v2487_v23 = vmax.f32 %v2459_v24, 0.0  ;;  %v1869_v25 = vadd.f32 %v1818_v31, %v1617_v52  ;;  %v1569_v0 = vpop.f32.mrf.mxu1 }
 0x227   : > { %v1618_v42 = vadd.f32 %v1569_v0, %v3676_v9 }
 0x228   : > { %v2515_v4 = vpack.c.bf16 %v2487_v23, %v2487_v23  ;;  %v2241_v8 = vadd.f32 %v2190_v34, %v1869_v25  ;;  %v2380_v12 = vpop.f32.mrf.mxu0  ;;  %v2200_v48 = vpop.f32.mrf.mxu3 }
 0x22a   : > { %2544 = vst.msk [vmem:[%s3846_s13 + $0x30] sm:$0xf] %vm2531_vm5, %v2515_v4  ;;  %v2428_v46 = vadd.f32 %v2377_v63, %v2241_v8 }
 0x22c   : > { %v2460_v27 = vadd.f32 %v3829_v21, %v2428_v46 }
 0x22d   : > { %v1821_v16 = vpop.f32.mrf.mxu2 }
 0x22e   : > { %v2488_v59 = vmax.f32 %v2460_v27, 0.0  ;;  %v1870_v56 = vadd.f32 %v1821_v16, %v1618_v42  ;;  %v1571_v51 = vpop.f32.mrf.mxu1 }
 0x22f   : > { %v1619_v62 = vadd.f32 %v1571_v51, %v3691_v6 }
 0x230   : > { %v2516_v36 = vpack.c.bf16 %v2488_v59, %v2488_v59  ;;  %v2242_v11 = vadd.f32 %v2193_v43, %v1870_v56  ;;  %v2382_v2 = vpop.f32.mrf.mxu0  ;;  %v2203_v60 = vpop.f32.mrf.mxu3 }
 0x232   : > { %2545 = vst.msk [vmem:[%s3846_s13 + $0x34] sm:$0xf] %vm2531_vm5, %v2516_v36  ;;  %v2429_v34 = vadd.f32 %v2380_v12, %v2242_v11 }
 0x234   : > { %v2461_v14 = vadd.f32 %v3829_v21, %v2429_v34 }
 0x235   : > { %v1823_v50 = vpop.f32.mrf.mxu2 }
 0x236   : > { %v2489_v44 = vmax.f32 %v2461_v14, 0.0  ;;  %v1871_v41 = vadd.f32 %v1823_v50, %v1619_v62  ;;  %v1574_v9 = vpop.f32.mrf.mxu1 }
 0x237   : > { %v1620_v17 = vadd.f32 %v1574_v9, %v3697_v10 }
 0x238   : > { %v2517_v58 = vpack.c.bf16 %v2489_v44, %v2489_v44  ;;  %v2243_v53 = vadd.f32 %v2195_v22, %v1871_v41  ;;  %v2385_v49 = vpop.f32.mrf.mxu0  ;;  %v2205_v47 = vpop.f32.mrf.mxu3 }
 0x23a   : > { %2546 = vst.msk [vmem:[%s3846_s13 + $0x38] sm:$0xf] %vm2531_vm5, %v2517_v58  ;;  %v2430_v43 = vadd.f32 %v2382_v2, %v2243_v53 }
 0x23c   : > { %v2462_v28 = vadd.f32 %v3829_v21, %v2430_v43 }
 0x23d   : > { %v1826_v15 = vpop.f32.mrf.mxu2 }
 0x23e   : > { %v2490_v5 = vmax.f32 %v2462_v28, 0.0  ;;  %v1872_v20 = vadd.f32 %v1826_v15, %v1620_v17  ;;  %v1576_v6 = vpop.f32.mrf.mxu1 }
 0x23f   : > { %v1621_v45 = vadd.f32 %v1576_v6, %v3712_v7 }
 0x240   : > { %v2518_v33 = vpack.c.bf16 %v2490_v5, %v2490_v5  ;;  %v2244_v38 = vadd.f32 %v2198_v61, %v1872_v20  ;;  %v2387_v30 = vpop.f32.mrf.mxu0  ;;  %v2208_v46 = vpop.f32.mrf.mxu3 }
 0x242   : > { %2547 = vst.msk [vmem:[%s3846_s13 + $0x3c] sm:$0xf] %vm2531_vm5, %v2518_v33  ;;  %v2431_v40 = vadd.f32 %v2385_v49, %v2244_v38 }
 0x244   : > { %v2463_v18 = vadd.f32 %v3829_v21, %v2431_v40 }
 0x245   : > { %v1828_v29 = vpop.f32.mrf.mxu2 }
 0x246   : > { %v2491_v22 = vmax.f32 %v2463_v18, 0.0  ;;  %v1873_v54 = vadd.f32 %v1828_v29, %v1621_v45  ;;  %v1579_v10 = vpop.f32.mrf.mxu1 }
 0x247   : > { %v1622_v23 = vadd.f32 %v1579_v10, %v3718_v55 }
 0x248   : > { %v2519_v63 = vpack.c.bf16 %v2491_v22, %v2491_v22  ;;  %v2245_v13 = vadd.f32 %v2200_v48, %v1873_v54  ;;  %v2390_v24 = vpop.f32.mrf.mxu0  ;;  %v2210_v48 = vpop.f32.mrf.mxu3 }
 0x24a   : > { %2548 = vst.msk [vmem:[%s3846_s13 + $0x40] sm:$0xf] %vm2531_vm5, %v2519_v63  ;;  %v2432_v52 = vadd.f32 %v2387_v30, %v2245_v13 }
 0x24c   : > { %v2464_v31 = vadd.f32 %v3829_v21, %v2432_v52 }
 0x24d   : > { %v1831_v25 = vpop.f32.mrf.mxu2 }
 0x24e   : > { %v2492_v0 = vmax.f32 %v2464_v31, 0.0  ;;  %v1874_v4 = vadd.f32 %v1831_v25, %v1622_v23  ;;  %v1581_v7 = vpop.f32.mrf.mxu1 }
 0x24f   : > { %v1623_v16 = vadd.f32 %v1581_v7, %v3733_v37 }
 0x250   : > { %v2520_v8 = vpack.c.bf16 %v2492_v0, %v2492_v0  ;;  %v2246_v12 = vadd.f32 %v2203_v60, %v1874_v4  ;;  %v2392_v61 = vpop.f32.mrf.mxu0  ;;  %v2213_v15 = vpop.f32.mrf.mxu3 }
 0x252   : > { %2549 = vst.msk [vmem:[%s3846_s13 + $0x44] sm:$0xf] %vm2531_vm5, %v2520_v8  ;;  %v2433_v27 = vadd.f32 %v2390_v24, %v2246_v12 }
 0x254   : > { %v2465_v42 = vadd.f32 %v3829_v21, %v2433_v27 }
 0x255   : > { %v1833_v59 = vpop.f32.mrf.mxu2 }
 0x256   : > { %v2493_v56 = vmax.f32 %v2465_v42, 0.0  ;;  %v1875_v51 = vadd.f32 %v1833_v59, %v1623_v16  ;;  %v1584_v55 = vpop.f32.mrf.mxu1 }
 0x257   : > { %v1624_v62 = vadd.f32 %v1584_v55, %v3739_v35 }
 0x258   : > { %v2521_v36 = vpack.c.bf16 %v2493_v56, %v2493_v56  ;;  %v2247_v11 = vadd.f32 %v2205_v47, %v1875_v51  ;;  %v2395_v2 = vpop.f32.mrf.mxu0  ;;  %v2215_v22 = vpop.f32.mrf.mxu3 }
 0x25a   : > { %2550 = vst.msk [vmem:[%s3846_s13 + $0x48] sm:$0xf] %vm2531_vm5, %v2521_v36  ;;  %v2434_v34 = vadd.f32 %v2392_v61, %v2247_v11 }
 0x25c   : > { %v2466_v14 = vadd.f32 %v3829_v21, %v2434_v34 }
 0x25d   : > { %v1836_v50 = vpop.f32.mrf.mxu2 }
 0x25e   : > { %v2494_v44 = vmax.f32 %v2466_v14, 0.0  ;;  %v1876_v41 = vadd.f32 %v1836_v50, %v1624_v62  ;;  %v1586_v37 = vpop.f32.mrf.mxu1 }
 0x25f   : > { %v1625_v28 = vadd.f32 %v1586_v37, %v3754_v57 }
 0x260   : > { %v2522_v9 = vpack.c.bf16 %v2494_v44, %v2494_v44  ;;  %v2248_v58 = vadd.f32 %v2208_v46, %v1876_v41  ;;  %v2397_v53 = vpop.f32.mrf.mxu0  ;;  %v2218_v4 = vpop.f32.mrf.mxu3 }
 0x262   : > { %2551 = vst.msk [vmem:[%s3846_s13 + $0x4c] sm:$0xf] %vm2531_vm5, %v2522_v9  ;;  %v2435_v49 = vadd.f32 %v2395_v2, %v2248_v58 }
 0x264   : > { %v2467_v43 = vadd.f32 %v3829_v21, %v2435_v49 }
 0x265   : > { %v1838_v17 = vpop.f32.mrf.mxu2 }
 0x266   : > { %v2495_v60 = vmax.f32 %v2467_v43, 0.0  ;;  %v1877_v5 = vadd.f32 %v1838_v17, %v1625_v28  ;;  %v1589_v35 = vpop.f32.mrf.mxu1 }
 0x267   : > { %v1626_v40 = vadd.f32 %v1589_v35, %v3760_v1 }
 0x268   : > { %v2523_v20 = vpack.c.bf16 %v2495_v60, %v2495_v60  ;;  %v2249_v6 = vadd.f32 %v2210_v48, %v1877_v5  ;;  %v2400_v33 = vpop.f32.mrf.mxu0  ;;  %v2220_v51 = vpop.f32.mrf.mxu3 }
 0x26a   : > { %2552 = vst.msk [vmem:[%s3846_s13 + $0x50] sm:$0xf] %vm2531_vm5, %v2523_v20  ;;  %v2436_v38 = vadd.f32 %v2397_v53, %v2249_v6 }
 0x26c   : > { %v2468_v30 = vadd.f32 %v3829_v21, %v2436_v38 }
 0x26d   : > { %v1841_v18 = vpop.f32.mrf.mxu2 }
 0x26e   : > { %v2496_v45 = vmax.f32 %v2468_v30, 0.0  ;;  %v1878_v29 = vadd.f32 %v1841_v18, %v1626_v40  ;;  %v1591_v57 = vpop.f32.mrf.mxu1 }
 0x26f   : > { %v1627_v24 = vadd.f32 %v1591_v57, %v3775_v32 }
 0x270   : > { %v2524_v54 = vpack.c.bf16 %v2496_v45, %v2496_v45  ;;  %v2250_v10 = vadd.f32 %v2213_v15, %v1878_v29  ;;  %v2402_v47 = vpop.f32.mrf.mxu0  ;;  %v2223_v37 = vpop.f32.mrf.mxu3 }
 0x272   : > { %2553 = vst.msk [vmem:[%s3846_s13 + $0x54] sm:$0xf] %vm2531_vm5, %v2524_v54  ;;  %v2437_v63 = vadd.f32 %v2400_v33, %v2250_v10 }
 0x274   : > { %v2469_v13 = vadd.f32 %v3829_v21, %v2437_v63 }
 0x275   : > { %v1843_v52 = vpop.f32.mrf.mxu2 }
 0x276   : > { %v2497_v31 = vmax.f32 %v2469_v13, 0.0  ;;  %v1879_v23 = vadd.f32 %v1843_v52, %v1627_v24  ;;  %v1594_v1 = vpop.f32.mrf.mxu1 }
 0x277   : > { %v1628_v61 = vadd.f32 %v1594_v1, %v3781_v39 }
 0x278   : > { %v2525_v25 = vpack.c.bf16 %v2497_v31, %v2497_v31  ;;  %v2251_v0 = vadd.f32 %v2215_v22, %v1879_v23  ;;  %v2405_v8 = vpop.f32.mrf.mxu0  ;;  %v2225_v20 = vpop.f32.mrf.mxu3 }
 0x27a   : > { %2554 = vst.msk [vmem:[%s3846_s13 + $0x58] sm:$0xf] %vm2531_vm5, %v2525_v25  ;;  %v2438_v7 = vadd.f32 %v2402_v47, %v2251_v0 }
 0x27c   : > { %v2470_v12 = vadd.f32 %v3829_v21, %v2438_v7 }
 0x27d   : > { %v1846_v46 = vpop.f32.mrf.mxu2 }
 0x27e   : > { %v2498_v27 = vmax.f32 %v2470_v12, 0.0  ;;  %v1880_v42 = vadd.f32 %v1846_v46, %v1628_v61  ;;  %v1596_v32 = vpop.f32.mrf.mxu1 }
 0x27f   : > { %v1629_v36 = vadd.f32 %v1596_v32, %v3796_v26 }
 0x280   : > { %v2526_v16 = vpack.c.bf16 %v2498_v27, %v2498_v27  ;;  %v2252_v59 = vadd.f32 %v2218_v4, %v1880_v42  ;;  %v2407_v11 = vpop.f32.mrf.mxu0 }
 0x282   : > { %2555 = vst.msk [vmem:[%s3846_s13 + $0x5c] sm:$0xf] %vm2531_vm5, %v2526_v16  ;;  %v2439_v56 = vadd.f32 %v2405_v8, %v2252_v59 }
 0x284   : > { %v2471_v55 = vadd.f32 %v3829_v21, %v2439_v56 }
 0x285   : > { %v1848_v2 = vpop.f32.mrf.mxu2 }
 0x286   : > { %v2499_v34 = vmax.f32 %v2471_v55, 0.0  ;;  %v1881_v48 = vadd.f32 %v1848_v2, %v1629_v36  ;;  %v1599_v39 = vpop.f32.mrf.mxu1 }
 0x287   : > { %v1630_v41 = vadd.f32 %v1599_v39, %v3802_v19 }
 0x288   : > { %v2527_v14 = vpack.c.bf16 %v2499_v34, %v2499_v34  ;;  %v2253_v62 = vadd.f32 %v2220_v51, %v1881_v48  ;;  %v2410_v26 = vpop.f32.mrf.mxu0 }
 0x28a   : > { %2556 = vst.msk [vmem:[%s3846_s13 + $0x60] sm:$0xf] %vm2531_vm5, %v2527_v14  ;;  %v2440_v50 = vadd.f32 %v2407_v11, %v2253_v62 }
 0x28c   : > { %v2472_v44 = vadd.f32 %v3829_v21, %v2440_v50 }
 0x28d   : > { %v1851_v9 = vpop.f32.mrf.mxu2 }
 0x28e   : > { %v2500_v58 = vmax.f32 %v2472_v44, 0.0  ;;  %v1882_v53 = vadd.f32 %v1851_v9, %v1630_v41  ;;  %v1601_v28 = vpop.f32.mrf.mxu1 }
 0x28f   : > { %v1631_v60 = vadd.f32 %v1601_v28, %v3819_v3 }
 0x290   : > { %v2528_v49 = vpack.c.bf16 %v2500_v58, %v2500_v58  ;;  %v2254_v43 = vadd.f32 %v2223_v37, %v1882_v53  ;;  %v2412_v38 = vpop.f32.mrf.mxu0 }
 0x292   : > { %2557 = vst.msk [vmem:[%s3846_s13 + $0x64] sm:$0xf] %vm2531_vm5, %v2528_v49  ;;  %v2441_v17 = vadd.f32 %v2410_v26, %v2254_v43 }
 0x294   : > { %v2473_v15 = vadd.f32 %v3829_v21, %v2441_v17 }
 0x295   : > { %v1853_v5 = vpop.f32.mrf.mxu2 }
 0x296   : > { %v2501_v35 = vmax.f32 %v2473_v15, 0.0  ;;  %v1883_v19 = vadd.f32 %v1853_v5, %v1631_v60 }
 0x298   : > { %v2529_v6 = vpack.c.bf16 %v2501_v35, %v2501_v35  ;;  %v2255_v33 = vadd.f32 %v2225_v20, %v1883_v19 }
 0x29a   : > { %2558 = vst.msk [vmem:[%s3846_s13 + $0x68] sm:$0xf] %vm2531_vm5, %v2529_v6  ;;  %v2442_v30 = vadd.f32 %v2412_v38, %v2255_v33 }
 0x29c   : > { %v2474_v40 = vadd.f32 %v3829_v21, %v2442_v30 }
 0x29e   : > { %v2502_v18 = vmax.f32 %v2474_v40, 0.0 }
 0x2a0   : > { %v2530_v45 = vpack.c.bf16 %v2502_v18, %v2502_v18 }
 0x2a2   : > { %2559 = vst.msk [vmem:[%s3846_s13 + $0x6c] sm:$0xf] %vm2531_vm5, %v2530_v45 }
 0x2a3 PF: > { %s13_s12 = sadd.s32 1, %s3137_s12  }
 0x2a4   : > { %p10_p4 = scmp.ge.s32.totalorder %s13_s12, 4  }
 0x2a6   :  { %12 = sbr.rel (!%p10_p4) target bundleno = 1 (0x1), region = 70 }

// kernel: net_forward.5
= control target key start
LH: loop header
LB: loop body
LE: loop exit
PB: predicated region body
PF: predicated region fallthrough
CT: control target
= control target key end

     0   :  { %s7380_s9 = smov 0   ;;  %s10337_s0 = inlined_call_operand.vmem [shape: bf16[2,64,8], index: 0, kind: input, shape index: {}]   ;;  %s10338_s1 = inlined_call_operand.vmem [shape: bf16[2,240,8], index: 1, kind: input, shape index: {}]   ;;  %s10339_s2 = inlined_call_operand.vmem [shape: f32[2,1,128], index: 2, kind: output, shape index: {}]  }
   0x1 LB: > { %s6424_s10 = sadd.s32 4294967295, %s7363_s9   ;;  %p6428_p0 = scmp.ge.s32.totalorder %s7363_s9, 1  ;;  %s7363_s9 = sphi %s7380_s9, %s12_s9  }
   0x2   : > { %p122_p1 = scmp.lt.s32.totalorder %s7363_s9, 3 }
   0x4   : > { %p123_p2 = pnand %p6428_p0, %p122_p1 }
   0x6   : > { %126 = sbr.rel (%p123_p2) target bundleno = 1194 (0x4aa), region = 28 }
   0xb   : > { %p147_p3 = scmp.lt.s32.totalorder %s6424_s10, 1  ;;  %vm296_vm0 = vcmask 64512   ;;  %vm378_vm1 = vcmask 1046528   ;;  %vm227_vm2 = vsmask.f32 7424  ;;  %vm704_vm5 = vcmask 1044480  }
   0xc   : > { %vm445_vm3 = vsmask.f32 6400  ;;  %vm608_vm4 = vsmask.f32 5376  ;;  %vm541_vm6 = vcmask 1045504  }
   0xd   : > { %s10391_s10 = smov (!%p147_p3, %s6424_s10), 1  ;;  %vm771_vm7 = vsmask.f32 4352 }
   0xe   : > { %s7329_s11 = smul.u32 120, %s10391_s10  ;;  %s6698_s15 = sshll.u32 %s10391_s10, 5 }
   0xf   : > { %s7625_s18 = scalar_lea.vmem %s10337_s0, %s6698_s15  ;;  %s159_s21 = scalar_lea.vmem %s10339_s2, %s10391_s10 }
  0x10   : > { %s7394_s14 = scalar_lea.vmem %s10338_s1, %s7329_s11 }
  0x11   : > { %v7397_v0 = vld [vmem:[%s7394_s14 + $0x38] sm:$0xff]  ;;  %v177_v1 = vld [vmem:[%s7394_s14 + $0x40] sm:$0x1]  ;;  %v7402_v5 = vld [vmem:[%s7394_s14 + $0x30] sm:$0xff] }
  0x12   : > { %v437_v2 = vld [vmem:[%s7394_s14 + $0x40] sm:$0x3]  ;;  %v217_v3 = vunpack.c.l.b16 %v177_v1  ;;  %v354_v6 = vsel %vm296_vm0, %v7397_v0, 0  ;;  %v7407_v7 = vshll.u32 %v7397_v0, 16  ;;  %v7410_v8 = vshrl.u32 %v7397_v0, 16  ;;  %v7427_v24 = vld [vmem:[%s7394_s14 + $0x28] sm:$0xff] }
  0x13   : > { %v443_v4 = vunpack.c.l.b16 %v437_v2  ;;  %v392_v10 = vrot.slane %v7397_v0, 1  ;;  %356 = vmatpush.bf16.xpose.msra.mxu1 %v354_v6  ;;  %v7419_v15 = vshll.u32 %v7402_v5, 16  ;;  %v390_v22 = vrot.slane %v7402_v5, 1  ;;  %v7453_v46 = vld [vmem:[%s7394_s14 + $0x20] sm:$0xff]  ;;  %v7473_v60 = vld [vmem:[%s7394_s14 + $0x18] sm:$0xff] }
  0x14   : > { %v226_v9 = vpack.c.b16 %v217_v3, %v217_v3  ;;  %v286_v12 = vrot.slane %v7407_v7, 1  ;;  %v478_v13 = vrot.slane %v7410_v8, 1  ;;  %v479_v14 = vrot.slane %v7407_v7, 2 }
  0x15   : > { %v7413_v11 = vpack.c.b16 %v443_v4, %v443_v4  ;;  %v278_v23 = vrot.slane %v7419_v15, 1  ;;  %v352_v30 = vsel %vm296_vm0, %v7402_v5, 0  ;;  %v7434_v31 = vshrl.u32 %v7402_v5, 16 }
  0x16   : > { %v394_v16 = vrot.slane %v226_v9, 1  ;;  %v292_v17 = vshll.u32 %v226_v9, 16  ;;  %v290_v20 = vor.u32 %v7410_v8, %v286_v12  ;;  %v480_v21 = vor.u32 %v479_v14, %v478_v13 }
  0x17   : > { %v483_v18 = vshrl.u32 %v7413_v11, 16  ;;  %v486_v19 = vshll.u32 %v7413_v11, 16  ;;  %v475_v32 = vrot.slane %v7419_v15, 2  ;;  %v282_v36 = vor.u32 %v7434_v31, %v278_v23 }
  0x18   : > { %v395_v25 = vsel %vm378_vm1, %v392_v10, %v394_v16  ;;  %v294_v26 = vrot.slane %v292_v17, 1  ;;  %v474_v37 = vrot.slane %v7434_v31, 1  ;;  %v7442_v38 = vshll.u32 %v7427_v24, 16 }
  0x19   : > { %v485_v27 = vrot.slane %v483_v18, 1  ;;  %v488_v28 = vrot.slane %v486_v19, 2  ;;  %v421_v29 = vsel %vm296_vm0, %v395_v25, 0  ;;  %v393_v40 = vsel %vm378_vm1, %v390_v22, %v392_v10 }
  0x1a   : > { %423 = vmatpush.bf16.xpose.msra.mxu2 %v421_v29  ;;  %v295_v33 = vsel %vm227_vm2, %v290_v20, %v294_v26  ;;  %v7447_v41 = vshrl.u32 %v7427_v24, 16  ;;  %v476_v43 = vor.u32 %v475_v32, %v474_v37  ;;  %v287_v44 = vsel %vm227_vm2, %v282_v36, %v286_v12  ;;  %v7497_v20 = vld [vmem:[%s7394_s14 + $0x10] sm:$0xff] }
  0x1b   : > { %v489_v34 = vor.u32 %v488_v28, %v485_v27  ;;  %v322_v35 = vsel %vm296_vm0, %v295_v33, 0  ;;  %357 = vmatpush.bf16.xpose.msra.mxu1 %v352_v30  ;;  %v270_v45 = vrot.slane %v7442_v38, 1  ;;  %v418_v47 = vsel %vm296_vm0, %v393_v40, 0  ;;  %v600_v27 = vld [vmem:[%s7394_s14 + $0x40] sm:$0x7] }
  0x1c   : > { %324 = vmatpush.bf16.xpose.msra.mxu0 %v322_v35  ;;  %v481_v48 = vsel %vm445_vm3, %v476_v43, %v480_v21  ;;  %v388_v49 = vrot.slane %v7427_v24, 1  ;;  %v470_v50 = vrot.slane %v7447_v41, 1  ;;  %v471_v51 = vrot.slane %v7442_v38, 2 }
  0x1d   : > { %v490_v39 = vsel %vm445_vm3, %v480_v21, %v489_v34  ;;  %v319_v52 = vsel %vm296_vm0, %v287_v44, 0  ;;  %v350_v53 = vsel %vm296_vm0, %v7427_v24, 0  ;;  %v274_v54 = vor.u32 %v7447_v41, %v270_v45  ;;  %v7516_v34 = vld [vmem:[%s7394_s14 + $0x8] sm:$0xff] }
  0x1e   : > { %v516_v42 = vsel %vm296_vm0, %v490_v39, 0  ;;  %v7465_v55 = vshll.u32 %v7453_v46, 16  ;;  %v513_v56 = vsel %vm296_vm0, %v481_v48, 0  ;;  %v391_v57 = vsel %vm378_vm1, %v388_v49, %v390_v22 }
  0x1f   : > { %518 = vmatpush.bf16.xpose.msra.mxu3 %v516_v42  ;;  %v472_v58 = vor.u32 %v471_v51, %v470_v50  ;;  %v7470_v59 = vshrl.u32 %v7453_v46, 16  ;;  %v279_v61 = vsel %vm227_vm2, %v274_v54, %v278_v23  ;;  %v415_v63 = vsel %vm296_vm0, %v391_v57, 0  ;;  %v6750_v54 = vld [vmem:[%s7394_s14] sm:$0xff]  }
  0x20   : > { %v262_v62 = vrot.slane %v7465_v55, 1  ;;  %v386_v2 = vrot.slane %v7453_v46, 1  ;;  %v467_v4 = vrot.slane %v7465_v55, 2  ;;  %v316_v6 = vsel %vm296_vm0, %v279_v61, 0 }
  0x21   : > { %v477_v1 = vsel %vm445_vm3, %v472_v58, %v476_v43  ;;  %v466_v3 = vrot.slane %v7470_v59, 1  ;;  %v348_v9 = vsel %vm296_vm0, %v7453_v46, 0  ;;  %v7486_v10 = vshll.u32 %v7473_v60, 16 }
  0x22   : > { %424 = vmatpush.bf16.xpose.msra.mxu2 %v418_v47  ;;  %v266_v12 = vor.u32 %v7470_v59, %v262_v62  ;;  %v510_v13 = vsel %vm296_vm0, %v477_v1, 0  ;;  %v389_v14 = vsel %vm378_vm1, %v386_v2, %v388_v49  ;;  %v7492_v17 = vshrl.u32 %v7473_v60, 16 }
  0x23   : > { %358 = vmatpush.bf16.xpose.msra.mxu1 %v350_v53  ;;  %v468_v16 = vor.u32 %v467_v4, %v466_v3  ;;  %v254_v18 = vrot.slane %v7486_v10, 1  ;;  %v412_v21 = vsel %vm296_vm0, %v389_v14, 0  ;;  %v384_v23 = vrot.slane %v7473_v60, 1 }
  0x24   : > { %325 = vmatpush.bf16.xpose.msra.mxu0 %v319_v52  ;;  %v271_v19 = vsel %vm227_vm2, %v266_v12, %v270_v45  ;;  %v462_v25 = vrot.slane %v7492_v17, 1  ;;  %v463_v26 = vrot.slane %v7486_v10, 2  ;;  %v346_v29 = vsel %vm296_vm0, %v7473_v60, 0 }
  0x25   : > { %v473_v22 = vsel %vm445_vm3, %v468_v16, %v472_v58  ;;  %v313_v28 = vsel %vm296_vm0, %v271_v19, 0  ;;  %v258_v30 = vor.u32 %v7492_v17, %v254_v18  ;;  %v7510_v32 = vshll.u32 %v7497_v20, 16 }
  0x26   : > { %v7513_v33 = vshrl.u32 %v7497_v20, 16  ;;  %v507_v35 = vsel %vm296_vm0, %v473_v22, 0  ;;  %v606_v36 = vunpack.c.l.b16 %v600_v27  ;;  %v387_v37 = vsel %vm378_vm1, %v384_v23, %v386_v2 }
  0x27   : > { %519 = vmatpush.bf16.xpose.msra.mxu3 %v513_v56  ;;  %v464_v39 = vor.u32 %v463_v26, %v462_v25  ;;  %v263_v40 = vsel %vm227_vm2, %v258_v30, %v262_v62  ;;  %v382_v42 = vrot.slane %v7497_v20, 1  ;;  %v246_v43 = vrot.slane %v7510_v32, 1  ;;  %v370_v56 = vld [vmem:[%s7394_s14] sm:$0xe] }
  0x28   : > { %v458_v44 = vrot.slane %v7513_v33, 1  ;;  %v459_v45 = vrot.slane %v7510_v32, 2  ;;  %v7526_v47 = vshll.u32 %v7516_v34, 16  ;;  %v409_v48 = vsel %vm296_vm0, %v387_v37, 0 }
  0x29   : > { %v7529_v49 = vpack.c.b16 %v606_v36, %v606_v36  ;;  %v469_v50 = vsel %vm445_vm3, %v464_v39, %v468_v16  ;;  %v310_v51 = vsel %vm296_vm0, %v263_v40, 0  ;;  %v385_v52 = vsel %vm378_vm1, %v382_v42, %v384_v23 }
  0x2a   : > { %425 = vmatpush.bf16.xpose.msra.mxu2 %v415_v63  ;;  %v344_v53 = vsel %vm296_vm0, %v7497_v20, 0  ;;  %v250_v57 = vor.u32 %v7513_v33, %v246_v43  ;;  %v460_v58 = vor.u32 %v459_v45, %v458_v44  ;;  %v238_v61 = vrot.slane %v7526_v47, 1  ;;  %v7544_v63 = vld [vmem:[%s7394_s14 + $0x40] sm:$0xff]  }
  0x2b   : > { %359 = vmatpush.bf16.xpose.msra.mxu1 %v348_v9  ;;  %v7541_v62 = vshrl.u32 %v7516_v34, 16  ;;  %v504_v1 = vsel %vm296_vm0, %v469_v50, 0  ;;  %v646_v2 = vshrl.u32 %v7529_v49, 16  ;;  %v649_v3 = vshll.u32 %v7529_v49, 16 }
  0x2c   : > { %326 = vmatpush.bf16.xpose.msra.mxu0 %v316_v6  ;;  %v7549_v4 = vunpack.c.h.b16 %v6750_v54  ;;  %v376_v6 = vunpack.c.l.b16 %v370_v56  ;;  %v406_v9 = vsel %vm296_vm0, %v385_v52, 0  ;;  %v380_v12 = vrot.slane %v7516_v34, 1 }
  0x2d   : > { %v769_v14 = vunpack.c.l.b16 %v7544_v63  ;;  %v255_v16 = vsel %vm227_vm2, %v250_v57, %v254_v18  ;;  %v465_v19 = vsel %vm445_vm3, %v460_v58, %v464_v39  ;;  %v454_v22 = vrot.slane %v7541_v62, 1 }
  0x2e   : > { %v641_v23 = vrot.slane %v7410_v8, 2  ;;  %v642_v25 = vrot.slane %v7407_v7, 3  ;;  %v648_v26 = vrot.slane %v646_v2, 2  ;;  %v651_v27 = vrot.slane %v649_v3, 3 }
  0x2f   : > { %520 = vmatpush.bf16.xpose.msra.mxu3 %v510_v13  ;;  %v455_v13 = vrot.slane %v7526_v47, 2  ;;  %v307_v30 = vsel %vm296_vm0, %v255_v16, 0  ;;  %v342_v18 = vsel %vm296_vm0, %v7516_v34, 0  ;;  %v501_v36 = vsel %vm296_vm0, %v465_v19, 0 }
  0x30   : > { %v383_v37 = vsel %vm378_vm1, %v380_v12, %v382_v42  ;;  %v229_v44 = vshrl.u32 %v6750_v54, 16  ;;  %v643_v45 = vor.u32 %v642_v25, %v641_v23  ;;  %v340_v3 = vsel %vm296_vm0, %v6750_v54, 0 }
  0x31   : > { %v456_v39 = vor.u32 %v455_v13, %v454_v22  ;;  %v638_v13 = vrot.slane %v7419_v15, 3  ;;  %v804_v22 = vrot.slane %v7410_v8, 3 }
  0x32   : > { %426 = vmatpush.bf16.xpose.msra.mxu2 %v412_v21  ;;  %v242_v21 = vor.u32 %v7541_v62, %v238_v61 }
  0x33   : > { %360 = vmatpush.bf16.xpose.msra.mxu1 %v346_v29  ;;  %v231_v29 = vshll.u32 %v6750_v54, 16  ;;  %v461_v42 = vsel %vm445_vm3, %v456_v39, %v460_v58  ;;  %v805_v58 = vrot.slane %v7407_v7, 4 }
  0x34   : > { %327 = vmatpush.bf16.xpose.msra.mxu0 %v313_v28  ;;  %v377_v28 = vpack.c.b16 %v7549_v4, %v376_v6  ;;  %v247_v40 = vsel %vm227_vm2, %v242_v21, %v246_v43  ;;  %v718_v43 = vrot.slane %v7397_v0, 3  ;;  %v498_v54 = vsel %vm296_vm0, %v461_v42, 0 }
  0x35   : > { %v233_v50 = vrot.slane %v231_v29, 1 }
  0x36   : > { %v450_v52 = vshll.u32 %v377_v28, 16  ;;  %v379_v2 = vrot.slane %v377_v28, 1 }
  0x37   : > { %521 = vmatpush.bf16.xpose.msra.mxu3 %v507_v35  ;;  %v770_v35 = vpack.c.b16 %v769_v14, %v769_v14  ;;  %v720_v14 = vrot.slane %v7529_v49, 3  ;;  %v234_v16 = vor.u32 %v233_v50, %v229_v44  ;;  %v557_v49 = vrot.slane %v7413_v11, 2 }
  0x38   : > { %v452_v21 = vrot.slane %v450_v52, 2  ;;  %v716_v50 = vrot.slane %v7402_v5, 3  ;;  %v801_v52 = vrot.slane %v7419_v15, 4 }
  0x39   : > { %v809_v56 = vshrl.u32 %v770_v35, 16  ;;  %v812_v57 = vshll.u32 %v770_v35, 16  ;;  %v721_v7 = vsel %vm704_vm5, %v718_v43, %v720_v14  ;;  %v797_v14 = vrot.slane %v7442_v38, 4 }
  0x3a   : > { %427 = vmatpush.bf16.xpose.msra.mxu2 %v409_v48  ;;  %v652_v48 = vor.u32 %v651_v27, %v648_v26  ;;  %v381_v27 = vsel %vm378_vm1, %v379_v2, %v380_v12 }
  0x3b   : > { %361 = vmatpush.bf16.xpose.msra.mxu1 %v344_v53  ;;  %v403_v53 = vsel %vm296_vm0, %v383_v37, 0  ;;  %v811_v23 = vrot.slane %v809_v56, 3  ;;  %v814_v25 = vrot.slane %v812_v57, 4  ;;  %v400_v12 = vsel %vm296_vm0, %v381_v27, 0 }
  0x3c   : > { %328 = vmatpush.bf16.xpose.msra.mxu0 %v310_v51  ;;  %v447_v51 = vshrl.u32 %v377_v28, 16  ;;  %v653_v6 = vsel %vm608_vm4, %v643_v45, %v652_v48  ;;  %v555_v28 = vrot.slane %v7397_v0, 2  ;;  %v634_v37 = vrot.slane %v7442_v38, 3 }
  0x3d   : > { %v679_v26 = vsel %vm296_vm0, %v653_v6, 0  ;;  %v815_v35 = vor.u32 %v814_v25, %v811_v23  ;;  %v553_v57 = vrot.slane %v7402_v5, 2  ;;  %v630_v5 = vrot.slane %v7465_v55, 3 }
  0x3e   : > { %v449_v19 = vrot.slane %v447_v51, 1  ;;  %v558_v0 = vsel %vm541_vm6, %v555_v28, %v557_v49  ;;  %v800_v51 = vrot.slane %v7434_v31, 3  ;;  %v625_v25 = vrot.slane %v7492_v17, 2 }
  0x3f   : > { %522 = vmatpush.bf16.xpose.msra.mxu3 %v504_v1  ;;  %v304_v1 = vsel %vm296_vm0, %v247_v40, 0  ;;  %v747_v40 = vsel %vm296_vm0, %v721_v7, 0  ;;  %v556_v42 = vsel %vm541_vm6, %v553_v57, %v555_v28  ;;  %v793_v7 = vrot.slane %v7465_v55, 4 }
  0x40   : > { %v453_v8 = vor.u32 %v452_v21, %v449_v19  ;;  %v802_v15 = vor.u32 %v801_v52, %v800_v51  ;;  %v551_v21 = vrot.slane %v7427_v24, 2  ;;  %v621_v52 = vrot.slane %v7513_v33, 2 }
  0x42   : > { %428 = vmatpush.bf16.xpose.msra.mxu2 %v406_v9  ;;  %v637_v9 = vrot.slane %v7434_v31, 2  ;;  %v719_v31 = vsel %vm704_vm5, %v716_v50, %v718_v43  ;;  %v796_v43 = vrot.slane %v7447_v41, 3  ;;  %v554_v23 = vsel %vm541_vm6, %v551_v21, %v553_v57  ;;  %v7655_v57 = vld [vmem:[%s7394_s14 + $0x38] sm:$0xff]  }
  0x43   : > { %362 = vmatpush.bf16.xpose.msra.mxu1 %v342_v18  ;;  %v806_v18 = vor.u32 %v805_v58, %v804_v22  ;;  %v744_v6 = vsel %vm296_vm0, %v719_v31, 0  ;;  %v710_v31 = vrot.slane %v7473_v60, 3 }
  0x44   : > { %329 = vmatpush.bf16.xpose.msra.mxu0 %v307_v30  ;;  %v639_v29 = vor.u32 %v638_v13, %v637_v9  ;;  %v239_v30 = vsel %vm227_vm2, %v234_v16, %v238_v61  ;;  %v457_v61 = vsel %vm445_vm3, %v453_v8, %v456_v39  ;;  %v714_v13 = vrot.slane %v7427_v24, 3 }
  0x45   : > { %v301_v44 = vsel %vm296_vm0, %v239_v30, 0  ;;  %v816_v48 = vsel %vm771_vm7, %v806_v18, %v815_v35  ;;  %v495_v56 = vsel %vm296_vm0, %v457_v61, 0  ;;  %v807_v9 = vsel %vm771_vm7, %v802_v15, %v806_v18  ;;  %v160_v30 = vld [vmem:[%s7625_s18] sm:$0x1] }
  0x46   : > { %v644_v11 = vsel %vm608_vm4, %v639_v29, %v643_v45  ;;  %v584_v45 = vsel %vm296_vm0, %v558_v0, 0  ;;  %v842_v39 = vsel %vm296_vm0, %v816_v48, 0  ;;  %v581_v16 = vsel %vm296_vm0, %v556_v42, 0 }
  0x47   : > { %523 = vmatpush.bf16.xpose.msra.mxu3 %v501_v36  ;;  %v633_v36 = vrot.slane %v7447_v41, 2  ;;  %v839_v58 = vsel %vm296_vm0, %v807_v9, 0  ;;  %v717_v38 = vsel %vm704_vm5, %v714_v13, %v716_v50  ;;  %v798_v41 = vor.u32 %v797_v14, %v796_v43 }
  0x48   : > { %v741_v27 = vsel %vm296_vm0, %v717_v38, 0  ;;  %v792_v8 = vrot.slane %v7470_v59, 3  ;;  %v578_v18 = vsel %vm296_vm0, %v554_v23, 0  ;;  %v179_v0 = vunpack.c.l.b16 %v160_v30 }
  0x49   : > { %v803_v49 = vsel %vm771_vm7, %v798_v41, %v802_v15  ;;  %v788_v15 = vrot.slane %v7492_v17, 3  ;;  %v789_v42 = vrot.slane %v7486_v10, 4 }
  0x4a   : > { %429 = vmatpush.bf16.xpose.msra.mxu2 %v403_v53  ;;  %v676_v53 = vsel %vm296_vm0, %v644_v11, 0  ;;  %v549_v11 = vrot.slane %v7453_v46, 2  ;;  %v794_v61 = vor.u32 %v793_v7, %v792_v8 }
  0x4b   : > { %363 = vmatpush.bf16.xpose.msra.mxu1 %v340_v3  ;;  %v629_v3 = vrot.slane %v7470_v59, 2  ;;  %v790_v17 = vor.u32 %v789_v42, %v788_v15 }
  0x4c   : > { %330 = vmatpush.bf16.xpose.msra.mxu0 %v304_v1  ;;  %v635_v1 = vor.u32 %v634_v37, %v633_v36  ;;  %v836_v37 = vsel %vm296_vm0, %v803_v49, 0  ;;  %v696_v49 = vld [vmem:[%s7394_s14] sm:$0x8] }
  0x4d   : > { %v631_v22 = vor.u32 %v630_v5, %v629_v3  ;;  %v547_v5 = vrot.slane %v7473_v60, 2  ;;  %v785_v60 = vrot.slane %v7510_v32, 4  ;;  %v795_v23 = vsel %vm771_vm7, %v790_v17, %v794_v61 }
  0x4e   : > { %v640_v2 = vsel %vm608_vm4, %v635_v1, %v639_v29  ;;  %v712_v29 = vrot.slane %v7453_v46, 3  ;;  %v552_v46 = vsel %vm541_vm6, %v549_v11, %v551_v21  ;;  %v617_v21 = vrot.slane %v7541_v62, 2 }
  0x4f   : > { %524 = vmatpush.bf16.xpose.msra.mxu3 %v498_v54  ;;  %v673_v19 = vsel %vm296_vm0, %v640_v2, 0  ;;  %v636_v24 = vsel %vm608_vm4, %v631_v22, %v635_v1  ;;  %v626_v54 = vrot.slane %v7486_v10, 3  ;;  %v7658_v1 = vld [vmem:[%s7394_s14 + $0x40] sm:$0xf]  ;;  %v575_v2 = vsel %vm296_vm0, %v552_v46, 0 }
  0x50   : > { %v670_v35 = vsel %vm296_vm0, %v636_v24, 0  ;;  %v715_v55 = vsel %vm704_vm5, %v712_v29, %v714_v13  ;;  %v6780_v13 = vunpack.c.h.b16 %v7655_v57  ;;  %v908_v43 = vunpack.c.l.b16 %v7658_v1  ;;  %v1178_v46 = vld [vmem:[%s7394_s14 + $0x48] sm:$0x1] }
  0x51   : > { %v627_v36 = vor.u32 %v626_v54, %v625_v25  ;;  %v713_v10 = vsel %vm704_vm5, %v710_v31, %v712_v29  ;;  %v708_v24 = vrot.slane %v7497_v20, 3  ;;  %v545_v25 = vrot.slane %v7497_v20, 2 }
  0x52   : > { %430 = vmatpush.bf16.xpose.msra.mxu2 %v400_v12  ;;  %6461 = vmatmul.msk.bf16.vlgmr.msra.gmra.mxu1 %vm296_vm0, %v160_v30 }
  0x53   : > { %681 = vmatpush.bf16.xpose.msrb.mxu1 %v679_v26  ;;  %v369_v26 = vld [vmem:[%s7625_s18] sm:$0x2]  ;;  %v632_v51 = vsel %vm608_vm4, %v627_v36, %v631_v22  ;;  %v618_v22 = vrot.slane %v7526_v47, 3 }
  0x54   : > { %331 = vmatpush.bf16.xpose.msra.mxu0 %v301_v44  ;;  %v372_v28 = vunpack.c.l.b16 %v369_v26  ;;  %v180_v44 = vpack.c.b16 %v179_v0, %v179_v0  ;;  %v667_v3 = vsel %vm296_vm0, %v632_v51, 0  ;;  %v548_v0 = vsel %vm541_vm6, %v545_v25, %v547_v5 }
  0x56   : > { %v373_v12 = vpack.c.b16 %v372_v28, %v372_v28  ;;  %v182_v48 = vshrl.u32 %v180_v44, 16  ;;  %v619_v28 = vor.u32 %v618_v22, %v617_v21  ;;  %v780_v44 = vrot.slane %v7541_v62, 3 }
  0x57   : > { %525 = vmatpush.bf16.xpose.msra.mxu3 %v495_v56  ;;  %v533_v56 = vld [vmem:[%s7394_s14] sm:$0xc] }
  0x58   : > { %v439_v59 = vshrl.u32 %v373_v12, 16  ;;  %v539_v9 = vunpack.c.l.b16 %v533_v56  ;;  %v7712_v56 = vld [vmem:[%s7394_s14 + $0x34] sm:$0xff]  }
  0x5a   : > { %749 = vmatpush.bf16.xpose.msrb.mxu2 %v747_v40  ;;  %v374_v40 = vrot.slane %v373_v12, 1  ;;  %v441_v50 = vrot.slane %v439_v59, 1  ;;  %v7681_v38 = vpack.c.b16 %v7549_v4, %v539_v9  ;;  %v711_v12 = vsel %vm704_vm5, %v708_v24, %v710_v31  ;;  %v532_v31 = vld [vmem:[%s7625_s18] sm:$0x4] }
  0x5b   : > { %682 = vmatpush.bf16.xpose.msrb.mxu1 %v676_v53  ;;  %v738_v53 = vsel %vm296_vm0, %v715_v55, 0  ;;  %6460 = vmatmul.msk.bf16.vlgmr.msra.gmra.mxu0 %vm296_vm0, %v182_v48  ;;  %v781_v59 = vrot.slane %v7526_v47, 4  ;;  %v732_v51 = vsel %vm296_vm0, %v711_v12, 0 }
  0x5c   : > { %586 = vmatpush.bf16.xpose.msrb.mxu0 %v584_v45  ;;  %6462 = vmatmul.msk.bf16.vlgmr.msra.gmra.mxu2 %vm296_vm0, %v374_v40  ;;  %v622_v45 = vrot.slane %v7510_v32, 3  ;;  %v610_v29 = vshrl.u32 %v7681_v38, 16  ;;  %v613_v8 = vshll.u32 %v7681_v38, 16 }
  0x5e   : > { %6463 = vmatmul.msk.bf16.vlgmr.msra.gmra.mxu3 %vm296_vm0, %v441_v50  ;;  %v612_v55 = vrot.slane %v610_v29, 2 }
  0x5f   : > { %844 = vmatpush.bf16.xpose.msrb.mxu3 %v842_v39  ;;  %v799_v39 = vsel %vm771_vm7, %v794_v61, %v798_v41  ;;  %v7685_v41 = vpack.c.b16 %v908_v43, %v6780_v13  ;;  %v615_v61 = vrot.slane %v613_v8, 3 }
  0x60   : > { %v833_v14 = vsel %vm296_vm0, %v799_v39, 0  ;;  %v569_v39 = vsel %vm296_vm0, %v548_v0, 0  ;;  %v7755_v0 = vld [vmem:[%s7394_s14 + $0x38] sm:$0xff] }
  0x61   : > { %v1050_v7 = vshrl.u32 %v7685_v41, 16  ;;  %v1053_v30 = vshll.u32 %v7685_v41, 16  ;;  %v616_v9 = vor.u32 %v615_v61, %v612_v55 }
  0x62   : > { %750 = vmatpush.bf16.xpose.msrb.mxu2 %v744_v6  ;;  %v623_v6 = vor.u32 %v622_v45, %v621_v52 }
  0x63   : > { %683 = vmatpush.bf16.xpose.msrb.mxu1 %v673_v19  ;;  %v784_v19 = vrot.slane %v7513_v33, 3  ;;  %v735_v33 = vsel %vm296_vm0, %v713_v10, 0  ;;  %v1052_v48 = vrot.slane %v1050_v7, 3  ;;  %v1055_v50 = vrot.slane %v1053_v30, 4 }
  0x64   : > { %587 = vmatpush.bf16.xpose.msrb.mxu0 %v581_v16  ;;  %v7671_v16 = vunpack.c.h.b16 %v7544_v63  ;;  %v628_v63 = vsel %vm608_vm4, %v623_v6, %v627_v36  ;;  %v702_v36 = vunpack.c.l.b16 %v696_v49  ;;  %v624_v40 = vsel %vm608_vm4, %v619_v28, %v623_v6 }
  0x65   : > { %v786_v54 = vor.u32 %v785_v60, %v784_v19  ;;  %v661_v42 = vsel %vm296_vm0, %v624_v40, 0  ;;  %v7726_v6 = vor.u32 %v781_v59, %v780_v44  ;;  %v1056_v13 = vor.u32 %v1055_v50, %v1052_v48  ;;  %v695_v44 = vld [vmem:[%s7625_s18] sm:$0x8] }
  0x66   : > { %v986_v32 = vpack.c.b16 %v7671_v16, %v7671_v16  ;;  %v703_v47 = vpack.c.b16 %v7549_v4, %v702_v36  ;;  %v1041_v4 = vshrl.u32 %v7712_v56, 16  ;;  %v535_v19 = vunpack.c.l.b16 %v532_v31 }
  0x67   : > { %845 = vmatpush.bf16.xpose.msrb.mxu3 %v839_v58  ;;  %v550_v58 = vsel %vm541_vm6, %v547_v5, %v549_v11  ;;  %v791_v11 = vsel %vm771_vm7, %v786_v54, %v790_v17  ;;  %v1216_v5 = vunpack.c.l.b16 %v1178_v46  ;;  %v1044_v17 = vshll.u32 %v7712_v56, 16 }
  0x68   : > { %v572_v26 = vsel %vm296_vm0, %v550_v58, 0  ;;  %v1062_v20 = vshll.u32 %v986_v32, 16  ;;  %v827_v62 = vsel %vm296_vm0, %v791_v11, 0  ;;  %v773_v60 = vshrl.u32 %v703_v47, 16 }
  0x69   : > { %v776_v21 = vshll.u32 %v703_v47, 16  ;;  %v1043_v49 = vrot.slane %v1041_v4, 3  ;;  %v1046_v29 = vrot.slane %v1044_v17, 4  ;;  %v542_v7 = vrot.slane %v7681_v38, 2 }
  0x6a   : > { %751 = vmatpush.bf16.xpose.msrb.mxu2 %v741_v27  ;;  %v664_v27 = vsel %vm296_vm0, %v628_v63, 0  ;;  %v1064_v45 = vrot.slane %v1062_v20, 4  ;;  %v7732_v63 = vpack.c.b16 %v1216_v5, %v1216_v5  ;;  %v775_v30 = vrot.slane %v773_v60, 3 }
  0x6b   : > { %684 = vmatpush.bf16.xpose.msrb.mxu1 %v670_v35  ;;  %v1059_v35 = vshrl.u32 %v986_v32, 16  ;;  %v787_v32 = vsel %vm771_vm7, %v7726_v6, %v786_v54  ;;  %v1120_v36 = vpack.c.b16 %v7671_v16, %v908_v43  ;;  %v932_v59 = vrot.slane %v7685_v41, 3 }
  0x6c   : > { %588 = vmatpush.bf16.xpose.msrb.mxu0 %v578_v18  ;;  %v830_v18 = vsel %vm296_vm0, %v795_v23, 0  ;;  %v705_v23 = vrot.slane %v703_v47, 3  ;;  %v1290_v12 = vshll.u32 %v7732_v63, 16  ;;  %v824_v11 = vsel %vm296_vm0, %v787_v32, 0 }
  0x6d   : > { %v1061_v52 = vrot.slane %v1059_v35, 3  ;;  %v7746_v35 = vld [vmem:[%s7394_s14 + $0x2c] sm:$0xff]   ;;  %v1047_v61 = vor.u32 %v1046_v29, %v1043_v49  ;;  %v698_v41 = vunpack.c.l.b16 %v695_v44  ;;  %v7775_v46 = vshll.u32 %v7755_v0, 16 }
  0x6e   : > { %v1035_v1 = vshll.u32 %v7746_v35, 16  ;;  %v1292_v16 = vrot.slane %v1290_v12, 1  ;;  %v930_v17 = vrot.slane %v7712_v56, 3 }
  0x6f   : > { %846 = vmatpush.bf16.xpose.msrb.mxu3 %v836_v37  ;;  %v706_v37 = vrot.slane %v7516_v34, 3  ;;  %v1065_v10 = vor.u32 %v1064_v45, %v1061_v52  ;;  %v1146_v52 = vsel %vm296_vm0, %v1120_v36, 0  ;;  %v699_v5 = vpack.c.b16 %v698_v41, %v698_v41 }
  0x71   : > { %v709_v15 = vsel %vm704_vm5, %v706_v37, %v708_v24  ;;  %v620_v24 = vsel %vm608_vm4, %v616_v9, %v619_v28  ;;  %v707_v38 = vsel %vm704_vm5, %v705_v23, %v706_v37  ;;  %v1032_v37 = vshrl.u32 %v7746_v35, 16 }
  0x72   : > { %752 = vmatpush.bf16.xpose.msrb.mxu2 %v738_v53  ;;  %v875_v53 = vld [vmem:[%s7394_s14 + $0x44] sm:$0x7]  ;;  %v729_v22 = vsel %vm296_vm0, %v709_v15, 0  ;;  %v658_v54 = vsel %vm296_vm0, %v620_v24, 0  ;;  %v1037_v15 = vrot.slane %v1035_v1, 4  ;;  %v1276_v9 = vrot.slane %v7775_v46, 1 }
  0x73   : > { %685 = vmatpush.bf16.xpose.msrb.mxu1 %v667_v3  ;;  %v7724_v3 = vld [vmem:[%s7394_s14 + $0x40] sm:$0xff]  ;;  %v1034_v31 = vrot.slane %v1032_v37, 3  ;;  %v765_v32 = vshrl.u32 %v699_v5, 16  ;;  %v933_v24 = vsel %vm704_vm5, %v930_v17, %v932_v59  ;;  %v7843_v1 = vld [vmem:[%s7394_s14 + $0x14] sm:$0xff]  }
  0x74   : > { %589 = vmatpush.bf16.xpose.msrb.mxu0 %v575_v2  ;;  %v543_v2 = vrot.slane %v7516_v34, 2  ;;  %v7751_v20 = vshrl.u32 %v7724_v3, 16  ;;  %v958_v12 = vsel %vm296_vm0, %v933_v24, 0 }
  0x75   : > { %v1038_v60 = vor.u32 %v1037_v15, %v1034_v31  ;;  %v1008_v31 = vshll.u32 %v7843_v1, 16  ;;  %v6965_v15 = vld [vmem:[%s7394_s14 + $0x28] sm:$0xff]  }
  0x76   : > { %v546_v58 = vsel %vm541_vm6, %v543_v2, %v545_v25  ;;  %v7741_v25 = vpack.c.b16 %v535_v19, %v535_v19  ;;  %v544_v50 = vsel %vm541_vm6, %v542_v7, %v543_v2  ;;  %v7813_v7 = vld [vmem:[%s7394_s14 + $0x1c] sm:$0xff]  }
  0x77   : > { %847 = vmatpush.bf16.xpose.msrb.mxu3 %v833_v14  ;;  %v909_v14 = vunpack.c.l.b16 %v875_v53  ;;  %v566_v8 = vsel %vm296_vm0, %v546_v58, 0  ;;  %v1057_v53 = vsel %vm771_vm7, %v1047_v61, %v1056_v13  ;;  %v700_v58 = vrot.slane %v699_v5, 3 }
  0x78   : > { %v602_v48 = vshrl.u32 %v7741_v25, 16  ;;  %v1089_v4 = vsel %vm296_vm0, %v1057_v53, 0  ;;  %v1048_v49 = vsel %vm771_vm7, %v1038_v60, %v1047_v61  ;;  %v1017_v44 = vshll.u32 %v7813_v7, 16 }
  0x79   : > { %v924_v24 = vrot.slane %v7813_v7, 3 }
  0x7a   : > { %753 = vmatpush.bf16.xpose.msrb.mxu2 %v735_v33  ;;  %v7735_v33 = vshll.u32 %v7724_v3, 16  ;;  %v1019_v37 = vrot.slane %v1017_v44, 4 }
  0x7b   : > { %686 = vmatpush.bf16.xpose.msrb.mxu1 %v664_v27  ;;  %v1066_v27 = vsel %vm771_vm7, %v1056_v13, %v1065_v10  ;;  %v7793_v10 = vld [vmem:[%s7394_s14 + $0x30] sm:$0xff] }
  0x7c   : > { %590 = vmatpush.bf16.xpose.msrb.mxu0 %v572_v26  ;;  %v918_v26 = vpack.c.b16 %v909_v14, %v909_v14  ;;  %v1284_v28 = vrot.slane %v7735_v33, 1  ;;  %v1092_v40 = vsel %vm296_vm0, %v1066_v27, 0  ;;  %v7790_v14 = vshrl.u32 %v7755_v0, 16 }
  0x7d   : > { %v7805_v56 = vshll.u32 %v7793_v10, 16  ;;  %v1143_v27 = vsel %vm296_vm0, %v7655_v57, 0  ;;  %v7824_v57 = vld [vmem:[%s7394_s14 + $0x28] sm:$0xff] }
  0x7e   : > { %v934_v55 = vrot.slane %v918_v26, 3  ;;  %v1288_v43 = vor.u32 %v7751_v20, %v1284_v28  ;;  %v1280_v23 = vor.u32 %v7790_v14, %v1276_v9  ;;  %v537_v26 = vrot.slane %v7741_v25, 2 }
  0x7f   : > { %848 = vmatpush.bf16.xpose.msrb.mxu3 %v830_v18  ;;  %v778_v18 = vrot.slane %v776_v21, 4  ;;  %v7821_v25 = vshrl.u32 %v7793_v10, 16  ;;  %v7837_v61 = vshll.u32 %v7824_v57, 16  ;;  %v7848_v41 = vshrl.u32 %v7824_v57, 16 }
  0x80   : > { %v935_v45 = vsel %vm704_vm5, %v932_v59, %v934_v55  ;;  %v1293_v2 = vsel %vm227_vm2, %v1288_v43, %v1292_v16  ;;  %v6966_v59 = vld [vmem:[%s7394_s14 + $0x30] sm:$0xff]  }
  0x81   : > { %v779_v34 = vor.u32 %v778_v18, %v775_v30  ;;  %v961_v13 = vsel %vm296_vm0, %v935_v45, 0  ;;  %v1319_v19 = vsel %vm296_vm0, %v1293_v2, 0  ;;  %v767_v30 = vrot.slane %v765_v32, 3  ;;  %v1402_v32 = vld [vmem:[%s7394_s14 + $0x48] sm:$0x3] }
  0x82   : > { %754 = vmatpush.bf16.xpose.msrb.mxu2 %v732_v51  ;;  %v726_v51 = vsel %vm296_vm0, %v707_v38, 0  ;;  %v1285_v18 = vsel %vm227_vm2, %v1280_v23, %v1284_v28  ;;  %v928_v38 = vrot.slane %v7746_v35, 3  ;;  %v1260_v16 = vrot.slane %v7837_v61, 1 }
  0x83   : > { %687 = vmatpush.bf16.xpose.msrb.mxu1 %v661_v42  ;;  %v783_v47 = vsel %vm771_vm7, %v779_v34, %v7726_v6  ;;  %v7785_v42 = vld [vmem:[%s7394_s14 + $0x24] sm:$0xff]   ;;  %v1316_v36 = vsel %vm296_vm0, %v1285_v18, 0 }
  0x84   : > { %591 = vmatpush.bf16.xpose.msrb.mxu0 %v569_v39  ;;  %v604_v39 = vrot.slane %v602_v48, 2  ;;  %v821_v6 = vsel %vm296_vm0, %v783_v47, 0  ;;  %v1023_v21 = vshrl.u32 %v7785_v42, 16  ;;  %v931_v35 = vsel %vm704_vm5, %v928_v38, %v930_v17 }
  0x85   : > { %v1140_v48 = vsel %vm296_vm0, %v6966_v59, 0  ;;  %v926_v53 = vrot.slane %v7785_v42, 3  ;;  %v1005_v47 = vshrl.u32 %v7843_v1, 16  ;;  %v1264_v2 = vor.u32 %v7848_v41, %v1260_v16 }
  0x86   : > { %v1025_v29 = vrot.slane %v1023_v21, 3  ;;  %v1010_v17 = vrot.slane %v1008_v31, 4 }
  0x87   : > { %849 = vmatpush.bf16.xpose.msrb.mxu3 %v827_v62  ;;  %v563_v62 = vsel %vm296_vm0, %v544_v50, 0 }
  0x8a   : > { %755 = vmatpush.bf16.xpose.msrb.mxu2 %v729_v22  ;;  %v1026_v22 = vshll.u32 %v7785_v42, 16  ;;  %v929_v42 = vsel %vm704_vm5, %v926_v53, %v928_v38  ;;  %v927_v38 = vsel %vm704_vm5, %v924_v24, %v926_v53 }
  0x8b   : > { %688 = vmatpush.bf16.xpose.msrb.mxu1 %v658_v54  ;;  %v1268_v54 = vrot.slane %v7805_v56, 1 }
  0x8c   : > { %592 = vmatpush.bf16.xpose.msrb.mxu0 %v566_v8  ;;  %v1028_v8 = vrot.slane %v1026_v22, 4 }
  0x8d   : > { %v1272_v55 = vor.u32 %v7821_v25, %v1268_v54 }
  0x8e   : > { %v1029_v28 = vor.u32 %v1028_v8, %v1025_v29 }
  0x8f   : > { %850 = vmatpush.bf16.xpose.msrb.mxu3 %v824_v11  ;;  %v1086_v11 = vsel %vm296_vm0, %v1048_v49, 0  ;;  %v1277_v43 = vsel %vm227_vm2, %v1272_v55, %v1276_v9  ;;  %v7866_v9 = vld [vmem:[%s7394_s14 + $0x18] sm:$0xff]  ;;  %v6964_v49 = vld [vmem:[%s7394_s14 + $0x20] sm:$0xff]  }
  0x90   : > { %v1039_v50 = vsel %vm771_vm7, %v1029_v28, %v1038_v60  ;;  %v1269_v60 = vsel %vm227_vm2, %v1264_v2, %v1268_v54  ;;  %v7148_v54 = vld [vmem:[%s7394_s14 + $0x4] sm:$0x8] }
  0x91   : > { %v1083_v45 = vsel %vm296_vm0, %v1039_v50, 0 }
  0x92   : > { %756 = vmatpush.bf16.xpose.msrb.mxu2 %v726_v51  ;;  %6465 = vmatmul.msk.bf16.vlgmr.msrb.gmra.mxu1 %vm296_vm0, %v604_v39  ;;  %v7851_v51 = vld [vmem:[%s7394_s14 + $0x20] sm:$0xff]  ;;  %v1313_v39 = vsel %vm296_vm0, %v1277_v43, 0 }
  0x93   : > { %1094 = vmatpush.bf16.xpose.msra.mxu1 %v1092_v40  ;;  %v1014_v40 = vshrl.u32 %v7813_v7, 16  ;;  %v7862_v5 = vshll.u32 %v7851_v51, 16  ;;  %v7876_v22 = vshrl.u32 %v7851_v51, 16  ;;  %v1134_v7 = vsel %vm296_vm0, %v6964_v49, 0 }
  0x94   : > { %593 = vmatpush.bf16.xpose.msrb.mxu0 %v563_v62  ;;  %v1442_v49 = vrot.slane %v7751_v20, 1 }
  0x95   : > { %v1016_v34 = vrot.slane %v1014_v40, 3  ;;  %v1252_v21 = vrot.slane %v7862_v5, 1  ;;  %v7899_v40 = vld [vmem:[%s7394_s14 + $0x10] sm:$0xff] }
  0x96   : > { %v7913_v53 = vshll.u32 %v7899_v40, 16 }
  0x97   : > { %851 = vmatpush.bf16.xpose.msrb.mxu3 %v821_v6  ;;  %v1020_v62 = vor.u32 %v1019_v37, %v1016_v34  ;;  %v1007_v6 = vrot.slane %v1005_v47, 3  ;;  %v1256_v18 = vor.u32 %v7876_v22, %v1252_v21  ;;  %v949_v34 = vsel %vm296_vm0, %v927_v38, 0  ;;  %v6963_v37 = vld [vmem:[%s7394_s14 + $0x18] sm:$0xff]  }
  0x99   : > { %6466 = vmatmul.msk.bf16.vlgmr.msrb.gmra.mxu2 %vm296_vm0, %v700_v58  ;;  %v952_v58 = vsel %vm296_vm0, %v929_v42, 0  ;;  %v1011_v29 = vor.u32 %v1010_v17, %v1007_v6  ;;  %v1236_v6 = vrot.slane %v7913_v53, 1  ;;  %v7926_v17 = vshrl.u32 %v7899_v40, 16 }
  0x9a   : > { %1148 = vmatpush.bf16.xpose.msra.mxu2 %v1146_v52  ;;  %v955_v52 = vsel %vm296_vm0, %v931_v35, 0 }
  0x9b   : > { %1095 = vmatpush.bf16.xpose.msra.mxu1 %v1089_v4  ;;  %6464 = vmatmul.msk.bf16.vlgmr.msrb.gmra.mxu0 %vm296_vm0, %v537_v26  ;;  %v1030_v4 = vsel %vm771_vm7, %v1020_v62, %v1029_v28  ;;  %v7883_v26 = vshll.u32 %v7866_v9, 16  ;;  %v7896_v28 = vshrl.u32 %v7866_v9, 16  ;;  %v1021_v44 = vsel %vm771_vm7, %v1011_v29, %v1020_v62 }
  0x9c   : > { %963 = vmatpush.bf16.xpose.msra.mxu0 %v961_v13  ;;  %v1137_v13 = vsel %vm296_vm0, %v6965_v15, 0  ;;  %v1080_v23 = vsel %vm296_vm0, %v1030_v4, 0  ;;  %v1077_v43 = vsel %vm296_vm0, %v1021_v44, 0 }
  0x9e   : > { %6467 = vmatmul.msk.bf16.vlgmr.msrb.gmra.mxu3 %vm296_vm0, %v767_v30 }
  0x9f   : > { %1321 = vmatpush.bf16.xpose.msra.mxu3 %v1319_v19  ;;  %v7871_v19 = vld [vmem:[%s7394_s14 + $0xc] sm:$0xff]  }
  0xa0   : > { %v996_v8 = vshrl.u32 %v7871_v19, 16  ;;  %v999_v30 = vshll.u32 %v7871_v19, 16 }
  0xa2   : > { %1149 = vmatpush.bf16.xpose.msra.mxu2 %v1143_v27  ;;  %v1310_v27 = vsel %vm296_vm0, %v1269_v60, 0  ;;  %v998_v59 = vrot.slane %v996_v8, 3  ;;  %v1001_v55 = vrot.slane %v999_v30, 4 }
  0xa3   : > { %1096 = vmatpush.bf16.xpose.msra.mxu1 %v1086_v11  ;;  %v1408_v11 = vunpack.c.l.b16 %v1402_v32 }
  0xa4   : > { %964 = vmatpush.bf16.xpose.msra.mxu0 %v958_v12  ;;  %v7293_v12 = vld [vmem:[%s7394_s14 + $0x4] sm:$0xf0]   ;;  %v1002_v47 = vor.u32 %v1001_v55, %v998_v59 }
  0xa5   : > { %v7902_v35 = vor.u32 %v7293_v12, %v7148_v54  ;;  %v7905_v50 = vpack.c.b16 %v1408_v11, %v1408_v11  ;;  %v7937_v54 = vld [vmem:[%s7394_s14 + $0x10] sm:$0xff]  }
  0xa6   : > { %v1012_v60 = vsel %vm771_vm7, %v1002_v47, %v1011_v29  ;;  %v1128_v55 = vsel %vm296_vm0, %v7937_v54, 0 }
  0xa7   : > { %1322 = vmatpush.bf16.xpose.msra.mxu3 %v1316_v36  ;;  %v1244_v36 = vrot.slane %v7883_v26, 1  ;;  %v991_v31 = vshll.u32 %v7902_v35, 16  ;;  %v1447_v15 = vshrl.u32 %v7905_v50, 16  ;;  %v1450_v2 = vshll.u32 %v7905_v50, 16 }
  0xa8   : > { %v1074_v29 = vsel %vm296_vm0, %v1012_v60, 0 }
  0xa9   : > { %v1449_v8 = vrot.slane %v1447_v15, 1  ;;  %v1452_v30 = vrot.slane %v1450_v2, 2 }
  0xaa   : > { %1150 = vmatpush.bf16.xpose.msra.mxu2 %v1140_v48  ;;  %v1261_v48 = vsel %vm227_vm2, %v1256_v18, %v1260_v16  ;;  %v988_v16 = vshrl.u32 %v7902_v35, 16 }
  0xab   : > { %1097 = vmatpush.bf16.xpose.msra.mxu1 %v1083_v45  ;;  %v1248_v45 = vor.u32 %v7896_v28, %v1244_v36  ;;  %v1307_v62 = vsel %vm296_vm0, %v1261_v48, 0  ;;  %v1453_v59 = vor.u32 %v1452_v30, %v1449_v8  ;;  %v1359_v8 = vrot.slane %v7732_v63, 1 }
  0xac   : > { %965 = vmatpush.bf16.xpose.msra.mxu0 %v955_v52  ;;  %v922_v52 = vrot.slane %v7843_v1, 3  ;;  %v1131_v1 = vsel %vm296_vm0, %v6963_v37, 0  ;;  %v990_v32 = vrot.slane %v988_v16, 3  ;;  %v7949_v37 = vld [vmem:[%s7625_s18 + $0x4] sm:$0x1]  ;;  %v919_v16 = vrot.slane %v7902_v35, 3 }
  0xad   : > { %v1253_v4 = vsel %vm227_vm2, %v1248_v45, %v1252_v21 }
  0xae   : > { %v1304_v12 = vsel %vm296_vm0, %v1253_v4, 0 }
  0xaf   : > { %1323 = vmatpush.bf16.xpose.msra.mxu3 %v1313_v39  ;;  %v1563_v39 = vld [vmem:[%s7394_s14 + $0x48] sm:$0x7] }
  0xb0   : > { %v1569_v42 = vunpack.c.l.b16 %v1563_v39  ;;  %v1520_v39 = vrot.slane %v7905_v50, 2  ;;  %v1604_v50 = vrot.slane %v7735_v33, 3 }
  0xb2   : > { %1151 = vmatpush.bf16.xpose.msra.mxu2 %v1137_v13  ;;  %v925_v13 = vsel %vm704_vm5, %v922_v52, %v924_v24  ;;  %v1443_v24 = vrot.slane %v7735_v33, 2  ;;  %v1570_v18 = vpack.c.b16 %v1569_v42, %v1569_v42  ;;  %v1438_v42 = vrot.slane %v7790_v14, 1 }
  0xb3   : > { %1098 = vmatpush.bf16.xpose.msra.mxu1 %v1080_v23  ;;  %v993_v23 = vrot.slane %v991_v31, 4  ;;  %v946_v21 = vsel %vm296_vm0, %v925_v13, 0  ;;  %v1603_v13 = vrot.slane %v7751_v20, 2 }
  0xb4   : > { %966 = vmatpush.bf16.xpose.msra.mxu0 %v952_v58  ;;  %v920_v58 = vrot.slane %v7871_v19, 3  ;;  %v1240_v19 = vor.u32 %v7926_v17, %v1236_v6  ;;  %v1444_v44 = vor.u32 %v1443_v24, %v1442_v49  ;;  %v1608_v48 = vshrl.u32 %v1570_v18, 16 }
  0xb5   : > { %v1357_v24 = vrot.slane %v7724_v3, 1 }
  0xb6   : > { %v923_v11 = vsel %vm704_vm5, %v920_v58, %v922_v52  ;;  %v1245_v45 = vsel %vm227_vm2, %v1240_v19, %v1244_v36  ;;  %v1518_v52 = vrot.slane %v7724_v3, 2  ;;  %v1454_v2 = vsel %vm445_vm3, %v1444_v44, %v1453_v59 }
  0xb7   : > { %1324 = vmatpush.bf16.xpose.msra.mxu3 %v1310_v27  ;;  %v7931_v27 = vld [vmem:[%s7394_s14 + $0x8] sm:$0xff]   ;;  %v1439_v36 = vrot.slane %v7775_v46, 2  ;;  %v1610_v4 = vrot.slane %v1608_v48, 2  ;;  %v1301_v35 = vsel %vm296_vm0, %v1245_v45, 0  ;;  %v1480_v49 = vsel %vm296_vm0, %v1454_v2, 0 }
  0xb8   : > { %v1229_v38 = vshll.u32 %v7931_v27, 16  ;;  %v1227_v31 = vshrl.u32 %v7931_v27, 16  ;;  %v921_v33 = vsel %vm704_vm5, %v919_v16, %v920_v58  ;;  %v1360_v63 = vsel %vm378_vm1, %v1357_v24, %v1359_v8 }
  0xb9   : > { %v940_v3 = vsel %vm296_vm0, %v921_v33, 0  ;;  %v1435_v48 = vrot.slane %v7805_v56, 2  ;;  %v1599_v45 = vrot.slane %v7790_v14, 2 }
  0xba   : > { %1152 = vmatpush.bf16.xpose.msra.mxu2 %v1134_v7  ;;  %v994_v7 = vor.u32 %v993_v23, %v990_v32  ;;  %v1231_v15 = vrot.slane %v1229_v38, 1  ;;  %v1521_v32 = vsel %vm541_vm6, %v1518_v52, %v1520_v39  ;;  %v1108_v23 = vld [vmem:[%s7625_s18 + $0x4] sm:$0x2]  ;;  %v1600_v39 = vrot.slane %v7775_v46, 3 }
  0xbb   : > { %1099 = vmatpush.bf16.xpose.msra.mxu1 %v1077_v43  ;;  %v943_v43 = vsel %vm296_vm0, %v923_v11, 0  ;;  %v1110_v19 = vunpack.c.l.b16 %v1108_v23  ;;  %v1547_v11 = vsel %vm296_vm0, %v1521_v32, 0 }
  0xbc   : > { %967 = vmatpush.bf16.xpose.msra.mxu0 %v949_v34  ;;  %v1611_v34 = vshll.u32 %v1570_v18, 16  ;;  %v1232_v30 = vor.u32 %v1231_v15, %v1227_v31  ;;  %v1605_v18 = vor.u32 %v1604_v50, %v1603_v13  ;;  %v1430_v50 = vrot.slane %v7848_v41, 1 }
  0xbe   : > { %v1237_v58 = vsel %vm227_vm2, %v1232_v30, %v1236_v6 }
  0xbf   : > { %1325 = vmatpush.bf16.xpose.msra.mxu3 %v1307_v62  ;;  %v1003_v62 = vsel %vm771_vm7, %v994_v7, %v1002_v47  ;;  %v1613_v47 = vrot.slane %v1611_v34, 3  ;;  %v1516_v7 = vrot.slane %v7755_v0, 2  ;;  %v1298_v6 = vsel %vm296_vm0, %v1237_v58, 0 }
  0xc0   : > { %v1071_v60 = vsel %vm296_vm0, %v1003_v62, 0  ;;  %v1386_v62 = vsel %vm296_vm0, %v1360_v63, 0 }
  0xc1   : > { %v1519_v15 = vsel %vm541_vm6, %v1516_v7, %v1518_v52  ;;  %v1431_v52 = vrot.slane %v7837_v61, 2 }
  0xc2   : > { %1153 = vmatpush.bf16.xpose.msra.mxu2 %v1131_v1  ;;  %v979_v1 = vunpack.c.l.b16 %v7949_v37 }
  0xc3   : > { %1100 = vmatpush.bf16.xpose.msra.mxu1 %v1074_v29  ;;  %v1614_v29 = vor.u32 %v1613_v47, %v1610_v4  ;;  %v1514_v47 = vrot.slane %v7793_v10, 2  ;;  %v1432_v8 = vor.u32 %v1431_v52, %v1430_v50  ;;  %v1583_v52 = vrot.slane %v7896_v28, 2 }
  0xc4   : > { %968 = vmatpush.bf16.xpose.msra.mxu0 %v946_v21  ;;  %v980_v20 = vpack.c.b16 %v979_v1, %v979_v1  ;;  %v1440_v21 = vor.u32 %v1439_v36, %v1438_v42  ;;  %v1601_v1 = vor.u32 %v1600_v39, %v1599_v45  ;;  %v1544_v42 = vsel %vm296_vm0, %v1519_v15, 0  ;;  %v1776_v15 = vld [vmem:[%s7394_s14 + $0x4c] sm:$0x7] }
  0xc5   : > { %v1615_v34 = vsel %vm608_vm4, %v1605_v18, %v1614_v29  ;;  %v1591_v29 = vrot.slane %v7848_v41, 2  ;;  %v1587_v41 = vrot.slane %v7876_v22, 2  ;;  %v1784_v50 = vunpack.c.l.b16 %v1776_v15  ;;  %v8102_v15 = vld [vmem:[%s7394_s14 + $0x3c] sm:$0xff]  }
  0xc6   : > { %v982_v38 = vshrl.u32 %v980_v20, 16  ;;  %v1445_v59 = vsel %vm445_vm3, %v1440_v21, %v1444_v44  ;;  %v1355_v44 = vrot.slane %v7755_v0, 1  ;;  %v1641_v31 = vsel %vm296_vm0, %v1615_v34, 0 }
  0xc7   : > { %1326 = vmatpush.bf16.xpose.msra.mxu3 %v1304_v12  ;;  %v1125_v12 = vsel %vm296_vm0, %v7931_v27, 0  ;;  %v1477_v16 = vsel %vm296_vm0, %v1445_v59, 0  ;;  %v1606_v4 = vsel %vm608_vm4, %v1601_v1, %v1605_v18  ;;  %v1426_v20 = vrot.slane %v7876_v22, 1  ;;  %v1336_v22 = vld [vmem:[%s7394_s14 + $0x8] sm:$0xe] }
  0xc8   : > { %v1358_v36 = vsel %vm378_vm1, %v1355_v44, %v1357_v24  ;;  %v1638_v24 = vsel %vm296_vm0, %v1606_v4, 0  ;;  %v1512_v18 = vrot.slane %v7824_v57, 2  ;;  %v1422_v59 = vrot.slane %v7896_v28, 1 }
  0xc9   : > { %v1383_v32 = vsel %vm296_vm0, %v1358_v36, 0  ;;  %v1510_v34 = vrot.slane %v7851_v51, 2  ;;  %v1584_v4 = vrot.slane %v7883_v26, 3 }
  0xca   : > { %1154 = vmatpush.bf16.xpose.msra.mxu2 %v1128_v55  ;;  %v1434_v55 = vrot.slane %v7821_v25, 1 }
  0xcb   : > { %1101 = vmatpush.bf16.xpose.msra.mxu1 %v1071_v60  ;;  %v1596_v60 = vrot.slane %v7805_v56, 3 }
  0xcc   : > { %969 = vmatpush.bf16.xpose.msra.mxu0 %v943_v43  ;;  %v1111_v43 = vpack.c.b16 %v1110_v19, %v1110_v19  ;;  %v1436_v2 = vor.u32 %v1435_v48, %v1434_v55  ;;  %v1592_v19 = vrot.slane %v7837_v61, 3  ;;  %v1588_v61 = vrot.slane %v7862_v5, 3 }
  0xcd   : > { %v1423_v55 = vrot.slane %v7883_v26, 2 }
  0xce   : > { %v1180_v14 = vshrl.u32 %v1111_v43, 16  ;;  %v1112_v46 = vrot.slane %v1111_v43, 1  ;;  %v1441_v13 = vsel %vm445_vm3, %v1436_v2, %v1440_v21  ;;  %v1437_v33 = vsel %vm445_vm3, %v1432_v8, %v1436_v2 }
  0xcf   : > { %1327 = vmatpush.bf16.xpose.msra.mxu3 %v1301_v35  ;;  %v1595_v35 = vrot.slane %v7821_v25, 2  ;;  %v1474_v23 = vsel %vm296_vm0, %v1441_v13, 0  ;;  %v1517_v25 = vsel %vm541_vm6, %v1514_v47, %v1516_v7  ;;  %v1515_v7 = vsel %vm541_vm6, %v1512_v18, %v1514_v47 }
  0xd0   : > { %v1182_v0 = vrot.slane %v1180_v14, 1  ;;  %v1538_v48 = vsel %vm296_vm0, %v1515_v7, 0  ;;  %v1589_v39 = vor.u32 %v1588_v61, %v1587_v41  ;;  %v1424_v2 = vor.u32 %v1423_v55, %v1422_v59 }
  0xd1   : > { %v1597_v30 = vor.u32 %v1596_v60, %v1595_v35  ;;  %v1508_v13 = vrot.slane %v7866_v9, 2  ;;  %v1419_v47 = vrot.slane %v7913_v53, 2  ;;  %v1345_v41 = vrot.slane %v7899_v40, 1 }
  0xd2   : > { %1155 = vmatpush.bf16.xpose.msra.mxu2 %v1125_v12  ;;  %6469 = vmatmul.msk.bf16.vlgmr.msra.gmra.mxu1 %vm296_vm0, %v982_v38  ;;  %v1593_v38 = vor.u32 %v1592_v19, %v1591_v29 }
  0xd3   : > { %1482 = vmatpush.bf16.xpose.msrb.mxu1 %v1480_v49  ;;  %v1353_v49 = vrot.slane %v7793_v10, 1  ;;  %v1427_v10 = vrot.slane %v7862_v5, 2  ;;  %v1602_v21 = vsel %vm608_vm4, %v1597_v30, %v1601_v1  ;;  %v1349_v5 = vrot.slane %v7851_v51, 1 }
  0xd4   : > { %970 = vmatpush.bf16.xpose.msra.mxu0 %v940_v3  ;;  %v1351_v3 = vrot.slane %v7824_v57, 1  ;;  %v1635_v63 = vsel %vm296_vm0, %v1602_v21, 0  ;;  %v1598_v45 = vsel %vm608_vm4, %v1593_v38, %v1597_v30  ;;  %v1342_v1 = vunpack.c.l.b16 %v1336_v22 }
  0xd5   : > { %v1356_v56 = vsel %vm378_vm1, %v1353_v49, %v1355_v44  ;;  %v1428_v58 = vor.u32 %v1427_v10, %v1426_v20  ;;  %v7358_v44 = vld [vmem:[%s7394_s14 + $0x44] sm:$0xf0]   ;;  %v1513_v51 = vsel %vm541_vm6, %v1510_v34, %v1512_v18  ;;  %v1511_v26 = vsel %vm541_vm6, %v1508_v13, %v1510_v34 }
  0xd6   : > { %v1380_v12 = vsel %vm296_vm0, %v1356_v56, 0  ;;  %v1354_v57 = vsel %vm378_vm1, %v1351_v3, %v1353_v49  ;;  %v1352_v36 = vsel %vm378_vm1, %v1349_v5, %v1351_v3  ;;  %v1497_v49 = vld [vmem:[%s7394_s14 + $0x8] sm:$0xc]  ;;  %v1585_v56 = vor.u32 %v1584_v4, %v1583_v52  ;;  %v365_v3 = vpop.f32.mrf.mxu1 }
  0xd7   : > { %1328 = vmatpush.bf16.xpose.msra.mxu3 %v1298_v6  ;;  %v1433_v43 = vsel %vm445_vm3, %v1428_v58, %v1432_v8  ;;  %v7357_v6 = vld [vmem:[%s7394_s14 + $0x44] sm:$0xf]  ;;  %v1429_v35 = vsel %vm445_vm3, %v1424_v2, %v1428_v58  ;;  %v1347_v8 = vrot.slane %v7866_v9, 1  ;;  %v1579_v20 = vrot.slane %v7926_v17, 2 }
  0xd8   : > { %v1468_v14 = vsel %vm296_vm0, %v1433_v43, 0  ;;  %v1465_v30 = vsel %vm296_vm0, %v1429_v35, 0  ;;  %v1580_v10 = vrot.slane %v7913_v53, 3  ;;  %v1503_v21 = vunpack.c.l.b16 %v1497_v49  ;;  %v333_v29 = vpop.f32.mrf.mxu0 }
  0xd9   : > { %6470 = vmatmul.msk.bf16.vlgmr.msra.gmra.mxu2 %vm296_vm0, %v1112_v46  ;;  %v6784_v46 = vunpack.c.h.b16 %v7931_v27  ;;  %v1418_v27 = vrot.slane %v7926_v17, 1  ;;  %v1532_v9 = vsel %vm296_vm0, %v1511_v26, 0  ;;  %v366_v58 = vadd.f32 %v365_v3, %v333_v29 }
  0xda   : > { %1549 = vmatpush.bf16.xpose.msrb.mxu2 %v1547_v11  ;;  %v1471_v11 = vsel %vm296_vm0, %v1437_v33, 0  ;;  %v1590_v7 = vsel %vm608_vm4, %v1585_v56, %v1589_v39  ;;  %v8093_v59 = vor.u32 %v1580_v10, %v1579_v20  ;;  %v1843_v26 = vshll.u32 %v8102_v15, 16 }
  0xdb   : > { %1483 = vmatpush.bf16.xpose.msrb.mxu1 %v1477_v16  ;;  %6468 = vmatmul.msk.bf16.vlgmr.msra.gmra.mxu0 %vm296_vm0, %v7949_v37  ;;  %v1541_v37 = vsel %vm296_vm0, %v1517_v25, 0  ;;  %v8042_v16 = vld [vmem:[%s7394_s14 + $0x48] sm:$0xff]   ;;  %v8059_v60 = vpack.c.b16 %v6784_v46, %v1342_v1  ;;  %v8069_v25 = vpack.c.b16 %v1784_v50, %v1784_v50  ;;  %v8073_v33 = vor.u32 %v1419_v47, %v1418_v27 }
  0xdc   : > { %1388 = vmatpush.bf16.xpose.msrb.mxu0 %v1386_v62  ;;  %v8038_v62 = vld [vmem:[%s7394_s14 + $0x40] sm:$0xff]   ;;  %v1980_v61 = vunpack.c.h.b16 %v8042_v16  ;;  %v1504_v55 = vpack.c.b16 %v6784_v46, %v1503_v21 }
  0xdd   : > { %v1411_v18 = vshrl.u32 %v8059_v60, 16  ;;  %v1414_v19 = vshll.u32 %v8059_v60, 16  ;;  %v1858_v17 = vshrl.u32 %v8069_v25, 16  ;;  %v1861_v53 = vshll.u32 %v8069_v25, 16 }
  0xde   : > { %6499 = vmatmul.msk.bf16.vlgmr.msra.gmra.mxu3 %vm296_vm0, %v1182_v0  ;;  %v1594_v0 = vsel %vm608_vm4, %v1589_v39, %v1593_v38  ;;  %v1981_v1 = vpack.c.b16 %v1980_v61, %v1980_v61  ;;  %v1572_v47 = vshrl.u32 %v1504_v55, 16  ;;  %v1575_v35 = vshll.u32 %v1504_v55, 16  ;;  %v8128_v61 = vld [vmem:[%s7394_s14 + $0x34] sm:$0xff]  }
  0xdf   : > { %1643 = vmatpush.bf16.xpose.msrb.mxu3 %v1641_v31  ;;  %v1377_v31 = vsel %vm296_vm0, %v1354_v57, 0  ;;  %v1629_v28 = vsel %vm296_vm0, %v1594_v0, 0  ;;  %v1425_v57 = vsel %vm445_vm3, %v8073_v33, %v1424_v2  ;;  %v432_v34 = vpop.f32.mrf.mxu2  ;;  %v1416_v43 = vrot.slane %v1414_v19, 2 }
  0xe0   : > { %v436_v39 = vadd.f32 %v432_v34, %v366_v58  ;;  %v1626_v2 = vsel %vm296_vm0, %v1590_v7, 0  ;;  %v1348_v0 = vsel %vm378_vm1, %v1345_v41, %v1347_v8  ;;  %v335_v52 = vpop.f32.mrf.mxu0  ;;  %v2022_v20 = vshll.u32 %v1981_v1, 16 }
  0xe1   : > { %v1505_v10 = vrot.slane %v1504_v55, 2  ;;  %v1344_v29 = vrot.slane %v8059_v60, 1 }
  0xe2   : > { %1550 = vmatpush.bf16.xpose.msrb.mxu2 %v1544_v42  ;;  %v1632_v42 = vsel %vm296_vm0, %v1598_v45, 0  ;;  %v2024_v55 = vrot.slane %v2022_v20, 4 }
  0xe3   : > { %1484 = vmatpush.bf16.xpose.msrb.mxu1 %v1474_v23  ;;  %v1374_v23 = vsel %vm296_vm0, %v1352_v36, 0  ;;  %v1462_v36 = vsel %vm296_vm0, %v1425_v57, 0 }
  0xe4   : > { %1389 = vmatpush.bf16.xpose.msrb.mxu0 %v1383_v32  ;;  %v1535_v32 = vsel %vm296_vm0, %v1513_v51, 0 }
  0xe7   : > { %1644 = vmatpush.bf16.xpose.msrb.mxu3 %v1638_v24  ;;  %v8064_v24 = vor.u32 %v7358_v44, %v7357_v6  ;;  %v1860_v44 = vrot.slane %v1858_v17, 2  ;;  %v1577_v17 = vrot.slane %v1575_v35, 3 }
  0xe9   : > { %v1929_v21 = vrot.slane %v8064_v24, 3 }
  0xea   : > { %1551 = vmatpush.bf16.xpose.msrb.mxu2 %v1541_v37  ;;  %v1506_v37 = vrot.slane %v7899_v40, 2 }
  0xeb   : > { %1485 = vmatpush.bf16.xpose.msrb.mxu1 %v1471_v11  ;;  %v1852_v11 = vshll.u32 %v8064_v24, 16 }
  0xec   : > { %1390 = vmatpush.bf16.xpose.msrb.mxu0 %v1380_v12  ;;  %v1849_v12 = vshrl.u32 %v8064_v24, 16  ;;  %v1509_v38 = vsel %vm541_vm6, %v1506_v37, %v1508_v13  ;;  %v1586_v13 = vsel %vm608_vm4, %v8093_v59, %v1585_v56  ;;  %v2019_v56 = vshrl.u32 %v1981_v1, 16 }
  0xed   : > { %v1854_v45 = vrot.slane %v1852_v11, 3  ;;  %v1529_v46 = vsel %vm296_vm0, %v1509_v38, 0  ;;  %v1845_v38 = vrot.slane %v1843_v26, 3 }
  0xee   : > { %v1851_v22 = vrot.slane %v1849_v12, 2  ;;  %v2014_v60 = vrot.slane %v1849_v12, 3 }
  0xef   : > { %1645 = vmatpush.bf16.xpose.msrb.mxu3 %v1635_v63  ;;  %v1350_v63 = vsel %vm378_vm1, %v1347_v8, %v1349_v5  ;;  %v1674_v5 = vld [vmem:[%s7394_s14 + $0x4c] sm:$0x3]  ;;  %v1368_v8 = vsel %vm296_vm0, %v1348_v0, 0 }
  0xf0   : > { %v1371_v6 = vsel %vm296_vm0, %v1350_v63, 0  ;;  %v1708_v50 = vunpack.c.l.b16 %v1674_v5  ;;  %v1855_v27 = vor.u32 %v1854_v45, %v1851_v22  ;;  %v1574_v63 = vrot.slane %v1572_v47, 2  ;;  %v1496_v45 = vld [vmem:[%s7625_s18 + $0x4] sm:$0x8] }
  0xf1   : > { %v1346_v22 = vsel %vm378_vm1, %v1344_v29, %v1345_v41  ;;  %v1499_v41 = vunpack.c.l.b16 %v1496_v45 }
  0xf2   : > { %1552 = vmatpush.bf16.xpose.msrb.mxu2 %v1538_v48  ;;  %v1413_v48 = vrot.slane %v1411_v18, 1  ;;  %v1931_v18 = vrot.slane %v8069_v25, 3  ;;  %v1717_v3 = vpack.c.b16 %v1708_v50, %v1708_v50  ;;  %v2015_v25 = vrot.slane %v1852_v11, 4 }
  0xf3   : > { %1486 = vmatpush.bf16.xpose.msrb.mxu1 %v1468_v14  ;;  %v527_v14 = vpop.f32.mrf.mxu3  ;;  %v1731_v11 = vrot.slane %v8064_v24, 2  ;;  %v1500_v35 = vpack.c.b16 %v1499_v41, %v1499_v41 }
  0xf4   : > { %1391 = vmatpush.bf16.xpose.msrb.mxu0 %v1377_v31  ;;  %v1863_v31 = vrot.slane %v1861_v53, 3  ;;  %v8107_v51 = vadd.f32 %v527_v14, %v436_v39  ;;  %v1417_v4 = vor.u32 %v1416_v43, %v1413_v48  ;;  %v1507_v48 = vsel %vm541_vm6, %v1505_v10, %v1506_v37 }
  0xf5   : > { %v1932_v43 = vsel %vm704_vm5, %v1929_v21, %v1931_v18  ;;  %v1733_v5 = vrot.slane %v1717_v3, 2  ;;  %v1578_v39 = vor.u32 %v1577_v17, %v1574_v63  ;;  %v1831_v37 = vshrl.u32 %v8128_v61, 16 }
  0xf6   : > { %v1421_v19 = vsel %vm445_vm3, %v1417_v4, %v8073_v33  ;;  %v2021_v33 = vrot.slane %v2019_v56, 3  ;;  %v2016_v40 = vor.u32 %v2015_v25, %v2014_v60  ;;  %v1958_v24 = vsel %vm296_vm0, %v1932_v43, 0  ;;  %v8157_v4 = vld [vmem:[%s7394_s14 + $0x2c] sm:$0xff]  }
  0xf7   : > { %1646 = vmatpush.bf16.xpose.msrb.mxu3 %v1632_v42  ;;  %v1335_v42 = vld [vmem:[%s7625_s18 + $0x4] sm:$0x4]  ;;  %v1459_v34 = vsel %vm296_vm0, %v1421_v19, 0  ;;  %v1734_v1 = vsel %vm541_vm6, %v1731_v11, %v1733_v5  ;;  %v1833_v50 = vrot.slane %v1831_v37, 2  ;;  %v1729_v56 = vrot.slane %v8102_v15, 2 }
  0xf8   : > { %v1338_v49 = vunpack.c.l.b16 %v1335_v42  ;;  %v2025_v14 = vor.u32 %v2024_v55, %v2021_v33  ;;  %v1582_v42 = vsel %vm608_vm4, %v1578_v39, %v8093_v59  ;;  %v1825_v10 = vshll.u32 %v8157_v4, 16  ;;  %v8190_v39 = vld [vmem:[%s7394_s14 + $0x1c] sm:$0xff]  }
  0xf9   : > { %v1501_v18 = vrot.slane %v1500_v35, 3  ;;  %v1727_v33 = vrot.slane %v8128_v61, 2 }
  0xfa   : > { %1553 = vmatpush.bf16.xpose.msrb.mxu2 %v1535_v32  ;;  %v367_v32 = vpop.f32.mrf.mxu1  ;;  %v8125_v58 = vpack.c.b16 %v1338_v49, %v1338_v49  ;;  %v2026_v47 = vsel %vm771_vm7, %v2016_v40, %v2025_v14  ;;  %v1760_v49 = vsel %vm296_vm0, %v1734_v1, 0  ;;  %v1827_v17 = vrot.slane %v1825_v10, 3 }
  0xfb   : > { %1487 = vmatpush.bf16.xpose.msrb.mxu1 %v1465_v30  ;;  %v1623_v30 = vsel %vm296_vm0, %v1586_v13, 0  ;;  %v529_v57 = vpop.f32.mrf.mxu3  ;;  %v2052_v20 = vsel %vm296_vm0, %v2026_v47, 0  ;;  %v2003_v5 = vrot.slane %v1825_v10, 4  ;;  %v1923_v14 = vrot.slane %v8157_v4, 3 }
  0xfc   : > { %1392 = vmatpush.bf16.xpose.msrb.mxu0 %v1374_v23  ;;  %v1864_v23 = vor.u32 %v1863_v31, %v1860_v44  ;;  %v1404_v44 = vshrl.u32 %v8125_v58, 16  ;;  %v1834_v31 = vshll.u32 %v8128_v61, 16  ;;  %v2006_v57 = vrot.slane %v1831_v37, 3 }
  0xfd   : > { %v1804_v1 = vshrl.u32 %v8190_v39, 16 }
  0xfe   : > { %v1865_v53 = vsel %vm608_vm4, %v1855_v27, %v1864_v23  ;;  %v1406_v13 = vrot.slane %v1404_v44, 2  ;;  %v1836_v52 = vrot.slane %v1834_v31, 3  ;;  %v2011_v23 = vrot.slane %v1843_v26, 4 }
  0xff   : > { %1647 = vmatpush.bf16.xpose.msrb.mxu3 %v1629_v28  ;;  %v1840_v28 = vshrl.u32 %v8102_v15, 16  ;;  %v1891_v12 = vsel %vm296_vm0, %v1865_v53, 0  ;;  %v1822_v26 = vshrl.u32 %v8157_v4, 16  ;;  %v8174_v53 = vld [vmem:[%s7394_s14 + $0x24] sm:$0xff]   ;;  %v2007_v60 = vrot.slane %v1834_v31, 4 }
 0x100   : > { %v1816_v43 = vshll.u32 %v8174_v53, 16  ;;  %v1921_v47 = vrot.slane %v8174_v53, 3 }
 0x101   : > { %v1842_v7 = vrot.slane %v1840_v28, 2  ;;  %v2010_v32 = vrot.slane %v1840_v28, 3  ;;  %v1837_v28 = vor.u32 %v1836_v52, %v1833_v50  ;;  %v1824_v63 = vrot.slane %v1822_v26, 2 }
 0x102   : > { %1554 = vmatpush.bf16.xpose.msrb.mxu2 %v1532_v9  ;;  %v434_v9 = vpop.f32.mrf.mxu2  ;;  %v2008_v45 = vor.u32 %v2007_v60, %v2006_v57  ;;  %v1818_v31 = vrot.slane %v1816_v43, 3 }
 0x103   : > { %1488 = vmatpush.bf16.xpose.msrb.mxu1 %v1462_v36  ;;  %v1927_v36 = vrot.slane %v8102_v15, 3  ;;  %v2012_v29 = vor.u32 %v2011_v23, %v2010_v32  ;;  %v1732_v9 = vsel %vm541_vm6, %v1729_v56, %v1731_v11  ;;  %v2002_v11 = vrot.slane %v1822_v26, 3 }
 0x104   : > { %1393 = vmatpush.bf16.xpose.msrb.mxu0 %v1371_v6  ;;  %v1846_v6 = vor.u32 %v1845_v38, %v1842_v7  ;;  %v1925_v38 = vrot.slane %v8128_v61, 3  ;;  %v1730_v61 = vsel %vm541_vm6, %v1727_v33, %v1729_v56  ;;  %v8210_v56 = vld [vmem:[%s7394_s14 + $0x14] sm:$0xff]  }
 0x105   : > { %v1930_v59 = vsel %vm704_vm5, %v1927_v36, %v1929_v21  ;;  %v1340_v21 = vrot.slane %v8125_v58, 2  ;;  %v2017_v7 = vsel %vm771_vm7, %v2012_v29, %v2016_v40  ;;  %v1757_v58 = vsel %vm296_vm0, %v1732_v9, 0 }
 0x106   : > { %v1856_v0 = vsel %vm608_vm4, %v1846_v6, %v1855_v27  ;;  %v1955_v15 = vsel %vm296_vm0, %v1930_v59, 0  ;;  %v1847_v3 = vsel %vm608_vm4, %v1837_v28, %v1846_v6  ;;  %v2049_v55 = vsel %vm296_vm0, %v2017_v7, 0 }
 0x107   : > { %1648 = vmatpush.bf16.xpose.msrb.mxu3 %v1626_v2  ;;  %v1526_v2 = vsel %vm296_vm0, %v1507_v48, 0  ;;  %v1888_v27 = vsel %vm296_vm0, %v1856_v0, 0  ;;  %v1885_v25 = vsel %vm296_vm0, %v1847_v3, 0  ;;  %v1828_v48 = vor.u32 %v1827_v17, %v1824_v63 }
 0x108   : > { %v2013_v40 = vsel %vm771_vm7, %v2008_v45, %v2012_v29  ;;  %v1754_v41 = vsel %vm296_vm0, %v1730_v61, 0  ;;  %v1924_v29 = vsel %vm704_vm5, %v1921_v47, %v1923_v14  ;;  %v1795_v3 = vshrl.u32 %v8210_v56, 16 }
 0x109   : > { %v1838_v44 = vsel %vm608_vm4, %v1828_v48, %v1837_v28  ;;  %v1658_v28 = vld [vmem:[%s7394_s14 + $0xc] sm:$0xc]  ;;  %v1798_v63 = vshll.u32 %v8210_v56, 16  ;;  %v6787_v17 = vunpack.c.l.b16 %v7937_v54  ;;  %v1946_v57 = vsel %vm296_vm0, %v1924_v29, 0 }
 0x10a   : > { %1555 = vmatpush.bf16.xpose.msrb.mxu2 %v1529_v46  ;;  %v1365_v46 = vsel %vm296_vm0, %v1346_v22, 0  ;;  %v1928_v22 = vsel %vm704_vm5, %v1925_v38, %v1927_v36  ;;  %v2046_v36 = vsel %vm296_vm0, %v2013_v40, 0  ;;  %v1692_v7 = vunpack.c.l.b16 %v1658_v28  ;;  %v8257_v28 = vld [vmem:[%s7394_s14 + $0x40] sm:$0xff] }
 0x10b   : > { %1489 = vmatpush.bf16.xpose.msrb.mxu1 %v1459_v34  ;;  %v1813_v34 = vshrl.u32 %v8174_v53, 16  ;;  %v1952_v6 = vsel %vm296_vm0, %v1928_v22, 0  ;;  %v1994_v22 = vrot.slane %v1804_v1, 3 }
 0x10c   : > { %1394 = vmatpush.bf16.xpose.msrb.mxu0 %v1368_v8  ;;  %v1620_v8 = vsel %vm296_vm0, %v1582_v42, 0  ;;  %v1807_v42 = vshll.u32 %v8190_v39, 16 }
 0x10d   : > { %v1815_v37 = vrot.slane %v1813_v34, 2 }
 0x10e   : > { %v1809_v59 = vrot.slane %v1807_v42, 3 }
 0x10f   : > { %1649 = vmatpush.bf16.xpose.msrb.mxu3 %v1623_v30  ;;  %v1565_v30 = vshrl.u32 %v1500_v35, 16  ;;  %v1819_v0 = vor.u32 %v1818_v31, %v1815_v37  ;;  %v1998_v35 = vrot.slane %v1813_v34, 3  ;;  %v1800_v34 = vrot.slane %v1798_v63, 3 }
 0x111   : > { %v1567_v19 = vrot.slane %v1565_v30, 3  ;;  %v1829_v30 = vsel %vm608_vm4, %v1819_v0, %v1828_v48  ;;  %v1797_v48 = vrot.slane %v1795_v3, 2 }
 0x112   : > { %1556 = vmatpush.bf16.xpose.msrb.mxu2 %v1526_v2  ;;  %6501 = vmatmul.msk.bf16.vlgmr.msrb.gmra.mxu1 %vm296_vm0, %v1406_v13  ;;  %v1725_v2 = vrot.slane %v8157_v4, 2  ;;  %v1926_v13 = vsel %vm704_vm5, %v1923_v14, %v1925_v38  ;;  %v2362_v14 = vld [vmem:[%s7394_s14 + $0x50] sm:$0x3] }
 0x113   : > { %1893 = vmatpush.bf16.xpose.msra.mxu1 %v1891_v12  ;;  %v690_v12 = vpop.f32.mrf.mxu1 }
 0x114   : > { %1395 = vmatpush.bf16.xpose.msrb.mxu0 %v1365_v46  ;;  %v1882_v46 = vsel %vm296_vm0, %v1838_v44, 0  ;;  %v1728_v52 = vsel %vm541_vm6, %v1725_v2, %v1727_v33 }
 0x115   : > { %v1751_v26 = vsel %vm296_vm0, %v1728_v52, 0  ;;  %v1917_v52 = vrot.slane %v8210_v56, 3 }
 0x117   : > { %1650 = vmatpush.bf16.xpose.msrb.mxu3 %v1620_v8  ;;  %v1806_v8 = vrot.slane %v1804_v1, 2 }
 0x118   : > { %v595_v50 = vpop.f32.mrf.mxu0 }
 0x119   : > { %6502 = vmatmul.msk.bf16.vlgmr.msrb.gmra.mxu2 %vm296_vm0, %v1501_v18  ;;  %v599_v23 = vadd.f32 %v595_v50, %v8107_v51  ;;  %v1723_v51 = vrot.slane %v8174_v53, 2  ;;  %v2138_v53 = vld [vmem:[%s7394_s14 + $0x50] sm:$0x1] }
 0x11a   : > { %1960 = vmatpush.bf16.xpose.msra.mxu2 %v1958_v24  ;;  %v2004_v24 = vor.u32 %v2003_v5, %v2002_v11  ;;  %v8233_v11 = vld [vmem:[%s7394_s14 + $0x48] sm:$0xff]  ;;  %v2176_v5 = vunpack.c.l.b16 %v2138_v53 }
 0x11b   : > { %1894 = vmatpush.bf16.xpose.msra.mxu1 %v1888_v27  ;;  %6500 = vmatmul.msk.bf16.vlgmr.msrb.gmra.mxu0 %vm296_vm0, %v1340_v21  ;;  %v692_v32 = vpop.f32.mrf.mxu1  ;;  %v1949_v27 = vsel %vm296_vm0, %v1926_v13, 0  ;;  %v2368_v13 = vunpack.c.l.b16 %v2362_v14 }
 0x11c   : > { %1762 = vmatpush.bf16.xpose.msra.mxu0 %v1760_v49  ;;  %v2009_v4 = vsel %vm771_vm7, %v2004_v24, %v2008_v45  ;;  %v1999_v49 = vrot.slane %v1816_v43, 4  ;;  %v758_v10 = vpop.f32.mrf.mxu2  ;;  %v8229_v43 = vpack.c.b16 %v6787_v17, %v1692_v7  ;;  %v1995_v45 = vrot.slane %v1807_v42, 4 }
 0x11d   : > { %v2043_v18 = vsel %vm296_vm0, %v2009_v4, 0  ;;  %v8243_v42 = vpack.c.b16 %v2176_v5, %v2176_v5  ;;  %v1719_v4 = vrot.slane %v8210_v56, 2  ;;  %v2369_v56 = vpack.c.b16 %v2368_v13, %v2368_v13 }
 0x11e   : > { %6503 = vmatmul.msk.bf16.vlgmr.msrb.gmra.mxu3 %vm296_vm0, %v1567_v19  ;;  %v2000_v9 = vor.u32 %v1999_v49, %v1998_v35  ;;  %v1810_v19 = vor.u32 %v1809_v59, %v1806_v8  ;;  %v1996_v1 = vor.u32 %v1995_v45, %v1994_v22  ;;  %v1991_v35 = vrot.slane %v1798_v63, 4 }
 0x11f   : > { %2054 = vmatpush.bf16.xpose.msra.mxu3 %v2052_v20  ;;  %v694_v20 = vadd.f32 %v690_v12, %v599_v23  ;;  %v1908_v12 = vld [vmem:[%s7394_s14 + $0xc] sm:$0x8]  ;;  %v2410_v53 = vshll.u32 %v2369_v56, 16 }
 0x120   : > { %v597_v60 = vpop.f32.mrf.mxu0  ;;  %v2005_v33 = vsel %vm771_vm7, %v2000_v9, %v2004_v24  ;;  %v1820_v54 = vsel %vm608_vm4, %v1810_v19, %v1819_v0  ;;  %v1787_v24 = vshrl.u32 %v8229_v43, 16  ;;  %v2001_v59 = vsel %vm771_vm7, %v1996_v1, %v2000_v9 }
 0x121   : > { %v762_v21 = vadd.f32 %v758_v10, %v694_v20  ;;  %v853_v38 = vpop.f32.mrf.mxu3  ;;  %v2040_v37 = vsel %vm296_vm0, %v2005_v33, 0  ;;  %v1876_v40 = vsel %vm296_vm0, %v1820_v54, 0  ;;  %v2250_v20 = vshll.u32 %v8243_v42, 16  ;;  %v8269_v60 = vld [vmem:[%s7625_s18 + $0x8] sm:$0x1] }
 0x122   : > { %1961 = vmatpush.bf16.xpose.msra.mxu2 %v1955_v15  ;;  %v1879_v15 = vsel %vm296_vm0, %v1829_v30, 0  ;;  %v1789_v49 = vrot.slane %v1787_v24, 2  ;;  %v2246_v30 = vshrl.u32 %v8233_v11, 16  ;;  %v2319_v54 = vrot.slane %v8243_v42, 1 }
 0x123   : > { %1895 = vmatpush.bf16.xpose.msra.mxu1 %v1885_v25  ;;  %v1726_v25 = vsel %vm541_vm6, %v1723_v51, %v1725_v2  ;;  %v1914_v2 = vunpack.c.l.b16 %v1908_v12  ;;  %v2252_v63 = vrot.slane %v2250_v20, 1  ;;  %v1778_v5 = vunpack.c.l.b16 %v8269_v60  ;;  %v8302_v20 = vld [vmem:[%s7394_s14 + $0x30] sm:$0xff] }
 0x124   : > { %1763 = vmatpush.bf16.xpose.msra.mxu0 %v1757_v58  ;;  %v8223_v58 = vadd.f32 %v853_v38, %v762_v21  ;;  %v1748_v61 = vsel %vm296_vm0, %v1726_v25, 0  ;;  %v760_v44 = vpop.f32.mrf.mxu2  ;;  %v2037_v21 = vsel %vm296_vm0, %v2001_v59, 0 }
 0x125   : > { %v1915_v23 = vpack.c.b16 %v6787_v17, %v1914_v2  ;;  %v2234_v17 = vshll.u32 %v8257_v28, 16  ;;  %v8282_v44 = vld [vmem:[%s7394_s14 + $0x38] sm:$0xff] }
 0x127   : > { %2055 = vmatpush.bf16.xpose.msra.mxu3 %v2049_v55  ;;  %v1919_v55 = vrot.slane %v8190_v39, 3  ;;  %v1983_v9 = vshrl.u32 %v1915_v23, 16  ;;  %v1916_v33 = vrot.slane %v1915_v23, 3 }
 0x129   : > { %v1922_v31 = vsel %vm704_vm5, %v1919_v55, %v1921_v47  ;;  %v855_v50 = vpop.f32.mrf.mxu3  ;;  %v1990_v47 = vrot.slane %v1795_v3, 3  ;;  %v1920_v10 = vsel %vm704_vm5, %v1917_v52, %v1919_v55  ;;  %v2317_v55 = vrot.slane %v8233_v11, 1 }
 0x12a   : > { %1962 = vmatpush.bf16.xpose.msra.mxu2 %v1952_v6  ;;  %v1721_v6 = vrot.slane %v8190_v39, 2  ;;  %v2242_v39 = vshll.u32 %v8233_v11, 16  ;;  %v1940_v7 = vsel %vm296_vm0, %v1920_v10, 0  ;;  %v1985_v22 = vrot.slane %v1983_v9, 3 }
 0x12b   : > { %1896 = vmatpush.bf16.xpose.msra.mxu1 %v1882_v46  ;;  %v1790_v46 = vshll.u32 %v8229_v43, 16  ;;  %v2402_v11 = vrot.slane %v2246_v30, 1  ;;  %v1918_v2 = vsel %vm704_vm5, %v1916_v33, %v1917_v52  ;;  %v2320_v24 = vsel %vm378_vm1, %v2317_v55, %v2319_v54  ;;  %v8319_v33 = vld [vmem:[%s7394_s14 + $0x28] sm:$0xff] }
 0x12c   : > { %1764 = vmatpush.bf16.xpose.msra.mxu0 %v1754_v41  ;;  %v1801_v41 = vor.u32 %v1800_v34, %v1797_v48  ;;  %v1724_v0 = vsel %vm541_vm6, %v1721_v6, %v1723_v51  ;;  %v1722_v29 = vsel %vm541_vm6, %v1719_v4, %v1721_v6  ;;  %v1992_v51 = vor.u32 %v1991_v35, %v1990_v47 }
 0x12d   : > { %v1792_v8 = vrot.slane %v1790_v46, 3  ;;  %v1742_v38 = vsel %vm296_vm0, %v1722_v29, 0  ;;  %v1718_v34 = vrot.slane %v8229_v43, 2  ;;  %v2238_v6 = vshrl.u32 %v8257_v28, 16 }
 0x12e   : > { %v1811_v32 = vsel %vm608_vm4, %v1801_v41, %v1810_v19  ;;  %v1986_v19 = vshll.u32 %v1915_v23, 16  ;;  %v1997_v25 = vsel %vm771_vm7, %v1992_v51, %v1996_v1  ;;  %v1937_v52 = vsel %vm296_vm0, %v1918_v2, 0 }
 0x12f   : > { %2056 = vmatpush.bf16.xpose.msra.mxu3 %v2046_v36  ;;  %v1943_v36 = vsel %vm296_vm0, %v1922_v31, 0  ;;  %v2034_v14 = vsel %vm296_vm0, %v1997_v25, 0  ;;  %v1720_v42 = vsel %vm541_vm6, %v1718_v34, %v1719_v4  ;;  %v2346_v35 = vsel %vm296_vm0, %v2320_v24, 0 }
 0x130   : > { %v1988_v45 = vrot.slane %v1986_v19, 4  ;;  %v2315_v23 = vrot.slane %v8257_v28, 1  ;;  %v2398_v10 = vrot.slane %v2238_v6, 1  ;;  %v2106_v29 = vsel %vm296_vm0, %v8042_v16, 0 }
 0x131   : > { %v2218_v9 = vshll.u32 %v8302_v20, 16  ;;  %v2222_v25 = vshrl.u32 %v8302_v20, 16 }
 0x132   : > { %1963 = vmatpush.bf16.xpose.msra.mxu2 %v1949_v27  ;;  %v8252_v27 = vrot.slane %v2242_v39, 1  ;;  %v1989_v1 = vor.u32 %v1988_v45, %v1985_v22 }
 0x133   : > { %1897 = vmatpush.bf16.xpose.msra.mxu1 %v1879_v15  ;;  %v1793_v15 = vor.u32 %v1792_v8, %v1789_v49 }
 0x134   : > { %1765 = vmatpush.bf16.xpose.msra.mxu0 %v1751_v26  ;;  %v1745_v26 = vsel %vm296_vm0, %v1724_v0, 0  ;;  %v2248_v3 = vor.u32 %v2246_v30, %v8252_v27  ;;  %v2226_v0 = vshll.u32 %v8282_v44, 16  ;;  %v1993_v4 = vsel %vm771_vm7, %v1989_v1, %v1992_v51 }
 0x135   : > { %v1802_v48 = vsel %vm608_vm4, %v1793_v15, %v1801_v41  ;;  %v1907_v41 = vld [vmem:[%s7625_s18 + $0x8] sm:$0x2]  ;;  %v2230_v30 = vshrl.u32 %v8282_v44, 16  ;;  %v2031_v28 = vsel %vm296_vm0, %v1993_v4, 0 }
 0x136   : > { %v2253_v12 = vsel %vm227_vm2, %v2248_v3, %v2252_v63  ;;  %v1870_v43 = vsel %vm296_vm0, %v1802_v48, 0  ;;  %v1910_v47 = vunpack.c.l.b16 %v1907_v41  ;;  %v2228_v59 = vrot.slane %v2226_v0, 1  ;;  %v8341_v41 = vld [vmem:[%s7394_s14 + $0x20] sm:$0xff] }
 0x137   : > { %2057 = vmatpush.bf16.xpose.msra.mxu3 %v2043_v18  ;;  %v1873_v18 = vsel %vm296_vm0, %v1811_v32, 0  ;;  %v2279_v46 = vsel %vm296_vm0, %v2253_v12, 0  ;;  %v1739_v32 = vsel %vm296_vm0, %v1720_v42, 0  ;;  %v2103_v48 = vsel %vm296_vm0, %v8038_v62, 0 }
 0x138   : > { %v2232_v15 = vor.u32 %v2230_v30, %v2228_v59 }
 0x13a   : > { %1964 = vmatpush.bf16.xpose.msra.mxu2 %v1946_v57  ;;  %v2407_v57 = vshrl.u32 %v2369_v56, 16  ;;  %v1911_v56 = vpack.c.b16 %v1910_v47, %v1910_v47  ;;  %v8355_v47 = vld [vmem:[%s7394_s14 + $0x30] sm:$0xff]  }
 0x13b   : > { %1898 = vmatpush.bf16.xpose.msra.mxu1 %v1876_v40  ;;  %v2412_v40 = vrot.slane %v2410_v53, 2  ;;  %v2220_v53 = vrot.slane %v2218_v9, 1 }
 0x13c   : > { %1766 = vmatpush.bf16.xpose.msra.mxu0 %v1748_v61  ;;  %v8278_v61 = vrot.slane %v2234_v17, 1  ;;  %v2409_v31 = vrot.slane %v2407_v57, 1  ;;  %v1912_v19 = vrot.slane %v1911_v56, 1  ;;  %v1976_v3 = vshrl.u32 %v1911_v56, 16  ;;  %v8371_v56 = vld [vmem:[%s7394_s14 + $0x50] sm:$0xff]  }
 0x13e   : > { %v2413_v50 = vor.u32 %v2412_v40, %v2409_v31  ;;  %v2237_v57 = vsel %vm227_vm2, %v2232_v15, %v8278_v61  ;;  %v2391_v40 = vrot.slane %v2218_v9, 2 }
 0x13f   : > { %2058 = vmatpush.bf16.xpose.msra.mxu3 %v2040_v37  ;;  %v2403_v37 = vrot.slane %v2242_v39, 2  ;;  %v2240_v39 = vor.u32 %v2238_v6, %v8278_v61  ;;  %v2273_v34 = vsel %vm296_vm0, %v2237_v57, 0  ;;  %v2210_v61 = vshll.u32 %v8319_v33, 16 }
 0x141   : > { %v2404_v13 = vor.u32 %v2403_v37, %v2402_v11  ;;  %v2245_v8 = vsel %vm227_vm2, %v2240_v39, %v8252_v27  ;;  %v2311_v11 = vrot.slane %v8302_v20, 1  ;;  %v2390_v37 = vrot.slane %v2222_v25, 1  ;;  %v8367_v20 = vld [vmem:[%s7394_s14 + $0x48] sm:$0xff]  }
 0x142   : > { %1965 = vmatpush.bf16.xpose.msra.mxu2 %v1943_v36  ;;  %v1779_v36 = vpack.c.b16 %v1778_v5, %v1778_v5  ;;  %v2276_v51 = vsel %vm296_vm0, %v2245_v8, 0  ;;  %v2224_v5 = vor.u32 %v2222_v25, %v2220_v53  ;;  %v2202_v39 = vshll.u32 %v8341_v41, 16  ;;  %v8389_v25 = vld [vmem:[%s7394_s14 + $0x28] sm:$0xff]  }
 0x143   : > { %1899 = vmatpush.bf16.xpose.msra.mxu1 %v1873_v18  ;;  %v2399_v18 = vrot.slane %v2234_v17, 2  ;;  %v2394_v17 = vrot.slane %v2230_v30, 1  ;;  %v2392_v42 = vor.u32 %v2391_v40, %v2390_v37  ;;  %v2387_v30 = vrot.slane %v2210_v61, 2  ;;  %v2773_v37 = vld [vmem:[%s7394_s14 + $0x54] sm:$0x7] }
 0x144   : > { %1767 = vmatpush.bf16.xpose.msra.mxu0 %v1745_v26  ;;  %v1781_v49 = vshrl.u32 %v1779_v36, 16  ;;  %v2414_v26 = vsel %vm445_vm3, %v2404_v13, %v2413_v50  ;;  %v2229_v31 = vsel %vm227_vm2, %v2224_v5, %v2228_v59  ;;  %v8404_v5 = vsel %vm296_vm0, %v8389_v25, 0 }
 0x145   : > { %v2440_v27 = vsel %vm296_vm0, %v2414_v26, 0  ;;  %v2400_v16 = vor.u32 %v2399_v18, %v2398_v10  ;;  %v7359_v26 = vld [vmem:[%s7394_s14 + $0x4c] sm:$0xf]  ;;  %v7360_v10 = vld [vmem:[%s7394_s14 + $0x4c] sm:$0xf0]  }
 0x147   : > { %2059 = vmatpush.bf16.xpose.msra.mxu3 %v2037_v21  ;;  %v2318_v21 = vsel %vm378_vm1, %v2315_v23, %v2317_v55  ;;  %v1978_v55 = vrot.slane %v1976_v3, 1  ;;  %v2405_v54 = vsel %vm445_vm3, %v2400_v16, %v2404_v13 }
 0x148   : > { %v2343_v63 = vsel %vm296_vm0, %v2318_v21, 0  ;;  %v2437_v45 = vsel %vm296_vm0, %v2405_v54, 0 }
 0x14a   : > { %1966 = vmatpush.bf16.xpose.msra.mxu2 %v1940_v7  ;;  %v2395_v7 = vrot.slane %v2226_v0, 2 }
 0x14b   : > { %1900 = vmatpush.bf16.xpose.msra.mxu1 %v1870_v43  ;;  %v2214_v43 = vshrl.u32 %v8319_v33, 16 }
 0x14c   : > { %1768 = vmatpush.bf16.xpose.msra.mxu0 %v1742_v38  ;;  %v2313_v38 = vrot.slane %v8282_v44, 1  ;;  %v2396_v22 = vor.u32 %v2395_v7, %v2394_v17  ;;  %v2383_v7 = vrot.slane %v2202_v39, 2 }
 0x14d   : > { %v2386_v59 = vrot.slane %v2214_v43, 1 }
 0x14e   : > { %v2316_v12 = vsel %vm378_vm1, %v2313_v38, %v2315_v23  ;;  %v2401_v6 = vsel %vm445_vm3, %v2396_v22, %v2400_v16  ;;  %v2314_v1 = vsel %vm378_vm1, %v2311_v11, %v2313_v38  ;;  %v8360_v23 = vrot.slane %v2202_v39, 1 }
 0x14f   : > { %2060 = vmatpush.bf16.xpose.msra.mxu3 %v2034_v14  ;;  %v2340_v62 = vsel %vm296_vm0, %v2316_v12, 0  ;;  %v1103_v44 = vpop.f32.mrf.mxu1  ;;  %v2212_v14 = vrot.slane %v2210_v61, 1  ;;  %v2434_v24 = vsel %vm296_vm0, %v2401_v6, 0  ;;  %v2337_v50 = vsel %vm296_vm0, %v2314_v1, 0 }
 0x150   : > { %v2388_v3 = vor.u32 %v2387_v30, %v2386_v59 }
 0x151   : > { %v2216_v36 = vor.u32 %v2214_v43, %v2212_v14 }
 0x152   : > { %1967 = vmatpush.bf16.xpose.msra.mxu2 %v1937_v52  ;;  %6505 = vmatmul.msk.bf16.vlgmr.msra.gmra.mxu1 %vm296_vm0, %v1781_v49  ;;  %v2309_v52 = vrot.slane %v8319_v33, 1  ;;  %v2206_v49 = vshrl.u32 %v8341_v41, 16  ;;  %v2307_v33 = vrot.slane %v8341_v41, 1  ;;  %v6977_v41 = vld [vmem:[%s7394_s14 + $0x10] sm:$0xf0] }
 0x153   : > { %2281 = vmatpush.bf16.xpose.msrb.mxu1 %v2279_v46  ;;  %v2270_v46 = vsel %vm296_vm0, %v2229_v31, 0  ;;  %v2221_v4 = vsel %vm227_vm2, %v2216_v36, %v2220_v53 }
 0x154   : > { %1769 = vmatpush.bf16.xpose.msra.mxu0 %v1739_v32  ;;  %v2397_v32 = vsel %vm445_vm3, %v2392_v42, %v2396_v22  ;;  %v2312_v21 = vsel %vm378_vm1, %v2309_v52, %v2311_v11  ;;  %v2267_v15 = vsel %vm296_vm0, %v2221_v4, 0  ;;  %v2208_v9 = vor.u32 %v2206_v49, %v8360_v23 }
 0x155   : > { %v2382_v17 = vrot.slane %v2206_v49, 1  ;;  %v2334_v53 = vsel %vm296_vm0, %v2312_v21, 0  ;;  %v8397_v22 = vor.u32 %v7360_v10, %v7359_v26  ;;  %v2310_v6 = vsel %vm378_vm1, %v2307_v33, %v2309_v52  ;;  %v2473_v10 = vld [vmem:[%s7394_s14 + $0x54] sm:$0x1]  ;;  %v2068_v21 = vld [vmem:[%s7625_s18 + $0x8] sm:$0x4] }
 0x157   : > { %2061 = vmatpush.bf16.xpose.msra.mxu3 %v2031_v28  ;;  %v2575_v28 = vld [vmem:[%s7394_s14 + $0x54] sm:$0x3]  ;;  %v2384_v61 = vor.u32 %v2383_v7, %v2382_v17  ;;  %v8415_v43 = vshll.u32 %v8397_v22, 16 }
 0x158   : > { %v972_v0 = vpop.f32.mrf.mxu0  ;;  %v2583_v16 = vunpack.c.l.b16 %v2575_v28 }
 0x159   : > { %6506 = vmatmul.msk.bf16.vlgmr.msra.gmra.mxu2 %vm296_vm0, %v1912_v19  ;;  %v976_v13 = vadd.f32 %v972_v0, %v8223_v58  ;;  %v8364_v58 = vld [vmem:[%s7394_s14 + $0x18] sm:$0xff]  ;;  %v2389_v36 = vsel %vm445_vm3, %v2384_v61, %v2388_v3  ;;  %v2779_v0 = vunpack.c.l.b16 %v2773_v37 }
 0x15a   : > { %2348 = vmatpush.bf16.xpose.msrb.mxu2 %v2346_v35  ;;  %v1105_v35 = vpop.f32.mrf.mxu1  ;;  %v2194_v19 = vshll.u32 %v8364_v58, 16  ;;  %v8400_v12 = vpack.c.b16 %v2583_v16, %v2583_v16  ;;  %v2305_v39 = vrot.slane %v8364_v58, 1 }
 0x15b   : > { %2282 = vmatpush.bf16.xpose.msrb.mxu1 %v2276_v51  ;;  %6504 = vmatmul.msk.bf16.vlgmr.msra.gmra.mxu0 %vm296_vm0, %v8269_v60  ;;  %v8334_v60 = vld [vmem:[%s7394_s14 + $0x38] sm:$0xff]   ;;  %v1107_v8 = vadd.f32 %v1103_v44, %v976_v13 }
 0x15c   : > { %2108 = vmatpush.bf16.xpose.msrb.mxu0 %v2106_v29  ;;  %v8345_v2 = vsel %vm296_vm0, %v8334_v60, 0  ;;  %v1157_v18 = vpop.f32.mrf.mxu2  ;;  %v8376_v29 = vsel %vm296_vm0, %v8355_v47, 0  ;;  %v8393_v54 = vrot.slane %v2194_v19, 1  ;;  %v2660_v1 = vshll.u32 %v8400_v12, 16 }
 0x15d   : > { %v1161_v51 = vadd.f32 %v1157_v18, %v1107_v8  ;;  %v2379_v35 = vrot.slane %v2194_v19, 2  ;;  %v8434_v18 = vld [vmem:[%s7394_s14 + $0x44] sm:$0xff]   ;;  %v2730_v37 = vrot.slane %v8400_v12, 2 }
 0x15e   : > { %6507 = vmatmul.msk.bf16.vlgmr.msra.gmra.mxu3 %vm296_vm0, %v1978_v55  ;;  %v2213_v55 = vsel %vm227_vm2, %v2208_v9, %v2212_v14  ;;  %v8412_v14 = vshrl.u32 %v8397_v22, 16  ;;  %v2662_v26 = vrot.slane %v2660_v1, 2  ;;  %v8447_v9 = vld [vmem:[%s7394_s14 + $0x18] sm:$0xff]  }
 0x15f   : > { %2442 = vmatpush.bf16.xpose.msrb.mxu3 %v2440_v27  ;;  %v2431_v27 = vsel %vm296_vm0, %v2397_v32, 0  ;;  %v2264_v44 = vsel %vm296_vm0, %v2213_v55, 0  ;;  %v8451_v55 = vshrl.u32 %v8434_v18, 16 }
 0x160   : > { %v974_v38 = vpop.f32.mrf.mxu0  ;;  %v2650_v59 = vrot.slane %v8412_v14, 1 }
 0x162   : > { %2349 = vmatpush.bf16.xpose.msrb.mxu2 %v2343_v63  ;;  %v1330_v63 = vpop.f32.mrf.mxu3 }
 0x163   : > { %2283 = vmatpush.bf16.xpose.msrb.mxu1 %v2273_v34  ;;  %v8385_v57 = vadd.f32 %v1330_v63, %v1161_v51  ;;  %v6976_v34 = vld [vmem:[%s7394_s14 + $0x10] sm:$0xff]   ;;  %v2425_v51 = vsel %vm296_vm0, %v2389_v36, 0  ;;  %v2507_v63 = vunpack.c.l.b16 %v2473_v10  ;;  %v8474_v36 = vld [vmem:[%s7394_s14 + $0x3c] sm:$0xff]  }
 0x164   : > { %2109 = vmatpush.bf16.xpose.msrb.mxu0 %v2103_v48  ;;  %v2198_v48 = vshrl.u32 %v8364_v58, 16  ;;  %v2189_v11 = vshll.u32 %v6976_v34, 16  ;;  %v2187_v32 = vshrl.u32 %v6976_v34, 16  ;;  %v2653_v58 = vrot.slane %v8415_v43, 2 }
 0x165   : > { %v8459_v34 = vsel %vm296_vm0, %v8447_v9, 0 }
 0x166   : > { %v2200_v40 = vor.u32 %v2198_v48, %v8393_v54  ;;  %v2378_v52 = vrot.slane %v2198_v48, 1  ;;  %v2191_v4 = vrot.slane %v2189_v11, 1  ;;  %v2654_v16 = vor.u32 %v2653_v58, %v2650_v59  ;;  %10361 = vst [vmem:[#allocation3_spill] sm:$0xff] %v8459_v34 }
 0x167   : > { %2443 = vmatpush.bf16.xpose.msrb.mxu3 %v2437_v45  ;;  %v2393_v45 = vsel %vm445_vm3, %v2388_v3, %v2392_v42  ;;  %v2331_v42 = vsel %vm296_vm0, %v2310_v6, 0  ;;  %v8454_v48 = vshll.u32 %v8434_v18, 16  ;;  %v2728_v11 = vrot.slane %v8397_v22, 2 }
 0x168   : > { %v2428_v31 = vsel %vm296_vm0, %v2393_v45, 0  ;;  %v2205_v49 = vsel %vm227_vm2, %v2200_v40, %v8360_v23  ;;  %v2308_v23 = vsel %vm378_vm1, %v2305_v39, %v2307_v33  ;;  %v2380_v19 = vor.u32 %v2379_v35, %v2378_v52 }
 0x169   : > { %v2192_v3 = vor.u32 %v2191_v4, %v2187_v32  ;;  %v2328_v33 = vsel %vm296_vm0, %v2308_v23, 0  ;;  %v2516_v40 = vpack.c.b16 %v2507_v63, %v2507_v63  ;;  %v2731_v4 = vsel %vm541_vm6, %v2728_v11, %v2730_v37  ;;  %v8504_v37 = vld [vmem:[%s7394_s14 + $0x34] sm:$0xff]  }
 0x16a   : > { %2350 = vmatpush.bf16.xpose.msrb.mxu2 %v2340_v62  ;;  %v1159_v62 = vpop.f32.mrf.mxu2  ;;  %v1332_v13 = vpop.f32.mrf.mxu3  ;;  %v2385_v6 = vsel %vm445_vm3, %v2380_v19, %v2384_v61  ;;  %v2644_v61 = vrot.slane %v8454_v48, 2  ;;  %v2530_v59 = vrot.slane %v8397_v22, 1  ;;  %v2757_v63 = vsel %vm296_vm0, %v2731_v4, 0 }
 0x16b   : > { %2284 = vmatpush.bf16.xpose.msrb.mxu1 %v2270_v46  ;;  %v2657_v46 = vshrl.u32 %v8400_v12, 16  ;;  %v2814_v12 = vrot.slane %v8415_v43, 3  ;;  %v2422_v52 = vsel %vm296_vm0, %v2385_v6, 0  ;;  %v2532_v58 = vrot.slane %v2516_v40, 1 }
 0x16c   : > { %2110 = vmatpush.bf16.xpose.msrb.mxu0 %v8345_v2 }
 0x16d   : > { %v2659_v30 = vrot.slane %v2657_v46, 1 }
 0x16f   : > { %2444 = vmatpush.bf16.xpose.msrb.mxu3 %v2434_v24  ;;  %v6978_v24 = vld [vmem:[%s7394_s14 + $0x10] sm:$0xe]  ;;  %v2663_v38 = vor.u32 %v2662_v26, %v2659_v30 }
 0x170   : > { %v6979_v8 = vor.u32 %v6978_v24, %v6977_v41 }
 0x171   : > { %v2664_v46 = vsel %vm445_vm3, %v2654_v16, %v2663_v38  ;;  %v2533_v38 = vsel %vm378_vm1, %v2530_v59, %v2532_v58 }
 0x172   : > { %2351 = vmatpush.bf16.xpose.msrb.mxu2 %v2337_v50  ;;  %v8426_v50 = vld [vmem:[%s7394_s14 + $0x20] sm:$0xff]   ;;  %v2371_v17 = vshrl.u32 %v6979_v8, 16  ;;  %v2374_v7 = vshll.u32 %v6979_v8, 16 }
 0x173   : > { %2285 = vmatpush.bf16.xpose.msrb.mxu1 %v2267_v15  ;;  %v8438_v28 = vsel %vm296_vm0, %v8426_v50, 0  ;;  %v2261_v15 = vsel %vm296_vm0, %v2205_v49, 0  ;;  %v2295_v49 = vld [vmem:[%s7625_s18 + $0x8] sm:$0x8] }
 0x174   : > { %2111 = vmatpush.bf16.xpose.msrb.mxu0 %v8376_v29  ;;  %10360 = vst [vmem:[#allocation2_spill] sm:$0xff] %v8438_v28  ;;  %v2373_v41 = vrot.slane %v2371_v17, 1  ;;  %v2376_v24 = vrot.slane %v2374_v7, 2  ;;  %v7338_v17 = vld [vmem:[%s7394_s14 + $0x10] sm:$0xff]  }
 0x175   : > { %v2085_v7 = vsel %vm296_vm0, %v7338_v17, 0  ;;  %v2526_v17 = vrot.slane %v8474_v36, 1 }
 0x176   : > { %v2377_v30 = vor.u32 %v2376_v24, %v2373_v41  ;;  %v2809_v41 = vrot.slane %v8451_v55, 2  ;;  %v2810_v24 = vrot.slane %v8454_v48, 3 }
 0x177   : > { %2445 = vmatpush.bf16.xpose.msrb.mxu3 %v2431_v27  ;;  %v8441_v27 = vpack.c.b16 %v2779_v0, %v2779_v0  ;;  %v2813_v0 = vrot.slane %v8412_v14, 2 }
 0x179   : > { %v2818_v45 = vshrl.u32 %v8441_v27, 16  ;;  %v2821_v62 = vshll.u32 %v8441_v27, 16 }
 0x17a   : > { %2352 = vmatpush.bf16.xpose.msrb.mxu2 %v2334_v53  ;;  %v2070_v53 = vunpack.c.l.b16 %v2068_v21  ;;  %v2815_v21 = vor.u32 %v2814_v12, %v2813_v0  ;;  %v2528_v0 = vrot.slane %v8434_v18, 1 }
 0x17b   : > { %2286 = vmatpush.bf16.xpose.msrb.mxu1 %v2264_v44  ;;  %v2304_v44 = vrot.slane %v6979_v8, 1  ;;  %v2820_v13 = vrot.slane %v2818_v45, 2  ;;  %v2690_v8 = vsel %vm296_vm0, %v2664_v46, 0 }
 0x17c   : > { %2112 = vmatpush.bf16.xpose.msrb.mxu0 %v8404_v5  ;;  %v8469_v1 = vpack.c.b16 %v2070_v53, %v2070_v53  ;;  %v2381_v53 = vsel %vm445_vm3, %v2377_v30, %v2380_v19  ;;  %v2559_v19 = vsel %vm296_vm0, %v2533_v38, 0 }
 0x17d   : > { %v2306_v35 = vsel %vm378_vm1, %v2304_v44, %v2305_v39  ;;  %v8491_v39 = vshll.u32 %v8474_v36, 16  ;;  %v2419_v46 = vsel %vm296_vm0, %v2381_v53, 0 }
 0x17e   : > { %v2140_v10 = vshrl.u32 %v8469_v1, 16 }
 0x17f   : > { %2446 = vmatpush.bf16.xpose.msrb.mxu3 %v2428_v31  ;;  %v2197_v31 = vsel %vm227_vm2, %v2192_v3, %v8393_v54  ;;  %v2823_v54 = vrot.slane %v2821_v62, 3  ;;  %v2325_v3 = vsel %vm296_vm0, %v2306_v35, 0  ;;  %v2635_v44 = vrot.slane %v8491_v39, 2 }
 0x180   : > { %v2258_v32 = vsel %vm296_vm0, %v2197_v31, 0  ;;  %v2142_v62 = vrot.slane %v2140_v10, 2  ;;  %v2811_v35 = vor.u32 %v2810_v24, %v2809_v41  ;;  %v8553_v41 = vld [vmem:[%s7394_s14 + $0x24] sm:$0xff]  }
 0x181   : > { %v2824_v23 = vor.u32 %v2823_v54, %v2820_v13  ;;  %v8517_v54 = vshrl.u32 %v8504_v37, 16 }
 0x182   : > { %2353 = vmatpush.bf16.xpose.msrb.mxu2 %v2331_v42  ;;  %v2641_v42 = vrot.slane %v8451_v55, 1 }
 0x183   : > { %2287 = vmatpush.bf16.xpose.msrb.mxu1 %v2261_v15  ;;  %v2298_v15 = vunpack.c.l.b16 %v2295_v49  ;;  %v2825_v31 = vsel %vm608_vm4, %v2815_v21, %v2824_v23  ;;  %v2531_v49 = vsel %vm378_vm1, %v2528_v0, %v2530_v59  ;;  %v2623_v10 = vrot.slane %v8517_v54, 1 }
 0x184   : > { %2113 = vmatpush.bf16.xpose.msrb.mxu0 %v8438_v28  ;;  %v2645_v26 = vor.u32 %v2644_v61, %v2641_v42  ;;  %v2851_v12 = vsel %vm296_vm0, %v2825_v31, 0  ;;  %v2556_v59 = vsel %vm296_vm0, %v2531_v49, 0 }
 0x185   : > { %v2299_v40 = vpack.c.b16 %v2298_v15, %v2298_v15  ;;  %v2816_v15 = vsel %vm608_vm4, %v2811_v35, %v2815_v21 }
 0x186   : > { %v2655_v45 = vsel %vm445_vm3, %v2645_v26, %v2654_v16  ;;  %v2848_v38 = vsel %vm296_vm0, %v2816_v15, 0 }
 0x187   : > { %2447 = vmatpush.bf16.xpose.msrb.mxu3 %v2425_v51  ;;  %v8488_v51 = vshrl.u32 %v8474_v36, 16  ;;  %v2687_v42 = vsel %vm296_vm0, %v2655_v45, 0  ;;  %v2364_v61 = vshrl.u32 %v2299_v40, 16 }
 0x189   : > { %v2632_v6 = vrot.slane %v8488_v51, 1  ;;  %v2366_v58 = vrot.slane %v2364_v61, 3 }
 0x18a   : > { %2354 = vmatpush.bf16.xpose.msrb.mxu2 %v2328_v33  ;;  %v2726_v33 = vrot.slane %v8434_v18, 2 }
 0x18b   : > { %2288 = vmatpush.bf16.xpose.msrb.mxu1 %v2258_v32  ;;  %v2636_v13 = vor.u32 %v2635_v44, %v2632_v6  ;;  %v2072_v32 = vrot.slane %v8469_v1, 2  ;;  %v2805_v1 = vrot.slane %v8488_v51, 2  ;;  %v2529_v6 = vsel %vm378_vm1, %v2526_v17, %v2528_v0 }
 0x18c   : > { %2114 = vmatpush.bf16.xpose.msrb.mxu0 %v8459_v34  ;;  %v2729_v16 = vsel %vm541_vm6, %v2726_v33, %v2728_v11  ;;  %v2300_v11 = vrot.slane %v2299_v40, 3  ;;  %v2553_v61 = vsel %vm296_vm0, %v2529_v6, 0  ;;  %v2524_v0 = vrot.slane %v8504_v37, 1 }
 0x18d   : > { %v2754_v4 = vsel %vm296_vm0, %v2729_v16, 0  ;;  %v2646_v30 = vsel %vm445_vm3, %v2636_v13, %v2645_v26  ;;  %v2801_v16 = vrot.slane %v8517_v54, 2 }
 0x18e   : > { %v2684_v26 = vsel %vm296_vm0, %v2646_v30, 0  ;;  %v2527_v30 = vsel %vm378_vm1, %v2524_v0, %v2526_v17 }
 0x18f   : > { %2448 = vmatpush.bf16.xpose.msrb.mxu3 %v2422_v52  ;;  %v8520_v52 = vshll.u32 %v8504_v37, 16  ;;  %v1491_v44 = vpop.f32.mrf.mxu1 }
 0x191   : > { %v2626_v23 = vrot.slane %v8520_v52, 2 }
 0x192   : > { %2355 = vmatpush.bf16.xpose.msrb.mxu2 %v2325_v3  ;;  %6537 = vmatmul.msk.bf16.vlgmr.msrb.gmra.mxu1 %vm296_vm0, %v2142_v62  ;;  %v2724_v3 = vrot.slane %v8474_v36, 2 }
 0x193   : > { %2692 = vmatpush.bf16.xpose.msra.mxu1 %v2690_v8  ;;  %v8526_v8 = vld [vmem:[%s7394_s14 + $0x2c] sm:$0xff]   ;;  %v2627_v53 = vor.u32 %v2626_v23, %v2623_v10 }
 0x194   : > { %2115 = vmatpush.bf16.xpose.msrb.mxu0 %v2085_v7  ;;  %v8541_v7 = vshrl.u32 %v8526_v8, 16  ;;  %v8544_v21 = vshll.u32 %v8526_v8, 16  ;;  %v2727_v45 = vsel %vm541_vm6, %v2724_v3, %v2726_v33  ;;  %v2722_v33 = vrot.slane %v8504_v37, 2 }
 0x195   : > { %v2751_v24 = vsel %vm296_vm0, %v2727_v45, 0  ;;  %v2720_v6 = vrot.slane %v8526_v8, 2 }
 0x196   : > { %v2614_v31 = vrot.slane %v8541_v7, 1  ;;  %v2617_v40 = vrot.slane %v8544_v21, 2  ;;  %v2797_v10 = vrot.slane %v8541_v7, 2  ;;  %v2798_v23 = vrot.slane %v8544_v21, 3 }
 0x197   : > { %2449 = vmatpush.bf16.xpose.msrb.mxu3 %v2419_v46 }
 0x199   : > { %6538 = vmatmul.msk.bf16.vlgmr.msrb.gmra.mxu2 %vm296_vm0, %v2300_v11  ;;  %v2618_v11 = vor.u32 %v2617_v40, %v2614_v31  ;;  %v2457_v31 = vld [vmem:[%s7394_s14 + $0x14] sm:$0xe] }
 0x19a   : > { %2759 = vmatpush.bf16.xpose.msra.mxu2 %v2757_v63  ;;  %v2806_v63 = vrot.slane %v8491_v39, 3 }
 0x19b   : > { %2693 = vmatpush.bf16.xpose.msra.mxu1 %v2687_v42  ;;  %6508 = vmatmul.msk.bf16.vlgmr.msrb.gmra.mxu0 %vm296_vm0, %v2072_v32  ;;  %v2802_v42 = vrot.slane %v8520_v52, 3  ;;  %v8565_v32 = vshrl.u32 %v8553_v41, 16 }
 0x19c   : > { %2561 = vmatpush.bf16.xpose.msra.mxu0 %v2559_v19  ;;  %v2807_v62 = vor.u32 %v2806_v63, %v2805_v1  ;;  %v2637_v19 = vsel %vm445_vm3, %v2627_v53, %v2636_v13  ;;  %v8568_v13 = vshll.u32 %v8553_v41, 16  ;;  %v2628_v1 = vsel %vm445_vm3, %v2618_v11, %v2627_v53  ;;  %v1558_v40 = vpop.f32.mrf.mxu2 }
 0x19d   : > { %v2803_v49 = vor.u32 %v2802_v42, %v2801_v16  ;;  %v2605_v63 = vrot.slane %v8565_v32, 1  ;;  %v2678_v53 = vsel %vm296_vm0, %v2628_v1, 0 }
 0x19e   : > { %6539 = vmatmul.msk.bf16.vlgmr.msrb.gmra.mxu3 %vm296_vm0, %v2366_v58  ;;  %v2812_v46 = vsel %vm608_vm4, %v2807_v62, %v2811_v35  ;;  %v1397_v58 = vpop.f32.mrf.mxu0 }
 0x19f   : > { %2853 = vmatpush.bf16.xpose.msra.mxu3 %v2851_v12  ;;  %v2681_v12 = vsel %vm296_vm0, %v2637_v19, 0  ;;  %v2845_v35 = vsel %vm296_vm0, %v2812_v46, 0  ;;  %v1401_v15 = vadd.f32 %v1397_v58, %v8385_v57  ;;  %v2808_v17 = vsel %vm608_vm4, %v2803_v49, %v2807_v62 }
 0x1a0   : > { %v2550_v57 = vsel %vm296_vm0, %v2527_v30, 0  ;;  %v2799_v19 = vor.u32 %v2798_v23, %v2797_v10  ;;  %v2842_v62 = vsel %vm296_vm0, %v2808_v17, 0  ;;  %v2940_v58 = vunpack.c.h.b16 %v8371_v56 }
 0x1a1   : > { %v1495_v45 = vadd.f32 %v1491_v44, %v1401_v15  ;;  %v1652_v30 = vpop.f32.mrf.mxu3  ;;  %v2793_v15 = vrot.slane %v8565_v32, 2 }
 0x1a2   : > { %2760 = vmatpush.bf16.xpose.msra.mxu2 %v2754_v4  ;;  %v2725_v4 = vsel %vm541_vm6, %v2722_v33, %v2724_v3  ;;  %v8580_v3 = vld [vmem:[%s7394_s14 + $0x1c] sm:$0xff]   ;;  %v2804_v23 = vsel %vm608_vm4, %v2799_v19, %v2803_v49 }
 0x1a3   : > { %2694 = vmatpush.bf16.xpose.msra.mxu1 %v2684_v26  ;;  %v1493_v26 = vpop.f32.mrf.mxu1  ;;  %v1562_v46 = vadd.f32 %v1558_v40, %v1495_v45  ;;  %v8590_v42 = vshrl.u32 %v8580_v3, 16  ;;  %v8593_v44 = vshll.u32 %v8580_v3, 16  ;;  %v2839_v45 = vsel %vm296_vm0, %v2804_v23, 0 }
 0x1a4   : > { %2562 = vmatpush.bf16.xpose.msra.mxu0 %v2556_v59  ;;  %v2608_v59 = vrot.slane %v8568_v13, 2  ;;  %v2941_v40 = vpack.c.b16 %v2940_v58, %v2940_v58 }
 0x1a5   : > { %v2599_v26 = vrot.slane %v8593_v44, 2 }
 0x1a6   : > { %v2609_v16 = vor.u32 %v2608_v59, %v2605_v63  ;;  %v1399_v1 = vpop.f32.mrf.mxu0  ;;  %v8606_v63 = vadd.f32 %v1652_v30, %v1562_v46  ;;  %v2596_v59 = vrot.slane %v8590_v42, 1  ;;  %v2887_v46 = vrot.slane %v8434_v18, 3 }
 0x1a7   : > { %2854 = vmatpush.bf16.xpose.msra.mxu3 %v2848_v38  ;;  %v2748_v38 = vsel %vm296_vm0, %v2725_v4, 0  ;;  %v2718_v4 = vrot.slane %v8553_v41, 2  ;;  %v2789_v30 = vrot.slane %v8590_v42, 2  ;;  %v2979_v18 = vshrl.u32 %v2941_v40, 16 }
 0x1a9   : > { %v2721_v17 = vsel %vm541_vm6, %v2718_v4, %v2720_v6 }
 0x1aa   : > { %2761 = vmatpush.bf16.xpose.msra.mxu2 %v2751_v24  ;;  %v2522_v24 = vrot.slane %v8526_v8, 1 }
 0x1ab   : > { %2695 = vmatpush.bf16.xpose.msra.mxu1 %v2681_v12  ;;  %v2491_v12 = vunpack.c.l.b16 %v2457_v31  ;;  %v2707_v31 = vld [vmem:[%s7394_s14 + $0x14] sm:$0xc] }
 0x1ac   : > { %2563 = vmatpush.bf16.xpose.msra.mxu0 %v2553_v61  ;;  %v8597_v61 = vunpack.c.l.b16 %v8447_v9  ;;  %v2525_v10 = vsel %vm378_vm1, %v2522_v24, %v2524_v0  ;;  %v2794_v9 = vrot.slane %v8568_v13, 3  ;;  %v2713_v23 = vunpack.c.l.b16 %v2707_v31 }
 0x1ad   : > { %v2547_v49 = vsel %vm296_vm0, %v2525_v10, 0  ;;  %v2790_v10 = vrot.slane %v8593_v44, 3  ;;  %v2518_v31 = vrot.slane %v8580_v3, 1 }
 0x1ae   : > { %v8613_v0 = vpack.c.b16 %v8597_v61, %v2491_v12  ;;  %v2795_v12 = vor.u32 %v2794_v9, %v2793_v15  ;;  %v2742_v15 = vsel %vm296_vm0, %v2721_v17, 0 }
 0x1af   : > { %2855 = vmatpush.bf16.xpose.msra.mxu3 %v2845_v35  ;;  %v2723_v35 = vsel %vm541_vm6, %v2720_v6, %v2722_v33  ;;  %v2619_v33 = vsel %vm445_vm3, %v2609_v16, %v2618_v11  ;;  %v2520_v11 = vrot.slane %v8553_v41, 1 }
 0x1b0   : > { %v2586_v6 = vshrl.u32 %v8613_v0, 16  ;;  %v2589_v58 = vshll.u32 %v8613_v0, 16 }
 0x1b1   : > { %v2523_v9 = vsel %vm378_vm1, %v2520_v11, %v2522_v24  ;;  %v2974_v24 = vrot.slane %v8412_v14, 3 }
 0x1b2   : > { %2762 = vmatpush.bf16.xpose.msra.mxu2 %v2748_v38  ;;  %v2745_v38 = vsel %vm296_vm0, %v2723_v35, 0  ;;  %v2600_v35 = vor.u32 %v2599_v26, %v2596_v59  ;;  %v1654_v59 = vpop.f32.mrf.mxu3  ;;  %v2800_v26 = vsel %vm608_vm4, %v2795_v12, %v2799_v19  ;;  %v2588_v17 = vrot.slane %v2586_v6, 1 }
 0x1b3   : > { %2696 = vmatpush.bf16.xpose.msra.mxu1 %v2678_v53  ;;  %v10340_v53 = vrot.slane %v8397_v22, 3  ;;  %v2981_v59 = vrot.slane %v2979_v18, 3  ;;  %v2544_v34 = vsel %vm296_vm0, %v2523_v9, 0  ;;  %v2836_v28 = vsel %vm296_vm0, %v2800_v26, 0  ;;  %v8657_v26 = vld [vmem:[%s7625_s18 + $0xc] sm:$0x1] }
 0x1b4   : > { %2564 = vmatpush.bf16.xpose.msra.mxu0 %v2550_v57  ;;  %v2675_v57 = vsel %vm296_vm0, %v2619_v33, 0  ;;  %v2982_v33 = vshll.u32 %v2941_v40, 16  ;;  %v2714_v40 = vpack.c.b16 %v8597_v61, %v2713_v23  ;;  %v2521_v6 = vsel %vm378_vm1, %v2518_v31, %v2520_v11 }
 0x1b5   : > { %v8630_v1 = vsel %vm704_vm5, %v2887_v46, %v10340_v53  ;;  %v3098_v53 = vld [vmem:[%s7394_s14 + $0x58] sm:$0x1] }
 0x1b6   : > { %v2984_v19 = vrot.slane %v2982_v33, 4  ;;  %v2782_v18 = vshrl.u32 %v2714_v40, 16  ;;  %v2785_v33 = vshll.u32 %v2714_v40, 16 }
 0x1b7   : > { %2856 = vmatpush.bf16.xpose.msra.mxu3 %v2842_v62  ;;  %v1560_v62 = vpop.f32.mrf.mxu2 }
 0x1b8   : > { %v8637_v62 = vor.u32 %v2790_v10, %v2789_v30  ;;  %v3136_v30 = vunpack.c.l.b16 %v3098_v53  ;;  %v2885_v10 = vrot.slane %v8474_v36, 3  ;;  %v2985_v53 = vor.u32 %v2984_v19, %v2981_v59  ;;  %v2706_v59 = vld [vmem:[%s7625_s18 + $0xc] sm:$0x2] }
 0x1b9   : > { %v2577_v19 = vunpack.c.l.b16 %v8657_v26 }
 0x1ba   : > { %2763 = vmatpush.bf16.xpose.msra.mxu2 %v2745_v38  ;;  %v2716_v38 = vrot.slane %v8580_v3, 2  ;;  %v2796_v14 = vsel %vm608_vm4, %v8637_v62, %v2795_v12  ;;  %v8654_v9 = vsel %vm704_vm5, %v2885_v10, %v2887_v46  ;;  %v2541_v12 = vsel %vm296_vm0, %v2521_v6, 0 }
 0x1bb   : > { %2697 = vmatpush.bf16.xpose.msra.mxu1 %v2675_v57  ;;  %v2591_v57 = vrot.slane %v2589_v58, 2 }
 0x1bc   : > { %2565 = vmatpush.bf16.xpose.msra.mxu0 %v2547_v49  ;;  %v2610_v49 = vsel %vm445_vm3, %v2600_v35, %v2609_v16  ;;  %v2719_v16 = vsel %vm541_vm6, %v2716_v38, %v2718_v4  ;;  %v3145_v4 = vpack.c.b16 %v3136_v30, %v3136_v30  ;;  %v2971_v30 = vrot.slane %v8454_v48, 4 }
 0x1bd   : > { %v2672_v23 = vsel %vm296_vm0, %v2610_v49, 0  ;;  %v2592_v58 = vor.u32 %v2591_v57, %v2588_v17  ;;  %v2739_v11 = vsel %vm296_vm0, %v2719_v16, 0  ;;  %v2833_v49 = vsel %vm296_vm0, %v2796_v14, 0 }
 0x1be   : > { %v2715_v17 = vrot.slane %v2714_v40, 2  ;;  %v2784_v57 = vrot.slane %v2782_v18, 2  ;;  %v3210_v6 = vshll.u32 %v3145_v4, 16  ;;  %v2883_v40 = vrot.slane %v8504_v37, 3 }
 0x1bf   : > { %2857 = vmatpush.bf16.xpose.msra.mxu3 %v2839_v45  ;;  %v2975_v45 = vrot.slane %v8415_v43, 4  ;;  %v6994_v43 = vld [vmem:[%s7394_s14 + $0x50] sm:$0xff]   ;;  %v2601_v46 = vsel %vm445_vm3, %v2592_v58, %v2600_v35  ;;  %v2891_v14 = vrot.slane %v8441_v27, 3 }
 0x1c0   : > { %v2717_v35 = vsel %vm541_vm6, %v2715_v17, %v2716_v38  ;;  %v3212_v4 = vrot.slane %v3210_v6, 1  ;;  %v3194_v38 = vshll.u32 %v8367_v20, 16 }
 0x1c1   : > { %v2976_v36 = vor.u32 %v2975_v45, %v2974_v24  ;;  %v2787_v24 = vrot.slane %v2785_v33, 3  ;;  %v2709_v33 = vunpack.c.l.b16 %v2706_v59  ;;  %v2736_v27 = vsel %vm296_vm0, %v2717_v35, 0 }
 0x1c2   : > { %2764 = vmatpush.bf16.xpose.msra.mxu2 %v2742_v15  ;;  %v3202_v15 = vshll.u32 %v6994_v43, 16  ;;  %v3063_v35 = vsel %vm296_vm0, %v8367_v20, 0 }
 0x1c3   : > { %2698 = vmatpush.bf16.xpose.msra.mxu1 %v2672_v23  ;;  %v2986_v45 = vsel %vm771_vm7, %v2976_v36, %v2985_v53  ;;  %v3206_v23 = vshrl.u32 %v6994_v43, 16  ;;  %v2788_v18 = vor.u32 %v2787_v24, %v2784_v57  ;;  %v2578_v43 = vpack.c.b16 %v2577_v19, %v2577_v19  ;;  %v6985_v19 = vld [vmem:[%s7394_s14 + $0x40] sm:$0xff]  }
 0x1c4   : > { %2566 = vmatpush.bf16.xpose.msra.mxu0 %v2544_v34  ;;  %v2517_v34 = vrot.slane %v8613_v0, 1  ;;  %v3204_v16 = vrot.slane %v3202_v15, 1  ;;  %v2669_v0 = vsel %vm296_vm0, %v2601_v46, 0  ;;  %v3012_v58 = vsel %vm296_vm0, %v2986_v45, 0 }
 0x1c5   : > { %v3066_v15 = vsel %vm296_vm0, %v8371_v56, 0  ;;  %v2710_v17 = vpack.c.b16 %v2709_v33, %v2709_v33  ;;  %v2580_v46 = vshrl.u32 %v2578_v43, 16  ;;  %v2967_v57 = vrot.slane %v8491_v39, 4 }
 0x1c6   : > { %v2519_v48 = vsel %vm378_vm1, %v2517_v34, %v2518_v31  ;;  %v3208_v37 = vor.u32 %v3206_v23, %v3204_v16  ;;  %v2966_v34 = vrot.slane %v8488_v51, 3  ;;  %v3196_v24 = vrot.slane %v3194_v38, 1 }
 0x1c7   : > { %2858 = vmatpush.bf16.xpose.msra.mxu3 %v2836_v28  ;;  %v2970_v28 = vrot.slane %v8451_v55, 3  ;;  %v8675_v55 = vsel %vm704_vm5, %v2883_v40, %v2885_v10  ;;  %v2538_v10 = vsel %vm296_vm0, %v2519_v48, 0  ;;  %v3198_v45 = vshrl.u32 %v8367_v20, 16 }
 0x1c8   : > { %v3213_v56 = vsel %vm227_vm2, %v3208_v37, %v3212_v4  ;;  %v3186_v6 = vshll.u32 %v6985_v19, 16  ;;  %v3190_v48 = vshrl.u32 %v6985_v19, 16  ;;  %v2879_v43 = vrot.slane %v8553_v41, 3 }
 0x1c9   : > { %v2972_v53 = vor.u32 %v2971_v30, %v2970_v28  ;;  %v3239_v39 = vsel %vm296_vm0, %v3213_v56, 0  ;;  %v2775_v28 = vshrl.u32 %v2710_v17, 16  ;;  %v2968_v30 = vor.u32 %v2967_v57, %v2966_v34 }
 0x1ca   : > { %2765 = vmatpush.bf16.xpose.msra.mxu2 %v2739_v11  ;;  %v10362_v11 = vrot.slane %v8397_v22, 3  ;;  %v2881_v22 = vrot.slane %v8526_v8, 3  ;;  %v2711_v8 = vrot.slane %v2710_v17, 1  ;;  %v3200_v23 = vor.u32 %v3198_v45, %v3196_v24 }
 0x1cb   : > { %2699 = vmatpush.bf16.xpose.msra.mxu1 %v2669_v0  ;;  %v2777_v0 = vrot.slane %v2775_v28, 1  ;;  %v3188_v33 = vrot.slane %v3186_v6, 1  ;;  %v2915_v37 = vsel %vm296_vm0, %v8630_v1, 0  ;;  %v3178_v41 = vshll.u32 %v8334_v60, 16 }
 0x1cc   : > { %2567 = vmatpush.bf16.xpose.msra.mxu0 %v2541_v12  ;;  %v2892_v31 = vsel %vm704_vm5, %v10362_v11, %v2891_v14  ;;  %v2792_v12 = vsel %vm608_vm4, %v2788_v18, %v8637_v62  ;;  %v8699_v51 = vsel %vm704_vm5, %v2881_v22, %v2883_v40  ;;  %v2973_v40 = vsel %vm771_vm7, %v2968_v30, %v2972_v53 }
 0x1cd   : > { %v2918_v59 = vsel %vm296_vm0, %v2892_v31, 0  ;;  %v2830_v62 = vsel %vm296_vm0, %v2792_v12, 0  ;;  %v2962_v14 = vrot.slane %v8517_v54, 3  ;;  %v3205_v18 = vsel %vm227_vm2, %v3200_v23, %v3204_v16 }
 0x1ce   : > { %v3006_v20 = vsel %vm296_vm0, %v2973_v40, 0  ;;  %v8717_v54 = vsel %vm704_vm5, %v2879_v43, %v2881_v22  ;;  %v3192_v16 = vor.u32 %v3190_v48, %v3188_v33  ;;  %v2958_v38 = vrot.slane %v8541_v7, 3 }
 0x1cf   : > { %2859 = vmatpush.bf16.xpose.msra.mxu3 %v2833_v49  ;;  %v2977_v49 = vsel %vm771_vm7, %v2972_v53, %v2976_v36  ;;  %v1902_v1 = vpop.f32.mrf.mxu1  ;;  %v3182_v11 = vshrl.u32 %v8334_v60, 16  ;;  %v2877_v31 = vrot.slane %v8580_v3, 3  ;;  %v2912_v12 = vsel %vm296_vm0, %v8654_v9, 0 }
 0x1d0   : > { %v3009_v36 = vsel %vm296_vm0, %v2977_v49, 0  ;;  %v3170_v60 = vshll.u32 %v8355_v47, 16  ;;  %v2955_v45 = vrot.slane %v8568_v13, 4  ;;  %v3162_v6 = vshll.u32 %v8389_v25, 16 }
 0x1d1   : > { %v3166_v48 = vshrl.u32 %v8389_v25, 16 }
 0x1d2   : > { %2766 = vmatpush.bf16.xpose.msra.mxu2 %v2736_v27  ;;  %6541 = vmatmul.msk.bf16.vlgmr.msra.gmra.mxu1 %vm296_vm0, %v2580_v46  ;;  %v2959_v27 = vrot.slane %v8544_v21, 4  ;;  %v8735_v46 = vsel %vm704_vm5, %v2877_v31, %v2879_v43  ;;  %v8764_v43 = vld [vmem:[%s7394_s14 + $0x54] sm:$0xff] }
 0x1d3   : > { %3014 = vmatpush.bf16.xpose.msrb.mxu1 %v3012_v58  ;;  %v2963_v58 = vrot.slane %v8520_v52, 4  ;;  %v3236_v52 = vsel %vm296_vm0, %v3205_v18, 0 }
 0x1d4   : > { %2568 = vmatpush.bf16.xpose.msra.mxu0 %v2538_v10  ;;  %v3180_v10 = vrot.slane %v3178_v41, 1  ;;  %v2960_v21 = vor.u32 %v2959_v27, %v2958_v38  ;;  %v3158_v27 = vshrl.u32 %v8426_v50, 16 }
 0x1d5   : > { %v2964_v53 = vor.u32 %v2963_v58, %v2962_v14  ;;  %v2951_v14 = vrot.slane %v8593_v44, 4  ;;  %v3154_v44 = vshll.u32 %v8426_v50, 16  ;;  %v2867_v50 = vld [vmem:[%s7625_s18 + $0xc] sm:$0x4] }
 0x1d6   : > { %v3184_v49 = vor.u32 %v3182_v11, %v3180_v10 }
 0x1d7   : > { %2860 = vmatpush.bf16.xpose.msra.mxu3 %v2830_v62  ;;  %v2969_v4 = vsel %vm771_vm7, %v2964_v53, %v2968_v30  ;;  %v1904_v57 = vpop.f32.mrf.mxu1  ;;  %v2965_v56 = vsel %vm771_vm7, %v2960_v21, %v2964_v53  ;;  %v3174_v62 = vshrl.u32 %v8355_v47, 16  ;;  %v8778_v38 = vrot.slane %v3154_v44, 1 }
 0x1d8   : > { %v3003_v17 = vsel %vm296_vm0, %v2969_v4, 0  ;;  %v1771_v34 = vpop.f32.mrf.mxu0  ;;  %v3000_v30 = vsel %vm296_vm0, %v2965_v56, 0 }
 0x1d9   : > { %6542 = vmatmul.msk.bf16.vlgmr.msra.gmra.mxu2 %vm296_vm0, %v2711_v8  ;;  %v1775_v9 = vadd.f32 %v1771_v34, %v8606_v63  ;;  %v2909_v63 = vsel %vm296_vm0, %v8675_v55, 0  ;;  %v2950_v55 = vrot.slane %v8590_v42, 3  ;;  %v2903_v34 = vsel %vm296_vm0, %v8717_v54, 0 }
 0x1da   : > { %3068 = vmatpush.bf16.xpose.msrb.mxu2 %v3066_v15  ;;  %v3197_v15 = vsel %vm227_vm2, %v3192_v16, %v3196_v24  ;;  %v2954_v24 = vrot.slane %v8565_v32, 3  ;;  %v3160_v56 = vor.u32 %v3158_v27, %v8778_v38  ;;  %v2870_v54 = vunpack.c.l.b16 %v2867_v50  ;;  %v10364_v50 = vld [vmem:[#allocation3_spill] sm:$0xff] }
 0x1db   : > { %3015 = vmatpush.bf16.xpose.msrb.mxu1 %v3009_v36  ;;  %6540 = vmatmul.msk.bf16.vlgmr.msra.gmra.mxu0 %vm296_vm0, %v8657_v26  ;;  %v3060_v26 = vsel %vm296_vm0, %v6985_v19, 0  ;;  %v3233_v7 = vsel %vm296_vm0, %v3197_v15, 0  ;;  %v1906_v22 = vadd.f32 %v1902_v1, %v1775_v9  ;;  %v3172_v19 = vrot.slane %v3170_v60, 1  ;;  %v2868_v36 = vld [vmem:[%s7394_s14 + $0x14] sm:$0x8]  ;;  %v8789_v60 = vld [vmem:[%s7394_s14 + $0x4c] sm:$0xff] }
 0x1dc   : > { %2920 = vmatpush.bf16.xpose.msrb.mxu0 %v2918_v59  ;;  %v3189_v59 = vsel %vm227_vm2, %v3184_v49, %v3188_v33  ;;  %v2956_v13 = vor.u32 %v2955_v45, %v2954_v24  ;;  %v2874_v8 = vunpack.c.l.b16 %v2868_v36  ;;  %v3164_v33 = vrot.slane %v3162_v6, 1  ;;  %v6987_v49 = vld [vmem:[%s7394_s14 + $0x18] sm:$0xff]  }
 0x1dd   : > { %v3230_v32 = vsel %vm296_vm0, %v3189_v59, 0  ;;  %v3176_v23 = vor.u32 %v3174_v62, %v3172_v19  ;;  %v2952_v16 = vor.u32 %v2951_v14, %v2950_v55  ;;  %v8804_v62 = vshll.u32 %v8789_v60, 16 }
 0x1de   : > { %6543 = vmatmul.msk.bf16.vlgmr.msra.gmra.mxu3 %vm296_vm0, %v2777_v0  ;;  %v8759_v58 = vpack.c.b16 %v8597_v61, %v2874_v8  ;;  %v3550_v61 = vld [vmem:[%s7394_s14 + $0x5c] sm:$0x3]  ;;  %v3168_v1 = vor.u32 %v3166_v48, %v3164_v33  ;;  %v3147_v8 = vshrl.u32 %v6987_v49, 16  ;;  %v3028_v48 = vld [vmem:[%s7625_s18 + $0xc] sm:$0x8] }
 0x1df   : > { %3241 = vmatpush.bf16.xpose.msrb.mxu3 %v3239_v39  ;;  %v1969_v39 = vpop.f32.mrf.mxu2  ;;  %v3181_v18 = vsel %vm227_vm2, %v3176_v23, %v3180_v10  ;;  %v2957_v15 = vsel %vm771_vm7, %v2952_v16, %v2956_v13 }
 0x1e0   : > { %v1973_v28 = vadd.f32 %v1969_v39, %v1906_v22  ;;  %v1773_v0 = vpop.f32.mrf.mxu0  ;;  %v3227_v53 = vsel %vm296_vm0, %v3181_v18, 0  ;;  %v2943_v41 = vshrl.u32 %v8759_v58, 16  ;;  %v2946_v25 = vshll.u32 %v8759_v58, 16 }
 0x1e1   : > { %v2063_v47 = vpop.f32.mrf.mxu3  ;;  %v2994_v57 = vsel %vm296_vm0, %v2957_v15, 0  ;;  %v3149_v22 = vshll.u32 %v6987_v49, 16  ;;  %v2900_v39 = vsel %vm296_vm0, %v8735_v46, 0  ;;  %v8819_v46 = vshrl.u32 %v8789_v60, 16  ;;  %v8822_v0 = vld [vmem:[%s7394_s14 + $0x44] sm:$0xff] }
 0x1e2   : > { %3069 = vmatpush.bf16.xpose.msrb.mxu2 %v3063_v35  ;;  %v3324_v35 = vld [vmem:[%s7394_s14 + $0x5c] sm:$0x1]  ;;  %v8753_v40 = vadd.f32 %v2063_v47, %v1973_v28  ;;  %v2945_v10 = vrot.slane %v2943_v41, 3  ;;  %v2948_v11 = vrot.slane %v2946_v25, 4  ;;  %v3505_v28 = vrot.slane %v8764_v43, 1 }
 0x1e3   : > { %3016 = vmatpush.bf16.xpose.msrb.mxu1 %v3006_v20  ;;  %v2906_v20 = vsel %vm296_vm0, %v8699_v51, 0  ;;  %v8776_v51 = vshll.u32 %v8764_v43, 16  ;;  %v3151_v23 = vrot.slane %v3149_v22, 1  ;;  %v8815_v47 = vpack.c.b16 %v2870_v54, %v2870_v54 }
 0x1e4   : > { %2921 = vmatpush.bf16.xpose.msrb.mxu0 %v2915_v37  ;;  %v3364_v37 = vunpack.c.l.b16 %v3324_v35  ;;  %v2949_v45 = vor.u32 %v2948_v11, %v2945_v10  ;;  %v3424_v35 = vrot.slane %v8804_v62, 1  ;;  %v8853_v11 = vshrl.u32 %v8822_v0, 16 }
 0x1e5   : > { %v3591_v55 = vrot.slane %v8776_v51, 2 }
 0x1e7   : > { %3242 = vmatpush.bf16.xpose.msrb.mxu3 %v3236_v52  ;;  %v1971_v52 = vpop.f32.mrf.mxu2 }
 0x1e9   : > { %v2065_v4 = vpop.f32.mrf.mxu3 }
 0x1ea   : > { %3070 = vmatpush.bf16.xpose.msrb.mxu2 %v3060_v26  ;;  %v3373_v26 = vpack.c.b16 %v3364_v37, %v3364_v37  ;;  %v3503_v4 = vrot.slane %v8789_v60, 1 }
 0x1eb   : > { %3017 = vmatpush.bf16.xpose.msrb.mxu1 %v3003_v17  ;;  %v3432_v17 = vrot.slane %v8776_v51, 1 }
 0x1ec   : > { %2922 = vmatpush.bf16.xpose.msrb.mxu0 %v2912_v12  ;;  %v3173_v12 = vsel %vm227_vm2, %v3168_v1, %v3172_v19  ;;  %v3030_v1 = vunpack.c.l.b16 %v3028_v48 }
 0x1ed   : > { %v3224_v24 = vsel %vm296_vm0, %v3173_v12, 0  ;;  %v8856_v12 = vld [vmem:[%s7394_s14 + $0x3c] sm:$0xff] }
 0x1ee   : > { %v3031_v49 = vpack.c.b16 %v3030_v1, %v3030_v1 }
 0x1ef   : > { %3243 = vmatpush.bf16.xpose.msrb.mxu3 %v3233_v7  ;;  %v8785_v7 = vshrl.u32 %v8764_v43, 16 }
 0x1f0   : > { %v3100_v22 = vshrl.u32 %v3031_v49, 16  ;;  %v3032_v54 = vrot.slane %v3031_v49, 3 }
 0x1f1   : > { %v3436_v59 = vor.u32 %v8785_v7, %v3432_v17 }
 0x1f2   : > { %3071 = vmatpush.bf16.xpose.msrb.mxu2 %v8345_v2  ;;  %v2961_v2 = vsel %vm771_vm7, %v2956_v13, %v2960_v21  ;;  %v3438_v21 = vshll.u32 %v3373_v26, 16  ;;  %v2876_v13 = vrot.slane %v8759_v58, 3  ;;  %v10363_v58 = vld [vmem:[#allocation2_spill] sm:$0xff] }
 0x1f3   : > { %3018 = vmatpush.bf16.xpose.msrb.mxu1 %v3000_v30  ;;  %v2997_v42 = vsel %vm296_vm0, %v2961_v2, 0  ;;  %v3507_v30 = vrot.slane %v3373_v26, 1  ;;  %v3590_v2 = vrot.slane %v8785_v7, 1  ;;  %v7255_v26 = vld [vmem:[%s7394_s14 + $0x54] sm:$0xff] }
 0x1f4   : > { %2923 = vmatpush.bf16.xpose.msrb.mxu0 %v2909_v63  ;;  %v3440_v19 = vrot.slane %v3438_v21, 1  ;;  %v3165_v63 = vsel %vm227_vm2, %v3160_v56, %v3164_v33  ;;  %v2878_v44 = vsel %vm704_vm5, %v2876_v13, %v2877_v31  ;;  %v3506_v56 = vsel %vm378_vm1, %v3503_v4, %v3505_v28 }
 0x1f5   : > { %v3221_v37 = vsel %vm296_vm0, %v3165_v63, 0  ;;  %v3592_v41 = vor.u32 %v3591_v55, %v3590_v2  ;;  %v2897_v31 = vsel %vm296_vm0, %v2878_v44, 0  ;;  %v2872_v63 = vrot.slane %v8815_v47, 2  ;;  %v8906_v44 = vld [vmem:[%s7394_s14 + $0x2c] sm:$0xff] }
 0x1f6   : > { %v3441_v6 = vsel %vm227_vm2, %v3436_v59, %v3440_v19  ;;  %v8870_v19 = vshll.u32 %v8856_v12, 16 }
 0x1f7   : > { %3244 = vmatpush.bf16.xpose.msrb.mxu3 %v3230_v32  ;;  %v2953_v32 = vsel %vm771_vm7, %v2949_v45, %v2952_v16  ;;  %v3467_v52 = vsel %vm296_vm0, %v3441_v6, 0  ;;  %v8840_v16 = vshll.u32 %v8822_v0, 16  ;;  %v3501_v6 = vrot.slane %v8822_v0, 1 }
 0x1f8   : > { %v2991_v33 = vsel %vm296_vm0, %v2953_v32, 0  ;;  %v3408_v13 = vrot.slane %v8870_v19, 1 }
 0x1f9   : > { %v3416_v10 = vrot.slane %v8840_v16, 1  ;;  %v3583_v2 = vrot.slane %v8840_v16, 2 }
 0x1fa   : > { %3072 = vmatpush.bf16.xpose.msrb.mxu2 %v8376_v29  ;;  %v3556_v29 = vunpack.c.l.b16 %v3550_v61  ;;  %v3428_v61 = vor.u32 %v8819_v46, %v3424_v35 }
 0x1fb   : > { %3019 = vmatpush.bf16.xpose.msrb.mxu1 %v2997_v42  ;;  %v3152_v42 = vor.u32 %v3151_v23, %v3147_v8  ;;  %v3420_v59 = vor.u32 %v8853_v11, %v3416_v10  ;;  %v8883_v8 = vshrl.u32 %v8856_v12, 16 }
 0x1fc   : > { %2924 = vmatpush.bf16.xpose.msrb.mxu0 %v2906_v20  ;;  %v8793_v9 = vpack.c.b16 %v3556_v29, %v3556_v29  ;;  %v3508_v20 = vsel %vm378_vm1, %v3505_v28, %v3507_v30  ;;  %v3433_v27 = vsel %vm227_vm2, %v3428_v61, %v3432_v17  ;;  %v3531_v28 = vsel %vm296_vm0, %v3506_v56, 0  ;;  %v8933_v56 = vld [vmem:[%s7394_s14 + $0x24] sm:$0xff] }
 0x1fd   : > { %v3534_v3 = vsel %vm296_vm0, %v3508_v20, 0  ;;  %v3157_v29 = vsel %vm227_vm2, %v3152_v42, %v8778_v38  ;;  %v3587_v38 = vrot.slane %v8804_v62, 2  ;;  %v3102_v30 = vrot.slane %v3100_v22, 3 }
 0x1fe   : > { %v3598_v36 = vshll.u32 %v8793_v9, 16  ;;  %v3218_v17 = vsel %vm296_vm0, %v3157_v29, 0  ;;  %v3425_v32 = vsel %vm227_vm2, %v3420_v59, %v3424_v35 }
 0x1ff   : > { %3245 = vmatpush.bf16.xpose.msrb.mxu3 %v3227_v53  ;;  %v2936_v53 = vshrl.u32 %v8815_v47, 16  ;;  %v3582_v47 = vrot.slane %v8853_v11, 1 }
 0x200   : > { %v3600_v18 = vrot.slane %v3598_v36, 2  ;;  %v7254_v36 = vld [vmem:[%s7394_s14 + $0x4c] sm:$0xff]  }
 0x201   : > { %v2938_v15 = vrot.slane %v2936_v53, 2  ;;  %v3289_v55 = vsel %vm296_vm0, %v7254_v36, 0  ;;  %v3584_v48 = vor.u32 %v3583_v2, %v3582_v47  ;;  %v8941_v36 = vld [vmem:[%s7394_s14 + $0x1c] sm:$0xff]  }
 0x202   : > { %3073 = vmatpush.bf16.xpose.msrb.mxu2 %v8404_v5  ;;  %v3595_v5 = vshrl.u32 %v8793_v9, 16 }
 0x203   : > { %3020 = vmatpush.bf16.xpose.msrb.mxu1 %v2994_v57  ;;  %v3292_v57 = vsel %vm296_vm0, %v7255_v26, 0  ;;  %v3499_v26 = vrot.slane %v8856_v12, 1 }
 0x204   : > { %2925 = vmatpush.bf16.xpose.msrb.mxu0 %v2903_v34  ;;  %v3597_v14 = vrot.slane %v3595_v5, 1  ;;  %v3586_v34 = vrot.slane %v8819_v46, 1 }
 0x206   : > { %v3601_v25 = vor.u32 %v3600_v18, %v3597_v14  ;;  %v3588_v5 = vor.u32 %v3587_v38, %v3586_v34  ;;  %v3461_v14 = vsel %vm296_vm0, %v3425_v32, 0 }
 0x207   : > { %3246 = vmatpush.bf16.xpose.msrb.mxu3 %v3224_v24  ;;  %v3464_v24 = vsel %vm296_vm0, %v3433_v27, 0 }
 0x208   : > { %v3602_v21 = vsel %vm445_vm3, %v3592_v41, %v3601_v25  ;;  %v3593_v23 = vsel %vm445_vm3, %v3588_v5, %v3592_v41  ;;  %v3578_v41 = vrot.slane %v8883_v8, 1  ;;  %v3579_v25 = vrot.slane %v8870_v19, 2 }
 0x209   : > { %v3628_v45 = vsel %vm296_vm0, %v3602_v21, 0  ;;  %v3625_v18 = vsel %vm296_vm0, %v3593_v23, 0  ;;  %v3589_v1 = vsel %vm445_vm3, %v3584_v48, %v3588_v5  ;;  %v3502_v21 = vsel %vm378_vm1, %v3499_v26, %v3501_v6  ;;  %v7248_v23 = vld [vmem:[%s7394_s14 + $0x34] sm:$0xff]  }
 0x20a   : > { %3074 = vmatpush.bf16.xpose.msrb.mxu2 %v10363_v58  ;;  %v3412_v58 = vor.u32 %v8883_v8, %v3408_v13  ;;  %v3622_v27 = vsel %vm296_vm0, %v3589_v1, 0  ;;  %v3525_v59 = vsel %vm296_vm0, %v3502_v21, 0  ;;  %v3280_v1 = vsel %vm296_vm0, %v7248_v23, 0 }
 0x20b   : > { %3021 = vmatpush.bf16.xpose.msrb.mxu1 %v2991_v33  ;;  %v3504_v33 = vsel %vm378_vm1, %v3501_v6, %v3503_v4  ;;  %v8920_v4 = vshll.u32 %v8906_v44, 16  ;;  %v3495_v6 = vrot.slane %v8906_v44, 1  ;;  %v10343_v23 = vrot.slane %v8764_v43, 2 }
 0x20c   : > { %2926 = vmatpush.bf16.xpose.msrb.mxu0 %v2900_v39  ;;  %v8874_v39 = vld [vmem:[%s7394_s14 + $0x34] sm:$0xff]  ;;  %v3528_v61 = vsel %vm296_vm0, %v3504_v33, 0  ;;  %v3417_v53 = vsel %vm227_vm2, %v3412_v58, %v3416_v10  ;;  %v3580_v10 = vor.u32 %v3579_v25, %v3578_v41  ;;  %v8957_v58 = vunpack.c.h.b16 %v8941_v36 }
 0x20d   : > { %v8892_v35 = vshll.u32 %v8874_v39, 16  ;;  %v3458_v29 = vsel %vm296_vm0, %v3417_v53, 0  ;;  %v3497_v49 = vrot.slane %v8874_v39, 1  ;;  %v3571_v2 = vrot.slane %v8920_v4, 2 }
 0x20e   : > { %v3585_v5 = vsel %vm445_vm3, %v3580_v10, %v3584_v48  ;;  %v8961_v48 = vshrl.u32 %v8933_v56, 16  ;;  %v3912_v53 = vrot.slane %v8785_v7, 3  ;;  %v3913_v41 = vrot.slane %v8776_v51, 4 }
 0x20f   : > { %3247 = vmatpush.bf16.xpose.msrb.mxu3 %v3221_v37  ;;  %v7252_v37 = vld [vmem:[%s7394_s14 + $0x44] sm:$0xff]   ;;  %v3400_v20 = vrot.slane %v8892_v35, 1  ;;  %v2290_v42 = vpop.f32.mrf.mxu1  ;;  %v3575_v38 = vrot.slane %v8892_v35, 2  ;;  %v3619_v33 = vsel %vm296_vm0, %v3585_v5, 0 }
 0x210   : > { %v8976_v21 = vor.u32 %v3913_v41, %v3912_v53 }
 0x212   : > { %3075 = vmatpush.bf16.xpose.msrb.mxu2 %v10364_v50  ;;  %6545 = vmatmul.msk.bf16.vlgmr.msrb.gmra.mxu1 %vm296_vm0, %v2938_v15  ;;  %v7250_v15 = vld [vmem:[%s7394_s14 + $0x3c] sm:$0xff]  }
 0x213   : > { %3469 = vmatpush.bf16.xpose.msra.mxu1 %v3467_v52  ;;  %v8903_v52 = vshrl.u32 %v8874_v39, 16 }
 0x214   : > { %2927 = vmatpush.bf16.xpose.msrb.mxu0 %v2897_v31 }
 0x215   : > { %v3404_v31 = vor.u32 %v8903_v52, %v3400_v20  ;;  %v3574_v34 = vrot.slane %v8903_v52, 1 }
 0x217   : > { %3248 = vmatpush.bf16.xpose.msrb.mxu3 %v3218_v17  ;;  %v8930_v17 = vshrl.u32 %v8906_v44, 16  ;;  %v2292_v22 = vpop.f32.mrf.mxu1  ;;  %v3576_v32 = vor.u32 %v3575_v38, %v3574_v34  ;;  %v7246_v38 = vld [vmem:[%s7394_s14 + $0x2c] sm:$0xff]  }
 0x218   : > { %v2117_v50 = vpop.f32.mrf.mxu0 }
 0x219   : > { %6546 = vmatmul.msk.bf16.vlgmr.msrb.gmra.mxu2 %vm296_vm0, %v3032_v54  ;;  %v3283_v54 = vsel %vm296_vm0, %v7250_v15, 0  ;;  %v3570_v47 = vrot.slane %v8930_v17, 1 }
 0x21a   : > { %3536 = vmatpush.bf16.xpose.msra.mxu2 %v3534_v3  ;;  %v3286_v3 = vsel %vm296_vm0, %v7252_v37, 0 }
 0x21b   : > { %3470 = vmatpush.bf16.xpose.msra.mxu1 %v3464_v24  ;;  %6544 = vmatmul.msk.bf16.vlgmr.msrb.gmra.mxu0 %vm296_vm0, %v2872_v63  ;;  %v2121_v24 = vadd.f32 %v2117_v50, %v8753_v40 }
 0x21c   : > { %3294 = vmatpush.bf16.xpose.msra.mxu0 %v3292_v57  ;;  %v3409_v57 = vsel %vm227_vm2, %v3404_v31, %v3408_v13  ;;  %v3711_v13 = vld [vmem:[%s7394_s14 + $0x5c] sm:$0x7]  ;;  %v2357_v40 = vpop.f32.mrf.mxu2 }
 0x21d   : > { %v2294_v63 = vadd.f32 %v2290_v42, %v2121_v24  ;;  %v3717_v37 = vunpack.c.l.b16 %v3711_v13 }
 0x21e   : > { %6547 = vmatmul.msk.bf16.vlgmr.msrb.gmra.mxu3 %vm296_vm0, %v3102_v30  ;;  %v3455_v30 = vsel %vm296_vm0, %v3409_v57, 0 }
 0x21f   : > { %3630 = vmatpush.bf16.xpose.msra.mxu3 %v3628_v45  ;;  %v3392_v45 = vrot.slane %v8920_v4, 1  ;;  %v8982_v57 = vpack.c.b16 %v3717_v37, %v3717_v37 }
 0x221   : > { %v2451_v25 = vpop.f32.mrf.mxu3 }
 0x222   : > { %3537 = vmatpush.bf16.xpose.msra.mxu2 %v3531_v28  ;;  %v3500_v28 = vsel %vm378_vm1, %v3497_v49, %v3499_v26  ;;  %v3498_v26 = vsel %vm378_vm1, %v3495_v6, %v3497_v49  ;;  %v3566_v49 = vrot.slane %v8961_v48, 1 }
 0x223   : > { %3471 = vmatpush.bf16.xpose.msra.mxu1 %v3461_v14  ;;  %v2361_v14 = vadd.f32 %v2357_v40, %v2294_v63  ;;  %v3522_v42 = vsel %vm296_vm0, %v3500_v28, 0  ;;  %v3519_v24 = vsel %vm296_vm0, %v3498_v26, 0  ;;  %v3493_v63 = vrot.slane %v8933_v56, 1 }
 0x224   : > { %3295 = vmatpush.bf16.xpose.msra.mxu0 %v3289_v55  ;;  %v8951_v55 = vshll.u32 %v8933_v56, 16  ;;  %v2359_v13 = vpop.f32.mrf.mxu2  ;;  %v3377_v40 = vshll.u32 %v8941_v36, 16 }
 0x225   : > { %v8971_v15 = vadd.f32 %v2451_v25, %v2361_v14  ;;  %v3496_v41 = vsel %vm378_vm1, %v3493_v63, %v3495_v6  ;;  %v3823_v6 = vrot.slane %v8822_v0, 3  ;;  %v3904_v13 = vrot.slane %v8853_v11, 3 }
 0x226   : > { %v3384_v31 = vrot.slane %v8951_v55, 1  ;;  %v3567_v50 = vrot.slane %v8951_v55, 2 }
 0x227   : > { %3631 = vmatpush.bf16.xpose.msra.mxu3 %v3625_v18  ;;  %v3396_v18 = vor.u32 %v8930_v17, %v3392_v45 }
 0x228   : > { %v3388_v28 = vor.u32 %v8961_v48, %v3384_v31  ;;  %v9005_v14 = vor.u32 %v3567_v50, %v3566_v49 }
 0x229   : > { %v2453_v26 = vpop.f32.mrf.mxu3 }
 0x22a   : > { %3538 = vmatpush.bf16.xpose.msra.mxu2 %v3528_v61  ;;  %v3581_v61 = vsel %vm445_vm3, %v3576_v32, %v3580_v10  ;;  %v3401_v10 = vsel %vm227_vm2, %v3396_v18, %v3400_v20  ;;  %v3756_v18 = vshrl.u32 %v8982_v57, 16  ;;  %v3393_v25 = vsel %vm227_vm2, %v3388_v28, %v3392_v45 }
 0x22b   : > { %3472 = vmatpush.bf16.xpose.msra.mxu1 %v3458_v29  ;;  %v3484_v29 = vld [vmem:[%s7394_s14 + $0x1c] sm:$0xe]  ;;  %v3616_v34 = vsel %vm296_vm0, %v3581_v61, 0  ;;  %v3452_v20 = vsel %vm296_vm0, %v3401_v10, 0  ;;  %v3751_v10 = vrot.slane %v8785_v7, 2  ;;  %v3662_v7 = vrot.slane %v8822_v0, 2 }
 0x22c   : > { %3296 = vmatpush.bf16.xpose.msra.mxu0 %v3286_v3  ;;  %v3572_v3 = vor.u32 %v3571_v2, %v3570_v47  ;;  %v3490_v22 = vunpack.c.l.b16 %v3484_v29  ;;  %v3277_v2 = vsel %vm296_vm0, %v7246_v38, 0  ;;  %v3375_v29 = vshrl.u32 %v8941_v36, 16 }
 0x22d   : > { %v3752_v38 = vrot.slane %v8776_v51, 3  ;;  %v3758_v49 = vrot.slane %v3756_v18, 2 }
 0x22e   : > { %v3577_v5 = vsel %vm445_vm3, %v3572_v3, %v3576_v32  ;;  %v3664_v32 = vrot.slane %v8789_v60, 2  ;;  %v3491_v37 = vpack.c.b16 %v8957_v58, %v3490_v22  ;;  %v3573_v45 = vsel %vm445_vm3, %v9005_v14, %v3572_v3 }
 0x22f   : > { %3632 = vmatpush.bf16.xpose.msra.mxu3 %v3622_v27  ;;  %v2119_v27 = vpop.f32.mrf.mxu0  ;;  %v3613_v53 = vsel %vm296_vm0, %v3577_v5, 0  ;;  %v3905_v3 = vrot.slane %v8840_v16, 4 }
 0x230   : > { %v9014_v61 = vsel %vm541_vm6, %v3664_v32, %v10343_v23  ;;  %v3379_v27 = vrot.slane %v3377_v40, 1  ;;  %v3492_v5 = vrot.slane %v3491_v37, 1  ;;  %v3559_v18 = vshrl.u32 %v3491_v37, 16  ;;  %v9046_v23 = vld [vmem:[%s7625_s18 + $0x10] sm:$0x1] }
 0x231   : > { %v3906_v0 = vor.u32 %v3905_v3, %v3904_v13  ;;  %v7242_v13 = vld [vmem:[%s7394_s14 + $0x1c] sm:$0xff]  }
 0x232   : > { %3539 = vmatpush.bf16.xpose.msra.mxu2 %v3525_v59  ;;  %v3827_v59 = vrot.slane %v8764_v43, 3  ;;  %v3380_v40 = vor.u32 %v3379_v27, %v3375_v29  ;;  %v3610_v29 = vsel %vm296_vm0, %v3573_v45, 0  ;;  %v3748_v45 = vrot.slane %v8804_v62, 3 }
 0x233   : > { %3473 = vmatpush.bf16.xpose.msra.mxu1 %v3455_v30  ;;  %v8994_v30 = vld [vmem:[%s7394_s14 + $0x5c] sm:$0xff]  }
 0x234   : > { %3297 = vmatpush.bf16.xpose.msra.mxu0 %v3283_v54  ;;  %v3825_v54 = vrot.slane %v8789_v60, 3  ;;  %v3908_v60 = vrot.slane %v8819_v46, 3 }
 0x236   : > { %v9001_v47 = vsel %vm704_vm5, %v3825_v54, %v3827_v59  ;;  %v9036_v51 = vsel %vm704_vm5, %v3823_v6, %v3825_v54 }
 0x237   : > { %3633 = vmatpush.bf16.xpose.msra.mxu3 %v3619_v33  ;;  %v3759_v33 = vshll.u32 %v8982_v57, 16 }
 0x239   : > { %v3761_v50 = vrot.slane %v3759_v33, 3  ;;  %v3562_v33 = vshll.u32 %v3491_v37, 16 }
 0x23a   : > { %3540 = vmatpush.bf16.xpose.msra.mxu2 %v3522_v42  ;;  %v3878_v42 = vunpack.c.l.b16 %v8994_v30 }
 0x23b   : > { %3474 = vmatpush.bf16.xpose.msra.mxu1 %v3452_v20  ;;  %v3449_v20 = vsel %vm296_vm0, %v3393_v25, 0  ;;  %v3762_v25 = vor.u32 %v3761_v50, %v3758_v49  ;;  %v3564_v27 = vrot.slane %v3562_v33, 2  ;;  %v3326_v49 = vunpack.c.l.b16 %v9046_v23 }
 0x23c   : > { %3298 = vmatpush.bf16.xpose.msra.mxu0 %v3280_v1  ;;  %v3909_v1 = vrot.slane %v8804_v62, 4  ;;  %v3879_v28 = vpack.c.b16 %v3878_v42, %v3878_v42  ;;  %v3829_v42 = vrot.slane %v8982_v57, 3  ;;  %v3494_v57 = vsel %vm378_vm1, %v3492_v5, %v3493_v63 }
 0x23d   : > { %v3821_v63 = vrot.slane %v8856_v12, 3  ;;  %v3660_v5 = vrot.slane %v8856_v12, 2  ;;  %v3327_v62 = vpack.c.b16 %v3326_v49, %v3326_v49  ;;  %v3897_v49 = vrot.slane %v8892_v35, 4 }
 0x23e   : > { %v3910_v22 = vor.u32 %v3909_v1, %v3908_v60  ;;  %v3753_v60 = vor.u32 %v3752_v38, %v3751_v10  ;;  %v9043_v1 = vsel %vm541_vm6, %v3662_v7, %v3664_v32  ;;  %v3917_v54 = vshrl.u32 %v3879_v28, 16 }
 0x23f   : > { %3634 = vmatpush.bf16.xpose.msra.mxu3 %v3616_v34  ;;  %v7244_v34 = vld [vmem:[%s7394_s14 + $0x24] sm:$0xff]   ;;  %v3920_v26 = vshll.u32 %v3879_v28, 16  ;;  %v3385_v32 = vsel %vm227_vm2, %v3380_v40, %v3384_v31  ;;  %v3747_v31 = vrot.slane %v8819_v46, 2  ;;  %v3901_v28 = vrot.slane %v8870_v19, 4 }
 0x240   : > { %v9033_v36 = vsel %vm771_vm7, %v3910_v22, %v8976_v21  ;;  %v3274_v37 = vsel %vm296_vm0, %v7244_v34, 0  ;;  %v9056_v10 = vsel %vm771_vm7, %v3906_v0, %v3910_v22  ;;  %v3763_v38 = vsel %vm608_vm4, %v3753_v60, %v3762_v25 }
 0x241   : > { %v3922_v50 = vrot.slane %v3920_v26, 4  ;;  %v9068_v22 = vsel %vm704_vm5, %v3821_v63, %v3823_v6  ;;  %v3446_v34 = vsel %vm296_vm0, %v3385_v32, 0  ;;  %v3789_v40 = vsel %vm296_vm0, %v3763_v38, 0 }
 0x242   : > { %3541 = vmatpush.bf16.xpose.msra.mxu2 %v3519_v24  ;;  %v3516_v24 = vsel %vm296_vm0, %v3496_v41, 0  ;;  %v3830_v41 = vsel %vm704_vm5, %v3827_v59, %v3829_v42  ;;  %v3900_v59 = vrot.slane %v8883_v8, 3  ;;  %v9078_v6 = vsel %vm541_vm6, %v3660_v5, %v3662_v7 }
 0x243   : > { %3475 = vmatpush.bf16.xpose.msra.mxu1 %v3449_v20  ;;  %v3483_v20 = vld [vmem:[%s7625_s18 + $0x10] sm:$0x2]  ;;  %v3749_v42 = vor.u32 %v3748_v45, %v3747_v31  ;;  %v3856_v26 = vsel %vm296_vm0, %v3830_v41, 0  ;;  %v3744_v41 = vrot.slane %v8840_v16, 3  ;;  %v3658_v38 = vrot.slane %v8874_v39, 2 }
 0x244   : > { %3299 = vmatpush.bf16.xpose.msra.mxu0 %v3277_v2  ;;  %v3561_v2 = vrot.slane %v3559_v18, 1  ;;  %v3668_v18 = vrot.slane %v8793_v9, 2  ;;  %v3486_v33 = vunpack.c.l.b16 %v3483_v20  ;;  %v3902_v3 = vor.u32 %v3901_v28, %v3900_v59 }
 0x245   : > { %v3271_v9 = vsel %vm296_vm0, %v7242_v13, 0  ;;  %v3853_v45 = vsel %vm296_vm0, %v9001_v47, 0  ;;  %v3740_v13 = vrot.slane %v8870_v19, 3  ;;  %v3893_v47 = vrot.slane %v8920_v4, 4 }
 0x246   : > { %v3565_v46 = vor.u32 %v3564_v27, %v3561_v2  ;;  %v9081_v25 = vsel %vm771_vm7, %v3902_v3, %v3906_v0  ;;  %v3487_v32 = vpack.c.b16 %v3486_v33, %v3486_v33  ;;  %v3329_v2 = vshrl.u32 %v3327_v62, 16 }
 0x247   : > { %3635 = vmatpush.bf16.xpose.msra.mxu3 %v3613_v53  ;;  %v3919_v53 = vrot.slane %v3917_v54, 3  ;;  %v3513_v54 = vsel %vm296_vm0, %v3494_v57, 0  ;;  %v3819_v0 = vrot.slane %v8874_v39, 3  ;;  %v3754_v57 = vsel %vm608_vm4, %v3749_v42, %v3753_v60 }
 0x248   : > { %v3743_v27 = vrot.slane %v8853_v11, 2  ;;  %v3786_v60 = vsel %vm296_vm0, %v3754_v57, 0  ;;  %v9107_v11 = vsel %vm541_vm6, %v3658_v38, %v3660_v5  ;;  %v3552_v39 = vshrl.u32 %v3487_v32, 16 }
 0x249   : > { %v3923_v12 = vor.u32 %v3922_v50, %v3919_v53  ;;  %v3488_v20 = vrot.slane %v3487_v32, 1  ;;  %v3817_v5 = vrot.slane %v8906_v44, 3  ;;  %v3692_v33 = vsel %vm296_vm0, %v9014_v61, 0 }
 0x24a   : > { %3542 = vmatpush.bf16.xpose.msra.mxu2 %v3516_v24  ;;  %v10365_v24 = vrot.slane %v8764_v43, 2  ;;  %v9098_v43 = vsel %vm704_vm5, %v3819_v0, %v3821_v63  ;;  %v3745_v50 = vor.u32 %v3744_v41, %v3743_v27  ;;  %v3554_v59 = vrot.slane %v3552_v39, 1  ;;  %v3645_v39 = vld [vmem:[%s7394_s14 + $0x1c] sm:$0xc] }
 0x24b   : > { %3476 = vmatpush.bf16.xpose.msra.mxu1 %v3446_v34  ;;  %v3739_v34 = vrot.slane %v8883_v8, 2  ;;  %v3689_v32 = vsel %vm296_vm0, %v9043_v1, 0 }
 0x24c   : > { %3300 = vmatpush.bf16.xpose.msra.mxu0 %v3274_v37  ;;  %v3669_v7 = vsel %vm541_vm6, %v10365_v24, %v3668_v18  ;;  %v3569_v37 = vsel %vm445_vm3, %v3565_v46, %v9005_v14  ;;  %v3896_v14 = vrot.slane %v8903_v52, 3  ;;  %v3750_v28 = vsel %vm608_vm4, %v3745_v50, %v3749_v42 }
 0x24d   : > { %v3695_v53 = vsel %vm296_vm0, %v3669_v7, 0  ;;  %v3656_v18 = vrot.slane %v8906_v44, 2  ;;  %v3892_v46 = vrot.slane %v8930_v17, 3  ;;  %v3783_v19 = vsel %vm296_vm0, %v3750_v28, 0 }
 0x24e   : > { %v3898_v16 = vor.u32 %v3897_v49, %v3896_v14  ;;  %v3947_v44 = vsel %vm296_vm0, %v9033_v36, 0  ;;  %v3850_v42 = vsel %vm296_vm0, %v9036_v51, 0  ;;  %v3735_v36 = vrot.slane %v8903_v52, 2 }
 0x24f   : > { %3636 = vmatpush.bf16.xpose.msra.mxu3 %v3610_v29  ;;  %v3924_v29 = vsel %vm771_vm7, %v8976_v21, %v3923_v12  ;;  %v3607_v21 = vsel %vm296_vm0, %v3569_v37, 0  ;;  %v9133_v8 = vsel %vm541_vm6, %v3656_v18, %v3658_v38  ;;  %v3894_v62 = vor.u32 %v3893_v47, %v3892_v46 }
 0x250   : > { %v3950_v63 = vsel %vm296_vm0, %v3924_v29, 0  ;;  %v9112_v31 = vsel %vm771_vm7, %v3898_v16, %v3902_v3  ;;  %v3741_v3 = vor.u32 %v3740_v13, %v3739_v34  ;;  %v3815_v12 = vrot.slane %v8933_v56, 3 }
 0x251   : > { %v9139_v61 = vsel %vm771_vm7, %v3894_v62, %v3898_v16  ;;  %v3654_v24 = vrot.slane %v8933_v56, 2  ;;  %v3888_v7 = vrot.slane %v8961_v48, 3  ;;  %v3889_v37 = vrot.slane %v8951_v55, 4 }
 0x252   : > { %3543 = vmatpush.bf16.xpose.msra.mxu2 %v3513_v54  ;;  %6577 = vmatmul.msk.bf16.vlgmr.msra.gmra.mxu1 %vm296_vm0, %v3329_v2  ;;  %v3746_v54 = vsel %vm608_vm4, %v3741_v3, %v3745_v50  ;;  %v3806_v2 = vld [vmem:[%s7394_s14 + $0x1c] sm:$0x8]  ;;  %v3944_v29 = vsel %vm296_vm0, %v9056_v10, 0  ;;  %v3728_v46 = vrot.slane %v8951_v55, 3 }
 0x253   : > { %3791 = vmatpush.bf16.xpose.msrb.mxu1 %v3789_v40  ;;  %v9122_v40 = vsel %vm704_vm5, %v3817_v5, %v3819_v0  ;;  %v3780_v51 = vsel %vm296_vm0, %v3746_v54, 0  ;;  %v3890_v52 = vor.u32 %v3889_v37, %v3888_v7  ;;  %v3812_v0 = vunpack.c.l.b16 %v3806_v2  ;;  %v4286_v2 = vld [vmem:[%s7394_s14 + $0x64] sm:$0x1] }
 0x254   : > { %3301 = vmatpush.bf16.xpose.msra.mxu0 %v3271_v9  ;;  %v9148_v9 = vsel %vm704_vm5, %v3815_v12, %v3817_v5  ;;  %v3841_v37 = vsel %vm296_vm0, %v9122_v40, 0 }
 0x255   : > { %v9165_v27 = vsel %vm771_vm7, %v3890_v52, %v3894_v62  ;;  %v3813_v1 = vpack.c.b16 %v8957_v58, %v3812_v0  ;;  %v9197_v62 = vld [vmem:[%s7394_s14 + $0x58] sm:$0xff]  }
 0x257   : > { %3637 = vmatpush.bf16.xpose.msra.mxu3 %v3607_v21  ;;  %v3814_v14 = vrot.slane %v3813_v1, 3  ;;  %v3731_v21 = vrot.slane %v8930_v17, 2  ;;  %v3651_v17 = vunpack.c.l.b16 %v3645_v39  ;;  %v3884_v28 = vshll.u32 %v3813_v1, 16 }
 0x258   : > { %v2570_v41 = vpop.f32.mrf.mxu0 }
 0x259   : > { %6578 = vmatmul.msk.bf16.vlgmr.msra.gmra.mxu2 %vm296_vm0, %v3488_v20  ;;  %v2574_v38 = vadd.f32 %v2570_v41, %v8971_v15  ;;  %v3686_v15 = vsel %vm296_vm0, %v9078_v6, 0  ;;  %v3727_v6 = vrot.slane %v8961_v48, 2  ;;  %v3886_v47 = vrot.slane %v3884_v28, 4  ;;  %v3983_v41 = vld [vmem:[%s7394_s14 + $0x60] sm:$0x7] }
 0x25a   : > { %3858 = vmatpush.bf16.xpose.msrb.mxu2 %v3856_v26  ;;  %v3736_v26 = vrot.slane %v8892_v35, 3  ;;  %v9160_v35 = vsel %vm541_vm6, %v3654_v24, %v3656_v18  ;;  %v4017_v39 = vunpack.c.l.b16 %v3983_v41 }
 0x25b   : > { %3792 = vmatpush.bf16.xpose.msrb.mxu1 %v3786_v60  ;;  %6548 = vmatmul.msk.bf16.vlgmr.msra.gmra.mxu0 %vm296_vm0, %v9046_v23  ;;  %v2701_v23 = vpop.f32.mrf.mxu1  ;;  %v3732_v60 = vrot.slane %v8920_v4, 3  ;;  %v9184_v4 = vunpack.c.h.b16 %v8994_v30 }
 0x25c   : > { %3697 = vmatpush.bf16.xpose.msrb.mxu0 %v3695_v53  ;;  %v3737_v57 = vor.u32 %v3736_v26, %v3735_v36  ;;  %v3847_v53 = vsel %vm296_vm0, %v9068_v22, 0  ;;  %v2705_v16 = vadd.f32 %v2701_v23, %v2574_v38  ;;  %v2768_v50 = vpop.f32.mrf.mxu2  ;;  %v3941_v22 = vsel %vm296_vm0, %v9081_v25, 0 }
 0x25d   : > { %v3733_v5 = vor.u32 %v3732_v60, %v3731_v21  ;;  %v4094_v48 = vpack.c.b16 %v9184_v4, %v9184_v4  ;;  %v3938_v23 = vsel %vm296_vm0, %v9112_v31, 0  ;;  %v4158_v36 = vshrl.u32 %v9197_v62, 16 }
 0x25e   : > { %6579 = vmatmul.msk.bf16.vlgmr.msra.gmra.mxu3 %vm296_vm0, %v3554_v59  ;;  %v3742_v10 = vsel %vm608_vm4, %v3737_v57, %v3741_v3  ;;  %v2772_v20 = vadd.f32 %v2768_v50, %v2705_v16  ;;  %v3881_v59 = vshrl.u32 %v3813_v1, 16  ;;  %v3683_v3 = vsel %vm296_vm0, %v9107_v11, 0 }
 0x25f   : > { %3952 = vmatpush.bf16.xpose.msrb.mxu3 %v3950_v63  ;;  %v9175_v63 = vsel %vm704_vm5, %v3814_v14, %v3815_v12  ;;  %v3738_v30 = vsel %vm608_vm4, %v3733_v5, %v3737_v57  ;;  %v3729_v12 = vor.u32 %v3728_v46, %v3727_v6  ;;  %v4161_v11 = vshll.u32 %v9197_v62, 16  ;;  %v9221_v14 = vld [vmem:[%s7394_s14 + $0x5c] sm:$0xff] }
 0x260   : > { %v2572_v13 = vpop.f32.mrf.mxu0  ;;  %v3883_v25 = vrot.slane %v3881_v59, 3  ;;  %v4167_v26 = vshrl.u32 %v4094_v48, 16  ;;  %v4170_v31 = vshll.u32 %v4094_v48, 16  ;;  %v4160_v0 = vrot.slane %v4158_v36, 3 }
 0x261   : > { %v2862_v34 = vpop.f32.mrf.mxu3  ;;  %v3680_v38 = vsel %vm296_vm0, %v9133_v8, 0  ;;  %v3935_v21 = vsel %vm296_vm0, %v9139_v61, 0  ;;  %v6904_v61 = vunpack.c.h.b16 %v9197_v62  ;;  %v4026_v28 = vpack.c.b16 %v4017_v39, %v4017_v39 }
 0x262   : > { %3859 = vmatpush.bf16.xpose.msrb.mxu2 %v3853_v45  ;;  %v3777_v45 = vsel %vm296_vm0, %v3742_v10, 0  ;;  %v9187_v18 = vadd.f32 %v2862_v34, %v2772_v20  ;;  %v4169_v57 = vrot.slane %v4167_v26, 3  ;;  %v4172_v1 = vrot.slane %v4170_v31, 4  ;;  %v9225_v10 = vld [vmem:[%s7394_s14 + $0x50] sm:$0xff]  }
 0x263   : > { %3793 = vmatpush.bf16.xpose.msrb.mxu1 %v3783_v19  ;;  %v2703_v49 = vpop.f32.mrf.mxu1  ;;  %v9194_v19 = vpack.c.b16 %v8957_v58, %v3651_v17  ;;  %v4149_v8 = vshrl.u32 %v9225_v10, 16  ;;  %v4152_v20 = vshll.u32 %v9225_v10, 16  ;;  %v3932_v48 = vsel %vm296_vm0, %v9165_v27, 0 }
 0x264   : > { %3698 = vmatpush.bf16.xpose.msrb.mxu0 %v3692_v33  ;;  %v3844_v33 = vsel %vm296_vm0, %v9098_v43, 0  ;;  %v2770_v55 = vpop.f32.mrf.mxu2  ;;  %v3774_v43 = vsel %vm296_vm0, %v3738_v30, 0  ;;  %v4324_v49 = vunpack.c.l.b16 %v4286_v2  ;;  %v4173_v50 = vor.u32 %v4172_v1, %v4169_v57  ;;  %v9253_v30 = vld [vmem:[%s7394_s14 + $0x54] sm:$0xff]  ;;  %v9293_v57 = vld [vmem:[%s7394_s14 + $0x4c] sm:$0xff]  ;;  %v9296_v1 = vld [vmem:[%s7394_s14 + $0x40] sm:$0xff]  }
 0x265   : > { %v3723_v54 = vshll.u32 %v9194_v19, 16  ;;  %v3653_v59 = vrot.slane %v9194_v19, 2  ;;  %v4151_v13 = vrot.slane %v4149_v8, 3  ;;  %v4154_v46 = vrot.slane %v4152_v20, 4 }
 0x266   : > { %v10348_v39 = vshll.u32 %v9296_v1, 16 }
 0x267   : > { %3953 = vmatpush.bf16.xpose.msrb.mxu3 %v3947_v44  ;;  %v3887_v44 = vor.u32 %v3886_v47, %v3883_v25  ;;  %v3677_v25 = vsel %vm296_vm0, %v9160_v35, 0  ;;  %v3805_v35 = vld [vmem:[%s7625_s18 + $0x10] sm:$0x8]  ;;  %v3655_v55 = vsel %vm541_vm6, %v3653_v59, %v3654_v24 }
 0x268   : > { %v3808_v24 = vunpack.c.l.b16 %v3805_v35  ;;  %v3674_v31 = vsel %vm296_vm0, %v3655_v55, 0  ;;  %v4136_v59 = vrot.slane %v10348_v39, 4 }
 0x269   : > { %v9207_v58 = vsel %vm771_vm7, %v3887_v44, %v3890_v52  ;;  %v2864_v7 = vpop.f32.mrf.mxu3  ;;  %v3725_v52 = vrot.slane %v3723_v54, 3 }
 0x26a   : > { %3860 = vmatpush.bf16.xpose.msrb.mxu2 %v3850_v42  ;;  %v3720_v42 = vshrl.u32 %v9194_v19, 16  ;;  %v9256_v19 = vld [vmem:[%s7394_s14 + $0x48] sm:$0xff]  }
 0x26b   : > { %3794 = vmatpush.bf16.xpose.msrb.mxu1 %v3780_v51  ;;  %v10351_v27 = vshrl.u32 %v9256_v19, 16  ;;  %v10350_v36 = vshll.u32 %v9256_v19, 16 }
 0x26c   : > { %3699 = vmatpush.bf16.xpose.msrb.mxu0 %v3689_v32  ;;  %v3734_v32 = vsel %vm608_vm4, %v3729_v12, %v3733_v5  ;;  %v3722_v51 = vrot.slane %v3720_v42, 2  ;;  %v3838_v5 = vsel %vm296_vm0, %v9148_v9, 0  ;;  %v4155_v42 = vor.u32 %v4154_v46, %v4151_v13  ;;  %v9332_v46 = vld [vmem:[%s7394_s14 + $0x44] sm:$0xff] }
 0x26d   : > { %v3771_v40 = vsel %vm296_vm0, %v3734_v32, 0  ;;  %v4142_v2 = vrot.slane %v10351_v27, 3  ;;  %v9329_v13 = vshrl.u32 %v9293_v57, 16 }
 0x26e   : > { %v3726_v60 = vor.u32 %v3725_v52, %v3722_v51  ;;  %v4145_v51 = vrot.slane %v10350_v36, 4 }
 0x26f   : > { %3954 = vmatpush.bf16.xpose.msrb.mxu3 %v3944_v29  ;;  %v4163_v29 = vrot.slane %v4161_v11, 4  ;;  %v9275_v11 = vshll.u32 %v9253_v30, 16 }
 0x270   : > { %v3730_v17 = vsel %vm608_vm4, %v3726_v60, %v3729_v12  ;;  %v4042_v12 = vrot.slane %v4026_v28, 3  ;;  %v9306_v60 = vor.u32 %v4145_v51, %v4142_v2 }
 0x271   : > { %v4164_v16 = vor.u32 %v4163_v29, %v4160_v0  ;;  %v3768_v44 = vsel %vm296_vm0, %v3730_v17, 0  ;;  %v3809_v0 = vpack.c.b16 %v3808_v24, %v3808_v24  ;;  %v9290_v29 = vshrl.u32 %v9253_v30, 16 }
 0x272   : > { %3861 = vmatpush.bf16.xpose.msrb.mxu2 %v3847_v53  ;;  %v3644_v53 = vld [vmem:[%s7625_s18 + $0x10] sm:$0x4] }
 0x273   : > { %3795 = vmatpush.bf16.xpose.msrb.mxu1 %v3777_v45  ;;  %v9232_v45 = vpack.c.b16 %v4324_v49, %v4324_v49  ;;  %v4174_v34 = vsel %vm771_vm7, %v4164_v16, %v4173_v50  ;;  %v3810_v50 = vrot.slane %v3809_v0, 3 }
 0x274   : > { %3700 = vmatpush.bf16.xpose.msrb.mxu0 %v3686_v15  ;;  %v3647_v15 = vunpack.c.l.b16 %v3644_v53  ;;  %v4038_v53 = vrot.slane %v9225_v10, 3  ;;  %v9312_v10 = vshll.u32 %v9293_v57, 16 }
 0x275   : > { %v4398_v9 = vshll.u32 %v9232_v45, 16 }
 0x276   : > { %v9243_v6 = vpack.c.b16 %v3647_v15, %v3647_v15  ;;  %v3874_v15 = vshrl.u32 %v3809_v0, 16  ;;  %v4034_v0 = vrot.slane %v9296_v1, 3 }
 0x277   : > { %3955 = vmatpush.bf16.xpose.msrb.mxu3 %v3941_v22  ;;  %v9235_v22 = vshll.u32 %v9221_v14, 16 }
 0x278   : > { %v3713_v54 = vshrl.u32 %v9243_v6, 16  ;;  %v3649_v8 = vrot.slane %v9243_v6, 2  ;;  %v3876_v28 = vrot.slane %v3874_v15, 3  ;;  %v4376_v6 = vrot.slane %v9312_v10, 1 }
 0x279   : > { %v4392_v47 = vrot.slane %v9235_v22, 1 }
 0x27a   : > { %3862 = vmatpush.bf16.xpose.msrb.mxu2 %v3844_v33  ;;  %v9249_v33 = vshrl.u32 %v9221_v14, 16  ;;  %v3715_v32 = vrot.slane %v3713_v54, 2 }
 0x27b   : > { %3796 = vmatpush.bf16.xpose.msrb.mxu1 %v3774_v43  ;;  %v4040_v43 = vrot.slane %v9197_v62, 3  ;;  %v3835_v62 = vsel %vm296_vm0, %v9175_v63, 0  ;;  %v4384_v63 = vrot.slane %v9275_v11, 1 }
 0x27c   : > { %3701 = vmatpush.bf16.xpose.msrb.mxu0 %v3683_v3  ;;  %v4228_v3 = vpack.c.b16 %v9184_v4, %v6904_v61  ;;  %v4396_v56 = vor.u32 %v9249_v33, %v4392_v47  ;;  %v4400_v4 = vrot.slane %v4398_v9, 1 }
 0x27d   : > { %v4043_v7 = vsel %vm704_vm5, %v4040_v43, %v4042_v12  ;;  %v4041_v20 = vsel %vm704_vm5, %v4038_v53, %v4040_v43  ;;  %v4380_v43 = vor.u32 %v9329_v13, %v4376_v6  ;;  %v9350_v12 = vshll.u32 %v9332_v46, 16 }
 0x27e   : > { %v4254_v26 = vsel %vm296_vm0, %v4228_v3, 0  ;;  %v4401_v52 = vsel %vm227_vm2, %v4396_v56, %v4400_v4  ;;  %v4069_v41 = vsel %vm296_vm0, %v4043_v7, 0  ;;  %v4066_v9 = vsel %vm296_vm0, %v4041_v20, 0  ;;  %v7266_v3 = vld [vmem:[%s7394_s14 + $0x4c] sm:$0xff]  }
 0x27f   : > { %3956 = vmatpush.bf16.xpose.msrb.mxu3 %v3938_v23  ;;  %v4200_v23 = vsel %vm296_vm0, %v4174_v34, 0  ;;  %v4248_v4 = vsel %vm296_vm0, %v7266_v3, 0  ;;  %v4368_v7 = vrot.slane %v9350_v12, 1 }
 0x282   : > { %3863 = vmatpush.bf16.xpose.msrb.mxu2 %v3841_v37  ;;  %v4165_v37 = vsel %vm771_vm7, %v4155_v42, %v4164_v16  ;;  %v10349_v16 = vshrl.u32 %v9296_v1, 16 }
 0x283   : > { %3797 = vmatpush.bf16.xpose.msrb.mxu1 %v3771_v40  ;;  %v4197_v49 = vsel %vm296_vm0, %v4165_v37, 0  ;;  %v4427_v40 = vsel %vm296_vm0, %v4401_v52, 0  ;;  %v9367_v37 = vshrl.u32 %v9332_v46, 16 }
 0x284   : > { %3702 = vmatpush.bf16.xpose.msrb.mxu0 %v3680_v38  ;;  %v3929_v38 = vsel %vm296_vm0, %v9207_v58, 0  ;;  %v4388_v58 = vor.u32 %v9290_v29, %v4384_v63  ;;  %v4133_v17 = vrot.slane %v10349_v16, 3 }
 0x286   : > { %v4393_v34 = vsel %vm227_vm2, %v4388_v58, %v4392_v47  ;;  %v4137_v35 = vor.u32 %v4136_v59, %v4133_v17  ;;  %v9391_v58 = vld [vmem:[%s7394_s14 + $0x34] sm:$0xff] }
 0x287   : > { %3957 = vmatpush.bf16.xpose.msrb.mxu3 %v3935_v21  ;;  %v7267_v21 = vld [vmem:[%s7394_s14 + $0x54] sm:$0xff]   ;;  %v4424_v47 = vsel %vm296_vm0, %v4393_v34, 0  ;;  %v9403_v34 = vld [vmem:[%s7394_s14 + $0x28] sm:$0xff]  }
 0x288   : > { %v4251_v61 = vsel %vm296_vm0, %v7267_v21, 0  ;;  %v4147_v24 = vsel %vm771_vm7, %v4137_v35, %v9306_v60 }
 0x289   : > { %v9377_v52 = vsel %vm296_vm0, %v4147_v24, 0 }
 0x28a   : > { %3864 = vmatpush.bf16.xpose.msrb.mxu2 %v3838_v5  ;;  %v4156_v5 = vsel %vm771_vm7, %v9306_v60, %v4155_v42  ;;  %v9353_v42 = vld [vmem:[%s7394_s14 + $0x3c] sm:$0xff] }
 0x28b   : > { %3798 = vmatpush.bf16.xpose.msrb.mxu1 %v3768_v44  ;;  %v9341_v44 = vrot.slane %v9256_v19, 3  ;;  %v9374_v51 = vshll.u32 %v9353_v42, 16  ;;  %v9388_v15 = vshrl.u32 %v9353_v42, 16 }
 0x28c   : > { %3703 = vmatpush.bf16.xpose.msrb.mxu0 %v3677_v25  ;;  %v9335_v25 = vld [vmem:[%s7394_s14 + $0x38] sm:$0xff]  }
 0x28d   : > { %v10347_v55 = vshrl.u32 %v9335_v25, 16  ;;  %v4039_v54 = vsel %vm704_vm5, %v9341_v44, %v4038_v53  ;;  %v4037_v20 = vsel %vm704_vm5, %v4034_v0, %v9341_v44 }
 0x28e   : > { %v4063_v2 = vsel %vm296_vm0, %v4039_v54, 0 }
 0x28f   : > { %3958 = vmatpush.bf16.xpose.msrb.mxu3 %v3932_v48  ;;  %v4194_v48 = vsel %vm296_vm0, %v4156_v5, 0  ;;  %v3023_v56 = vpop.f32.mrf.mxu1 }
 0x292   : > { %3865 = vmatpush.bf16.xpose.msrb.mxu2 %v3835_v62  ;;  %6581 = vmatmul.msk.bf16.vlgmr.msrb.gmra.mxu1 %vm296_vm0, %v3715_v32  ;;  %v4124_v62 = vrot.slane %v10347_v55, 3  ;;  %v9370_v32 = vld [vmem:[%s7394_s14 + $0x30] sm:$0xff]   ;;  %v4028_v55 = vrot.slane %v9403_v34, 3 }
 0x293   : > { %4202 = vmatpush.bf16.xpose.msra.mxu1 %v4200_v23  ;;  %v10346_v23 = vshll.u32 %v9335_v25, 16  ;;  %v10344_v53 = vshll.u32 %v9370_v32, 16 }
 0x294   : > { %3704 = vmatpush.bf16.xpose.msrb.mxu0 %v3674_v31  ;;  %v4385_v31 = vsel %vm227_vm2, %v4380_v43, %v4384_v63  ;;  %v9411_v43 = vsel %vm296_vm0, %v4037_v20, 0 }
 0x295   : > { %v4421_v63 = vsel %vm296_vm0, %v4385_v31, 0 }
 0x297   : > { %3959 = vmatpush.bf16.xpose.msrb.mxu3 %v3929_v38 }
 0x298   : > { %v2929_v21 = vpop.f32.mrf.mxu0 }
 0x299   : > { %6582 = vmatmul.msk.bf16.vlgmr.msrb.gmra.mxu2 %vm296_vm0, %v3810_v50  ;;  %v4360_v50 = vrot.slane %v9374_v51, 1 }
 0x29a   : > { %4256 = vmatpush.bf16.xpose.msra.mxu2 %v4254_v26  ;;  %v4127_v26 = vrot.slane %v10346_v23, 4 }
 0x29b   : > { %4203 = vmatpush.bf16.xpose.msra.mxu1 %v4197_v49  ;;  %6580 = vmatmul.msk.bf16.vlgmr.msrb.gmra.mxu0 %vm296_vm0, %v3649_v8  ;;  %v10345_v49 = vshrl.u32 %v9370_v32, 16  ;;  %v2933_v8 = vadd.f32 %v2929_v21, %v9187_v18  ;;  %v4364_v54 = vor.u32 %v9388_v15, %v4360_v50 }
 0x29c   : > { %4071 = vmatpush.bf16.xpose.msra.mxu0 %v4069_v41  ;;  %v7264_v41 = vld [vmem:[%s7394_s14 + $0x44] sm:$0xff]   ;;  %v4128_v38 = vor.u32 %v4127_v26, %v4124_v62  ;;  %v3077_v3 = vpop.f32.mrf.mxu2  ;;  %v4104_v62 = vshrl.u32 %v9403_v34, 16  ;;  %v4107_v26 = vshll.u32 %v9403_v34, 16 }
 0x29d   : > { %v4245_v5 = vsel %vm296_vm0, %v7264_v41, 0  ;;  %v4115_v59 = vrot.slane %v10345_v49, 3 }
 0x29e   : > { %6583 = vmatmul.msk.bf16.vlgmr.msrb.gmra.mxu3 %vm296_vm0, %v3876_v28  ;;  %v4138_v17 = vsel %vm771_vm7, %v4128_v38, %v4137_v35  ;;  %v4118_v28 = vrot.slane %v10344_v53, 4  ;;  %v4032_v35 = vrot.slane %v9335_v25, 3 }
 0x29f   : > { %4429 = vmatpush.bf16.xpose.msra.mxu3 %v4427_v40  ;;  %v4372_v40 = vor.u32 %v9367_v37, %v4368_v7 }
 0x2a0   : > { %v4035_v20 = vsel %vm704_vm5, %v4032_v35, %v4034_v0 }
 0x2a1   : > { %v4377_v18 = vsel %vm227_vm2, %v4372_v40, %v4376_v6  ;;  %v9422_v6 = vsel %vm296_vm0, %v4138_v17, 0  ;;  %v2931_v17 = vpop.f32.mrf.mxu0 }
 0x2a2   : > { %4257 = vmatpush.bf16.xpose.msra.mxu2 %v4251_v61  ;;  %v3025_v61 = vpop.f32.mrf.mxu1  ;;  %10366 = vst [vmem:[#allocation2_spill] sm:$0xff] %v9422_v6  ;;  %v4418_v31 = vsel %vm296_vm0, %v4377_v18, 0  ;;  %v4109_v18 = vrot.slane %v4107_v26, 4  ;;  %v7260_v26 = vld [vmem:[%s7394_s14 + $0x34] sm:$0xff]  }
 0x2a3   : > { %4204 = vmatpush.bf16.xpose.msra.mxu1 %v4194_v48  ;;  %v3967_v48 = vld [vmem:[%s7394_s14 + $0x20] sm:$0x8]  ;;  %v4369_v61 = vsel %vm227_vm2, %v4364_v54, %v4368_v7 }
 0x2a4   : > { %4072 = vmatpush.bf16.xpose.msra.mxu0 %v4066_v9  ;;  %v3027_v9 = vadd.f32 %v3023_v56, %v2933_v8  ;;  %v4510_v56 = vld [vmem:[%s7394_s14 + $0x64] sm:$0x3]  ;;  %v4001_v41 = vunpack.c.l.b16 %v3967_v48  ;;  %v3250_v8 = vpop.f32.mrf.mxu3  ;;  %v9442_v48 = vld [vmem:[%s7394_s14 + $0x2c] sm:$0xff] }
 0x2a5   : > { %v4516_v21 = vunpack.c.l.b16 %v4510_v56  ;;  %v4270_v56 = vld [vmem:[%s7394_s14 + $0x24] sm:$0xf]  ;;  %v9490_v16 = vshrl.u32 %v9442_v48, 16 }
 0x2a6   : > { %v3081_v24 = vadd.f32 %v3077_v3, %v3027_v9  ;;  %v4106_v9 = vrot.slane %v4104_v62, 3  ;;  %v4415_v62 = vsel %vm296_vm0, %v4369_v61, 0  ;;  %v4308_v53 = vunpack.c.l.b16 %v4270_v56 }
 0x2a7   : > { %4430 = vmatpush.bf16.xpose.msra.mxu3 %v4424_v47  ;;  %v9408_v47 = vld [vmem:[%s7394_s14 + $0x24] sm:$0xff]   ;;  %v9451_v54 = vpack.c.b16 %v4516_v21, %v4516_v21 }
 0x2a8   : > { %v10352_v40 = vunpack.c.l.b16 %v9408_v47  ;;  %v4110_v21 = vor.u32 %v4109_v18, %v4106_v9  ;;  %v4239_v9 = vsel %vm296_vm0, %v7260_v26, 0 }
 0x2aa   : > { %4258 = vmatpush.bf16.xpose.msra.mxu2 %v4248_v4  ;;  %v9418_v4 = vshll.u32 %v9391_v58, 16  ;;  %v9449_v0 = vpack.c.b16 %v10352_v40, %v4001_v41  ;;  %v7258_v40 = vld [vmem:[%s7394_s14 + $0x2c] sm:$0xff]  }
 0x2ab   : > { %4205 = vmatpush.bf16.xpose.msra.mxu1 %v9377_v52 }
 0x2ac   : > { %4073 = vmatpush.bf16.xpose.msra.mxu0 %v4063_v2  ;;  %v7262_v2 = vld [vmem:[%s7394_s14 + $0x3c] sm:$0xff]   ;;  %v4096_v61 = vshrl.u32 %v9449_v0, 16  ;;  %v4099_v17 = vshll.u32 %v9449_v0, 16  ;;  %v3252_v23 = vpop.f32.mrf.mxu3 }
 0x2ad   : > { %v4242_v3 = vsel %vm296_vm0, %v7262_v2, 0  ;;  %v3079_v2 = vpop.f32.mrf.mxu2  ;;  %v4550_v23 = vrot.slane %v9249_v33, 1 }
 0x2ae   : > { %v9475_v2 = vunpack.c.h.b16 %v9408_v47  ;;  %v4098_v36 = vrot.slane %v4096_v61, 3 }
 0x2af   : > { %4431 = vmatpush.bf16.xpose.msra.mxu3 %v4421_v63  ;;  %v9428_v63 = vor.u32 %v4118_v28, %v4115_v59  ;;  %v9436_v59 = vadd.f32 %v3250_v8, %v3081_v24  ;;  %v9439_v28 = vshrl.u32 %v9391_v58, 16  ;;  %v9455_v24 = vsel %vm296_vm0, %v4035_v20, 0  ;;  %v4671_v20 = vld [vmem:[%s7394_s14 + $0x64] sm:$0x7] }
 0x2b0   : > { %10368 = vst [vmem:[#allocation4_spill] sm:$0xff] %v9455_v24  ;;  %v9469_v8 = vshll.u32 %v9442_v48, 16  ;;  %v4677_v49 = vunpack.c.l.b16 %v4671_v20  ;;  %v4325_v20 = vpack.c.b16 %v9475_v2, %v4308_v53 }
 0x2b1   : > { %10367 = vst [vmem:[#allocation3_spill] sm:$0xff] %v9428_v63  ;;  %v4129_v7 = vsel %vm771_vm7, %v9428_v63, %v4128_v38  ;;  %v4120_v26 = vsel %vm771_vm7, %v4110_v21, %v9428_v63 }
 0x2b2   : > { %4259 = vmatpush.bf16.xpose.msra.mxu2 %v4245_v5  ;;  %v10353_v5 = vrot.slane %v9418_v4, 1  ;;  %v9463_v38 = vsel %vm296_vm0, %v4129_v7, 0  ;;  %v4558_v7 = vshll.u32 %v9451_v54, 16  ;;  %v4182_v39 = vsel %vm296_vm0, %v4120_v26, 0 }
 0x2b3   : > { %4206 = vmatpush.bf16.xpose.msra.mxu1 %v9422_v6  ;;  %10370 = vst [vmem:[#allocation6_spill] sm:$0xff] %v9463_v38  ;;  %v10372_v53 = vrot.slane %v9469_v8, 1 }
 0x2b4   : > { %4074 = vmatpush.bf16.xpose.msra.mxu0 %v9411_v43  ;;  %v4356_v41 = vor.u32 %v9439_v28, %v10353_v5  ;;  %v4678_v5 = vpack.c.b16 %v4677_v49, %v4677_v49  ;;  %v4236_v49 = vsel %vm296_vm0, %v7258_v40, 0 }
 0x2b6   : > { %v4361_v56 = vsel %vm227_vm2, %v4356_v41, %v4360_v50  ;;  %v4560_v50 = vrot.slane %v4558_v7, 2  ;;  %v4337_v7 = vshll.u32 %v4325_v20, 16  ;;  %v4716_v26 = vshrl.u32 %v4678_v5, 16 }
 0x2b7   : > { %4432 = vmatpush.bf16.xpose.msra.mxu3 %v4418_v31  ;;  %v9460_v31 = vrot.slane %v9370_v32, 3  ;;  %v4412_v63 = vsel %vm296_vm0, %v4361_v56, 0  ;;  %v4719_v6 = vshll.u32 %v4678_v5, 16 }
 0x2b8   : > { %v4339_v5 = vrot.slane %v4337_v7, 1  ;;  %v4216_v7 = vld [vmem:[%s7625_s18 + $0x14] sm:$0x2] }
 0x2b9   : > { %10369 = vst [vmem:[#allocation5_spill] sm:$0xff] %v9460_v31  ;;  %v4033_v18 = vsel %vm704_vm5, %v9460_v31, %v4032_v35  ;;  %v4101_v35 = vrot.slane %v4099_v17, 4  ;;  %v4031_v61 = vsel %vm704_vm5, %v4028_v55, %v9460_v31  ;;  %v4348_v17 = vor.u32 %v9490_v16, %v10372_v53  ;;  %v9512_v31 = vld [vmem:[%s7625_s18 + $0x14] sm:$0x1] }
 0x2ba   : > { %4260 = vmatpush.bf16.xpose.msra.mxu2 %v4242_v3  ;;  %v4555_v3 = vshrl.u32 %v9451_v54, 16  ;;  %v9498_v41 = vsel %vm296_vm0, %v4033_v18, 0  ;;  %v10373_v53 = vrot.slane %v9418_v4, 1 }
 0x2bb   : > { %4207 = vmatpush.bf16.xpose.msra.mxu1 %v9463_v38  ;;  %10371 = vst [vmem:[#allocation7_spill] sm:$0xff] %v9498_v41 }
 0x2bc   : > { %4075 = vmatpush.bf16.xpose.msra.mxu0 %v9455_v24  ;;  %v4557_v27 = vrot.slane %v4555_v3, 1  ;;  %v4102_v3 = vor.u32 %v4101_v35, %v4098_v36  ;;  %v4353_v56 = vsel %vm227_vm2, %v4348_v17, %v10373_v53  ;;  %v6879_v36 = vunpack.c.l.b16 %v9403_v34 }
 0x2bd   : > { %v4626_v35 = vrot.slane %v9221_v14, 2  ;;  %v4711_v34 = vrot.slane %v9249_v33, 2  ;;  %v4712_v17 = vrot.slane %v9235_v22, 3  ;;  %v4721_v53 = vrot.slane %v4719_v6, 3 }
 0x2be   : > { %v4561_v38 = vor.u32 %v4560_v50, %v4557_v27  ;;  %v4628_v27 = vrot.slane %v9451_v54, 2  ;;  %v4111_v40 = vsel %vm771_vm7, %v4102_v3, %v4110_v21  ;;  %v4546_v50 = vrot.slane %v9290_v29, 1 }
 0x2bf   : > { %4433 = vmatpush.bf16.xpose.msra.mxu3 %v4415_v62  ;;  %v4551_v62 = vrot.slane %v9235_v22, 2  ;;  %v4718_v54 = vrot.slane %v4716_v26, 2  ;;  %v10374_v21 = vunpack.c.l.b16 %v9408_v47  ;;  %v4465_v24 = vrot.slane %v9221_v14, 1 }
 0x2c0   : > { %v4629_v3 = vsel %vm541_vm6, %v4626_v35, %v4628_v27  ;;  %v4467_v33 = vrot.slane %v9232_v45, 1  ;;  %v4713_v47 = vor.u32 %v4712_v17, %v4711_v34  ;;  %v4708_v34 = vrot.slane %v9275_v11, 3 }
 0x2c1   : > { %v4552_v18 = vor.u32 %v4551_v62, %v4550_v23  ;;  %v4335_v23 = vshrl.u32 %v4325_v20, 16  ;;  %v4221_v20 = vpack.c.b16 %v6879_v36, %v10374_v21  ;;  %v4218_v36 = vunpack.c.l.b16 %v4216_v7 }
 0x2c2   : > { %4261 = vmatpush.bf16.xpose.msra.mxu2 %v4239_v9  ;;  %v4051_v9 = vsel %vm296_vm0, %v4031_v61, 0  ;;  %v4547_v61 = vrot.slane %v9275_v11, 2  ;;  %v4468_v45 = vsel %vm378_vm1, %v4465_v24, %v4467_v33 }
 0x2c3   : > { %4208 = vmatpush.bf16.xpose.msra.mxu1 %v4182_v39  ;;  %v4027_v39 = vrot.slane %v9449_v0, 3  ;;  %v4562_v62 = vsel %vm445_vm3, %v4552_v18, %v4561_v38  ;;  %v4409_v0 = vsel %vm296_vm0, %v4353_v56, 0  ;;  %v4179_v38 = vsel %vm296_vm0, %v4111_v40, 0 }
 0x2c4   : > { %4076 = vmatpush.bf16.xpose.msra.mxu0 %v9498_v41  ;;  %v4588_v41 = vsel %vm296_vm0, %v4562_v62, 0  ;;  %v4340_v22 = vor.u32 %v4339_v5, %v4335_v23  ;;  %v4548_v26 = vor.u32 %v4547_v61, %v4546_v50  ;;  %v4722_v56 = vor.u32 %v4721_v53, %v4718_v54 }
 0x2c5   : > { %v4029_v6 = vsel %vm704_vm5, %v4027_v39, %v4028_v55  ;;  %v4233_v27 = vsel %vm296_vm0, %v4221_v20, 0  ;;  %v4655_v40 = vsel %vm296_vm0, %v4629_v3, 0  ;;  %v4624_v39 = vrot.slane %v9253_v30, 2 }
 0x2c6   : > { %v4048_v14 = vsel %vm296_vm0, %v4029_v6, 0  ;;  %v4553_v5 = vsel %vm445_vm3, %v4548_v26, %v4552_v18  ;;  %v4542_v62 = vrot.slane %v9329_v13, 1  ;;  %v4723_v50 = vsel %vm608_vm4, %v4713_v47, %v4722_v56 }
 0x2c7   : > { %4434 = vmatpush.bf16.xpose.msra.mxu3 %v4412_v63  ;;  %v4087_v63 = vunpack.c.l.b16 %v9512_v31  ;;  %v4707_v61 = vrot.slane %v9290_v29, 2  ;;  %v4494_v17 = vsel %vm296_vm0, %v4468_v45, 0  ;;  %v4585_v53 = vsel %vm296_vm0, %v4553_v5, 0 }
 0x2c8   : > { %v4463_v18 = vrot.slane %v9253_v30, 1  ;;  %v4627_v21 = vsel %vm541_vm6, %v4624_v39, %v4626_v35  ;;  %v4539_v35 = vrot.slane %v9350_v12, 2  ;;  %v4703_v56 = vrot.slane %v9329_v13, 2 }
 0x2c9   : > { %v4652_v3 = vsel %vm296_vm0, %v4627_v21, 0  ;;  %v4620_v5 = vrot.slane %v9332_v46, 2  ;;  %v4531_v21 = vrot.slane %v9418_v4, 2 }
 0x2ca   : > { %4262 = vmatpush.bf16.xpose.msra.mxu2 %v4236_v49  ;;  %v4088_v49 = vpack.c.b16 %v4087_v63, %v4087_v63  ;;  %v4543_v63 = vrot.slane %v9312_v10, 2  ;;  %v4466_v7 = vsel %vm378_vm1, %v4463_v18, %v4465_v24 }
 0x2cb   : > { %4209 = vmatpush.bf16.xpose.msra.mxu1 %v4179_v38  ;;  %v4709_v38 = vor.u32 %v4708_v34, %v4707_v61 }
 0x2cc   : > { %4077 = vmatpush.bf16.xpose.msra.mxu0 %v4051_v9  ;;  %v10375_v9 = vrot.slane %v9469_v8, 1  ;;  %v4090_v23 = vshrl.u32 %v4088_v49, 16  ;;  %v4544_v20 = vor.u32 %v4543_v63, %v4542_v62  ;;  %v4622_v49 = vrot.slane %v9293_v57, 2 }
 0x2cd   : > { %v4714_v6 = vsel %vm608_vm4, %v4709_v38, %v4713_v47  ;;  %v4700_v62 = vrot.slane %v9350_v12, 3  ;;  %v4696_v12 = vrot.slane %v9374_v51, 3 }
 0x2ce   : > { %v4345_v55 = vsel %vm227_vm2, %v4340_v22, %v10375_v9  ;;  %v4549_v33 = vsel %vm445_vm3, %v4544_v20, %v4548_v26  ;;  %v4538_v22 = vrot.slane %v9367_v37, 1  ;;  %v4461_v26 = vrot.slane %v9293_v57, 1 }
 0x2cf   : > { %4435 = vmatpush.bf16.xpose.msra.mxu3 %v4409_v0  ;;  %v4406_v54 = vsel %vm296_vm0, %v4345_v55, 0  ;;  %v4749_v0 = vsel %vm296_vm0, %v4723_v50, 0  ;;  %v4582_v24 = vsel %vm296_vm0, %v4549_v33, 0  ;;  %v4625_v13 = vsel %vm541_vm6, %v4622_v49, %v4624_v39  ;;  %v3478_v45 = vpop.f32.mrf.mxu1 }
 0x2d0   : > { %v4534_v57 = vrot.slane %v9388_v15, 1  ;;  %v4535_v55 = vrot.slane %v9374_v51, 2  ;;  %v4699_v39 = vrot.slane %v9367_v37, 2  ;;  %v4695_v37 = vrot.slane %v9388_v15, 2 }
 0x2d1   : > { %v4618_v51 = vrot.slane %v9353_v42, 2 }
 0x2d2   : > { %4263 = vmatpush.bf16.xpose.msra.mxu2 %v4233_v27  ;;  %6585 = vmatmul.msk.bf16.vlgmr.msra.gmra.mxu1 %vm296_vm0, %v4090_v23  ;;  %v4491_v27 = vsel %vm296_vm0, %v4466_v7, 0  ;;  %v4536_v34 = vor.u32 %v4535_v55, %v4534_v57  ;;  %v4697_v33 = vor.u32 %v4696_v12, %v4695_v37  ;;  %v4526_v55 = vrot.slane %v9490_v16, 1 }
 0x2d3   : > { %4590 = vmatpush.bf16.xpose.msrb.mxu1 %v4588_v41  ;;  %v4219_v41 = vpack.c.b16 %v4218_v36, %v4218_v36  ;;  %v4704_v36 = vrot.slane %v9312_v10, 3  ;;  %v4464_v10 = vsel %vm378_vm1, %v4461_v26, %v4463_v18 }
 0x2d4   : > { %4078 = vmatpush.bf16.xpose.msra.mxu0 %v4048_v14  ;;  %v4540_v14 = vor.u32 %v4539_v35, %v4538_v22  ;;  %v4488_v63 = vsel %vm296_vm0, %v4464_v10, 0  ;;  %v4884_v22 = vld [vmem:[%s7394_s14 + $0x68] sm:$0x7] }
 0x2d5   : > { %v4288_v29 = vshrl.u32 %v4219_v41, 16  ;;  %v4220_v11 = vrot.slane %v4219_v41, 1  ;;  %v4705_v47 = vor.u32 %v4704_v36, %v4703_v56  ;;  %v4459_v41 = vrot.slane %v9332_v46, 1 }
 0x2d6   : > { %v4545_v9 = vsel %vm445_vm3, %v4540_v14, %v4544_v20 }
 0x2d7   : > { %4436 = vmatpush.bf16.xpose.msra.mxu3 %v4406_v54  ;;  %v4290_v30 = vrot.slane %v4288_v29, 1  ;;  %v4710_v23 = vsel %vm608_vm4, %v4705_v47, %v4709_v38  ;;  %v4579_v50 = vsel %vm296_vm0, %v4545_v9, 0  ;;  %v4701_v54 = vor.u32 %v4700_v62, %v4699_v39  ;;  %v3480_v29 = vpop.f32.mrf.mxu1  ;;  %v4444_v38 = vld [vmem:[%s7394_s14 + $0x24] sm:$0xe] }
 0x2d8   : > { %v4743_v61 = vsel %vm296_vm0, %v4710_v23, 0  ;;  %v4462_v46 = vsel %vm378_vm1, %v4459_v41, %v4461_v26  ;;  %v4450_v56 = vunpack.c.l.b16 %v4444_v38  ;;  %v4892_v26 = vunpack.c.l.b16 %v4884_v22  ;;  %v4605_v39 = vld [vmem:[%s7394_s14 + $0x24] sm:$0xc] }
 0x2d9   : > { %6586 = vmatmul.msk.bf16.vlgmr.msra.gmra.mxu2 %vm296_vm0, %v4220_v11  ;;  %v4541_v11 = vsel %vm445_vm3, %v4536_v34, %v4540_v14  ;;  %v4706_v15 = vsel %vm608_vm4, %v4701_v54, %v4705_v47  ;;  %v4485_v7 = vsel %vm296_vm0, %v4462_v46, 0  ;;  %v4702_v14 = vsel %vm608_vm4, %v4697_v33, %v4701_v54  ;;  %v9627_v62 = vld [vmem:[%s7394_s14 + $0x60] sm:$0xff]  }
 0x2da   : > { %4657 = vmatpush.bf16.xpose.msrb.mxu2 %v4655_v40  ;;  %v4746_v40 = vsel %vm296_vm0, %v4714_v6, 0  ;;  %v4576_v6 = vsel %vm296_vm0, %v4541_v11, 0  ;;  %v4740_v36 = vsel %vm296_vm0, %v4706_v15, 0  ;;  %v4692_v47 = vrot.slane %v9418_v4, 3 }
 0x2db   : > { %4591 = vmatpush.bf16.xpose.msrb.mxu1 %v4585_v53  ;;  %6584 = vmatmul.msk.bf16.vlgmr.msra.gmra.mxu0 %vm296_vm0, %v9512_v31  ;;  %v4649_v31 = vsel %vm296_vm0, %v4625_v13, 0  ;;  %v3303_v53 = vpop.f32.mrf.mxu0  ;;  %v4691_v13 = vrot.slane %v9439_v28, 2  ;;  %v9617_v9 = vpack.c.b16 %v9475_v2, %v4450_v56  ;;  %v4527_v23 = vrot.slane %v9469_v8, 2 }
 0x2dc   : > { %4496 = vmatpush.bf16.xpose.msrb.mxu0 %v4494_v17  ;;  %v4623_v17 = vsel %vm541_vm6, %v4620_v5, %v4622_v49  ;;  %v3307_v18 = vadd.f32 %v3303_v53, %v9436_v59  ;;  %v3545_v59 = vpop.f32.mrf.mxu2  ;;  %v4737_v4 = vsel %vm296_vm0, %v4702_v14, 0  ;;  %v4687_v54 = vrot.slane %v9490_v16, 2  ;;  %v4443_v14 = vld [vmem:[%s7625_s18 + $0x14] sm:$0x4] }
 0x2dd   : > { %v4646_v20 = vsel %vm296_vm0, %v4623_v17, 0  ;;  %v4688_v53 = vrot.slane %v9469_v8, 3  ;;  %v4519_v37 = vshrl.u32 %v9617_v9, 16  ;;  %v4522_v12 = vshll.u32 %v9617_v9, 16 }
 0x2de   : > { %6615 = vmatmul.msk.bf16.vlgmr.msra.gmra.mxu3 %vm296_vm0, %v4290_v30  ;;  %v4457_v30 = vrot.slane %v9353_v42, 1  ;;  %v4528_v46 = vor.u32 %v4527_v23, %v4526_v55 }
 0x2df   : > { %4751 = vmatpush.bf16.xpose.msrb.mxu3 %v4749_v0  ;;  %v4530_v0 = vrot.slane %v9439_v28, 1  ;;  %v4524_v22 = vrot.slane %v4522_v12, 2  ;;  %v4452_v12 = vrot.slane %v9617_v9, 1 }
 0x2e0   : > { %v4460_v42 = vsel %vm378_vm1, %v4457_v30, %v4459_v41  ;;  %v4455_v41 = vrot.slane %v9391_v58, 1 }
 0x2e1   : > { %v4532_v49 = vor.u32 %v4531_v21, %v4530_v0  ;;  %v4611_v0 = vunpack.c.l.b16 %v4605_v39  ;;  %v4957_v21 = vshrl.u32 %v9627_v62, 16 }
 0x2e2   : > { %4658 = vmatpush.bf16.xpose.msrb.mxu2 %v4652_v3  ;;  %v3482_v3 = vadd.f32 %v3478_v45, %v3307_v18  ;;  %v5082_v18 = vld [vmem:[%s7394_s14 + $0x68] sm:$0xf]  ;;  %v4458_v8 = vsel %vm378_vm1, %v4455_v41, %v4457_v30 }
 0x2e3   : > { %4592 = vmatpush.bf16.xpose.msrb.mxu1 %v4582_v24  ;;  %v4616_v24 = vrot.slane %v9391_v58, 2  ;;  %v3305_v10 = vpop.f32.mrf.mxu0  ;;  %v4960_v58 = vshll.u32 %v9627_v62, 16  ;;  %v4533_v30 = vsel %vm445_vm3, %v4528_v46, %v4532_v49 }
 0x2e4   : > { %4497 = vmatpush.bf16.xpose.msrb.mxu0 %v4491_v27  ;;  %v3549_v35 = vadd.f32 %v3545_v59, %v3482_v3  ;;  %v4621_v27 = vsel %vm541_vm6, %v4618_v51, %v4620_v5  ;;  %v4482_v5 = vsel %vm296_vm0, %v4460_v42, 0  ;;  %v3547_v17 = vpop.f32.mrf.mxu2  ;;  %v9649_v3 = vunpack.c.l.b16 %v5082_v18 }
 0x2e5   : > { %v4643_v57 = vsel %vm296_vm0, %v4621_v27, 0  ;;  %v4619_v28 = vsel %vm541_vm6, %v4616_v24, %v4618_v51  ;;  %v4453_v51 = vrot.slane %v9442_v48, 1  ;;  %v9652_v59 = vor.u32 %v4688_v53, %v4687_v54  ;;  %v4782_v27 = vld [vmem:[%s7394_s14 + $0x68] sm:$0x3] }
 0x2e6   : > { %v4640_v29 = vsel %vm296_vm0, %v4619_v28, 0  ;;  %v5089_v42 = vpack.c.b16 %v9649_v3, %v9649_v3  ;;  %v5037_v53 = vrot.slane %v9627_v62, 3 }
 0x2e7   : > { %4752 = vmatpush.bf16.xpose.msrb.mxu3 %v4746_v40  ;;  %v3639_v40 = vpop.f32.mrf.mxu3 }
 0x2e8   : > { %v9613_v45 = vadd.f32 %v3639_v40, %v3549_v35  ;;  %v4959_v35 = vrot.slane %v4957_v21, 2  ;;  %v5127_v17 = vshrl.u32 %v5089_v42, 16  ;;  %v5130_v54 = vshll.u32 %v5089_v42, 16 }
 0x2ea   : > { %4659 = vmatpush.bf16.xpose.msrb.mxu2 %v4649_v31  ;;  %v4537_v31 = vsel %vm445_vm3, %v4532_v49, %v4536_v34  ;;  %v4614_v34 = vrot.slane %v9442_v48, 2  ;;  %v4456_v49 = vsel %vm378_vm1, %v4453_v51, %v4455_v41 }
 0x2eb   : > { %4593 = vmatpush.bf16.xpose.msrb.mxu1 %v4579_v50  ;;  %v4573_v50 = vsel %vm296_vm0, %v4537_v31, 0 }
 0x2ec   : > { %4498 = vmatpush.bf16.xpose.msrb.mxu0 %v4488_v63  ;;  %v9629_v63 = vpack.c.b16 %v4892_v26, %v4892_v26  ;;  %v4617_v38 = vsel %vm541_vm6, %v4614_v34, %v4616_v24  ;;  %v4479_v24 = vsel %vm296_vm0, %v4458_v8, 0 }
 0x2ed   : > { %v4637_v40 = vsel %vm296_vm0, %v4617_v38, 0 }
 0x2ee   : > { %v4969_v16 = vshll.u32 %v9629_v63, 16 }
 0x2ef   : > { %4753 = vmatpush.bf16.xpose.msrb.mxu3 %v4743_v61  ;;  %v4693_v61 = vor.u32 %v4692_v47, %v4691_v13  ;;  %v3641_v15 = vpop.f32.mrf.mxu3  ;;  %v9664_v13 = vld [vmem:[%s7394_s14 + $0x58] sm:$0xff]  }
 0x2f0   : > { %v4948_v28 = vshrl.u32 %v9664_v13, 16  ;;  %v4951_v39 = vshll.u32 %v9664_v13, 16  ;;  %v5122_v15 = vrot.slane %v4957_v21, 3  ;;  %v4839_v21 = vrot.slane %v9627_v62, 2 }
 0x2f1   : > { %v4698_v11 = vsel %vm608_vm4, %v4693_v61, %v4697_v33  ;;  %v4612_v33 = vpack.c.b16 %v9475_v2, %v4611_v0  ;;  %v4570_v2 = vsel %vm296_vm0, %v4533_v30, 0  ;;  %v4694_v47 = vsel %vm608_vm4, %v9652_v59, %v4693_v61 }
 0x2f2   : > { %4660 = vmatpush.bf16.xpose.msrb.mxu2 %v4646_v20  ;;  %v4966_v20 = vshrl.u32 %v9629_v63, 16  ;;  %v4734_v26 = vsel %vm296_vm0, %v4698_v11, 0  ;;  %v4731_v41 = vsel %vm296_vm0, %v4694_v47, 0  ;;  %v4950_v11 = vrot.slane %v4948_v28, 2 }
 0x2f3   : > { %4594 = vmatpush.bf16.xpose.msrb.mxu1 %v4576_v6  ;;  %v4962_v6 = vrot.slane %v4960_v58, 3  ;;  %v4680_v55 = vshrl.u32 %v4612_v33, 16  ;;  %v4683_v23 = vshll.u32 %v4612_v33, 16  ;;  %v4613_v61 = vrot.slane %v4612_v33, 2  ;;  %v9682_v33 = vld [vmem:[%s7394_s14 + $0x50] sm:$0xff]  }
 0x2f4   : > { %4499 = vmatpush.bf16.xpose.msrb.mxu0 %v4485_v7  ;;  %v4521_v7 = vrot.slane %v4519_v37, 1  ;;  %v4968_v56 = vrot.slane %v4966_v20, 2  ;;  %v5039_v37 = vrot.slane %v9629_v63, 3  ;;  %v4953_v38 = vrot.slane %v4951_v39, 3 }
 0x2f5   : > { %v4963_v31 = vor.u32 %v4962_v6, %v4959_v35  ;;  %v4685_v20 = vrot.slane %v4683_v23, 3  ;;  %v5132_v30 = vrot.slane %v5130_v54, 4  ;;  %v4615_v9 = vsel %vm541_vm6, %v4613_v61, %v4614_v34  ;;  %v4604_v6 = vld [vmem:[%s7625_s18 + $0x14] sm:$0x8] }
 0x2f6   : > { %v4525_v10 = vor.u32 %v4524_v22, %v4521_v7  ;;  %v5123_v7 = vrot.slane %v4960_v58, 4  ;;  %v5129_v22 = vrot.slane %v5127_v17, 3  ;;  %v4454_v35 = vsel %vm378_vm1, %v4452_v12, %v4453_v51 }
 0x2f7   : > { %4754 = vmatpush.bf16.xpose.msrb.mxu3 %v4740_v36  ;;  %v4971_v36 = vrot.slane %v4969_v16, 3  ;;  %v4939_v48 = vshrl.u32 %v9682_v33, 16  ;;  %v4942_v34 = vshll.u32 %v9682_v33, 16  ;;  %v4607_v42 = vunpack.c.l.b16 %v4604_v6 }
 0x2f8   : > { %v4529_v18 = vsel %vm445_vm3, %v4525_v10, %v4528_v46  ;;  %v5040_v46 = vsel %vm704_vm5, %v5037_v53, %v5039_v37  ;;  %v4634_v51 = vsel %vm296_vm0, %v4615_v9, 0  ;;  %v5035_v10 = vrot.slane %v9664_v13, 3 }
 0x2f9   : > { %v4567_v63 = vsel %vm296_vm0, %v4529_v18, 0  ;;  %v4941_v23 = vrot.slane %v4939_v48, 2  ;;  %v5119_v17 = vrot.slane %v4951_v39, 4  ;;  %v4837_v37 = vrot.slane %v9664_v13, 2 }
 0x2fa   : > { %4661 = vmatpush.bf16.xpose.msrb.mxu2 %v4643_v57  ;;  %v4816_v57 = vunpack.c.l.b16 %v4782_v27  ;;  %v4954_v27 = vor.u32 %v4953_v38, %v4950_v11  ;;  %v5038_v12 = vsel %vm704_vm5, %v5035_v10, %v5037_v53  ;;  %v10376_v53 = vshrl.u32 %v9256_v19, 16 }
 0x2fb   : > { %4595 = vmatpush.bf16.xpose.msrb.mxu1 %v4573_v50  ;;  %v4476_v50 = vsel %vm296_vm0, %v4456_v49, 0  ;;  %v4840_v13 = vsel %vm541_vm6, %v4837_v37, %v4839_v21  ;;  %v5115_v9 = vrot.slane %v4942_v34, 4 }
 0x2fc   : > { %4500 = vmatpush.bf16.xpose.msrb.mxu0 %v4482_v5  ;;  %v4972_v5 = vor.u32 %v4971_v36, %v4968_v56  ;;  %v4825_v0 = vpack.c.b16 %v4816_v57, %v4816_v57  ;;  %v4964_v57 = vsel %vm608_vm4, %v4954_v27, %v4963_v31  ;;  %v4932_v38 = vrot.slane %v10376_v53, 2 }
 0x2fe   : > { %v4973_v16 = vsel %vm608_vm4, %v4963_v31, %v4972_v5  ;;  %v4841_v58 = vrot.slane %v4825_v0, 2  ;;  %v4944_v5 = vrot.slane %v4942_v34, 3  ;;  %v10379_v34 = vshll.u32 %v9296_v1, 16 }
 0x2ff   : > { %4755 = vmatpush.bf16.xpose.msrb.mxu3 %v4737_v4  ;;  %v4446_v4 = vunpack.c.l.b16 %v4443_v14  ;;  %v4999_v56 = vsel %vm296_vm0, %v4973_v16, 0  ;;  %v5066_v14 = vsel %vm296_vm0, %v5040_v46, 0 }
 0x300   : > { %v4842_v49 = vsel %vm541_vm6, %v4839_v21, %v4841_v58 }
 0x301   : > { %v9679_v8 = vpack.c.b16 %v4446_v4, %v4446_v4  ;;  %v4868_v54 = vsel %vm296_vm0, %v4842_v49, 0 }
 0x302   : > { %4662 = vmatpush.bf16.xpose.msrb.mxu2 %v4640_v29  ;;  %v4682_v29 = vrot.slane %v4680_v55, 2 }
 0x303   : > { %4596 = vmatpush.bf16.xpose.msrb.mxu1 %v4570_v2  ;;  %v4473_v2 = vsel %vm296_vm0, %v4454_v35, 0  ;;  %v4835_v35 = vrot.slane %v9682_v33, 2 }
 0x304   : > { %4501 = vmatpush.bf16.xpose.msrb.mxu0 %v4479_v24  ;;  %v4686_v36 = vor.u32 %v4685_v20, %v4682_v29  ;;  %v4512_v24 = vshrl.u32 %v9679_v8, 16  ;;  %v4448_v29 = vrot.slane %v9679_v8, 2  ;;  %v5063_v20 = vsel %vm296_vm0, %v5038_v12, 0 }
 0x305   : > { %v5114_v8 = vrot.slane %v4939_v48, 3  ;;  %v4838_v58 = vsel %vm541_vm6, %v4835_v35, %v4837_v37 }
 0x306   : > { %v4690_v47 = vsel %vm608_vm4, %v4686_v36, %v9652_v59  ;;  %v4514_v55 = vrot.slane %v4512_v24, 2  ;;  %v4996_v59 = vsel %vm296_vm0, %v4964_v57, 0 }
 0x307   : > { %4756 = vmatpush.bf16.xpose.msrb.mxu3 %v4734_v26  ;;  %v5124_v26 = vor.u32 %v5123_v7, %v5122_v15  ;;  %v4728_v61 = vsel %vm296_vm0, %v4690_v47, 0  ;;  %v10377_v15 = vshll.u32 %v9256_v19, 16  ;;  %v5116_v21 = vor.u32 %v5115_v9, %v5114_v8  ;;  %v5016_v9 = vld [vmem:[%s7394_s14 + $0x28] sm:$0x8] }
 0x309   : > { %v4935_v7 = vrot.slane %v10377_v15, 3  ;;  %v10382_v15 = vshrl.u32 %v9370_v32, 16 }
 0x30a   : > { %4663 = vmatpush.bf16.xpose.msrb.mxu2 %v4637_v40  ;;  %v5133_v40 = vor.u32 %v5132_v30, %v5129_v22  ;;  %v5033_v30 = vrot.slane %v9682_v33, 3  ;;  %v10378_v33 = vshrl.u32 %v9296_v1, 16 }
 0x30b   : > { %4597 = vmatpush.bf16.xpose.msrb.mxu1 %v4567_v63  ;;  %v4865_v63 = vsel %vm296_vm0, %v4840_v13, 0  ;;  %v4936_v6 = vor.u32 %v4935_v7, %v4932_v38  ;;  %v5246_v13 = vld [vmem:[%s7394_s14 + $0x6c] sm:$0x1]  ;;  %v4905_v7 = vrot.slane %v10382_v15, 2 }
 0x30c   : > { %4502 = vmatpush.bf16.xpose.msrb.mxu0 %v4476_v50  ;;  %v5134_v4 = vsel %vm771_vm7, %v5124_v26, %v5133_v40  ;;  %v4608_v50 = vpack.c.b16 %v4607_v42, %v4607_v42  ;;  %v4923_v48 = vrot.slane %v10378_v33, 2  ;;  %v4862_v42 = vsel %vm296_vm0, %v4838_v58, 0  ;;  %v5470_v58 = vld [vmem:[%s7394_s14 + $0x6c] sm:$0x3] }
 0x30d   : > { %v5160_v31 = vsel %vm296_vm0, %v5134_v4, 0 }
 0x30e   : > { %v4673_v18 = vshrl.u32 %v4608_v50, 16  ;;  %v4609_v39 = vrot.slane %v4608_v50, 3  ;;  %v10380_v50 = vshrl.u32 %v9335_v25, 16 }
 0x30f   : > { %4757 = vmatpush.bf16.xpose.msrb.mxu3 %v4731_v41  ;;  %v5118_v41 = vrot.slane %v4948_v28, 3  ;;  %v4945_v28 = vor.u32 %v4944_v5, %v4941_v23  ;;  %v3800_v36 = vpop.f32.mrf.mxu1 }
 0x310   : > { %v4675_v16 = vrot.slane %v4673_v18, 3 }
 0x311   : > { %v5120_v0 = vor.u32 %v5119_v17, %v5118_v41  ;;  %v4955_v11 = vsel %vm608_vm4, %v4945_v28, %v4954_v27  ;;  %v4946_v24 = vsel %vm608_vm4, %v4936_v6, %v4945_v28  ;;  %v4914_v41 = vrot.slane %v10380_v50, 2  ;;  %v7340_v28 = vld [vmem:[%s7394_s14 + $0x40] sm:$0xff]  }
 0x312   : > { %4664 = vmatpush.bf16.xpose.msrb.mxu2 %v4634_v51  ;;  %6617 = vmatmul.msk.bf16.vlgmr.msrb.gmra.mxu1 %vm296_vm0, %v4514_v55  ;;  %v4993_v46 = vsel %vm296_vm0, %v4955_v11, 0  ;;  %v4990_v51 = vsel %vm296_vm0, %v4946_v24, 0  ;;  %v10381_v17 = vshll.u32 %v9335_v25, 16 }
 0x313   : > { %5001 = vmatpush.bf16.xpose.msra.mxu1 %v4999_v56  ;;  %v5125_v22 = vsel %vm771_vm7, %v5120_v0, %v5124_v26  ;;  %v5036_v56 = vsel %vm704_vm5, %v5033_v30, %v5035_v10  ;;  %v4926_v26 = vrot.slane %v10379_v34, 3  ;;  %v5121_v40 = vsel %vm771_vm7, %v5116_v21, %v5120_v0 }
 0x314   : > { %4503 = vmatpush.bf16.xpose.msrb.mxu0 %v4473_v2  ;;  %v5157_v19 = vsel %vm296_vm0, %v5125_v22, 0  ;;  %v5060_v27 = vsel %vm296_vm0, %v5036_v56, 0  ;;  %v5154_v49 = vsel %vm296_vm0, %v5121_v40, 0  ;;  %v5034_v10 = vsel %vm704_vm5, %v9341_v44, %v5033_v30  ;;  %v7341_v56 = vld [vmem:[%s7394_s14 + $0x38] sm:$0xff]   ;;  %v9792_v40 = vld [vmem:[%s7394_s14 + $0x30] sm:$0xff]  }
 0x315   : > { %v4927_v47 = vor.u32 %v4926_v26, %v4923_v48  ;;  %v5057_v5 = vsel %vm296_vm0, %v5034_v10, 0  ;;  %v10383_v22 = vshll.u32 %v9370_v32, 16  ;;  %v5476_v34 = vunpack.c.l.b16 %v5470_v58 }
 0x317   : > { %4758 = vmatpush.bf16.xpose.msrb.mxu3 %v4728_v61  ;;  %v3802_v23 = vpop.f32.mrf.mxu1  ;;  %v4937_v4 = vsel %vm608_vm4, %v4927_v47, %v4936_v6  ;;  %v5117_v61 = vsel %vm771_vm7, %v9306_v60, %v5116_v21  ;;  %v4908_v30 = vrot.slane %v10383_v22, 3  ;;  %v4829_v21 = vrot.slane %v7341_v56, 2 }
 0x318   : > { %v3706_v1 = vpop.f32.mrf.mxu0  ;;  %v4987_v18 = vsel %vm296_vm0, %v4937_v4, 0  ;;  %v5151_v25 = vsel %vm296_vm0, %v5117_v61, 0  ;;  %v10384_v23 = vld [vmem:[#allocation4_spill] sm:$0xff] }
 0x319   : > { %6618 = vmatmul.msk.bf16.vlgmr.msrb.gmra.mxu2 %vm296_vm0, %v4609_v39  ;;  %v3710_v57 = vadd.f32 %v3706_v1, %v9613_v45  ;;  %v9755_v45 = vld [vmem:[%s7394_s14 + $0x2c] sm:$0xff]   ;;  %v4831_v39 = vrot.slane %v7340_v28, 2  ;;  %v4909_v32 = vor.u32 %v4908_v30, %v4905_v7  ;;  %v9823_v7 = vld [vmem:[%s7394_s14 + $0x54] sm:$0xff] }
 0x31a   : > { %5068 = vmatpush.bf16.xpose.msra.mxu2 %v5066_v14  ;;  %v7339_v14 = vld [vmem:[%s7394_s14 + $0x48] sm:$0xff]   ;;  %v9763_v60 = vunpack.c.l.b16 %v9755_v45 }
 0x31b   : > { %5002 = vmatpush.bf16.xpose.msra.mxu1 %v4996_v59  ;;  %6616 = vmatmul.msk.bf16.vlgmr.msrb.gmra.mxu0 %vm296_vm0, %v4448_v29  ;;  %v4833_v2 = vrot.slane %v7339_v14, 2  ;;  %v3804_v44 = vadd.f32 %v3800_v36, %v3710_v57  ;;  %v4766_v59 = vld [vmem:[%s7394_s14 + $0x28] sm:$0xc]  ;;  %v5022_v36 = vunpack.c.l.b16 %v5016_v9  ;;  %v4832_v26 = vsel %vm541_vm6, %v4829_v21, %v4831_v39  ;;  %v9801_v57 = vld [vmem:[%s7394_s14 + $0x5c] sm:$0xff] }
 0x31c   : > { %4870 = vmatpush.bf16.xpose.msra.mxu0 %v4868_v54  ;;  %v4917_v54 = vrot.slane %v10381_v17, 3  ;;  %v3867_v37 = vpop.f32.mrf.mxu2  ;;  %v4800_v29 = vunpack.c.l.b16 %v4766_v59  ;;  %v5342_v61 = vshll.u32 %v9801_v57, 16  ;;  %v5346_v15 = vshrl.u32 %v9801_v57, 16 }
 0x31d   : > { %v4836_v55 = vsel %vm541_vm6, %v4833_v2, %v4835_v35  ;;  %v3871_v12 = vadd.f32 %v3867_v37, %v3804_v44  ;;  %v4834_v53 = vsel %vm541_vm6, %v4831_v39, %v4833_v2  ;;  %v5023_v14 = vpack.c.b16 %v9763_v60, %v5022_v36 }
 0x31e   : > { %6619 = vmatmul.msk.bf16.vlgmr.msrb.gmra.mxu3 %vm296_vm0, %v4675_v16  ;;  %v4918_v0 = vor.u32 %v4917_v54, %v4914_v41  ;;  %v9775_v8 = vpack.c.b16 %v9763_v60, %v4800_v29  ;;  %v4856_v35 = vsel %vm296_vm0, %v4834_v53, 0 }
 0x31f   : > { %5162 = vmatpush.bf16.xpose.msra.mxu3 %v5160_v31  ;;  %v4859_v31 = vsel %vm296_vm0, %v4836_v55, 0  ;;  %v5477_v55 = vpack.c.b16 %v5476_v34, %v5476_v34  ;;  %v5091_v41 = vshrl.u32 %v5023_v14, 16  ;;  %v5094_v17 = vshll.u32 %v5023_v14, 16 }
 0x320   : > { %v3708_v16 = vpop.f32.mrf.mxu0  ;;  %v4928_v38 = vsel %vm608_vm4, %v4918_v0, %v4927_v47  ;;  %v4898_v24 = vshll.u32 %v9775_v8, 16  ;;  %v5024_v28 = vrot.slane %v5023_v14, 3  ;;  %v4826_v29 = vrot.slane %v9775_v8, 2 }
 0x321   : > { %v4984_v6 = vsel %vm296_vm0, %v4928_v38, 0  ;;  %v5515_v59 = vshrl.u32 %v5477_v55, 16  ;;  %v5518_v37 = vshll.u32 %v5477_v55, 16  ;;  %v9819_v38 = vrot.slane %v5342_v61, 1 }
 0x322   : > { %5069 = vmatpush.bf16.xpose.msra.mxu2 %v5063_v20  ;;  %v3961_v20 = vpop.f32.mrf.mxu3 }
 0x323   : > { %5003 = vmatpush.bf16.xpose.msra.mxu1 %v4993_v46  ;;  %v9766_v11 = vadd.f32 %v3961_v20, %v3871_v12  ;;  %v5284_v46 = vunpack.c.l.b16 %v5246_v13  ;;  %v10385_v12 = vld [vmem:[#allocation2_spill] sm:$0xff]  ;;  %v5093_v20 = vrot.slane %v5091_v41, 3  ;;  %v5096_v13 = vrot.slane %v5094_v17, 4 }
 0x324   : > { %4871 = vmatpush.bf16.xpose.msra.mxu0 %v4865_v63  ;;  %v9779_v63 = vld [vmem:[%s7394_s14 + $0x64] sm:$0xff]  ;;  %v5517_v9 = vrot.slane %v5515_v59, 1  ;;  %v5507_v41 = vrot.slane %v5342_v61, 2 }
 0x325   : > { %v5293_v33 = vpack.c.b16 %v5284_v46, %v5284_v46  ;;  %v5350_v48 = vshll.u32 %v9779_v63, 16  ;;  %v5354_v10 = vshrl.u32 %v9779_v63, 16  ;;  %v5425_v39 = vrot.slane %v9779_v63, 1  ;;  %v10386_v46 = vld [vmem:[#allocation7_spill] sm:$0xff] }
 0x326   : > { %v5520_v63 = vrot.slane %v5518_v37, 2 }
 0x327   : > { %5163 = vmatpush.bf16.xpose.msra.mxu3 %v5157_v19  ;;  %v3869_v19 = vpop.f32.mrf.mxu2  ;;  %v9797_v47 = vrot.slane %v5350_v48, 1  ;;  %v5358_v1 = vshll.u32 %v5293_v33, 16  ;;  %v5510_v22 = vrot.slane %v5354_v10, 1  ;;  %v5511_v30 = vrot.slane %v5350_v48, 2 }
 0x328   : > { %v5015_v19 = vld [vmem:[%s7625_s18 + $0x18] sm:$0x2]  ;;  %v5521_v48 = vor.u32 %v5520_v63, %v5517_v9 }
 0x329   : > { %v5356_v54 = vor.u32 %v5354_v10, %v9797_v47  ;;  %v5360_v44 = vrot.slane %v5358_v1, 1  ;;  %v5018_v34 = vunpack.c.l.b16 %v5015_v19  ;;  %v5423_v10 = vrot.slane %v9801_v57, 1 }
 0x32a   : > { %5070 = vmatpush.bf16.xpose.msra.mxu2 %v5060_v27  ;;  %v4895_v27 = vshrl.u32 %v9775_v8, 16 }
 0x32b   : > { %5004 = vmatpush.bf16.xpose.msra.mxu1 %v4990_v51  ;;  %v4919_v51 = vsel %vm608_vm4, %v4909_v32, %v4918_v0  ;;  %v5361_v16 = vsel %vm227_vm2, %v5356_v54, %v5360_v44  ;;  %v5426_v54 = vsel %vm378_vm1, %v5423_v10, %v5425_v39 }
 0x32c   : > { %4872 = vmatpush.bf16.xpose.msra.mxu0 %v4862_v42  ;;  %v4827_v42 = vrot.slane %v9792_v40, 2  ;;  %v4897_v2 = vrot.slane %v4895_v27, 2  ;;  %v5387_v58 = vsel %vm296_vm0, %v5361_v16, 0 }
 0x32e   : > { %v4830_v4 = vsel %vm541_vm6, %v4827_v42, %v4829_v21  ;;  %v4828_v36 = vsel %vm541_vm6, %v4826_v29, %v4827_v42 }
 0x32f   : > { %5164 = vmatpush.bf16.xpose.msra.mxu3 %v5154_v49  ;;  %v4900_v49 = vrot.slane %v4898_v24, 3  ;;  %v5348_v24 = vor.u32 %v5346_v15, %v9819_v38  ;;  %v4847_v42 = vsel %vm296_vm0, %v4828_v36, 0 }
 0x331   : > { %v4901_v50 = vor.u32 %v4900_v49, %v4897_v2  ;;  %v10389_v2 = vld [vmem:[#allocation3_spill] sm:$0xff] }
 0x332   : > { %5071 = vmatpush.bf16.xpose.msra.mxu2 %v5057_v5  ;;  %v4981_v5 = vsel %vm296_vm0, %v4919_v51, 0 }
 0x333   : > { %5005 = vmatpush.bf16.xpose.msra.mxu1 %v4987_v18  ;;  %v4850_v18 = vsel %vm296_vm0, %v4830_v4, 0  ;;  %v4910_v0 = vsel %vm608_vm4, %v4901_v50, %v4909_v32  ;;  %v5097_v32 = vor.u32 %v5096_v13, %v5093_v20  ;;  %v5019_v4 = vpack.c.b16 %v5018_v34, %v5018_v34 }
 0x334   : > { %4873 = vmatpush.bf16.xpose.msra.mxu0 %v4859_v31  ;;  %v9810_v31 = vld [vmem:[%s7625_s18 + $0x18] sm:$0x1]  ;;  %v4978_v8 = vsel %vm296_vm0, %v4910_v0, 0  ;;  %v5506_v50 = vrot.slane %v5346_v15, 1 }
 0x335   : > { %v4886_v53 = vunpack.c.l.b16 %v9810_v31  ;;  %v5101_v49 = vsel %vm771_vm7, %v5097_v32, %v10389_v2  ;;  %v5084_v59 = vshrl.u32 %v5019_v4, 16 }
 0x336   : > { %v5139_v57 = vsel %vm296_vm0, %v5101_v49, 0 }
 0x337   : > { %5165 = vmatpush.bf16.xpose.msra.mxu3 %v5151_v25  ;;  %v5427_v25 = vrot.slane %v5293_v33, 1  ;;  %v4887_v27 = vpack.c.b16 %v4886_v53, %v4886_v53  ;;  %v5334_v33 = vshll.u32 %v9823_v7, 16  ;;  %v5086_v0 = vrot.slane %v5084_v59, 1 }
 0x338   : > { %v5421_v53 = vrot.slane %v9823_v7, 1 }
 0x339   : > { %v5428_v21 = vsel %vm378_vm1, %v5425_v39, %v5427_v25  ;;  %v4889_v1 = vshrl.u32 %v4887_v27, 16  ;;  %v5336_v55 = vrot.slane %v5334_v33, 1  ;;  %v5451_v39 = vsel %vm296_vm0, %v5426_v54, 0  ;;  %v9861_v25 = vld [vmem:[%s7394_s14 + $0x44] sm:$0xff] }
 0x33a   : > { %5072 = vmatpush.bf16.xpose.msra.mxu2 %v9411_v43  ;;  %v3963_v43 = vpop.f32.mrf.mxu3  ;;  %v5454_v14 = vsel %vm296_vm0, %v5428_v21, 0  ;;  %v5318_v9 = vshll.u32 %v9861_v25, 16 }
 0x33b   : > { %5006 = vmatpush.bf16.xpose.msra.mxu1 %v4984_v6  ;;  %v10387_v6 = vld [vmem:[#allocation5_spill] sm:$0xff]  ;;  %v10388_v43 = vld [vmem:[#allocation6_spill] sm:$0xff] }
 0x33c   : > { %4874 = vmatpush.bf16.xpose.msra.mxu0 %v4856_v35  ;;  %v6932_v35 = vunpack.c.h.b16 %v9627_v62  ;;  %v5026_v56 = vsel %vm704_vm5, %v5024_v28, %v10387_v6  ;;  %v5512_v62 = vor.u32 %v5511_v30, %v5510_v22  ;;  %v7279_v28 = vld [vmem:[%s7394_s14 + $0x5c] sm:$0xff]   ;;  %v5503_v22 = vrot.slane %v5334_v33, 2 }
 0x33d   : > { %v5211_v30 = vsel %vm296_vm0, %v7279_v28, 0  ;;  %v5322_v6 = vshrl.u32 %v9861_v25, 16  ;;  %v5495_v49 = vrot.slane %v5318_v9, 2 }
 0x33e   : > { %v5188_v51 = vpack.c.b16 %v9649_v3, %v6932_v35  ;;  %v5522_v3 = vsel %vm445_vm3, %v5512_v62, %v5521_v48  ;;  %v7278_v35 = vld [vmem:[%s7394_s14 + $0x54] sm:$0xff]  }
 0x33f   : > { %5166 = vmatpush.bf16.xpose.msra.mxu3 %v9377_v52  ;;  %v4853_v52 = vsel %vm296_vm0, %v4832_v26, 0  ;;  %v5045_v26 = vsel %vm296_vm0, %v5026_v56, 0  ;;  %v5548_v44 = vsel %vm296_vm0, %v5522_v3, 0  ;;  %v9880_v56 = vld [vmem:[%s7394_s14 + $0x3c] sm:$0xff]  ;;  %v5208_v33 = vsel %vm296_vm0, %v7278_v35, 0  ;;  %v9899_v3 = vld [vmem:[%s7394_s14 + $0x34] sm:$0xff] }
 0x340   : > { %v5214_v17 = vsel %vm296_vm0, %v5188_v51, 0  ;;  %v5310_v34 = vshll.u32 %v9880_v56, 16  ;;  %v5494_v2 = vrot.slane %v5322_v6, 1  ;;  %v5302_v28 = vshll.u32 %v9899_v3, 16 }
 0x342   : > { %5073 = vmatpush.bf16.xpose.msra.mxu2 %v10384_v23  ;;  %v5338_v23 = vshrl.u32 %v9823_v7, 16  ;;  %v5424_v7 = vsel %vm378_vm1, %v5421_v53, %v5423_v10 }
 0x343   : > { %5007 = vmatpush.bf16.xpose.msra.mxu1 %v4981_v5  ;;  %v9848_v5 = vld [vmem:[%s7394_s14 + $0x4c] sm:$0xff]  ;;  %v5448_v21 = vsel %vm296_vm0, %v5424_v7, 0 }
 0x344   : > { %4875 = vmatpush.bf16.xpose.msra.mxu0 %v4853_v52  ;;  %v5353_v52 = vsel %vm227_vm2, %v5348_v24, %v9797_v47  ;;  %v5340_v37 = vor.u32 %v5338_v23, %v5336_v55  ;;  %v5326_v61 = vshll.u32 %v9848_v5, 16  ;;  %v5330_v13 = vshrl.u32 %v9848_v5, 16  ;;  %v5404_v7 = vld [vmem:[%s7394_s14 + $0x2c] sm:$0xe] }
 0x345   : > { %v5384_v47 = vsel %vm296_vm0, %v5353_v52, 0  ;;  %v5502_v15 = vrot.slane %v5338_v23, 1  ;;  %v5419_v36 = vrot.slane %v9848_v5, 1  ;;  %v9894_v52 = vrot.slane %v5310_v34, 1 }
 0x346   : > { %v5345_v29 = vsel %vm227_vm2, %v5340_v37, %v9819_v38  ;;  %v5328_v20 = vrot.slane %v5326_v61, 1  ;;  %v5498_v27 = vrot.slane %v5330_v13, 1  ;;  %v5499_v24 = vrot.slane %v5326_v61, 2 }
 0x347   : > { %5167 = vmatpush.bf16.xpose.msra.mxu3 %v10385_v12  ;;  %v5020_v12 = vrot.slane %v5019_v4, 1  ;;  %v5381_v38 = vsel %vm296_vm0, %v5345_v29, 0  ;;  %v5230_v4 = vld [vmem:[%s7394_s14 + $0x2c] sm:$0xf]  ;;  %v5269_v61 = vunpack.c.h.b16 %v9755_v45  ;;  %v5491_v45 = vrot.slane %v5310_v34, 2 }
 0x348   : > { %v5500_v51 = vor.u32 %v5499_v24, %v5498_v27  ;;  %v5881_v24 = vld [vmem:[%s7394_s14 + $0x70] sm:$0x7] }
 0x34a   : > { %5074 = vmatpush.bf16.xpose.msra.mxu2 %v10386_v46  ;;  %v5332_v46 = vor.u32 %v5330_v13, %v5328_v20  ;;  %v5415_v13 = vrot.slane %v9880_v56, 1 }
 0x34b   : > { %5008 = vmatpush.bf16.xpose.msra.mxu1 %v4978_v8  ;;  %v5504_v8 = vor.u32 %v5503_v22, %v5502_v15 }
 0x34c   : > { %4876 = vmatpush.bf16.xpose.msra.mxu0 %v4850_v18  ;;  %v5508_v18 = vor.u32 %v5507_v41, %v5506_v50 }
 0x34d   : > { %v5505_v41 = vsel %vm445_vm3, %v5500_v51, %v5504_v8 }
 0x34e   : > { %v5513_v16 = vsel %vm445_vm3, %v5508_v18, %v5512_v62  ;;  %v5509_v32 = vsel %vm445_vm3, %v5504_v8, %v5508_v18  ;;  %v5539_v18 = vsel %vm296_vm0, %v5505_v41, 0  ;;  %v9925_v8 = vld [vmem:[%s7394_s14 + $0x68] sm:$0xff]  }
 0x34f   : > { %5168 = vmatpush.bf16.xpose.msra.mxu3 %v10388_v43  ;;  %v5545_v63 = vsel %vm296_vm0, %v5513_v16, 0  ;;  %v4211_v19 = vpop.f32.mrf.mxu1  ;;  %v5542_v43 = vsel %vm296_vm0, %v5509_v32, 0  ;;  %v9939_v34 = vshll.u32 %v9925_v8, 16 }
 0x351   : > { %v5761_v41 = vrot.slane %v9939_v34, 2 }
 0x352   : > { %5075 = vmatpush.bf16.xpose.msra.mxu2 %v5045_v26  ;;  %6621 = vmatmul.msk.bf16.vlgmr.msra.gmra.mxu1 %vm296_vm0, %v4889_v1  ;;  %v5422_v26 = vsel %vm378_vm1, %v5419_v36, %v5421_v53 }
 0x353   : > { %5389 = vmatpush.bf16.xpose.msrb.mxu1 %v5387_v58  ;;  %v5337_v58 = vsel %vm227_vm2, %v5332_v46, %v5336_v55  ;;  %v5314_v55 = vshrl.u32 %v9880_v56, 16  ;;  %v5445_v5 = vsel %vm296_vm0, %v5422_v26, 0 }
 0x354   : > { %4877 = vmatpush.bf16.xpose.msra.mxu0 %v4847_v42  ;;  %v5378_v62 = vsel %vm296_vm0, %v5337_v58, 0  ;;  %v7276_v42 = vld [vmem:[%s7394_s14 + $0x4c] sm:$0xff]   ;;  %v5413_v58 = vrot.slane %v9899_v3, 1 }
 0x355   : > { %v5316_v37 = vor.u32 %v5314_v55, %v9894_v52  ;;  %v5490_v16 = vrot.slane %v5314_v55, 1 }
 0x357   : > { %5169 = vmatpush.bf16.xpose.msra.mxu3 %v5139_v57  ;;  %v4213_v23 = vpop.f32.mrf.mxu1  ;;  %v5205_v57 = vsel %vm296_vm0, %v7276_v42, 0  ;;  %v5492_v56 = vor.u32 %v5491_v45, %v5490_v16 }
 0x359   : > { %6622 = vmatmul.msk.bf16.vlgmr.msra.gmra.mxu2 %vm296_vm0, %v5020_v12  ;;  %v5268_v12 = vunpack.c.l.b16 %v5230_v4 }
 0x35a   : > { %5456 = vmatpush.bf16.xpose.msrb.mxu2 %v5454_v14  ;;  %v4080_v14 = vpop.f32.mrf.mxu0 }
 0x35b   : > { %5390 = vmatpush.bf16.xpose.msrb.mxu1 %v5384_v47  ;;  %6620 = vmatmul.msk.bf16.vlgmr.msra.gmra.mxu0 %vm296_vm0, %v9810_v31  ;;  %v5320_v31 = vrot.slane %v5318_v9, 1  ;;  %v4084_v10 = vadd.f32 %v4080_v14, %v9766_v11  ;;  %v5417_v11 = vrot.slane %v9861_v25, 1  ;;  %v5496_v47 = vor.u32 %v5495_v49, %v5494_v2  ;;  %v7274_v25 = vld [vmem:[%s7394_s14 + $0x44] sm:$0xff]   ;;  %v7272_v14 = vld [vmem:[%s7394_s14 + $0x3c] sm:$0xff]  }
 0x35c   : > { %5216 = vmatpush.bf16.xpose.msrb.mxu0 %v5214_v17  ;;  %v4265_v17 = vpop.f32.mrf.mxu2  ;;  %v5202_v46 = vsel %vm296_vm0, %v7274_v25, 0  ;;  %v5887_v2 = vunpack.c.l.b16 %v5881_v24 }
 0x35d   : > { %v5324_v48 = vor.u32 %v5322_v6, %v5320_v31  ;;  %v4215_v50 = vadd.f32 %v4211_v19, %v4084_v10  ;;  %v5321_v22 = vsel %vm227_vm2, %v5316_v37, %v5320_v31  ;;  %v5418_v6 = vsel %vm378_vm1, %v5415_v13, %v5417_v11  ;;  %v5176_v37 = vld [vmem:[%s7625_s18 + $0x18] sm:$0x4] }
 0x35e   : > { %6623 = vmatmul.msk.bf16.vlgmr.msra.gmra.mxu3 %vm296_vm0, %v5086_v0  ;;  %v5372_v31 = vsel %vm296_vm0, %v5321_v22, 0  ;;  %v5497_v42 = vsel %vm445_vm3, %v5492_v56, %v5496_v47  ;;  %v5416_v10 = vsel %vm378_vm1, %v5413_v58, %v5415_v13  ;;  %v5178_v13 = vunpack.c.l.b16 %v5176_v37 }
 0x35f   : > { %5550 = vmatpush.bf16.xpose.msrb.mxu3 %v5548_v44  ;;  %v5329_v1 = vsel %vm227_vm2, %v5324_v48, %v5328_v20  ;;  %v5683_v44 = vld [vmem:[%s7394_s14 + $0x70] sm:$0x3]  ;;  %v4269_v59 = vadd.f32 %v4265_v17, %v4215_v50  ;;  %v5501_v20 = vsel %vm445_vm3, %v5496_v47, %v5500_v51  ;;  %v9936_v48 = vshrl.u32 %v9925_v8, 16 }
 0x360   : > { %v5375_v54 = vsel %vm296_vm0, %v5329_v1, 0  ;;  %v5691_v0 = vunpack.c.l.b16 %v5683_v44  ;;  %v5536_v19 = vsel %vm296_vm0, %v5501_v20, 0  ;;  %v5439_v51 = vsel %vm296_vm0, %v5418_v6, 0  ;;  %v7270_v44 = vld [vmem:[%s7394_s14 + $0x34] sm:$0xff]  }
 0x361   : > { %v4438_v29 = vpop.f32.mrf.mxu3  ;;  %v5758_v50 = vrot.slane %v9936_v48, 1  ;;  %v5533_v47 = vsel %vm296_vm0, %v5497_v42, 0  ;;  %v5403_v42 = vld [vmem:[%s7625_s18 + $0x18] sm:$0x8] }
 0x362   : > { %5457 = vmatpush.bf16.xpose.msrb.mxu2 %v5451_v39  ;;  %v5420_v39 = vsel %vm378_vm1, %v5417_v11, %v5419_v36  ;;  %v4082_v53 = vpop.f32.mrf.mxu0  ;;  %v9915_v15 = vadd.f32 %v4438_v29, %v4269_v59  ;;  %v9927_v35 = vpack.c.b16 %v5691_v0, %v5691_v0  ;;  %v5487_v36 = vrot.slane %v5302_v28, 2 }
 0x363   : > { %5391 = vmatpush.bf16.xpose.msrb.mxu1 %v5381_v38  ;;  %v5285_v38 = vpack.c.b16 %v5269_v61, %v5268_v12  ;;  %v5442_v9 = vsel %vm296_vm0, %v5420_v39, 0  ;;  %v9959_v59 = vpack.c.b16 %v5887_v2, %v5887_v2  ;;  %v9963_v12 = vld [vmem:[%s7394_s14 + $0x60] sm:$0xff]   ;;  %v5762_v39 = vor.u32 %v5761_v41, %v5758_v50 }
 0x364   : > { %5217 = vmatpush.bf16.xpose.msrb.mxu0 %v5211_v30  ;;  %v5306_v30 = vshrl.u32 %v9899_v3, 16  ;;  %v5768_v26 = vshll.u32 %v9927_v35, 16  ;;  %v9970_v16 = vshrl.u32 %v9963_v12, 16  ;;  %v9973_v45 = vshll.u32 %v9963_v12, 16 }
 0x365   : > { %v5297_v27 = vshll.u32 %v5285_v38, 16  ;;  %v5295_v55 = vshrl.u32 %v5285_v38, 16  ;;  %v5196_v53 = vsel %vm296_vm0, %v7270_v44, 0  ;;  %v5929_v38 = vshll.u32 %v9959_v59, 16 }
 0x366   : > { %v5486_v32 = vrot.slane %v5306_v30, 1  ;;  %v5770_v17 = vrot.slane %v5768_v26, 2  ;;  %v5752_v24 = vrot.slane %v9973_v45, 2  ;;  %v5406_v50 = vunpack.c.l.b16 %v5403_v42 }
 0x367   : > { %5551 = vmatpush.bf16.xpose.msrb.mxu3 %v5545_v63  ;;  %v9920_v63 = vrot.slane %v5302_v28, 1  ;;  %v5299_v23 = vrot.slane %v5297_v27, 1  ;;  %v5749_v27 = vrot.slane %v9970_v16, 1 }
 0x368   : > { %v9949_v1 = vor.u32 %v5487_v36, %v5486_v32  ;;  %v9985_v36 = vpack.c.b16 %v5178_v13, %v5178_v13 }
 0x369   : > { %v4440_v49 = vpop.f32.mrf.mxu3  ;;  %v5300_v28 = vor.u32 %v5299_v23, %v5295_v55  ;;  %v5753_v23 = vor.u32 %v5752_v24, %v5749_v27 }
 0x36a   : > { %5458 = vmatpush.bf16.xpose.msrb.mxu2 %v5448_v21  ;;  %v4267_v21 = vpop.f32.mrf.mxu2  ;;  %v5638_v49 = vrot.slane %v9925_v8, 1 }
 0x36b   : > { %5392 = vmatpush.bf16.xpose.msrb.mxu1 %v5378_v62  ;;  %v5410_v62 = vunpack.c.l.b16 %v5404_v7  ;;  %v5838_v7 = vrot.slane %v9927_v35, 2  ;;  %v5305_v6 = vsel %vm227_vm2, %v5300_v28, %v9920_v63  ;;  %v5763_v44 = vsel %vm445_vm3, %v5753_v23, %v5762_v39 }
 0x36c   : > { %5218 = vmatpush.bf16.xpose.msrb.mxu0 %v5208_v33  ;;  %v5308_v33 = vor.u32 %v5306_v30, %v9920_v63  ;;  %v5926_v30 = vshrl.u32 %v9959_v59, 16  ;;  %v5366_v26 = vsel %vm296_vm0, %v5305_v6, 0  ;;  %v5407_v28 = vpack.c.b16 %v5406_v50, %v5406_v50 }
 0x36d   : > { %v5411_v4 = vpack.c.b16 %v5269_v61, %v5410_v62  ;;  %v5931_v62 = vrot.slane %v5929_v38, 3  ;;  %v5795_v13 = vsel %vm296_vm0, %v5763_v44, 0  ;;  %v5180_v6 = vrot.slane %v9985_v36, 2 }
 0x36f   : > { %5552 = vmatpush.bf16.xpose.msrb.mxu3 %v5542_v43  ;;  %v5765_v43 = vshrl.u32 %v9927_v35, 16  ;;  %v5479_v0 = vshrl.u32 %v5411_v4, 16  ;;  %v5482_v29 = vshll.u32 %v5411_v4, 16  ;;  %v5922_v35 = vrot.slane %v9939_v34, 3 }
 0x371   : > { %v5767_v11 = vrot.slane %v5765_v43, 1  ;;  %v5484_v21 = vrot.slane %v5482_v29, 2  ;;  %v9992_v43 = vld [vmem:[%s7394_s14 + $0x58] sm:$0xff]   ;;  %v10024_v29 = vld [vmem:[%s7394_s14 + $0x50] sm:$0xff]  }
 0x372   : > { %5459 = vmatpush.bf16.xpose.msrb.mxu2 %v5445_v5  ;;  %v5313_v5 = vsel %vm227_vm2, %v5308_v33, %v9894_v52  ;;  %v5436_v52 = vsel %vm296_vm0, %v5416_v10, 0  ;;  %v5921_v33 = vrot.slane %v9936_v48, 2  ;;  %v10005_v3 = vshrl.u32 %v9992_v43, 16 }
 0x373   : > { %5393 = vmatpush.bf16.xpose.msrb.mxu1 %v5375_v54  ;;  %v5199_v54 = vsel %vm296_vm0, %v7272_v14, 0  ;;  %v5369_v61 = vsel %vm296_vm0, %v5313_v5, 0  ;;  %v5771_v20 = vor.u32 %v5770_v17, %v5767_v11  ;;  %v5248_v5 = vshrl.u32 %v9985_v36, 16 }
 0x374   : > { %5219 = vmatpush.bf16.xpose.msrb.mxu0 %v5205_v57  ;;  %v5581_v57 = vld [vmem:[%s7394_s14 + $0x70] sm:$0x1]  ;;  %v5913_v36 = vrot.slane %v10005_v3, 2 }
 0x375   : > { %v5615_v25 = vunpack.c.l.b16 %v5581_v57  ;;  %v5772_v32 = vsel %vm445_vm3, %v5762_v39, %v5771_v20  ;;  %v5250_v37 = vrot.slane %v5248_v5, 2 }
 0x376   : > { %v5798_v2 = vsel %vm296_vm0, %v5772_v32, 0 }
 0x377   : > { %5553 = vmatpush.bf16.xpose.msrb.mxu3 %v5539_v18  ;;  %v5493_v18 = vsel %vm445_vm3, %v9949_v1, %v5492_v56  ;;  %v5481_v56 = vrot.slane %v5479_v0, 1  ;;  %v5918_v0 = vrot.slane %v9973_v45, 3 }
 0x378   : > { %v5530_v22 = vsel %vm296_vm0, %v5493_v18, 0 }
 0x379   : > { %v5485_v55 = vor.u32 %v5484_v21, %v5481_v56 }
 0x37a   : > { %5460 = vmatpush.bf16.xpose.msrb.mxu2 %v5442_v9  ;;  %v5412_v9 = vrot.slane %v5411_v4, 1  ;;  %v5923_v4 = vor.u32 %v5922_v35, %v5921_v33  ;;  %v10046_v33 = vld [vmem:[%s7394_s14 + $0x48] sm:$0xff]  }
 0x37b   : > { %5394 = vmatpush.bf16.xpose.msrb.mxu1 %v5372_v31  ;;  %v5624_v31 = vpack.c.b16 %v5615_v25, %v5615_v25  ;;  %v5917_v25 = vrot.slane %v9970_v16, 2  ;;  %v10061_v42 = vshll.u32 %v10046_v33, 16 }
 0x37c   : > { %5220 = vmatpush.bf16.xpose.msrb.mxu0 %v5202_v46  ;;  %v5836_v46 = vrot.slane %v9925_v8, 2  ;;  %v5414_v63 = vsel %vm378_vm1, %v5412_v9, %v5413_v58  ;;  %v10008_v58 = vshll.u32 %v9992_v43, 16  ;;  %v10034_v9 = vshrl.u32 %v10024_v29, 16 }
 0x37d   : > { %v5640_v10 = vrot.slane %v5624_v31, 1  ;;  %v5433_v41 = vsel %vm296_vm0, %v5414_v63, 0 }
 0x37e   : > { %v5731_v27 = vrot.slane %v10034_v9, 1 }
 0x37f   : > { %5554 = vmatpush.bf16.xpose.msrb.mxu3 %v5536_v19  ;;  %v6907_v19 = vunpack.c.l.b16 %v9792_v40  ;;  %v5928_v40 = vrot.slane %v5926_v30, 2  ;;  %v5641_v57 = vsel %vm378_vm1, %v5638_v49, %v5640_v10 }
 0x381   : > { %v5181_v14 = vpack.c.b16 %v6907_v19, %v9763_v60  ;;  %v5932_v60 = vor.u32 %v5931_v62, %v5928_v40  ;;  %v5919_v19 = vor.u32 %v5918_v0, %v5917_v25  ;;  %v5832_v40 = vrot.slane %v9992_v43, 2 }
 0x382   : > { %5461 = vmatpush.bf16.xpose.msrb.mxu2 %v5439_v51  ;;  %v5839_v51 = vsel %vm541_vm6, %v5836_v46, %v5838_v7  ;;  %v10037_v7 = vshll.u32 %v10024_v29, 16  ;;  %v5914_v62 = vrot.slane %v10008_v58, 3 }
 0x383   : > { %5395 = vmatpush.bf16.xpose.msrb.mxu1 %v5369_v61  ;;  %v5865_v11 = vsel %vm296_vm0, %v5839_v51, 0  ;;  %v5193_v17 = vsel %vm296_vm0, %v5181_v14, 0  ;;  %v5743_v61 = vrot.slane %v10008_v58, 2  ;;  %v5933_v18 = vsel %vm608_vm4, %v5923_v4, %v5932_v60 }
 0x384   : > { %5221 = vmatpush.bf16.xpose.msrb.mxu0 %v5199_v54  ;;  %v5489_v54 = vsel %vm445_vm3, %v5485_v55, %v9949_v1  ;;  %v5667_v1 = vsel %vm296_vm0, %v5641_v57, 0  ;;  %v5959_v30 = vsel %vm296_vm0, %v5933_v18, 0  ;;  %v5734_v24 = vrot.slane %v10037_v7, 2 }
 0x385   : > { %v5527_v20 = vsel %vm296_vm0, %v5489_v54, 0  ;;  %v5924_v35 = vsel %vm608_vm4, %v5919_v19, %v5923_v4  ;;  %v5634_v51 = vrot.slane %v9992_v43, 1  ;;  %v10058_v14 = vshrl.u32 %v10046_v33, 16 }
 0x386   : > { %v5915_v55 = vor.u32 %v5914_v62, %v5913_v36  ;;  %v5725_v60 = vrot.slane %v10061_v42, 2  ;;  %v5830_v57 = vrot.slane %v10024_v29, 2  ;;  %v5909_v54 = vrot.slane %v10034_v9, 2 }
 0x387   : > { %5555 = vmatpush.bf16.xpose.msrb.mxu3 %v5533_v47  ;;  %v5834_v47 = vrot.slane %v9963_v12, 2  ;;  %v5722_v4 = vrot.slane %v10058_v14, 1 }
 0x388   : > { %v5833_v0 = vsel %vm541_vm6, %v5830_v57, %v5832_v40 }
 0x389   : > { %v5837_v39 = vsel %vm541_vm6, %v5834_v47, %v5836_v46  ;;  %v5408_v46 = vrot.slane %v5407_v28, 3  ;;  %v5835_v10 = vsel %vm541_vm6, %v5832_v40, %v5834_v47  ;;  %v5910_v47 = vrot.slane %v10037_v7, 3 }
 0x38a   : > { %5462 = vmatpush.bf16.xpose.msrb.mxu2 %v5436_v52  ;;  %v5740_v52 = vrot.slane %v10005_v3, 1  ;;  %v5862_v31 = vsel %vm296_vm0, %v5837_v39, 0  ;;  %v5859_v50 = vsel %vm296_vm0, %v5835_v10, 0 }
 0x38b   : > { %5396 = vmatpush.bf16.xpose.msrb.mxu1 %v5366_v26 }
 0x38c   : > { %5222 = vmatpush.bf16.xpose.msrb.mxu0 %v5196_v53  ;;  %v5472_v53 = vshrl.u32 %v5407_v28, 16  ;;  %v5744_v38 = vor.u32 %v5743_v61, %v5740_v52  ;;  %v5726_v61 = vor.u32 %v5725_v60, %v5722_v4 }
 0x38e   : > { %v5474_v21 = vrot.slane %v5472_v53, 3  ;;  %v5754_v32 = vsel %vm445_vm3, %v5744_v38, %v5753_v23  ;;  %v5906_v53 = vrot.slane %v10061_v42, 3 }
 0x38f   : > { %5556 = vmatpush.bf16.xpose.msrb.mxu3 %v5530_v22  ;;  %v5636_v22 = vrot.slane %v9963_v12, 1  ;;  %v5792_v26 = vsel %vm296_vm0, %v5754_v32, 0  ;;  %v4599_v5 = vpop.f32.mrf.mxu1  ;;  %v5828_v32 = vrot.slane %v10046_v33, 2 }
 0x391   : > { %v5639_v56 = vsel %vm378_vm1, %v5636_v22, %v5638_v49  ;;  %v5735_v49 = vor.u32 %v5734_v24, %v5731_v27  ;;  %v5637_v23 = vsel %vm378_vm1, %v5634_v51, %v5636_v22  ;;  %v5566_v27 = vld [vmem:[%s7394_s14 + $0x34] sm:$0xf]  ;;  %v5565_v24 = vld [vmem:[%s7394_s14 + $0x30] sm:$0xe] }
 0x392   : > { %5463 = vmatpush.bf16.xpose.msrb.mxu2 %v5433_v41  ;;  %6653 = vmatmul.msk.bf16.vlgmr.msrb.gmra.mxu1 %vm296_vm0, %v5250_v37  ;;  %v5664_v63 = vsel %vm296_vm0, %v5639_v56, 0  ;;  %v5661_v44 = vsel %vm296_vm0, %v5637_v23, 0  ;;  %v5632_v37 = vrot.slane %v10024_v29, 1  ;;  %v5599_v23 = vunpack.c.l.b16 %v5565_v24 }
 0x393   : > { %5800 = vmatpush.bf16.xpose.msra.mxu1 %v5798_v2  ;;  %v5956_v2 = vsel %vm296_vm0, %v5924_v35, 0  ;;  %v5745_v41 = vsel %vm445_vm3, %v5735_v49, %v5744_v38 }
 0x394   : > { %5223 = vmatpush.bf16.xpose.msrb.mxu0 %v5193_v17  ;;  %v5920_v17 = vsel %vm608_vm4, %v5915_v55, %v5919_v19  ;;  %v5789_v52 = vsel %vm296_vm0, %v5745_v41, 0  ;;  %v5635_v39 = vsel %vm378_vm1, %v5632_v37, %v5634_v51 }
 0x395   : > { %v5953_v25 = vsel %vm296_vm0, %v5920_v17, 0  ;;  %v5658_v40 = vsel %vm296_vm0, %v5635_v39, 0 }
 0x397   : > { %5557 = vmatpush.bf16.xpose.msrb.mxu3 %v5527_v20  ;;  %v4601_v19 = vpop.f32.mrf.mxu1 }
 0x398   : > { %v4505_v20 = vpop.f32.mrf.mxu0 }
 0x399   : > { %6654 = vmatmul.msk.bf16.vlgmr.msrb.gmra.mxu2 %vm296_vm0, %v5408_v46  ;;  %v4509_v22 = vadd.f32 %v4505_v20, %v9915_v15  ;;  %v5630_v15 = vrot.slane %v10046_v33, 1  ;;  %v5815_v20 = vld [vmem:[%s7394_s14 + $0x30] sm:$0xc] }
 0x39a   : > { %5867 = vmatpush.bf16.xpose.msra.mxu2 %v5865_v11  ;;  %v10072_v11 = vld [vmem:[%s7394_s14 + $0x40] sm:$0xff]  }
 0x39b   : > { %5801 = vmatpush.bf16.xpose.msra.mxu1 %v5795_v13  ;;  %6624 = vmatmul.msk.bf16.vlgmr.msrb.gmra.mxu0 %vm296_vm0, %v5180_v6  ;;  %v10082_v18 = vshrl.u32 %v10072_v11, 16  ;;  %v10085_v28 = vshll.u32 %v10072_v11, 16  ;;  %v5905_v13 = vrot.slane %v10058_v14, 2  ;;  %v5856_v6 = vsel %vm296_vm0, %v5833_v0, 0 }
 0x39c   : > { %5669 = vmatpush.bf16.xpose.msra.mxu0 %v5667_v1  ;;  %v5911_v1 = vor.u32 %v5910_v47, %v5909_v54  ;;  %v4603_v56 = vadd.f32 %v4599_v5, %v4509_v22  ;;  %v4666_v35 = vpop.f32.mrf.mxu2  ;;  %v5831_v5 = vsel %vm541_vm6, %v5828_v32, %v5830_v57  ;;  %v5633_v4 = vsel %vm378_vm1, %v5630_v15, %v5632_v37 }
 0x39d   : > { %v5713_v38 = vrot.slane %v10082_v18, 1  ;;  %v5716_v46 = vrot.slane %v10085_v28, 2  ;;  %v5907_v62 = vor.u32 %v5906_v53, %v5905_v13  ;;  %v5826_v17 = vrot.slane %v10072_v11, 2 }
 0x39e   : > { %6655 = vmatmul.msk.bf16.vlgmr.msrb.gmra.mxu3 %vm296_vm0, %v5474_v21  ;;  %v5916_v21 = vsel %vm608_vm4, %v5911_v1, %v5915_v55  ;;  %v10115_v55 = vunpack.c.l.b16 %v5566_v27  ;;  %v5901_v54 = vrot.slane %v10082_v18, 2  ;;  %v5902_v47 = vrot.slane %v10085_v28, 3 }
 0x39f   : > { %5961 = vmatpush.bf16.xpose.msra.mxu3 %v5959_v30  ;;  %v5736_v30 = vsel %vm445_vm3, %v5726_v61, %v5735_v49  ;;  %v5717_v51 = vor.u32 %v5716_v46, %v5713_v38  ;;  %v5950_v10 = vsel %vm296_vm0, %v5916_v21, 0  ;;  %v5912_v41 = vsel %vm608_vm4, %v5907_v62, %v5911_v1 }
 0x3a0   : > { %v5786_v36 = vsel %vm296_vm0, %v5736_v30, 0  ;;  %v5853_v0 = vsel %vm296_vm0, %v5831_v5, 0  ;;  %v10133_v1 = vpack.c.b16 %v10115_v55, %v5599_v23  ;;  %v5655_v39 = vsel %vm296_vm0, %v5633_v4, 0 }
 0x3a1   : > { %v5727_v57 = vsel %vm445_vm3, %v5717_v51, %v5726_v61  ;;  %v5947_v13 = vsel %vm296_vm0, %v5912_v41, 0  ;;  %v5829_v22 = vsel %vm541_vm6, %v5826_v17, %v5828_v32  ;;  %v5628_v30 = vrot.slane %v10072_v11, 1  ;;  %v6206_v41 = vld [vmem:[%s7394_s14 + $0x74] sm:$0x1] }
 0x3a2   : > { %5868 = vmatpush.bf16.xpose.msra.mxu2 %v5862_v31  ;;  %v10098_v31 = vld [vmem:[%s7394_s14 + $0x38] sm:$0xff]   ;;  %v5783_v61 = vsel %vm296_vm0, %v5727_v57, 0  ;;  %v5903_v38 = vor.u32 %v5902_v47, %v5901_v54  ;;  %v5821_v21 = vunpack.c.l.b16 %v5815_v20  ;;  %v5694_v27 = vshrl.u32 %v10133_v1, 16 }
 0x3a3   : > { %5802 = vmatpush.bf16.xpose.msra.mxu1 %v5792_v26  ;;  %v4670_v26 = vadd.f32 %v4666_v35, %v4603_v56  ;;  %v10112_v49 = vshll.u32 %v10098_v31, 16  ;;  %v5697_v24 = vshll.u32 %v10133_v1, 16  ;;  %v5997_v32 = vrot.slane %v9925_v8, 3 }
 0x3a4   : > { %5670 = vmatpush.bf16.xpose.msra.mxu0 %v5664_v63  ;;  %v6042_v63 = vld [vmem:[%s7394_s14 + $0x70] sm:$0xf]  ;;  %v4668_v46 = vpop.f32.mrf.mxu2  ;;  %v5995_v35 = vrot.slane %v9963_v12, 3  ;;  %v5908_v5 = vsel %vm608_vm4, %v5903_v38, %v5907_v62  ;;  %v5824_v12 = vrot.slane %v10098_v31, 2  ;;  %v5626_v4 = vrot.slane %v10098_v31, 1 }
 0x3a5   : > { %v10119_v60 = vunpack.c.l.b16 %v6042_v63  ;;  %v5898_v56 = vrot.slane %v10112_v49, 3  ;;  %v5850_v63 = vsel %vm296_vm0, %v5829_v22, 0  ;;  %v5696_v47 = vrot.slane %v5694_v27, 1 }
 0x3a6   : > { %v6082_v57 = vrot.slane %v9936_v48, 3  ;;  %v5944_v20 = vsel %vm296_vm0, %v5908_v5, 0  ;;  %v5629_v48 = vsel %vm378_vm1, %v5626_v4, %v5628_v30 }
 0x3a7   : > { %5962 = vmatpush.bf16.xpose.msra.mxu3 %v5956_v2  ;;  %v10109_v2 = vshrl.u32 %v10098_v31, 16  ;;  %v6049_v53 = vpack.c.b16 %v10119_v60, %v10119_v60 }
 0x3a9   : > { %v5704_v37 = vrot.slane %v10109_v2, 1 }
 0x3aa   : > { %5869 = vmatpush.bf16.xpose.msra.mxu2 %v5859_v50  ;;  %v4760_v50 = vpop.f32.mrf.mxu3 }
 0x3ab   : > { %5803 = vmatpush.bf16.xpose.msra.mxu1 %v5789_v52  ;;  %v10125_v52 = vadd.f32 %v4760_v50, %v4670_v26  ;;  %v5631_v26 = vsel %vm378_vm1, %v5628_v30, %v5630_v15  ;;  %v5822_v15 = vpack.c.b16 %v10115_v55, %v5821_v21  ;;  %v5649_v30 = vsel %vm296_vm0, %v5629_v48, 0 }
 0x3ac   : > { %5671 = vmatpush.bf16.xpose.msra.mxu0 %v5661_v44  ;;  %v4507_v44 = vpop.f32.mrf.mxu0  ;;  %v5652_v62 = vsel %vm296_vm0, %v5631_v26, 0  ;;  %v5625_v26 = vrot.slane %v10133_v1, 1 }
 0x3ad   : > { %v5699_v44 = vrot.slane %v5697_v24, 2  ;;  %v5890_v46 = vshrl.u32 %v5822_v15, 16 }
 0x3af   : > { %5963 = vmatpush.bf16.xpose.msra.mxu3 %v5953_v25  ;;  %v5707_v25 = vrot.slane %v10112_v49, 2 }
 0x3b1   : > { %v5708_v19 = vor.u32 %v5707_v25, %v5704_v37  ;;  %v6083_v37 = vrot.slane %v9939_v34, 4 }
 0x3b2   : > { %5870 = vmatpush.bf16.xpose.msra.mxu2 %v5856_v6  ;;  %v5897_v6 = vrot.slane %v10109_v2, 2  ;;  %v4762_v23 = vpop.f32.mrf.mxu3 }
 0x3b3   : > { %5804 = vmatpush.bf16.xpose.msra.mxu1 %v5786_v36  ;;  %v6090_v36 = vshll.u32 %v6049_v53, 16  ;;  %v5718_v54 = vsel %vm445_vm3, %v5708_v19, %v5717_v51  ;;  %v5827_v51 = vsel %vm541_vm6, %v5824_v12, %v5826_v17  ;;  %v5892_v23 = vrot.slane %v5890_v46, 2 }
 0x3b4   : > { %5672 = vmatpush.bf16.xpose.msra.mxu0 %v5658_v40  ;;  %v6087_v40 = vshrl.u32 %v6049_v53, 16  ;;  %v10158_v50 = vor.u32 %v5898_v56, %v5897_v6  ;;  %v5993_v53 = vrot.slane %v9992_v43, 3  ;;  %v5780_v22 = vsel %vm296_vm0, %v5718_v54, 0  ;;  %v5814_v54 = vld [vmem:[%s7625_s18 + $0x1c] sm:$0x2] }
 0x3b5   : > { %v5893_v6 = vshll.u32 %v5822_v15, 16  ;;  %v6084_v43 = vor.u32 %v6083_v37, %v6082_v57  ;;  %v5847_v17 = vsel %vm296_vm0, %v5827_v51, 0  ;;  %v6079_v57 = vrot.slane %v9973_v45, 4 }
 0x3b6   : > { %v6089_v25 = vrot.slane %v6087_v40, 3  ;;  %v5904_v34 = vsel %vm608_vm4, %v10158_v50, %v5903_v38  ;;  %v10177_v56 = vsel %vm704_vm5, %v5993_v53, %v5995_v35  ;;  %v10181_v40 = vld [vmem:[%s7625_s18 + $0x1c] sm:$0x1]  ;;  %v5817_v45 = vunpack.c.l.b16 %v5814_v54 }
 0x3b7   : > { %5964 = vmatpush.bf16.xpose.msra.mxu3 %v5950_v10  ;;  %v10153_v10 = vsel %vm704_vm5, %v5995_v35, %v5997_v32  ;;  %v5941_v38 = vsel %vm296_vm0, %v5904_v34, 0  ;;  %v6960_v35 = vunpack.c.h.b16 %v9925_v8  ;;  %v5895_v5 = vrot.slane %v5893_v6, 3 }
 0x3b8   : > { %v5818_v6 = vpack.c.b16 %v5817_v45, %v5817_v45  ;;  %v5989_v8 = vrot.slane %v10046_v33, 3 }
 0x3b9   : > { %v5896_v51 = vor.u32 %v5895_v5, %v5892_v23 }
 0x3ba   : > { %5871 = vmatpush.bf16.xpose.msra.mxu2 %v5853_v0  ;;  %v6092_v0 = vrot.slane %v6090_v36, 4  ;;  %v5823_v36 = vrot.slane %v5822_v15, 2  ;;  %v5819_v33 = vrot.slane %v5818_v6, 1 }
 0x3bb   : > { %5805 = vmatpush.bf16.xpose.msra.mxu1 %v5783_v61  ;;  %v5700_v61 = vor.u32 %v5699_v44, %v5696_v47  ;;  %v5685_v47 = vunpack.c.l.b16 %v10181_v40  ;;  %v6078_v44 = vrot.slane %v9970_v16, 3  ;;  %v5900_v46 = vsel %vm608_vm4, %v5896_v51, %v10158_v50 }
 0x3bc   : > { %5673 = vmatpush.bf16.xpose.msra.mxu0 %v5655_v39  ;;  %v6748_v39 = vld [vmem:[%s7394_s14 + $0x6c] sm:$0xff]  ;;  %v6093_v21 = vor.u32 %v6092_v0, %v6089_v25  ;;  %v6747_v0 = vld [vmem:[%s7394_s14 + $0x64] sm:$0xff]  ;;  %v5825_v1 = vsel %vm541_vm6, %v5823_v36, %v5824_v12  ;;  %v5938_v50 = vsel %vm296_vm0, %v5900_v46, 0  ;;  %v7288_v46 = vld [vmem:[%s7394_s14 + $0x54] sm:$0xff]  }
 0x3bd   : > { %v6310_v24 = vshll.u32 %v6748_v39, 16  ;;  %v6314_v15 = vshrl.u32 %v6748_v39, 16  ;;  %v5686_v39 = vpack.c.b16 %v5685_v47, %v5685_v47  ;;  %v6080_v12 = vor.u32 %v6079_v57, %v6078_v44 }
 0x3be   : > { %v6302_v34 = vshll.u32 %v6747_v0, 16  ;;  %v6306_v36 = vshrl.u32 %v6747_v0, 16  ;;  %v6070_v57 = vrot.slane %v10034_v9, 3 }
 0x3bf   : > { %5965 = vmatpush.bf16.xpose.msra.mxu3 %v5947_v13  ;;  %v6244_v13 = vunpack.c.l.b16 %v6206_v41  ;;  %v6094_v41 = vsel %vm771_vm7, %v6084_v43, %v6093_v21  ;;  %v10193_v37 = vrot.slane %v6310_v24, 1  ;;  %v5688_v21 = vshrl.u32 %v5686_v39, 16 }
 0x3c0   : > { %v6120_v16 = vsel %vm296_vm0, %v6094_v41, 0  ;;  %v6075_v24 = vrot.slane %v10008_v58, 4  ;;  %v6066_v39 = vrot.slane %v10058_v14, 3 }
 0x3c1   : > { %v6253_v27 = vpack.c.b16 %v6244_v13, %v6244_v13  ;;  %v5999_v13 = vrot.slane %v9959_v59, 3  ;;  %v6316_v48 = vor.u32 %v6314_v15, %v10193_v37  ;;  %v5844_v59 = vsel %vm296_vm0, %v5825_v1, 0  ;;  %v6745_v1 = vld [vmem:[%s7394_s14 + $0x54] sm:$0xff] }
 0x3c2   : > { %5872 = vmatpush.bf16.xpose.msra.mxu2 %v5850_v63  ;;  %v5709_v63 = vsel %vm445_vm3, %v5700_v61, %v5708_v19  ;;  %v5991_v19 = vrot.slane %v10024_v29, 3  ;;  %v5627_v29 = vsel %vm378_vm1, %v5625_v26, %v5626_v4  ;;  %v5883_v26 = vshrl.u32 %v5818_v6, 16 }
 0x3c3   : > { %5806 = vmatpush.bf16.xpose.msra.mxu1 %v5780_v22  ;;  %v6318_v25 = vshll.u32 %v6253_v27, 16  ;;  %v6000_v4 = vsel %vm704_vm5, %v5997_v32, %v5999_v13  ;;  %v6074_v27 = vrot.slane %v10005_v3, 3  ;;  %v6071_v15 = vrot.slane %v10037_v7, 4  ;;  %v7290_v13 = vld [vmem:[%s7394_s14 + $0x5c] sm:$0xff]  }
 0x3c4   : > { %5674 = vmatpush.bf16.xpose.msra.mxu0 %v5652_v62  ;;  %v5777_v62 = vsel %vm296_vm0, %v5709_v63, 0  ;;  %v10203_v22 = vsel %vm704_vm5, %v5991_v19, %v5993_v53  ;;  %v5646_v53 = vsel %vm296_vm0, %v5627_v29, 0  ;;  %v6026_v32 = vsel %vm296_vm0, %v6000_v4, 0  ;;  %v7291_v63 = vld [vmem:[%s7394_s14 + $0x64] sm:$0xff]  }
 0x3c5   : > { %v10228_v3 = vsel %vm704_vm5, %v5989_v8, %v5991_v19  ;;  %v6076_v23 = vor.u32 %v6075_v24, %v6074_v27  ;;  %v6171_v54 = vsel %vm296_vm0, %v7291_v63, 0  ;;  %v5885_v47 = vrot.slane %v5883_v26, 1  ;;  %v5976_v63 = vld [vmem:[%s7394_s14 + $0x30] sm:$0x8] }
 0x3c6   : > { %v6286_v51 = vshll.u32 %v6745_v1, 16  ;;  %v6168_v45 = vsel %vm296_vm0, %v7290_v13, 0  ;;  %v7286_v26 = vld [vmem:[%s7394_s14 + $0x4c] sm:$0xff]  }
 0x3c7   : > { %5966 = vmatpush.bf16.xpose.msra.mxu3 %v5944_v20  ;;  %v6148_v20 = vpack.c.b16 %v10119_v60, %v6960_v35  ;;  %v6320_v60 = vrot.slane %v6318_v25, 1  ;;  %v6746_v35 = vld [vmem:[%s7394_s14 + $0x5c] sm:$0xff]  ;;  %v6081_v44 = vsel %vm771_vm7, %v6076_v23, %v6080_v12 }
 0x3c8   : > { %v6294_v41 = vshll.u32 %v6746_v35, 16  ;;  %v6298_v19 = vshrl.u32 %v6746_v35, 16  ;;  %v6114_v9 = vsel %vm296_vm0, %v6081_v44, 0 }
 0x3c9   : > { %v6174_v61 = vsel %vm296_vm0, %v6148_v20, 0  ;;  %v6023_v20 = vsel %vm296_vm0, %v10153_v10, 0 }
 0x3ca   : > { %5873 = vmatpush.bf16.xpose.msra.mxu2 %v5847_v17  ;;  %v6085_v17 = vsel %vm771_vm7, %v6080_v12, %v6084_v43  ;;  %v6296_v0 = vrot.slane %v6294_v41, 1  ;;  %v6067_v12 = vrot.slane %v10061_v42, 4 }
 0x3cb   : > { %5807 = vmatpush.bf16.xpose.msra.mxu1 %v5777_v62  ;;  %v6117_v43 = vsel %vm296_vm0, %v6085_v17, 0  ;;  %v5987_v62 = vrot.slane %v10072_v11, 3 }
 0x3cc   : > { %5675 = vmatpush.bf16.xpose.msra.mxu0 %v5649_v30  ;;  %v6321_v30 = vsel %vm227_vm2, %v6316_v48, %v6320_v60  ;;  %v6300_v10 = vor.u32 %v6298_v19, %v6296_v0  ;;  %v6288_v60 = vrot.slane %v6286_v51, 1  ;;  %v6068_v6 = vor.u32 %v6067_v12, %v6066_v39 }
 0x3cd   : > { %v6347_v58 = vsel %vm296_vm0, %v6321_v30, 0  ;;  %v10249_v7 = vsel %vm704_vm5, %v5987_v62, %v5989_v8  ;;  %v6062_v30 = vrot.slane %v10082_v18, 3 }
 0x3cf   : > { %5967 = vmatpush.bf16.xpose.msra.mxu3 %v5941_v38  ;;  %v6304_v38 = vrot.slane %v6302_v34, 1  ;;  %v6290_v34 = vshrl.u32 %v6745_v1, 16 }
 0x3d1   : > { %v6308_v5 = vor.u32 %v6306_v36, %v6304_v38  ;;  %v6305_v48 = vsel %vm227_vm2, %v6300_v10, %v6304_v38  ;;  %v6292_v14 = vor.u32 %v6290_v34, %v6288_v60  ;;  %v6063_v38 = vrot.slane %v10085_v28, 4 }
 0x3d2   : > { %5874 = vmatpush.bf16.xpose.msra.mxu2 %v5844_v59  ;;  %6657 = vmatmul.msk.bf16.vlgmr.msra.gmra.mxu1 %vm296_vm0, %v5688_v21  ;;  %v6744_v59 = vld [vmem:[%s7394_s14 + $0x4c] sm:$0xff]  ;;  %v6341_v4 = vsel %vm296_vm0, %v6305_v48, 0  ;;  %v5982_v28 = vunpack.c.l.b16 %v5976_v63 }
 0x3d3   : > { %6122 = vmatpush.bf16.xpose.msrb.mxu1 %v6120_v16  ;;  %v6313_v25 = vsel %vm227_vm2, %v6308_v5, %v10193_v37  ;;  %v6072_v16 = vor.u32 %v6071_v15, %v6070_v57  ;;  %v6278_v42 = vshll.u32 %v6744_v59, 16  ;;  %v6297_v35 = vsel %vm227_vm2, %v6292_v14, %v6296_v0 }
 0x3d4   : > { %5676 = vmatpush.bf16.xpose.msra.mxu0 %v5646_v53  ;;  %v6344_v37 = vsel %vm296_vm0, %v6313_v25, 0  ;;  %v6338_v18 = vsel %vm296_vm0, %v6297_v35, 0  ;;  %v6058_v15 = vrot.slane %v10109_v2, 3  ;;  %v6059_v25 = vrot.slane %v10112_v49, 4  ;;  %v7284_v2 = vld [vmem:[%s7394_s14 + $0x44] sm:$0xff]  }
 0x3d5   : > { %v6077_v29 = vsel %vm771_vm7, %v6072_v16, %v6076_v23  ;;  %v6073_v24 = vsel %vm771_vm7, %v6068_v6, %v6072_v16  ;;  %v6280_v8 = vrot.slane %v6278_v42, 1  ;;  %v10285_v0 = vpack.c.b16 %v10115_v55, %v5982_v28 }
 0x3d6   : > { %v6111_v53 = vsel %vm296_vm0, %v6077_v29, 0  ;;  %v6108_v23 = vsel %vm296_vm0, %v6073_v24, 0  ;;  %v6060_v51 = vor.u32 %v6059_v25, %v6058_v15  ;;  %v5985_v14 = vrot.slane %v10098_v31, 3 }
 0x3d7   : > { %5968 = vmatpush.bf16.xpose.msra.mxu3 %v5938_v50  ;;  %v6743_v50 = vld [vmem:[%s7394_s14 + $0x44] sm:$0xff]  ;;  %v6051_v49 = vshrl.u32 %v10285_v0, 16  ;;  %v5984_v11 = vrot.slane %v10285_v0, 3 }
 0x3d8   : > { %v4879_v21 = vpop.f32.mrf.mxu0  ;;  %v6270_v41 = vshll.u32 %v6743_v50, 16 }
 0x3d9   : > { %6658 = vmatmul.msk.bf16.vlgmr.msra.gmra.mxu2 %vm296_vm0, %v5819_v33  ;;  %v4883_v17 = vadd.f32 %v4879_v21, %v10125_v52  ;;  %v6017_v52 = vsel %vm296_vm0, %v10203_v22, 0  ;;  %v6064_v33 = vor.u32 %v6063_v38, %v6062_v30  ;;  %v6162_v22 = vsel %vm296_vm0, %v7286_v26, 0  ;;  %v7282_v21 = vld [vmem:[%s7394_s14 + $0x3c] sm:$0xff]  }
 0x3da   : > { %6176 = vmatpush.bf16.xpose.msrb.mxu2 %v6174_v61  ;;  %v6020_v61 = vsel %vm296_vm0, %v10177_v56, 0  ;;  %v6165_v56 = vsel %vm296_vm0, %v7288_v46, 0  ;;  %v6272_v1 = vrot.slane %v6270_v41, 1  ;;  %v6053_v48 = vrot.slane %v6051_v49, 3  ;;  %v5975_v46 = vld [vmem:[%s7625_s18 + $0x1c] sm:$0x4] }
 0x3db   : > { %6123 = vmatpush.bf16.xpose.msrb.mxu1 %v6117_v43  ;;  %6656 = vmatmul.msk.bf16.vlgmr.msra.gmra.mxu0 %vm296_vm0, %v10181_v40  ;;  %v5010_v40 = vpop.f32.mrf.mxu1  ;;  %v6069_v57 = vsel %vm771_vm7, %v6064_v33, %v6068_v6  ;;  %v6065_v12 = vsel %vm771_vm7, %v6060_v51, %v6064_v33  ;;  %v5978_v24 = vunpack.c.l.b16 %v5975_v46  ;;  %v6156_v30 = vsel %vm296_vm0, %v7282_v21, 0 }
 0x3dc   : > { %6028 = vmatpush.bf16.xpose.msrb.mxu0 %v6026_v32  ;;  %v5014_v36 = vadd.f32 %v5010_v40, %v4883_v17  ;;  %v6282_v32 = vshrl.u32 %v6744_v59, 16  ;;  %v5077_v43 = vpop.f32.mrf.mxu2  ;;  %v6105_v16 = vsel %vm296_vm0, %v6069_v57, 0  ;;  %v6054_v40 = vshll.u32 %v10285_v0, 16 }
 0x3dd   : > { %v6102_v6 = vsel %vm296_vm0, %v6065_v12, 0  ;;  %v6935_v38 = vunpack.c.l.b16 %v10098_v31 }
 0x3de   : > { %6659 = vmatmul.msk.bf16.vlgmr.msra.gmra.mxu3 %vm296_vm0, %v5885_v47  ;;  %v6284_v5 = vor.u32 %v6282_v32, %v6280_v8 }
 0x3df   : > { %6349 = vmatpush.bf16.xpose.msrb.mxu3 %v6347_v58  ;;  %v5081_v58 = vadd.f32 %v5077_v43, %v5014_v36 }
 0x3e0   : > { %v4881_v47 = vpop.f32.mrf.mxu0  ;;  %v6289_v19 = vsel %vm227_vm2, %v6284_v5, %v6288_v60  ;;  %v6056_v60 = vrot.slane %v6054_v40, 4 }
 0x3e1   : > { %v6335_v10 = vsel %vm296_vm0, %v6289_v19, 0 }
 0x3e2   : > { %6177 = vmatpush.bf16.xpose.msrb.mxu2 %v6171_v54  ;;  %v5171_v54 = vpop.f32.mrf.mxu3  ;;  %v6057_v17 = vor.u32 %v6056_v60, %v6053_v48 }
 0x3e3   : > { %6124 = vmatpush.bf16.xpose.msrb.mxu1 %v6114_v9  ;;  %v5012_v27 = vpop.f32.mrf.mxu1  ;;  %v10278_v44 = vadd.f32 %v5171_v54, %v5081_v58  ;;  %v6742_v9 = vld [vmem:[%s7394_s14 + $0x3c] sm:$0xff]  ;;  %v6141_v58 = vpack.c.b16 %v6935_v38, %v10115_v55 }
 0x3e4   : > { %6029 = vmatpush.bf16.xpose.msrb.mxu0 %v6023_v20  ;;  %v6274_v20 = vshrl.u32 %v6743_v50, 16  ;;  %v5079_v13 = vpop.f32.mrf.mxu2  ;;  %v6262_v29 = vshll.u32 %v6742_v9, 16  ;;  %v6061_v36 = vsel %vm771_vm7, %v6057_v17, %v6060_v51  ;;  %v5979_v50 = vpack.c.b16 %v5978_v24, %v5978_v24 }
 0x3e5   : > { %v6099_v43 = vsel %vm296_vm0, %v6061_v36, 0  ;;  %v6153_v33 = vsel %vm296_vm0, %v6141_v58, 0 }
 0x3e6   : > { %v6264_v59 = vrot.slane %v6262_v29, 1  ;;  %v6044_v26 = vshrl.u32 %v5979_v50, 16  ;;  %v5980_v57 = vrot.slane %v5979_v50, 2 }
 0x3e7   : > { %6350 = vmatpush.bf16.xpose.msrb.mxu3 %v6344_v37  ;;  %v6014_v37 = vsel %vm296_vm0, %v10228_v3, 0  ;;  %v6159_v3 = vsel %vm296_vm0, %v7284_v2, 0 }
 0x3e8   : > { %v6046_v5 = vrot.slane %v6044_v26, 2 }
 0x3ea   : > { %6178 = vmatpush.bf16.xpose.msrb.mxu2 %v6168_v45  ;;  %v6276_v45 = vor.u32 %v6274_v20, %v6272_v1  ;;  %v5173_v39 = vpop.f32.mrf.mxu3 }
 0x3eb   : > { %6125 = vmatpush.bf16.xpose.msrb.mxu1 %v6111_v53  ;;  %v6741_v53 = vld [vmem:[%s7394_s14 + $0x34] sm:$0xff] }
 0x3ec   : > { %6030 = vmatpush.bf16.xpose.msrb.mxu0 %v6020_v61  ;;  %v6281_v34 = vsel %vm227_vm2, %v6276_v45, %v6280_v8  ;;  %v6266_v61 = vshrl.u32 %v6742_v9, 16  ;;  %v6255_v8 = vshrl.u32 %v6741_v53, 16 }
 0x3ed   : > { %v6332_v42 = vsel %vm296_vm0, %v6281_v34, 0 }
 0x3ee   : > { %v6268_v27 = vor.u32 %v6266_v61, %v6264_v59 }
 0x3ef   : > { %6351 = vmatpush.bf16.xpose.msrb.mxu3 %v6341_v4  ;;  %v6011_v4 = vsel %vm296_vm0, %v10249_v7, 0  ;;  %v5988_v7 = vsel %vm704_vm5, %v5985_v14, %v5987_v62 }
 0x3f0   : > { %v6273_v35 = vsel %vm227_vm2, %v6268_v27, %v6272_v1  ;;  %v6008_v63 = vsel %vm296_vm0, %v5988_v7, 0 }
 0x3f1   : > { %v6329_v62 = vsel %vm296_vm0, %v6273_v35, 0 }
 0x3f2   : > { %6179 = vmatpush.bf16.xpose.msrb.mxu2 %v6165_v56  ;;  %v6257_v56 = vshll.u32 %v6741_v53, 16 }
 0x3f3   : > { %6126 = vmatpush.bf16.xpose.msrb.mxu1 %v6108_v23 }
 0x3f4   : > { %6031 = vmatpush.bf16.xpose.msrb.mxu0 %v6017_v52  ;;  %v6259_v32 = vrot.slane %v6257_v56, 1  ;;  %v6136_v52 = vld [vmem:[%s7625_s18 + $0x1c] sm:$0x8] }
 0x3f5   : > { %v6138_v23 = vunpack.c.l.b16 %v6136_v52 }
 0x3f6   : > { %v6260_v31 = vor.u32 %v6259_v32, %v6255_v8 }
 0x3f7   : > { %6352 = vmatpush.bf16.xpose.msrb.mxu3 %v6338_v18  ;;  %v5986_v18 = vsel %vm704_vm5, %v5984_v11, %v5985_v14  ;;  %v6139_v54 = vpack.c.b16 %v6138_v23, %v6138_v23 }
 0x3f8   : > { %v6265_v28 = vsel %vm227_vm2, %v6260_v31, %v6264_v59  ;;  %v6005_v41 = vsel %vm296_vm0, %v5986_v18, 0 }
 0x3f9   : > { %v6326_v47 = vsel %vm296_vm0, %v6265_v28, 0  ;;  %v6140_v55 = vrot.slane %v6139_v54, 3 }
 0x3fa   : > { %6180 = vmatpush.bf16.xpose.msrb.mxu2 %v6162_v22  ;;  %v6208_v22 = vshrl.u32 %v6139_v54, 16 }
 0x3fb   : > { %6127 = vmatpush.bf16.xpose.msrb.mxu1 %v6105_v16 }
 0x3fc   : > { %6032 = vmatpush.bf16.xpose.msrb.mxu0 %v6014_v37  ;;  %v6210_v15 = vrot.slane %v6208_v22, 3 }
 0x3ff   : > { %6353 = vmatpush.bf16.xpose.msrb.mxu3 %v6335_v10 }
 0x402   : > { %6181 = vmatpush.bf16.xpose.msrb.mxu2 %v6159_v3 }
 0x403   : > { %6128 = vmatpush.bf16.xpose.msrb.mxu1 %v6102_v6 }
 0x404   : > { %6033 = vmatpush.bf16.xpose.msrb.mxu0 %v6011_v4 }
 0x407   : > { %6354 = vmatpush.bf16.xpose.msrb.mxu3 %v6332_v42 }
 0x40a   : > { %6182 = vmatpush.bf16.xpose.msrb.mxu2 %v6156_v30 }
 0x40b   : > { %6129 = vmatpush.bf16.xpose.msrb.mxu1 %v6099_v43 }
 0x40c   : > { %6034 = vmatpush.bf16.xpose.msrb.mxu0 %v6008_v63 }
 0x40f   : > { %6355 = vmatpush.bf16.xpose.msrb.mxu3 %v6329_v62  ;;  %v5398_v25 = vpop.f32.mrf.mxu1 }
 0x412   : > { %6183 = vmatpush.bf16.xpose.msrb.mxu2 %v6153_v33  ;;  %6661 = vmatmul.msk.bf16.vlgmr.msrb.gmra.mxu1 %vm296_vm0, %v6046_v5 }
 0x414   : > { %6035 = vmatpush.bf16.xpose.msrb.mxu0 %v6005_v41 }
 0x417   : > { %6356 = vmatpush.bf16.xpose.msrb.mxu3 %v6326_v47  ;;  %v5400_v1 = vpop.f32.mrf.mxu1 }
 0x418   : > { %v5225_v0 = vpop.f32.mrf.mxu0 }
 0x419   : > { %6662 = vmatmul.msk.bf16.vlgmr.msrb.gmra.mxu2 %vm296_vm0, %v6140_v55  ;;  %v5229_v19 = vadd.f32 %v5225_v0, %v10278_v44 }
 0x41b   : > { %6660 = vmatmul.msk.bf16.vlgmr.msrb.gmra.mxu0 %vm296_vm0, %v5980_v57  ;;  %v5402_v20 = vadd.f32 %v5398_v25, %v5229_v19 }
 0x41c   : > { %v5465_v9 = vpop.f32.mrf.mxu2 }
 0x41d   : > { %v5469_v37 = vadd.f32 %v5465_v9, %v5402_v20 }
 0x41e   : > { %6695 = vmatmul.msk.bf16.vlgmr.msrb.gmra.mxu3 %vm296_vm0, %v6210_v15 }
 0x420   : > { %v5227_v16 = vpop.f32.mrf.mxu0 }
 0x421   : > { %v5559_v13 = vpop.f32.mrf.mxu3 }
 0x422   : > { %v5563_v10 = vadd.f32 %v5559_v13, %v5469_v37 }
 0x424   : > { %v5467_v2 = vpop.f32.mrf.mxu2 }
 0x429   : > { %v5561_v51 = vpop.f32.mrf.mxu3 }
 0x44f   : > { %v5809_v49 = vpop.f32.mrf.mxu1 }
 0x457   : > { %v5811_v45 = vpop.f32.mrf.mxu1 }
 0x458   : > { %v5678_v40 = vpop.f32.mrf.mxu0 }
 0x459   : > { %v5682_v60 = vadd.f32 %v5678_v40, %v5563_v10 }
 0x45b   : > { %v5813_v44 = vadd.f32 %v5809_v49, %v5682_v60 }
 0x45c   : > { %v5876_v29 = vpop.f32.mrf.mxu2 }
 0x45d   : > { %v5880_v59 = vadd.f32 %v5876_v29, %v5813_v44 }
 0x460   : > { %v5680_v3 = vpop.f32.mrf.mxu0 }
 0x461   : > { %v5970_v39 = vpop.f32.mrf.mxu3 }
 0x462   : > { %v5974_v61 = vadd.f32 %v5970_v39, %v5880_v59 }
 0x464   : > { %v5878_v12 = vpop.f32.mrf.mxu2 }
 0x469   : > { %v5972_v48 = vpop.f32.mrf.mxu3 }
 0x48f   : > { %v6131_v34 = vpop.f32.mrf.mxu1 }
 0x497   : > { %v6133_v46 = vpop.f32.mrf.mxu1 }
 0x498   : > { %v6037_v53 = vpop.f32.mrf.mxu0 }
 0x499   : > { %v6041_v4 = vadd.f32 %v6037_v53, %v5974_v61 }
 0x49b   : > { %v6135_v6 = vadd.f32 %v6131_v34, %v6041_v4 }
 0x49c   : > { %v6185_v14 = vpop.f32.mrf.mxu2 }
 0x49d   : > { %v6189_v42 = vadd.f32 %v6185_v14, %v6135_v6 }
 0x4a0   : > { %v6039_v21 = vpop.f32.mrf.mxu0 }
 0x4a1   : > { %v6358_v17 = vpop.f32.mrf.mxu3 }
 0x4a2   : > { %v6362_v27 = vadd.f32 %v6358_v17, %v6189_v42 }
 0x4a4   : > { %v6363_v56 = vmul.f32 0.001, %v6362_v27  ;;  %v6187_v24 = vpop.f32.mrf.mxu2 }
 0x4a6   : > { %6364 = vst [vmem:[%s159_s21] sm:$0x1] %v6363_v56 }
 0x4a9   : > { %v6360_v7 = vpop.f32.mrf.mxu3 }
 0x4aa PF: > { %s12_s9 = sadd.s32 1, %s7363_s9  }
 0x4ab   : > { %p9_p4 = scmp.ge.s32.totalorder %s12_s9, 4  }
 0x4ad   :  { %11 = sbr.rel (!%p9_p4) target bundleno = 1 (0x1), region = 61 }

</bundles_post_ra>
